<compile_context>
chip_gen: v6e
topology: v6e:2x2x1
jax: 0.10.0
libtpu: 0.0.40
codegen_flags: <defaults>
</compile_context>

<pallas_src>
import functools

import jax
import jax.numpy as jnp
from jax.experimental import pallas as pl
from jax.experimental.pallas import tpu as pltpu


# Logical (PyTorch) dims and lane-padded dims used inside the kernel.
ENC_DIMS = [28 * 28, 128, 64, 12, 3]
DEC_DIMS = [3, 12, 64, 128, 28 * 28]
ENC_PAD = [28 * 28, 128, 128, 128, 128]
DEC_PAD = [128, 128, 128, 128, 28 * 28]
LATENT_PAD = 128  # encode is emitted lane-dense as (B, 128); true latent is [:, :3]


def _autoencoder_kernel(x_ref,
                        # encoder params (padded, W: bf16, b: f32)
                        ew1, eb1, ew2, eb2, ew3, eb3, ew4, eb4,
                        # decoder params
                        dw1, db1, dw2, db2, dw3, db3, dw4, db4,
                        # outputs
                        enc_ref, dec_ref,
                        *, tanh_bf16):
    """Full autoencoder forward for one (tm, 784) batch tile.

    Eight MXU matmuls with bf16 inputs / f32 accumulation; bias add + ReLU on
    the VPU in f32; tanh on the EUP (bf16 on v6e/v7x, f32 on v5e).
    """

    def linear(h, w_ref, b_ref):
        return jnp.dot(h.astype(jnp.bfloat16), w_ref[...],
                       preferred_element_type=jnp.float32) + b_ref[...]

    # ----- encoder -----
    h = jnp.maximum(linear(x_ref[...], ew1, eb1), 0.0)
    h = jnp.maximum(linear(h, ew2, eb2), 0.0)
    h = jnp.maximum(linear(h, ew3, eb3), 0.0)
    enc = linear(h, ew4, eb4)                      # (tm, 128); cols 3..127 exactly 0

    # ----- decoder -----
    h = jnp.maximum(linear(enc, dw1, db1), 0.0)
    h = jnp.maximum(linear(h, dw2, db2), 0.0)
    h = jnp.maximum(linear(h, dw3, db3), 0.0)
    pre = linear(h, dw4, db4)                      # (tm, 784) f32 pre-activation
    if tanh_bf16:
        dec = jnp.tanh(pre.astype(jnp.bfloat16))   # bf16-native EUP on v6e/v7x
    else:
        dec = jnp.tanh(pre)                        # f32 EUP on v5e

    enc_ref[...] = enc.astype(enc_ref.dtype)
    dec_ref[...] = dec.astype(dec_ref.dtype)


def _resident_spec(p):
    """Whole-array BlockSpec with constant index_map: DMA'd once, kept in VMEM."""
    return pl.BlockSpec(p.shape, lambda i: (0, 0))


def _round_up(x, m):
    return ((x + m - 1) // m) * m


def _choose_tm(B, tm_cap=512):
    """Batch tile: multiple of 256, >= 2 grid steps when the batch allows (v7x
    has 2 TensorCores and the parallel grid axis is the only work split)."""
    return min(tm_cap, max(256, _round_up((B + 1) // 2, 256)))


def _is_v5_device():
    try:
        kind = jax.devices()[0].device_kind.lower()
    except Exception:
        return False
    return "v5" in kind


@functools.partial(jax.jit, static_argnames=("tm", "tanh_bf16"))
def _autoencoder_pallas(x, padded_params, *, tm, tanh_bf16):
    """x: (B, 784) float32.  Returns (encode_padded (B,128) f32, decode (B,784) bf16)."""
    B, D = x.shape
    n_steps = (B + tm - 1) // tm   # ragged last block is masked by Pallas

    in_specs = [pl.BlockSpec((tm, D), lambda i: (i, 0))]
    in_specs += [_resident_spec(p) for p in padded_params]

    out_shapes = (
        jax.ShapeDtypeStruct((B, LATENT_PAD), jnp.float32),       # encode (lane-padded)
        jax.ShapeDtypeStruct((B, DEC_DIMS[-1]), jnp.bfloat16),    # decode (bf16 HBM stream)
    )
    out_specs = (
        pl.BlockSpec((tm, LATENT_PAD), lambda i: (i, 0)),
        pl.BlockSpec((tm, DEC_DIMS[-1]), lambda i: (i, 0)),
    )

    # Advisory cost estimate for XLA scheduling.
    layer_dims = list(zip(ENC_PAD[:-1], ENC_PAD[1:])) + list(zip(DEC_PAD[:-1], DEC_PAD[1:]))
    flops = 2 * B * sum(fi * fo for fi, fo in layer_dims)
    param_bytes = sum(p.size * p.dtype.itemsize for p in padded_params)
    bytes_accessed = (B * D * 4                       # x (f32, read once in-kernel)
                      + B * LATENT_PAD * 4            # encode (f32)
                      + B * DEC_DIMS[-1] * 2          # decode (bf16)
                      + param_bytes)
    cost = pl.CostEstimate(flops=flops,
                           transcendentals=B * DEC_DIMS[-1],
                           bytes_accessed=bytes_accessed)

    kernel = functools.partial(_autoencoder_kernel, tanh_bf16=tanh_bf16)

    return pl.pallas_call(
        kernel,
        out_shape=out_shapes,
        grid_spec=pltpu.PrefetchScalarGridSpec(
            num_scalar_prefetch=0,
            grid=(n_steps,),
            in_specs=in_specs,
            out_specs=out_specs,
        ),
        compiler_params=pltpu.CompilerParams(
            dimension_semantics=("parallel",),
            vmem_limit_bytes=32 * 1024 * 1024,   # safe on v7x (64 MiB/TC) with tm<=512
        ),
        cost_estimate=cost,
    )(x, *padded_params)


def autoencoder_forward(x, padded_params, *, tm=None):
    """x: (B, 784) float32.  padded_params: output of pad_params(make_params(...)).

    Returns (encode (B, 3) float32, decode (B, 784) bfloat16).
    NOTE(API): decode is bf16 to halve the dominant HBM stream; cast to f32 in
    the caller only if strictly required.
    """
    B, D = x.shape
    assert D == 28 * 28
    if tm is None:
        tm = _choose_tm(B)
    tanh_bf16 = not _is_v5_device()   # bf16 EUP path on v6e/v7x, f32 on v5e

    enc_full, dec = _autoencoder_pallas(x, padded_params, tm=tm, tanh_bf16=tanh_bf16)
    return enc_full[:, :ENC_DIMS[-1]], dec


def make_params(key):
    """Deterministic synthetic init matching nn.Linear's default uniform bound.

    Weights stored as (in, out) float32; bias as (1, out) float32 (unpadded).
    """
    params = []
    for dims in (ENC_DIMS, DEC_DIMS):
        for fan_in, fan_out in zip(dims[:-1], dims[1:]):
            key, kw, kb = jax.random.split(key, 3)
            bound = 1.0 / jnp.sqrt(fan_in)
            w = jax.random.uniform(kw, (fan_in, fan_out), jnp.float32, -bound, bound)
            b = jax.random.uniform(kb, (1, fan_out), jnp.float32, -bound, bound)
            params += [w, b]
    return params


def pad_params(params):
    """Zero-pad narrow dims to 128 lanes; weights -> bf16, biases stay f32.

    Padding is exact: padded weight rows/cols and bias lanes are zero, so
    padded activation lanes stay exactly zero and contribute nothing.
    """
    logical = list(zip(ENC_DIMS[:-1], ENC_DIMS[1:])) + list(zip(DEC_DIMS[:-1], DEC_DIMS[1:]))
    padded_dims = list(zip(ENC_PAD[:-1], ENC_PAD[1:])) + list(zip(DEC_PAD[:-1], DEC_PAD[1:]))
    padded = []
    for layer, ((fi, fo), (pfi, pfo)) in enumerate(zip(logical, padded_dims)):
        w, b = params[2 * layer], params[2 * layer + 1]
        wp = jnp.zeros((pfi, pfo), jnp.bfloat16).at[:fi, :fo].set(w.astype(jnp.bfloat16))
        bp = jnp.zeros((1, pfo), jnp.float32).at[:, :fo].set(b)
        padded += [wp, bp]
    return padded


def reference_forward(x, params):
    """Plain-JAX f32 reference mirroring the PyTorch module (unpadded params)."""
    h = x
    for layer in range(4):
        w, b = params[2 * layer], params[2 * layer + 1]
        h = h @ w + b
        if layer < 3:
            h = jnp.maximum(h, 0.0)
    enc = h
    h = enc
    for layer in range(4):
        w, b = params[8 + 2 * layer], params[8 + 2 * layer + 1]
        h = h @ w + b
        if layer < 3:
            h = jnp.maximum(h, 0.0)
    dec = jnp.tanh(h)
    return enc, dec


if __name__ == "__main__":
    key = jax.random.PRNGKey(0)
    key, kx = jax.random.split(key)

    # B=600 with tm=512 -> 2 grid steps (both v7x TCs usable) and exercises the
    # ragged last block (no batch padding in the wrapper).
    B = 600
    x = jax.random.normal(kx, (B, 28 * 28), jnp.float32)

    params = make_params(key)
    padded_params = pad_params(params)

    enc, dec = autoencoder_forward(x, padded_params)
    enc, dec = jax.block_until_ready((enc, dec))

    enc_ref, dec_ref = reference_forward(x, params)
    assert enc.shape == (B, 3) and dec.shape == (B, 28 * 28)
    assert enc.dtype == jnp.float32 and dec.dtype == jnp.bfloat16
    # bf16 weights + bf16 decode output -> relaxed tolerances vs the f32 reference.
    assert jnp.allclose(enc, enc_ref, atol=2e-2, rtol=2e-2)
    assert jnp.allclose(dec.astype(jnp.float32), dec_ref, atol=3e-2, rtol=3e-2)

    print("KERNEL_OK")
</pallas_src>

<mosaic_0001>
module attributes {stable_mosaic.version = 11 : i64} {
  func.func @_autoencoder_kernel(%arg0: i32, %arg1: memref<512x784xf32, #tpu.memory_space<vmem>>, %arg2: memref<784x128xbf16, #tpu.memory_space<vmem>>, %arg3: memref<1x128xf32, #tpu.memory_space<vmem>>, %arg4: memref<128x128xbf16, #tpu.memory_space<vmem>>, %arg5: memref<1x128xf32, #tpu.memory_space<vmem>>, %arg6: memref<128x128xbf16, #tpu.memory_space<vmem>>, %arg7: memref<1x128xf32, #tpu.memory_space<vmem>>, %arg8: memref<128x128xbf16, #tpu.memory_space<vmem>>, %arg9: memref<1x128xf32, #tpu.memory_space<vmem>>, %arg10: memref<128x128xbf16, #tpu.memory_space<vmem>>, %arg11: memref<1x128xf32, #tpu.memory_space<vmem>>, %arg12: memref<128x128xbf16, #tpu.memory_space<vmem>>, %arg13: memref<1x128xf32, #tpu.memory_space<vmem>>, %arg14: memref<128x128xbf16, #tpu.memory_space<vmem>>, %arg15: memref<1x128xf32, #tpu.memory_space<vmem>>, %arg16: memref<128x784xbf16, #tpu.memory_space<vmem>>, %arg17: memref<1x784xf32, #tpu.memory_space<vmem>>, %arg18: memref<512x128xf32, #tpu.memory_space<vmem>>, %arg19: memref<512x784xbf16, #tpu.memory_space<vmem>>) attributes {dimension_semantics = [#tpu.dimension_semantics<parallel>], iteration_bounds = array<i64: 2>, scalar_prefetch = 0 : i64, scratch_operands = 0 : i64, tpu.core_type = #tpu.core_type<tc>, window_params = [{transform_indices = @transform_0, window_bounds = array<i64: 512, 784>}, {pipeline_mode = #tpu.pipeline_mode<synchronous>, transform_indices = @transform_1, window_bounds = array<i64: 784, 128>}, {pipeline_mode = #tpu.pipeline_mode<synchronous>, transform_indices = @transform_2, window_bounds = array<i64: 1, 128>}, {pipeline_mode = #tpu.pipeline_mode<synchronous>, transform_indices = @transform_3, window_bounds = array<i64: 128, 128>}, {pipeline_mode = #tpu.pipeline_mode<synchronous>, transform_indices = @transform_4, window_bounds = array<i64: 1, 128>}, {pipeline_mode = #tpu.pipeline_mode<synchronous>, transform_indices = @transform_5, window_bounds = array<i64: 128, 128>}, {pipeline_mode = #tpu.pipeline_mode<synchronous>, transform_indices = @transform_6, window_bounds = array<i64: 1, 128>}, {pipeline_mode = #tpu.pipeline_mode<synchronous>, transform_indices = @transform_7, window_bounds = array<i64: 128, 128>}, {pipeline_mode = #tpu.pipeline_mode<synchronous>, transform_indices = @transform_8, window_bounds = array<i64: 1, 128>}, {pipeline_mode = #tpu.pipeline_mode<synchronous>, transform_indices = @transform_9, window_bounds = array<i64: 128, 128>}, {pipeline_mode = #tpu.pipeline_mode<synchronous>, transform_indices = @transform_10, window_bounds = array<i64: 1, 128>}, {pipeline_mode = #tpu.pipeline_mode<synchronous>, transform_indices = @transform_11, window_bounds = array<i64: 128, 128>}, {pipeline_mode = #tpu.pipeline_mode<synchronous>, transform_indices = @transform_12, window_bounds = array<i64: 1, 128>}, {pipeline_mode = #tpu.pipeline_mode<synchronous>, transform_indices = @transform_13, window_bounds = array<i64: 128, 128>}, {pipeline_mode = #tpu.pipeline_mode<synchronous>, transform_indices = @transform_14, window_bounds = array<i64: 1, 128>}, {pipeline_mode = #tpu.pipeline_mode<synchronous>, transform_indices = @transform_15, window_bounds = array<i64: 128, 784>}, {pipeline_mode = #tpu.pipeline_mode<synchronous>, transform_indices = @transform_16, window_bounds = array<i64: 1, 784>}, {transform_indices = @transform_17, window_bounds = array<i64: 512, 128>}, {transform_indices = @transform_18, window_bounds = array<i64: 512, 784>}]} {
    %c0 = arith.constant 0 : index
    %c0_0 = arith.constant 0 : index
    %0 = vector.load %arg1[%c0, %c0_0] : memref<512x784xf32, #tpu.memory_space<vmem>>, vector<512x784xf32>
    %1 = arith.truncf %0 : vector<512x784xf32> to vector<512x784xbf16>
    %c0_1 = arith.constant 0 : index
    %c0_2 = arith.constant 0 : index
    %2 = vector.load %arg2[%c0_1, %c0_2] : memref<784x128xbf16, #tpu.memory_space<vmem>>, vector<784x128xbf16>
    %cst = arith.constant dense<0.000000e+00> : vector<512x128xf32>
    %3 = tpu.matmul %1, %2, %cst {dimension_numbers = #tpu.dot_dimension_numbers<[1], [0], [0], [1], [0, 0, 1, 1], [], []>} : vector<512x784xbf16>, vector<784x128xbf16>, vector<512x128xf32> -> vector<512x128xf32>
    %c0_3 = arith.constant 0 : index
    %c0_4 = arith.constant 0 : index
    %4 = vector.load %arg3[%c0_3, %c0_4] : memref<1x128xf32, #tpu.memory_space<vmem>>, vector<1x128xf32>
    %5 = vector.broadcast %4 : vector<1x128xf32> to vector<512x128xf32>
    %6 = arith.addf %3, %5 : vector<512x128xf32>
    %cst_5 = arith.constant 0.000000e+00 : f32
    %7 = vector.broadcast %cst_5 : f32 to vector<512x128xf32>
    %8 = arith.maximumf %6, %7 : vector<512x128xf32>
    %9 = arith.truncf %8 : vector<512x128xf32> to vector<512x128xbf16>
    %c0_6 = arith.constant 0 : index
    %c0_7 = arith.constant 0 : index
    %10 = vector.load %arg4[%c0_6, %c0_7] : memref<128x128xbf16, #tpu.memory_space<vmem>>, vector<128x128xbf16>
    %cst_8 = arith.constant dense<0.000000e+00> : vector<512x128xf32>
    %11 = tpu.matmul %9, %10, %cst_8 {dimension_numbers = #tpu.dot_dimension_numbers<[1], [0], [0], [1], [0, 0, 1, 1], [], []>} : vector<512x128xbf16>, vector<128x128xbf16>, vector<512x128xf32> -> vector<512x128xf32>
    %c0_9 = arith.constant 0 : index
    %c0_10 = arith.constant 0 : index
    %12 = vector.load %arg5[%c0_9, %c0_10] : memref<1x128xf32, #tpu.memory_space<vmem>>, vector<1x128xf32>
    %13 = vector.broadcast %12 : vector<1x128xf32> to vector<512x128xf32>
    %14 = arith.addf %11, %13 : vector<512x128xf32>
    %cst_11 = arith.constant 0.000000e+00 : f32
    %15 = vector.broadcast %cst_11 : f32 to vector<512x128xf32>
    %16 = arith.maximumf %14, %15 : vector<512x128xf32>
    %17 = arith.truncf %16 : vector<512x128xf32> to vector<512x128xbf16>
    %c0_12 = arith.constant 0 : index
    %c0_13 = arith.constant 0 : index
    %18 = vector.load %arg6[%c0_12, %c0_13] : memref<128x128xbf16, #tpu.memory_space<vmem>>, vector<128x128xbf16>
    %cst_14 = arith.constant dense<0.000000e+00> : vector<512x128xf32>
    %19 = tpu.matmul %17, %18, %cst_14 {dimension_numbers = #tpu.dot_dimension_numbers<[1], [0], [0], [1], [0, 0, 1, 1], [], []>} : vector<512x128xbf16>, vector<128x128xbf16>, vector<512x128xf32> -> vector<512x128xf32>
    %c0_15 = arith.constant 0 : index
    %c0_16 = arith.constant 0 : index
    %20 = vector.load %arg7[%c0_15, %c0_16] : memref<1x128xf32, #tpu.memory_space<vmem>>, vector<1x128xf32>
    %21 = vector.broadcast %20 : vector<1x128xf32> to vector<512x128xf32>
    %22 = arith.addf %19, %21 : vector<512x128xf32>
    %cst_17 = arith.constant 0.000000e+00 : f32
    %23 = vector.broadcast %cst_17 : f32 to vector<512x128xf32>
    %24 = arith.maximumf %22, %23 : vector<512x128xf32>
    %25 = arith.truncf %24 : vector<512x128xf32> to vector<512x128xbf16>
    %c0_18 = arith.constant 0 : index
    %c0_19 = arith.constant 0 : index
    %26 = vector.load %arg8[%c0_18, %c0_19] : memref<128x128xbf16, #tpu.memory_space<vmem>>, vector<128x128xbf16>
    %cst_20 = arith.constant dense<0.000000e+00> : vector<512x128xf32>
    %27 = tpu.matmul %25, %26, %cst_20 {dimension_numbers = #tpu.dot_dimension_numbers<[1], [0], [0], [1], [0, 0, 1, 1], [], []>} : vector<512x128xbf16>, vector<128x128xbf16>, vector<512x128xf32> -> vector<512x128xf32>
    %c0_21 = arith.constant 0 : index
    %c0_22 = arith.constant 0 : index
    %28 = vector.load %arg9[%c0_21, %c0_22] : memref<1x128xf32, #tpu.memory_space<vmem>>, vector<1x128xf32>
    %29 = vector.broadcast %28 : vector<1x128xf32> to vector<512x128xf32>
    %30 = arith.addf %27, %29 : vector<512x128xf32>
    %31 = arith.truncf %30 : vector<512x128xf32> to vector<512x128xbf16>
    %c0_23 = arith.constant 0 : index
    %c0_24 = arith.constant 0 : index
    %32 = vector.load %arg10[%c0_23, %c0_24] : memref<128x128xbf16, #tpu.memory_space<vmem>>, vector<128x128xbf16>
    %cst_25 = arith.constant dense<0.000000e+00> : vector<512x128xf32>
    %33 = tpu.matmul %31, %32, %cst_25 {dimension_numbers = #tpu.dot_dimension_numbers<[1], [0], [0], [1], [0, 0, 1, 1], [], []>} : vector<512x128xbf16>, vector<128x128xbf16>, vector<512x128xf32> -> vector<512x128xf32>
    %c0_26 = arith.constant 0 : index
    %c0_27 = arith.constant 0 : index
    %34 = vector.load %arg11[%c0_26, %c0_27] : memref<1x128xf32, #tpu.memory_space<vmem>>, vector<1x128xf32>
    %35 = vector.broadcast %34 : vector<1x128xf32> to vector<512x128xf32>
    %36 = arith.addf %33, %35 : vector<512x128xf32>
    %cst_28 = arith.constant 0.000000e+00 : f32
    %37 = vector.broadcast %cst_28 : f32 to vector<512x128xf32>
    %38 = arith.maximumf %36, %37 : vector<512x128xf32>
    %39 = arith.truncf %38 : vector<512x128xf32> to vector<512x128xbf16>
    %c0_29 = arith.constant 0 : index
    %c0_30 = arith.constant 0 : index
    %40 = vector.load %arg12[%c0_29, %c0_30] : memref<128x128xbf16, #tpu.memory_space<vmem>>, vector<128x128xbf16>
    %cst_31 = arith.constant dense<0.000000e+00> : vector<512x128xf32>
    %41 = tpu.matmul %39, %40, %cst_31 {dimension_numbers = #tpu.dot_dimension_numbers<[1], [0], [0], [1], [0, 0, 1, 1], [], []>} : vector<512x128xbf16>, vector<128x128xbf16>, vector<512x128xf32> -> vector<512x128xf32>
    %c0_32 = arith.constant 0 : index
    %c0_33 = arith.constant 0 : index
    %42 = vector.load %arg13[%c0_32, %c0_33] : memref<1x128xf32, #tpu.memory_space<vmem>>, vector<1x128xf32>
    %43 = vector.broadcast %42 : vector<1x128xf32> to vector<512x128xf32>
    %44 = arith.addf %41, %43 : vector<512x128xf32>
    %cst_34 = arith.constant 0.000000e+00 : f32
    %45 = vector.broadcast %cst_34 : f32 to vector<512x128xf32>
    %46 = arith.maximumf %44, %45 : vector<512x128xf32>
    %47 = arith.truncf %46 : vector<512x128xf32> to vector<512x128xbf16>
    %c0_35 = arith.constant 0 : index
    %c0_36 = arith.constant 0 : index
    %48 = vector.load %arg14[%c0_35, %c0_36] : memref<128x128xbf16, #tpu.memory_space<vmem>>, vector<128x128xbf16>
    %cst_37 = arith.constant dense<0.000000e+00> : vector<512x128xf32>
    %49 = tpu.matmul %47, %48, %cst_37 {dimension_numbers = #tpu.dot_dimension_numbers<[1], [0], [0], [1], [0, 0, 1, 1], [], []>} : vector<512x128xbf16>, vector<128x128xbf16>, vector<512x128xf32> -> vector<512x128xf32>
    %c0_38 = arith.constant 0 : index
    %c0_39 = arith.constant 0 : index
    %50 = vector.load %arg15[%c0_38, %c0_39] : memref<1x128xf32, #tpu.memory_space<vmem>>, vector<1x128xf32>
    %51 = vector.broadcast %50 : vector<1x128xf32> to vector<512x128xf32>
    %52 = arith.addf %49, %51 : vector<512x128xf32>
    %cst_40 = arith.constant 0.000000e+00 : f32
    %53 = vector.broadcast %cst_40 : f32 to vector<512x128xf32>
    %54 = arith.maximumf %52, %53 : vector<512x128xf32>
    %55 = arith.truncf %54 : vector<512x128xf32> to vector<512x128xbf16>
    %c0_41 = arith.constant 0 : index
    %c0_42 = arith.constant 0 : index
    %56 = vector.load %arg16[%c0_41, %c0_42] : memref<128x784xbf16, #tpu.memory_space<vmem>>, vector<128x784xbf16>
    %cst_43 = arith.constant dense<0.000000e+00> : vector<512x784xf32>
    %57 = tpu.matmul %55, %56, %cst_43 {dimension_numbers = #tpu.dot_dimension_numbers<[1], [0], [0], [1], [0, 0, 1, 1], [], []>} : vector<512x128xbf16>, vector<128x784xbf16>, vector<512x784xf32> -> vector<512x784xf32>
    %c0_44 = arith.constant 0 : index
    %c0_45 = arith.constant 0 : index
    %58 = vector.load %arg17[%c0_44, %c0_45] : memref<1x784xf32, #tpu.memory_space<vmem>>, vector<1x784xf32>
    %59 = vector.broadcast %58 : vector<1x784xf32> to vector<512x784xf32>
    %60 = arith.addf %57, %59 : vector<512x784xf32>
    %61 = arith.truncf %60 : vector<512x784xf32> to vector<512x784xbf16>
    %62 = math.tanh %61 : vector<512x784xbf16>
    %c0_46 = arith.constant 0 : index
    %c0_47 = arith.constant 0 : index
    %63 = vector.load %arg18[%c0_46, %c0_47] : memref<512x128xf32, #tpu.memory_space<vmem>>, vector<512x128xf32>
    tpu.vector_store %arg18[%c0_46, %c0_47], %30 {strides = array<i32>} : memref<512x128xf32, #tpu.memory_space<vmem>>, vector<512x128xf32>,
    %c0_48 = arith.constant 0 : index
    %c0_49 = arith.constant 0 : index
    %64 = vector.load %arg19[%c0_48, %c0_49] : memref<512x784xbf16, #tpu.memory_space<vmem>>, vector<512x784xbf16>
    tpu.vector_store %arg19[%c0_48, %c0_49], %62 {strides = array<i32>} : memref<512x784xbf16, #tpu.memory_space<vmem>>, vector<512x784xbf16>,
    return
  }
  func.func @transform_0(%arg0: i32) -> (i32, i32) {
    %c0_i32 = arith.constant 0 : i32
    %c0_i32_0 = arith.constant 0 : i32
    return %arg0, %c0_i32 : i32, i32
  }
  func.func @transform_1(%arg0: i32) -> (i32, i32) {
    %c0_i32 = arith.constant 0 : i32
    %c0_i32_0 = arith.constant 0 : i32
    %c0_i32_1 = arith.constant 0 : i32
    return %c0_i32, %c0_i32_0 : i32, i32
  }
  func.func @transform_2(%arg0: i32) -> (i32, i32) {
    %c0_i32 = arith.constant 0 : i32
    %c0_i32_0 = arith.constant 0 : i32
    %c0_i32_1 = arith.constant 0 : i32
    return %c0_i32, %c0_i32_0 : i32, i32
  }
  func.func @transform_3(%arg0: i32) -> (i32, i32) {
    %c0_i32 = arith.constant 0 : i32
    %c0_i32_0 = arith.constant 0 : i32
    %c0_i32_1 = arith.constant 0 : i32
    return %c0_i32, %c0_i32_0 : i32, i32
  }
  func.func @transform_4(%arg0: i32) -> (i32, i32) {
    %c0_i32 = arith.constant 0 : i32
    %c0_i32_0 = arith.constant 0 : i32
    %c0_i32_1 = arith.constant 0 : i32
    return %c0_i32, %c0_i32_0 : i32, i32
  }
  func.func @transform_5(%arg0: i32) -> (i32, i32) {
    %c0_i32 = arith.constant 0 : i32
    %c0_i32_0 = arith.constant 0 : i32
    %c0_i32_1 = arith.constant 0 : i32
    return %c0_i32, %c0_i32_0 : i32, i32
  }
  func.func @transform_6(%arg0: i32) -> (i32, i32) {
    %c0_i32 = arith.constant 0 : i32
    %c0_i32_0 = arith.constant 0 : i32
    %c0_i32_1 = arith.constant 0 : i32
    return %c0_i32, %c0_i32_0 : i32, i32
  }
  func.func @transform_7(%arg0: i32) -> (i32, i32) {
    %c0_i32 = arith.constant 0 : i32
    %c0_i32_0 = arith.constant 0 : i32
    %c0_i32_1 = arith.constant 0 : i32
    return %c0_i32, %c0_i32_0 : i32, i32
  }
  func.func @transform_8(%arg0: i32) -> (i32, i32) {
    %c0_i32 = arith.constant 0 : i32
    %c0_i32_0 = arith.constant 0 : i32
    %c0_i32_1 = arith.constant 0 : i32
    return %c0_i32, %c0_i32_0 : i32, i32
  }
  func.func @transform_9(%arg0: i32) -> (i32, i32) {
    %c0_i32 = arith.constant 0 : i32
    %c0_i32_0 = arith.constant 0 : i32
    %c0_i32_1 = arith.constant 0 : i32
    return %c0_i32, %c0_i32_0 : i32, i32
  }
  func.func @transform_10(%arg0: i32) -> (i32, i32) {
    %c0_i32 = arith.constant 0 : i32
    %c0_i32_0 = arith.constant 0 : i32
    %c0_i32_1 = arith.constant 0 : i32
    return %c0_i32, %c0_i32_0 : i32, i32
  }
  func.func @transform_11(%arg0: i32) -> (i32, i32) {
    %c0_i32 = arith.constant 0 : i32
    %c0_i32_0 = arith.constant 0 : i32
    %c0_i32_1 = arith.constant 0 : i32
    return %c0_i32, %c0_i32_0 : i32, i32
  }
  func.func @transform_12(%arg0: i32) -> (i32, i32) {
    %c0_i32 = arith.constant 0 : i32
    %c0_i32_0 = arith.constant 0 : i32
    %c0_i32_1 = arith.constant 0 : i32
    return %c0_i32, %c0_i32_0 : i32, i32
  }
  func.func @transform_13(%arg0: i32) -> (i32, i32) {
    %c0_i32 = arith.constant 0 : i32
    %c0_i32_0 = arith.constant 0 : i32
    %c0_i32_1 = arith.constant 0 : i32
    return %c0_i32, %c0_i32_0 : i32, i32
  }
  func.func @transform_14(%arg0: i32) -> (i32, i32) {
    %c0_i32 = arith.constant 0 : i32
    %c0_i32_0 = arith.constant 0 : i32
    %c0_i32_1 = arith.constant 0 : i32
    return %c0_i32, %c0_i32_0 : i32, i32
  }
  func.func @transform_15(%arg0: i32) -> (i32, i32) {
    %c0_i32 = arith.constant 0 : i32
    %c0_i32_0 = arith.constant 0 : i32
    %c0_i32_1 = arith.constant 0 : i32
    return %c0_i32, %c0_i32_0 : i32, i32
  }
  func.func @transform_16(%arg0: i32) -> (i32, i32) {
    %c0_i32 = arith.constant 0 : i32
    %c0_i32_0 = arith.constant 0 : i32
    %c0_i32_1 = arith.constant 0 : i32
    return %c0_i32, %c0_i32_0 : i32, i32
  }
  func.func @transform_17(%arg0: i32) -> (i32, i32) {
    %c0_i32 = arith.constant 0 : i32
    %c0_i32_0 = arith.constant 0 : i32
    return %arg0, %c0_i32 : i32, i32
  }
  func.func @transform_18(%arg0: i32) -> (i32, i32) {
    %c0_i32 = arith.constant 0 : i32
    %c0_i32_0 = arith.constant 0 : i32
    return %arg0, %c0_i32 : i32, i32
  }
}

</mosaic_0001>

<bundles_post_ra>
// kernel: _autoencoder_pallas.1
= control target key start
LH: loop header
LB: loop body
LE: loop exit
PB: predicated region body
PF: predicated region fallthrough
CT: control target
= control target key end

     0   :  { %s15979_s0 = inlined_call_operand.vmem [shape: f32[600,784], index: 0, kind: input, shape index: {}]   ;;  %s15980_s1 = inlined_call_operand.vmem [shape: bf16[784,128], index: 1, kind: input, shape index: {}]   ;;  %s15981_s2 = inlined_call_operand.vmem [shape: f32[1,128], index: 2, kind: input, shape index: {}]   ;;  %s15982_s3 = inlined_call_operand.vmem [shape: bf16[128,128], index: 3, kind: input, shape index: {}]   ;;  %s15983_s4 = inlined_call_operand.vmem [shape: f32[1,128], index: 4, kind: input, shape index: {}]   ;;  %s15984_s5 = inlined_call_operand.vmem [shape: bf16[128,128], index: 5, kind: input, shape index: {}]   ;;  %s15985_s6 = inlined_call_operand.vmem [shape: f32[1,128], index: 6, kind: input, shape index: {}]   ;;  %s15986_s7 = inlined_call_operand.vmem [shape: bf16[128,128], index: 7, kind: input, shape index: {}]   ;;  %s15987_s8 = inlined_call_operand.vmem [shape: f32[1,128], index: 8, kind: input, shape index: {}]   ;;  %s15988_s9 = inlined_call_operand.vmem [shape: bf16[128,128], index: 9, kind: input, shape index: {}]   ;;  %s15989_s10 = inlined_call_operand.vmem [shape: f32[1,128], index: 10, kind: input, shape index: {}]   ;;  %s15990_s11 = inlined_call_operand.vmem [shape: bf16[128,128], index: 11, kind: input, shape index: {}]   ;;  %s15991_s12 = inlined_call_operand.vmem [shape: f32[1,128], index: 12, kind: input, shape index: {}]   ;;  %s15992_s13 = inlined_call_operand.vmem [shape: bf16[128,128], index: 13, kind: input, shape index: {}]   ;;  %s15993_s14 = inlined_call_operand.vmem [shape: f32[1,128], index: 14, kind: input, shape index: {}]   ;;  %s15994_s15 = inlined_call_operand.vmem [shape: bf16[128,784], index: 15, kind: input, shape index: {}]   ;;  %s15995_s16 = inlined_call_operand.vmem [shape: f32[1,784], index: 16, kind: input, shape index: {}]   ;;  %s15996_s17 = inlined_call_operand.hbm [shape: f32[600,128], index: 17, kind: output, shape index: {0}]   ;;  %s15997_s18 = inlined_call_operand.vmem [shape: bf16[600,784], index: 18, kind: output, shape index: {1}]  }
   0x1   :  { %16009 = sst [smem:[#allocation33_spill]] %s15979_s0 }
   0x2   :  { %16010 = sst [smem:[#allocation34_spill]] %s15980_s1 }
   0x3   :  { %16011 = sst [smem:[#allocation35_spill]] %s15981_s2 }
   0x4   :  { %16012 = sst [smem:[#allocation36_spill]] %s15982_s3 }
   0x5   :  { %16013 = sst [smem:[#allocation37_spill]] %s15983_s4 }
   0x6   :  { %16014 = sst [smem:[#allocation38_spill]] %s15984_s5 }
   0x7   :  { %16015 = sst [smem:[#allocation39_spill]] %s15985_s6 }
   0x8   :  { %16016 = sst [smem:[#allocation40_spill]] %s15986_s7 }
   0x9   :  { %24 = vsyncpa [#allocation3], 0 }
   0xa   :  { %26 = vsyncpa [#allocation3 + $0x1], 0  ;;  %s12484_s27 = smov 0   ;;  %s12486_s28 = smov 0  }
   0xb   :  { %s12488_s29 = smov 0   ;;  %s12490_s30 = smov 0  }
   0xc LB: > { %16017 = sst [smem:[#allocation6_spill]] %s12307_s27  ;;  %s12505_s0 = sadd.s32 4294967295, %s12319_s30   ;;  %s12319_s30 = sphi %s12490_s30, %s16087_s30   ;;  %s12315_s29 = sphi %s12488_s29, %s16089_s29   ;;  %s12311_s28 = sphi %s12486_s28, %s16091_s28   ;;  %s12307_s27 = sphi %s12484_s27, %s16090_s27  }
   0xd   : > { %16018 = sst [smem:[#allocation7_spill]] %s12315_s29  ;;  %s9973_s19 = sadd.s32 4294967294, %s12319_s30  }
   0xe   : > { %16019 = sst [smem:[#allocation8_spill]] %s12319_s30  ;;  %s12509_s1 = sadd.s32 1, %s12319_s30  }
   0xf   : > { %16020 = sst [smem:[#allocation9_spill]] %s12509_s1  ;;  %s401_s20 = sadd.s32 1, %s12315_s29 }
  0x10   : > { %s398_s21 = ssub.s32 %s12319_s30, %s12509_s1  ;;  %p411_p0 = scmp.ne.s32.totalorder %s12315_s29, %s12311_s28 }
  0x11   : > { %p399_p1 = scmp.eq.s32.totalorder %s398_s21, 0  ;;  %p412_p2 = scmp.eq.s32.totalorder %s12505_s0, 1 }
  0x12   : > { %p417_p3 = scmp.ne.s32.totalorder %s12311_s28, %s12307_s27  ;;  %p418_p4 = scmp.eq.s32.totalorder %s9973_s19, 1 }
  0x13   : > { %s12520_s22 = scalar_select %p399_p1, %s12315_s29, %s401_s20  }
  0x14   : > { %p12522_p5 = por %p412_p2, %p411_p0  ;;  %p12526_p6 = por %p418_p4, %p417_p3 }
  0x15   : > { %16021 = sst [smem:[#allocation10_spill]] %s12520_s22  ;;  %p9976_p7 = scmp.ge.s32.totalorder %s12319_s30, 1 }
  0x16   : > { %s16023_s23 = scalar_select %p12526_p6, 1, 0 }
  0x17   : > { %p530_p8 = scmp.lt.s32.totalorder %s12319_s30, 3 }
  0x18   : > { %16024 = sst [smem:[#allocation11_spill]] %s16023_s23 }
  0x19   : > { %p531_p9 = pnand %p9976_p7, %p530_p8 }
  0x1b   : > { %534 = sbr.rel (%p531_p9) target bundleno = 2721 (0xaa1), region = 88 }
  0x20   : > { %s16025_s26 = sld [smem:[#allocation34_spill]]  ;;  %v16006_v1 = vmov 0   ;;  %s12568_s22 = sshll.u32 %s12505_s0, 6  ;;  %vm1694_vm0 = vcmask 130048   ;;  %vm9151_vm1 = vcmask 125952  }
  0x21   : > { %1791 = vmatprep.subr.bf16.mxu0 %v16006_v1  ;;  %2080 = vmatprep.subr.bf16.mxu1 %v16006_v1  ;;  %p600_p10 = scmp.lt.s32.totalorder %s12568_s22, 74  ;;  %s16026_s21 = sld [smem:[#allocation33_spill]] }
  0x22   : > { %s16028_s3 = sld [smem:[#allocation36_spill]]  ;;  %s13848_s27 = sand.u32 1, %s12311_s28  }
  0x23   : > { %s601_s25 = scalar_select %p600_p10, %s12568_s22, 74 }
  0x24   : > { %s16029_s5 = sld [smem:[#allocation38_spill]]  ;;  %s11390_s19 = smul.u32 1792, %s13848_s27 }
  0x25   : > { %s11391_s23 = smul.u32 56, %s601_s25  ;;  %s16052_s7 = sld [smem:[#allocation40_spill]] }
  0x26   : > { %v11563_v0 = vld [vmem:[%s16025_s26 + $0x38] sm:$0xff]   ;;  %v11565_v3 = vld [vmem:[%s16025_s26 + $0x30] sm:$0xff]   ;;  %v11567_v5 = vld [vmem:[%s16025_s26 + $0x28] sm:$0xff]   ;;  %s16063_s4 = sld [smem:[#allocation37_spill]]  ;;  %s9418_s24 = ssub.s32 (%p12522_p5), 75, %s12568_s22 }
  0x27   : > { %v11564_v2 = vld [vmem:[%s16025_s26 + $0xb8] sm:$0xff]   ;;  %1792 = vmatpush1.bf16.msra.mxu0 %v11563_v0  ;;  %v11566_v4 = vld [vmem:[%s16025_s26 + $0xb0] sm:$0xff]   ;;  %v11568_v6 = vld [vmem:[%s16025_s26 + $0xa8] sm:$0xff]   ;;  %s12604_s30 = scalar_lea.vmem %s16026_s21, %s11391_s23  ;;  %s16027_s23 = sld [smem:[#allocation35_spill]] }
  0x28   : > { %2081 = vmatpush1.bf16.msra.mxu1 %v11564_v2  ;;  %1793 = vmatprep.subr.bf16.mxu0 %v16006_v1  ;;  %v11569_v7 = vld [vmem:[%s16025_s26 + $0x20] sm:$0xff]   ;;  %v11571_v9 = vld [vmem:[%s16025_s26 + $0x18] sm:$0xff]   ;;  %v11573_v11 = vld [vmem:[%s16025_s26 + $0x10] sm:$0xff]   ;;  %s16074_s6 = sld [smem:[#allocation39_spill]]  ;;  %p9419_p11 = scmp.lt.s32.totalorder (%p12522_p5), %s9418_s24, 64 }
  0x29   : > { %2082 = vmatprep.subr.bf16.mxu1 %v16006_v1  ;;  %v11570_v8 = vld [vmem:[%s16025_s26 + $0xa0] sm:$0xff]   ;;  %v11572_v10 = vld [vmem:[%s16025_s26 + $0x98] sm:$0xff]   ;;  %v11574_v12 = vld [vmem:[%s16025_s26 + $0x90] sm:$0xff]  }
  0x2a   : > { %v11575_v13 = vld [vmem:[%s16025_s26 + $0x8] sm:$0xff]   ;;  %v11577_v15 = vld [vmem:[%s16025_s26] sm:$0xff]   ;;  %v11579_v17 = vld [vmem:[%s16025_s26 + $0x78] sm:$0xff]  }
  0x2b   : > { %1794 = vmatpush1.bf16.msra.mxu0 %v11565_v3  ;;  %v11576_v14 = vld [vmem:[%s16025_s26 + $0x88] sm:$0xff]   ;;  %v11578_v16 = vld [vmem:[%s16025_s26 + $0x80] sm:$0xff]   ;;  %v11580_v18 = vld [vmem:[%s16025_s26 + $0xf8] sm:$0xff]  }
  0x2c   : > { %2083 = vmatpush1.bf16.msra.mxu1 %v11566_v4  ;;  %1795 = vmatprep.subr.bf16.mxu0 %v16006_v1  ;;  %v624_v19 = vld [vmem:[%s12604_s30 + $0x8] sm:$0xff]  ;;  %v631_v20 = vld [vmem:[%s12604_s30 + $0x40] sm:$0xff]  ;;  %v626_v21 = vld [vmem:[%s12604_s30 + $0x18] sm:$0xff] }
  0x2d   : > { %2084 = vmatprep.subr.bf16.mxu1 %v16006_v1  ;;  %v1072_v22 = vpack.c.bf16 %v631_v20, %v624_v19  ;;  %v633_v23 = vld [vmem:[%s12604_s30 + $0x50] sm:$0xff]  ;;  %v11583_v27 = vld [vmem:[%s16025_s26 + $0x68] sm:$0xff]   ;;  %v11585_v29 = vld [vmem:[%s16025_s26 + $0x60] sm:$0xff]  }
  0x2e   : > { %v11581_v24 = vld [vmem:[%s16025_s26 + $0x70] sm:$0xff]   ;;  %v1074_v25 = vpack.c.bf16 %v633_v23, %v626_v21  ;;  %v11584_v28 = vld [vmem:[%s16025_s26 + $0xe8] sm:$0xff]   ;;  %v11586_v30 = vld [vmem:[%s16025_s26 + $0xe0] sm:$0xff]  }
  0x2f   : > { %1796 = vmatpush1.bf16.msra.mxu0 %v11567_v5  ;;  %v11582_v26 = vld [vmem:[%s16025_s26 + $0xf0] sm:$0xff]   ;;  %1823 = vmatprep.mubr.bf16.mxu0 %v1072_v22  ;;  %v11587_v31 = vld [vmem:[%s16025_s26 + $0x58] sm:$0xff]   ;;  %v11591_v35 = vld [vmem:[%s16025_s26 + $0x48] sm:$0xff]  }
  0x30   : > { %2085 = vmatpush1.bf16.msra.mxu1 %v11568_v6  ;;  %1797 = vmatprep.subr.bf16.mxu0 %v16006_v1  ;;  %v11588_v32 = vld [vmem:[%s16025_s26 + $0xd8] sm:$0xff]   ;;  %v11589_v33 = vld [vmem:[%s16025_s26 + $0x50] sm:$0xff]   ;;  %v11592_v36 = vld [vmem:[%s16025_s26 + $0xc8] sm:$0xff]  }
  0x31   : > { %2086 = vmatprep.subr.bf16.mxu1 %v16006_v1  ;;  %2112 = vmatprep.mubr.bf16.mxu1 %v1074_v25  ;;  %v11590_v34 = vld [vmem:[%s16025_s26 + $0xd0] sm:$0xff]   ;;  %v11593_v37 = vld [vmem:[%s16025_s26 + $0x40] sm:$0xff]   ;;  %v630_v40 = vld [vmem:[%s12604_s30 + $0x38] sm:$0xff] }
  0x32   : > { %v11594_v38 = vld [vmem:[%s16025_s26 + $0xc0] sm:$0xff]   ;;  %v625_v41 = vld [vmem:[%s12604_s30 + $0x10] sm:$0xff]  ;;  %v632_v42 = vld [vmem:[%s12604_s30 + $0x48] sm:$0xff] }
  0x33   : > { %1798 = vmatpush1.bf16.msra.mxu0 %v11569_v7  ;;  %v623_v39 = vld [vmem:[%s12604_s30] sm:$0xff]  ;;  %v638_v43 = vld [vmem:[%s12604_s30 + $0x78] sm:$0xff]  ;;  %v645_v44 = vld [vmem:[%s12604_s30 + $0xb0] sm:$0xff]  ;;  %v1073_v49 = vpack.c.bf16 %v632_v42, %v625_v41 }
  0x34   : > { %2087 = vmatpush1.bf16.msra.mxu1 %v11570_v8  ;;  %1799 = vmatprep.subr.bf16.mxu0 %v16006_v1  ;;  %v640_v45 = vld [vmem:[%s12604_s30 + $0x88] sm:$0xff]  ;;  %v647_v46 = vld [vmem:[%s12604_s30 + $0xc0] sm:$0xff]  ;;  %v1071_v48 = vpack.c.bf16 %v630_v40, %v623_v39  ;;  %v11595_v50 = vld [vmem:[%s16025_s26 + $0x138] sm:$0xff]   ;;  %v1079_v51 = vpack.c.bf16 %v645_v44, %v638_v43 }
  0x35   : > { %2088 = vmatprep.subr.bf16.mxu1 %v16006_v1  ;;  %v11596_v47 = vld [vmem:[%s16025_s26 + $0x180] sm:$0xff]   ;;  %v1081_v52 = vpack.c.bf16 %v647_v46, %v640_v45  ;;  %v637_v53 = vld [vmem:[%s12604_s30 + $0x70] sm:$0xff]  ;;  %v644_v54 = vld [vmem:[%s12604_s30 + $0xa8] sm:$0xff] }
  0x36   : > { %v639_v55 = vld [vmem:[%s12604_s30 + $0x80] sm:$0xff]  ;;  %v646_v56 = vld [vmem:[%s12604_s30 + $0xb8] sm:$0xff]  ;;  %v652_v57 = vld [vmem:[%s12604_s30 + $0xe8] sm:$0xff]  ;;  %v1078_v62 = vpack.c.bf16 %v644_v54, %v637_v53 }
  0x37   : > { %1800 = vmatpush1.bf16.msra.mxu0 %v11571_v9  ;;  %v11597_v58 = vld [vmem:[%s16025_s26 + $0x130] sm:$0xff]   ;;  %v659_v59 = vld [vmem:[%s12604_s30 + $0x120] sm:$0xff]  ;;  %v654_v60 = vld [vmem:[%s12604_s30 + $0xf8] sm:$0xff]  ;;  %v1080_v63 = vpack.c.bf16 %v646_v56, %v639_v55 }
  0x38   : > { %2089 = vmatpush1.bf16.msra.mxu1 %v11572_v10  ;;  %1801 = vmatprep.subr.bf16.mxu0 %v16006_v1  ;;  %v661_v61 = vld [vmem:[%s12604_s30 + $0x130] sm:$0xff]  ;;  %v1086_v0 = vpack.c.bf16 %v659_v59, %v652_v57  ;;  %v11598_v3 = vld [vmem:[%s16025_s26 + $0x128] sm:$0xff]   ;;  %v651_v4 = vld [vmem:[%s12604_s30 + $0xe0] sm:$0xff] }
  0x39   : > { %2090 = vmatprep.subr.bf16.mxu1 %v16006_v1  ;;  %v1088_v2 = vpack.c.bf16 %v661_v61, %v654_v60  ;;  %v658_v5 = vld [vmem:[%s12604_s30 + $0x118] sm:$0xff]  ;;  %v653_v6 = vld [vmem:[%s12604_s30 + $0xf0] sm:$0xff]  ;;  %v660_v7 = vld [vmem:[%s12604_s30 + $0x128] sm:$0xff] }
  0x3a   : > { %v666_v8 = vld [vmem:[%s12604_s30 + $0x158] sm:$0xff]  ;;  %v673_v9 = vld [vmem:[%s12604_s30 + $0x190] sm:$0xff]  ;;  %v11599_v10 = vld [vmem:[%s16025_s26 + $0x120] sm:$0xff]  }
  0x3b   : > { %1802 = vmatpush1.bf16.msra.mxu0 %v11573_v11  ;;  %v668_v11 = vld [vmem:[%s12604_s30 + $0x168] sm:$0xff]  ;;  %v667_v20 = vld [vmem:[%s12604_s30 + $0x160] sm:$0xff]  ;;  %v674_v21 = vld [vmem:[%s12604_s30 + $0x198] sm:$0xff] }
  0x3c   : > { %2091 = vmatpush1.bf16.msra.mxu1 %v11574_v12  ;;  %1803 = vmatprep.subr.bf16.mxu0 %v16006_v1  ;;  %v675_v12 = vld [vmem:[%s12604_s30 + $0x1a0] sm:$0xff]  ;;  %v672_v19 = vld [vmem:[%s12604_s30 + $0x188] sm:$0xff]  ;;  %v682_v25 = vld [vmem:[%s12604_s30 + $0x1d8] sm:$0xff] }
  0x3d   : > { %2092 = vmatprep.subr.bf16.mxu1 %v16006_v1  ;;  %v680_v22 = vld [vmem:[%s12604_s30 + $0x1c8] sm:$0xff]  ;;  %v687_v23 = vld [vmem:[%s12604_s30 + $0x200] sm:$0xff]  ;;  %v11604_v45 = vld [vmem:[%s16025_s26 + $0x178] sm:$0xff]  }
  0x3e   : > { %v696_v39 = vld [vmem:[%s12604_s30 + $0x248] sm:$0xff]  ;;  %v703_v40 = vld [vmem:[%s12604_s30 + $0x280] sm:$0xff]  ;;  %v693_v46 = vld [vmem:[%s12604_s30 + $0x230] sm:$0xff] }
  0x3f   : > { %1804 = vmatpush1.bf16.msra.mxu0 %v11575_v13  ;;  %v1085_v13 = vpack.c.bf16 %v658_v5, %v651_v4  ;;  %v1109_v44 = vpack.c.bf16 %v703_v40, %v696_v39  ;;  %v710_v53 = vld [vmem:[%s12604_s30 + $0x2b8] sm:$0xff]  ;;  %v717_v54 = vld [vmem:[%s12604_s30 + $0x2f0] sm:$0xff]  ;;  %v11606_v59 = vld [vmem:[%s16025_s26 + $0x168] sm:$0xff]  }
  0x40   : > { %2093 = vmatpush1.bf16.msra.mxu1 %v11576_v14  ;;  %1805 = vmatprep.subr.bf16.mxu0 %v16006_v1  ;;  %v1087_v14 = vpack.c.bf16 %v660_v7, %v653_v6  ;;  %v707_v60 = vld [vmem:[%s12604_s30 + $0x2a0] sm:$0xff]  ;;  %v714_v61 = vld [vmem:[%s12604_s30 + $0x2d8] sm:$0xff] }
  0x41   : > { %2094 = vmatprep.subr.bf16.mxu1 %v16006_v1  ;;  %v731_v4 = vld [vmem:[%s12604_s30 + $0x360] sm:$0xff]  ;;  %v1113_v5 = vpack.c.bf16 %v714_v61, %v707_v60  ;;  %v766_v40 = vld [vmem:[%s12604_s30 + $0x478] sm:$0xff]  ;;  %v784_v60 = vld [vmem:[%s12604_s30 + $0x508] sm:$0xff] }
  0x42   : > { %v771_v39 = vld [vmem:[%s12604_s30 + $0x4a0] sm:$0xff] }
  0x43   : > { %1806 = vmatpush1.bf16.msra.mxu0 %v11577_v15  ;;  %v1093_v15 = vpack.c.bf16 %v673_v9, %v666_v8  ;;  %v721_v9 = vld [vmem:[%s12604_s30 + $0x310] sm:$0xff]  ;;  %v779_v61 = vld [vmem:[%s12604_s30 + $0x4e0] sm:$0xff] }
  0x44   : > { %2095 = vmatpush1.bf16.msra.mxu1 %v11578_v16  ;;  %1807 = vmatprep.subr.bf16.mxu0 %v16006_v1  ;;  %v1095_v16 = vpack.c.bf16 %v675_v12, %v668_v11  ;;  %v723_v11 = vld [vmem:[%s12604_s30 + $0x320] sm:$0xff]  ;;  %v730_v12 = vld [vmem:[%s12604_s30 + $0x358] sm:$0xff] }
  0x45   : > { %2096 = vmatprep.subr.bf16.mxu1 %v16006_v1 }
  0x47   : > { %1808 = vmatpush2.bf16.msra.mxu0 %v11579_v17  ;;  %v11600_v17 = vld [vmem:[%s16025_s26 + $0x118] sm:$0xff]  }
  0x48   : > { %2097 = vmatpush2.bf16.msra.mxu1 %v11580_v18  ;;  %1809 = vmatprep.subr.bf16.mxu0 %v16006_v1  ;;  %v665_v18 = vld [vmem:[%s12604_s30 + $0x150] sm:$0xff] }
  0x49   : > { %2098 = vmatprep.subr.bf16.mxu1 %v16006_v1 }
  0x4b   : > { %1810 = vmatpush2.bf16.msra.mxu0 %v11581_v24  ;;  %v11601_v24 = vld [vmem:[%s16025_s26 + $0x110] sm:$0xff]  }
  0x4c   : > { %2099 = vmatpush2.bf16.msra.mxu1 %v11582_v26  ;;  %1811 = vmatprep.subr.bf16.mxu0 %v16006_v1  ;;  %v689_v26 = vld [vmem:[%s12604_s30 + $0x210] sm:$0xff] }
  0x4d   : > { %2100 = vmatprep.subr.bf16.mxu1 %v16006_v1 }
  0x4f   : > { %1812 = vmatpush2.bf16.msra.mxu0 %v11583_v27  ;;  %v1092_v27 = vpack.c.bf16 %v672_v19, %v665_v18  ;;  %v1122_v19 = vpack.c.bf16 %v730_v12, %v723_v11  ;;  %v793_v11 = vld [vmem:[%s12604_s30 + $0x550] sm:$0xff]  ;;  %v800_v12 = vld [vmem:[%s12604_s30 + $0x588] sm:$0xff] }
  0x50   : > { %2101 = vmatpush2.bf16.msra.mxu1 %v11584_v28  ;;  %1813 = vmatprep.subr.bf16.mxu0 %v16006_v1  ;;  %v1094_v28 = vpack.c.bf16 %v674_v21, %v667_v20 }
  0x51   : > { %2102 = vmatprep.subr.bf16.mxu1 %v16006_v1 }
  0x53   : > { %1814 = vmatpush2.bf16.msra.mxu0 %v11585_v29  ;;  %v1100_v29 = vpack.c.bf16 %v687_v23, %v680_v22  ;;  %v735_v22 = vld [vmem:[%s12604_s30 + $0x380] sm:$0xff]  ;;  %v742_v23 = vld [vmem:[%s12604_s30 + $0x3b8] sm:$0xff] }
  0x54   : > { %2103 = vmatpush2.bf16.msra.mxu1 %v11586_v30  ;;  %1815 = vmatprep.subr.bf16.mxu0 %v16006_v1  ;;  %v1102_v30 = vpack.c.bf16 %v689_v26, %v682_v25  ;;  %v744_v25 = vld [vmem:[%s12604_s30 + $0x3c8] sm:$0xff]  ;;  %v750_v26 = vld [vmem:[%s12604_s30 + $0x3f8] sm:$0xff] }
  0x55   : > { %2104 = vmatprep.subr.bf16.mxu1 %v16006_v1 }
  0x57   : > { %1816 = vmatpush2.bf16.msra.mxu0 %v11587_v31  ;;  %v11602_v31 = vld [vmem:[%s16025_s26 + $0x108] sm:$0xff]  }
  0x58   : > { %2105 = vmatpush2.bf16.msra.mxu1 %v11588_v32  ;;  %1817 = vmatprep.subr.bf16.mxu0 %v16006_v1  ;;  %v679_v32 = vld [vmem:[%s12604_s30 + $0x1c0] sm:$0xff] }
  0x59   : > { %2106 = vmatprep.subr.bf16.mxu1 %v16006_v1 }
  0x5b   : > { %1818 = vmatpush2.bf16.msra.mxu0 %v11589_v33  ;;  %v686_v33 = vld [vmem:[%s12604_s30 + $0x1f8] sm:$0xff] }
  0x5c   : > { %2107 = vmatpush2.bf16.msra.mxu1 %v11590_v34  ;;  %1819 = vmatprep.subr.bf16.mxu0 %v16006_v1  ;;  %v681_v34 = vld [vmem:[%s12604_s30 + $0x1d0] sm:$0xff]  ;;  %v1099_v41 = vpack.c.bf16 %v686_v33, %v679_v32 }
  0x5d   : > { %2108 = vmatprep.subr.bf16.mxu1 %v16006_v1 }
  0x5f   : > { %1820 = vmatpush2.bf16.msra.mxu0 %v11591_v35  ;;  %v688_v35 = vld [vmem:[%s12604_s30 + $0x208] sm:$0xff] }
  0x60   : > { %2109 = vmatpush2.bf16.msra.mxu1 %v11592_v36  ;;  %1821 = vmatprep.subr.bf16.mxu0 %v16006_v1  ;;  %v694_v36 = vld [vmem:[%s12604_s30 + $0x238] sm:$0xff]  ;;  %v1101_v42 = vpack.c.bf16 %v688_v35, %v681_v34  ;;  %v749_v34 = vld [vmem:[%s12604_s30 + $0x3f0] sm:$0xff]  ;;  %v756_v35 = vld [vmem:[%s12604_s30 + $0x428] sm:$0xff] }
  0x61   : > { %2110 = vmatprep.subr.bf16.mxu1 %v16006_v1 }
  0x63   : > { %1822 = vmatpush2.bf16.msra.mxu0 %v11593_v37  ;;  %v701_v37 = vld [vmem:[%s12604_s30 + $0x270] sm:$0xff] }
  0x64   : > { %2111 = vmatpush2.bf16.msra.mxu1 %v11594_v38  ;;  %2369 = vmatprep.subr.bf16.mxu0 %v16006_v1  ;;  %v11603_v38 = vld [vmem:[%s16025_s26 + $0x100] sm:$0xff]   ;;  %v1107_v43 = vpack.c.bf16 %v701_v37, %v694_v36  ;;  %v758_v37 = vld [vmem:[%s12604_s30 + $0x438] sm:$0xff] }
  0x65   : > { %10764 = vmatprep.subr.bf16.mxu1 %v11596_v47  ;;  %v751_v36 = vld [vmem:[%s12604_s30 + $0x400] sm:$0xff] }
  0x66   : > { %1824 = vmatmul.mubr.bf16.vlgmr.msra.gmra.mxu0 %v1071_v48  ;;  %v695_v48 = vld [vmem:[%s12604_s30 + $0x240] sm:$0xff] }
  0x67   : > { %2113 = vmatmul.mubr.bf16.vlgmr.msra.gmra.mxu1 %v1073_v49  ;;  %2370 = vmatpush1.bf16.msra.mxu0 %v11595_v50  ;;  %v702_v49 = vld [vmem:[%s12604_s30 + $0x278] sm:$0xff]  ;;  %v708_v50 = vld [vmem:[%s12604_s30 + $0x2a8] sm:$0xff] }
  0x68   : > { %1831 = vmatprep.mubr.bf16.mxu0 %v1079_v51  ;;  %2120 = vmatprep.mubr.bf16.mxu1 %v1081_v52  ;;  %v715_v51 = vld [vmem:[%s12604_s30 + $0x2e0] sm:$0xff]  ;;  %v11605_v52 = vld [vmem:[%s16025_s26 + $0x170] sm:$0xff]   ;;  %v1108_v56 = vpack.c.bf16 %v702_v49, %v695_v48  ;;  %v770_v48 = vld [vmem:[%s12604_s30 + $0x498] sm:$0xff] }
  0x69   : > { %10765 = vmatpush3.bf16.msra.mxu1 %v11596_v47  ;;  %2371 = vmatprep.subr.bf16.mxu0 %v16006_v1  ;;  %v700_v47 = vld [vmem:[%s12604_s30 + $0x268] sm:$0xff]  ;;  %v1114_v57 = vpack.c.bf16 %v715_v51, %v708_v50  ;;  %v765_v49 = vld [vmem:[%s12604_s30 + $0x470] sm:$0xff]  ;;  %v778_v51 = vld [vmem:[%s12604_s30 + $0x4d8] sm:$0xff] }
  0x6a   : > { %v1106_v55 = vpack.c.bf16 %v700_v47, %v693_v46  ;;  %v763_v47 = vld [vmem:[%s12604_s30 + $0x460] sm:$0xff]  ;;  %v772_v50 = vld [vmem:[%s12604_s30 + $0x4a8] sm:$0xff] }
  0x6b   : > { %2372 = vmatpush1.bf16.msra.mxu0 %v11597_v58  ;;  %v1116_v58 = vpack.c.bf16 %v717_v54, %v710_v53  ;;  %v780_v53 = vld [vmem:[%s12604_s30 + $0x4e8] sm:$0xff]  ;;  %v787_v54 = vld [vmem:[%s12604_s30 + $0x520] sm:$0xff] }
  0x6c   : > { %2373 = vmatprep.subr.bf16.mxu0 %v16006_v1 }
  0x6e   : > { %1832 = vmatmul.mubr.bf16.gmra.mxu0 %v1078_v62  ;;  %v709_v62 = vld [vmem:[%s12604_s30 + $0x2b0] sm:$0xff] }
  0x6f   : > { %2121 = vmatmul.mubr.bf16.gmra.mxu1 %v1080_v63  ;;  %1839 = vmatprep.mubr.bf16.mxu0 %v1086_v0  ;;  %v716_v63 = vld [vmem:[%s12604_s30 + $0x2e8] sm:$0xff]  ;;  %v722_v0 = vld [vmem:[%s12604_s30 + $0x318] sm:$0xff] }
  0x70   : > { %2128 = vmatprep.mubr.bf16.mxu1 %v1088_v2  ;;  %2374 = vmatpush1.bf16.msra.mxu0 %v11598_v3  ;;  %v729_v2 = vld [vmem:[%s12604_s30 + $0x350] sm:$0xff]  ;;  %v724_v3 = vld [vmem:[%s12604_s30 + $0x328] sm:$0xff]  ;;  %v1115_v6 = vpack.c.bf16 %v716_v63, %v709_v62  ;;  %v786_v62 = vld [vmem:[%s12604_s30 + $0x518] sm:$0xff] }
  0x71   : > { %2375 = vmatprep.subr.bf16.mxu0 %v16006_v1  ;;  %v1121_v7 = vpack.c.bf16 %v729_v2, %v722_v0  ;;  %v1123_v8 = vpack.c.bf16 %v731_v4, %v724_v3  ;;  %v792_v63 = vld [vmem:[%s12604_s30 + $0x548] sm:$0xff]  ;;  %v799_v0 = vld [vmem:[%s12604_s30 + $0x580] sm:$0xff]  ;;  %v794_v2 = vld [vmem:[%s12604_s30 + $0x558] sm:$0xff] }
  0x72   : > { %v801_v3 = vld [vmem:[%s12604_s30 + $0x590] sm:$0xff] }
  0x73   : > { %v11609_v4 = vld [vmem:[%s16025_s26 + $0x150] sm:$0xff]  }
  0x74   : > { %2376 = vmatpush1.bf16.msra.mxu0 %v11599_v10  ;;  %v728_v10 = vld [vmem:[%s12604_s30 + $0x348] sm:$0xff] }
  0x75   : > { %2377 = vmatprep.subr.bf16.mxu0 %v16006_v1  ;;  %v1120_v18 = vpack.c.bf16 %v728_v10, %v721_v9  ;;  %v791_v9 = vld [vmem:[%s12604_s30 + $0x540] sm:$0xff]  ;;  %v798_v10 = vld [vmem:[%s12604_s30 + $0x578] sm:$0xff] }
  0x76   : > { %1840 = vmatmul.mubr.bf16.gmra.mxu0 %v1085_v13  ;;  %v11607_v13 = vld [vmem:[%s16025_s26 + $0x160] sm:$0xff]  }
  0x77   : > { %2129 = vmatmul.mubr.bf16.gmra.mxu1 %v1087_v14  ;;  %1847 = vmatprep.mubr.bf16.mxu0 %v1093_v15  ;;  %v736_v14 = vld [vmem:[%s12604_s30 + $0x388] sm:$0xff]  ;;  %v743_v15 = vld [vmem:[%s12604_s30 + $0x3c0] sm:$0xff] }
  0x78   : > { %2136 = vmatprep.mubr.bf16.mxu1 %v1095_v16  ;;  %2378 = vmatpush1.bf16.msra.mxu0 %v11600_v17  ;;  %v738_v16 = vld [vmem:[%s12604_s30 + $0x398] sm:$0xff]  ;;  %v745_v17 = vld [vmem:[%s12604_s30 + $0x3d0] sm:$0xff]  ;;  %v1128_v20 = vpack.c.bf16 %v743_v15, %v736_v14  ;;  %v808_v15 = vld [vmem:[%s12604_s30 + $0x5c8] sm:$0xff] }
  0x79   : > { %2379 = vmatprep.subr.bf16.mxu0 %v16006_v1  ;;  %v1130_v21 = vpack.c.bf16 %v745_v17, %v738_v16  ;;  %v813_v14 = vld [vmem:[%s12604_s30 + $0x5f0] sm:$0xff]  ;;  %v815_v16 = vld [vmem:[%s12604_s30 + $0x600] sm:$0xff]  ;;  %v1155_v17 = vpack.c.bf16 %v798_v10, %v791_v9  ;;  %v868_v9 = vld [vmem:[%s12604_s30 + $0x7a8] sm:$0xff] }
  0x7a   : > { %v863_v10 = vld [vmem:[%s12604_s30 + $0x780] sm:$0xff] }
  0x7c   : > { %2380 = vmatpush1.bf16.msra.mxu0 %v11601_v24  ;;  %v737_v24 = vld [vmem:[%s12604_s30 + $0x390] sm:$0xff] }
  0x7d   : > { %2381 = vmatprep.subr.bf16.mxu0 %v16006_v1 }
  0x7e   : > { %1848 = vmatmul.mubr.bf16.gmra.mxu0 %v1092_v27  ;;  %v757_v27 = vld [vmem:[%s12604_s30 + $0x430] sm:$0xff] }
  0x7f   : > { %2137 = vmatmul.mubr.bf16.gmra.mxu1 %v1094_v28  ;;  %1855 = vmatprep.mubr.bf16.mxu0 %v1100_v29  ;;  %v752_v28 = vld [vmem:[%s12604_s30 + $0x408] sm:$0xff]  ;;  %v759_v29 = vld [vmem:[%s12604_s30 + $0x440] sm:$0xff]  ;;  %v1135_v32 = vpack.c.bf16 %v757_v27, %v750_v26  ;;  %v822_v27 = vld [vmem:[%s12604_s30 + $0x638] sm:$0xff] }
  0x80   : > { %2144 = vmatprep.mubr.bf16.mxu1 %v1102_v30  ;;  %2382 = vmatpush1.bf16.msra.mxu0 %v11602_v31  ;;  %v1127_v30 = vpack.c.bf16 %v742_v23, %v735_v22  ;;  %v1129_v31 = vpack.c.bf16 %v744_v25, %v737_v24  ;;  %v1137_v33 = vpack.c.bf16 %v759_v29, %v752_v28  ;;  %v812_v22 = vld [vmem:[%s12604_s30 + $0x5e8] sm:$0xff]  ;;  %v807_v23 = vld [vmem:[%s12604_s30 + $0x5c0] sm:$0xff]  ;;  %v814_v24 = vld [vmem:[%s12604_s30 + $0x5f8] sm:$0xff] }
  0x81   : > { %2383 = vmatprep.subr.bf16.mxu0 %v16006_v1  ;;  %v820_v25 = vld [vmem:[%s12604_s30 + $0x628] sm:$0xff]  ;;  %v827_v26 = vld [vmem:[%s12604_s30 + $0x660] sm:$0xff]  ;;  %v829_v28 = vld [vmem:[%s12604_s30 + $0x670] sm:$0xff] }
  0x82   : > { %v11610_v29 = vld [vmem:[%s16025_s26 + $0x148] sm:$0xff]  }
  0x84   : > { %2384 = vmatpush1.bf16.msra.mxu0 %v11603_v38  ;;  %v764_v38 = vld [vmem:[%s12604_s30 + $0x468] sm:$0xff] }
  0x85   : > { %2385 = vmatprep.subr.bf16.mxu0 %v16006_v1 }
  0x86   : > { %1856 = vmatmul.mubr.bf16.gmra.mxu0 %v1099_v41  ;;  %v773_v41 = vld [vmem:[%s12604_s30 + $0x4b0] sm:$0xff] }
  0x87   : > { %2145 = vmatmul.mubr.bf16.gmra.mxu1 %v1101_v42  ;;  %1863 = vmatprep.mubr.bf16.mxu0 %v1107_v43  ;;  %v11608_v42 = vld [vmem:[%s16025_s26 + $0x158] sm:$0xff]   ;;  %v1134_v43 = vpack.c.bf16 %v756_v35, %v749_v34  ;;  %v1144_v46 = vpack.c.bf16 %v773_v41, %v766_v40  ;;  %v819_v34 = vld [vmem:[%s12604_s30 + $0x620] sm:$0xff]  ;;  %v836_v40 = vld [vmem:[%s12604_s30 + $0x6a8] sm:$0xff] }
  0x88   : > { %2152 = vmatprep.mubr.bf16.mxu1 %v1109_v44  ;;  %2386 = vmatpush2.bf16.msra.mxu0 %v11604_v45  ;;  %v1136_v44 = vpack.c.bf16 %v758_v37, %v751_v36  ;;  %v1142_v45 = vpack.c.bf16 %v771_v39, %v764_v38  ;;  %v826_v35 = vld [vmem:[%s12604_s30 + $0x658] sm:$0xff]  ;;  %v821_v36 = vld [vmem:[%s12604_s30 + $0x630] sm:$0xff]  ;;  %v828_v37 = vld [vmem:[%s12604_s30 + $0x668] sm:$0xff] }
  0x89   : > { %2387 = vmatprep.subr.bf16.mxu0 %v16006_v1  ;;  %v834_v38 = vld [vmem:[%s12604_s30 + $0x698] sm:$0xff]  ;;  %v841_v39 = vld [vmem:[%s12604_s30 + $0x6d0] sm:$0xff]  ;;  %v843_v41 = vld [vmem:[%s12604_s30 + $0x6e0] sm:$0xff] }
  0x8c   : > { %2388 = vmatpush2.bf16.msra.mxu0 %v11605_v52  ;;  %v785_v52 = vld [vmem:[%s12604_s30 + $0x510] sm:$0xff] }
  0x8d   : > { %2389 = vmatprep.subr.bf16.mxu0 %v16006_v1 }
  0x8e   : > { %1864 = vmatmul.mubr.bf16.gmra.mxu0 %v1106_v55  ;;  %v1141_v55 = vpack.c.bf16 %v770_v48, %v763_v47  ;;  %v840_v47 = vld [vmem:[%s12604_s30 + $0x6c8] sm:$0xff]  ;;  %v835_v48 = vld [vmem:[%s12604_s30 + $0x6a0] sm:$0xff] }
  0x8f   : > { %2153 = vmatmul.mubr.bf16.gmra.mxu1 %v1108_v56  ;;  %1871 = vmatprep.mubr.bf16.mxu0 %v1114_v57  ;;  %v1143_v56 = vpack.c.bf16 %v772_v50, %v765_v49  ;;  %v1149_v57 = vpack.c.bf16 %v785_v52, %v778_v51  ;;  %v842_v49 = vld [vmem:[%s12604_s30 + $0x6d8] sm:$0xff]  ;;  %v848_v50 = vld [vmem:[%s12604_s30 + $0x708] sm:$0xff]  ;;  %v855_v51 = vld [vmem:[%s12604_s30 + $0x740] sm:$0xff] }
  0x90   : > { %2160 = vmatprep.mubr.bf16.mxu1 %v1116_v58  ;;  %2390 = vmatpush2.bf16.msra.mxu0 %v11606_v59  ;;  %v1151_v58 = vpack.c.bf16 %v787_v54, %v780_v53  ;;  %v777_v59 = vld [vmem:[%s12604_s30 + $0x4d0] sm:$0xff]  ;;  %v850_v52 = vld [vmem:[%s12604_s30 + $0x718] sm:$0xff]  ;;  %v11611_v54 = vld [vmem:[%s16025_s26 + $0x140] sm:$0xff]  }
  0x91   : > { %2391 = vmatprep.subr.bf16.mxu0 %v16006_v1  ;;  %v857_v53 = vld [vmem:[%s12604_s30 + $0x750] sm:$0xff] }
  0x94   : > { %2392 = vmatpush2.bf16.msra.mxu0 %v11607_v13  ;;  %v806_v13 = vld [vmem:[%s12604_s30 + $0x5b8] sm:$0xff] }
  0x95   : > { %2393 = vmatprep.subr.bf16.mxu0 %v16006_v1 }
  0x96   : > { %1872 = vmatmul.mubr.bf16.gmra.mxu0 %v1113_v5  ;;  %v1148_v5 = vpack.c.bf16 %v784_v60, %v777_v59  ;;  %v847_v59 = vld [vmem:[%s12604_s30 + $0x700] sm:$0xff]  ;;  %v854_v60 = vld [vmem:[%s12604_s30 + $0x738] sm:$0xff] }
  0x97   : > { %2161 = vmatmul.mubr.bf16.gmra.mxu1 %v1115_v6  ;;  %1879 = vmatprep.mubr.bf16.mxu0 %v1121_v7  ;;  %v1150_v6 = vpack.c.bf16 %v786_v62, %v779_v61  ;;  %v1156_v7 = vpack.c.bf16 %v799_v0, %v792_v63  ;;  %v849_v61 = vld [vmem:[%s12604_s30 + $0x710] sm:$0xff]  ;;  %v856_v62 = vld [vmem:[%s12604_s30 + $0x748] sm:$0xff]  ;;  %v862_v63 = vld [vmem:[%s12604_s30 + $0x778] sm:$0xff] }
  0x98   : > { %2168 = vmatprep.mubr.bf16.mxu1 %v1123_v8  ;;  %2394 = vmatpush2.bf16.msra.mxu0 %v11608_v42  ;;  %v1158_v8 = vpack.c.bf16 %v801_v3, %v794_v2  ;;  %v1169_v42 = vpack.c.bf16 %v826_v35, %v819_v34  ;;  %v869_v0 = vld [vmem:[%s12604_s30 + $0x7b0] sm:$0xff]  ;;  %v864_v2 = vld [vmem:[%s12604_s30 + $0x788] sm:$0xff]  ;;  %v871_v3 = vld [vmem:[%s12604_s30 + $0x7c0] sm:$0xff] }
  0x99   : > { %2395 = vmatprep.subr.bf16.mxu0 %v16006_v1  ;;  %v891_v34 = vld [vmem:[%s12604_s30 + $0x860] sm:$0xff]  ;;  %v898_v35 = vld [vmem:[%s12604_s30 + $0x898] sm:$0xff] }
  0x9c   : > { %2396 = vmatpush2.bf16.msra.mxu0 %v11609_v4  ;;  %v1183_v4 = vpack.c.bf16 %v854_v60, %v847_v59  ;;  %v926_v59 = vld [vmem:[%s12604_s30 + $0x978] sm:$0xff]  ;;  %v932_v60 = vld [vmem:[%s12604_s30 + $0x9a8] sm:$0xff] }
  0x9d   : > { %2397 = vmatprep.subr.bf16.mxu0 %v16006_v1 }
  0x9e   : > { %1880 = vmatmul.mubr.bf16.gmra.mxu0 %v1120_v18  ;;  %v1157_v18 = vpack.c.bf16 %v800_v12, %v793_v11  ;;  %v870_v11 = vld [vmem:[%s12604_s30 + $0x7b8] sm:$0xff]  ;;  %v876_v12 = vld [vmem:[%s12604_s30 + $0x7e8] sm:$0xff] }
  0x9f   : > { %2169 = vmatmul.mubr.bf16.gmra.mxu1 %v1122_v19  ;;  %1887 = vmatprep.mubr.bf16.mxu0 %v1128_v20  ;;  %v1163_v19 = vpack.c.bf16 %v813_v14, %v806_v13  ;;  %v1165_v20 = vpack.c.bf16 %v815_v16, %v808_v15  ;;  %v883_v13 = vld [vmem:[%s12604_s30 + $0x820] sm:$0xff]  ;;  %v878_v14 = vld [vmem:[%s12604_s30 + $0x7f8] sm:$0xff]  ;;  %v885_v15 = vld [vmem:[%s12604_s30 + $0x830] sm:$0xff] }
  0xa0   : > { %2176 = vmatprep.mubr.bf16.mxu1 %v1130_v21  ;;  %v805_v21 = vld [vmem:[%s12604_s30 + $0x5b0] sm:$0xff]  ;;  %2398 = vmatpush2.bf16.msra.mxu0 %v11610_v29 }
  0xa1   : > { %2399 = vmatprep.subr.bf16.mxu0 %v16006_v1 }
  0xa4   : > { %2400 = vmatpush2.bf16.msra.mxu0 %v11611_v54 }
  0xa6   : > { %1888 = vmatmul.mubr.bf16.gmra.mxu0 %v1127_v30  ;;  %v1162_v30 = vpack.c.bf16 %v812_v22, %v805_v21  ;;  %v882_v21 = vld [vmem:[%s12604_s30 + $0x818] sm:$0xff]  ;;  %v877_v22 = vld [vmem:[%s12604_s30 + $0x7f0] sm:$0xff] }
  0xa7   : > { %2177 = vmatmul.mubr.bf16.gmra.mxu1 %v1129_v31  ;;  %1895 = vmatprep.mubr.bf16.mxu0 %v1135_v32  ;;  %v1164_v31 = vpack.c.bf16 %v814_v24, %v807_v23  ;;  %v1170_v32 = vpack.c.bf16 %v827_v26, %v820_v25  ;;  %v884_v23 = vld [vmem:[%s12604_s30 + $0x828] sm:$0xff]  ;;  %v890_v24 = vld [vmem:[%s12604_s30 + $0x858] sm:$0xff]  ;;  %v897_v25 = vld [vmem:[%s12604_s30 + $0x890] sm:$0xff] }
  0xa8   : > { %2184 = vmatprep.mubr.bf16.mxu1 %v1137_v33  ;;  %v1172_v33 = vpack.c.bf16 %v829_v28, %v822_v27  ;;  %v892_v26 = vld [vmem:[%s12604_s30 + $0x868] sm:$0xff]  ;;  %v899_v27 = vld [vmem:[%s12604_s30 + $0x8a0] sm:$0xff]  ;;  %v1199_v29 = vpack.c.bf16 %v884_v23, %v877_v22  ;;  %v962_v23 = vld [vmem:[%s12604_s30 + $0xa98] sm:$0xff] }
  0xa9   : > { %v967_v22 = vld [vmem:[%s12604_s30 + $0xac0] sm:$0xff] }
  0xae   : > { %1896 = vmatmul.mubr.bf16.gmra.mxu0 %v1134_v43  ;;  %v1171_v43 = vpack.c.bf16 %v828_v37, %v821_v36  ;;  %v904_v36 = vld [vmem:[%s12604_s30 + $0x8c8] sm:$0xff]  ;;  %v911_v37 = vld [vmem:[%s12604_s30 + $0x900] sm:$0xff] }
  0xaf   : > { %2185 = vmatmul.mubr.bf16.gmra.mxu1 %v1136_v44  ;;  %1903 = vmatprep.mubr.bf16.mxu0 %v1142_v45  ;;  %v1177_v44 = vpack.c.bf16 %v841_v39, %v834_v38  ;;  %v1179_v45 = vpack.c.bf16 %v843_v41, %v836_v40  ;;  %v906_v38 = vld [vmem:[%s12604_s30 + $0x8d8] sm:$0xff]  ;;  %v913_v39 = vld [vmem:[%s12604_s30 + $0x910] sm:$0xff]  ;;  %v1206_v41 = vpack.c.bf16 %v898_v35, %v891_v34  ;;  %v976_v35 = vld [vmem:[%s12604_s30 + $0xb08] sm:$0xff] }
  0xb0   : > { %2192 = vmatprep.mubr.bf16.mxu1 %v1144_v46  ;;  %v833_v46 = vld [vmem:[%s12604_s30 + $0x690] sm:$0xff] }
  0xb1   : > { %v981_v34 = vld [vmem:[%s12604_s30 + $0xb30] sm:$0xff] }
  0xb6   : > { %1904 = vmatmul.mubr.bf16.gmra.mxu0 %v1141_v55  ;;  %v1176_v55 = vpack.c.bf16 %v840_v47, %v833_v46  ;;  %v905_v46 = vld [vmem:[%s12604_s30 + $0x8d0] sm:$0xff]  ;;  %v912_v47 = vld [vmem:[%s12604_s30 + $0x908] sm:$0xff] }
  0xb7   : > { %2193 = vmatmul.mubr.bf16.gmra.mxu1 %v1143_v56  ;;  %1911 = vmatprep.mubr.bf16.mxu0 %v1149_v57  ;;  %v1178_v56 = vpack.c.bf16 %v842_v49, %v835_v48  ;;  %v1184_v57 = vpack.c.bf16 %v855_v51, %v848_v50  ;;  %v918_v48 = vld [vmem:[%s12604_s30 + $0x938] sm:$0xff]  ;;  %v925_v49 = vld [vmem:[%s12604_s30 + $0x970] sm:$0xff]  ;;  %v920_v50 = vld [vmem:[%s12604_s30 + $0x948] sm:$0xff] }
  0xb8   : > { %2200 = vmatprep.mubr.bf16.mxu1 %v1151_v58  ;;  %v1186_v58 = vpack.c.bf16 %v857_v53, %v850_v52  ;;  %v927_v51 = vld [vmem:[%s12604_s30 + $0x980] sm:$0xff]  ;;  %v1213_v53 = vpack.c.bf16 %v912_v47, %v905_v46  ;;  %v1219_v54 = vpack.c.bf16 %v925_v49, %v918_v48  ;;  %v980_v46 = vld [vmem:[%s12604_s30 + $0xb28] sm:$0xff]  ;;  %v982_v49 = vld [vmem:[%s12604_s30 + $0xb38] sm:$0xff] }
  0xb9   : > { %v975_v47 = vld [vmem:[%s12604_s30 + $0xb00] sm:$0xff] }
  0xbe   : > { %1912 = vmatmul.mubr.bf16.gmra.mxu0 %v1148_v5  ;;  %v1185_v5 = vpack.c.bf16 %v856_v62, %v849_v61  ;;  %v939_v61 = vld [vmem:[%s12604_s30 + $0x9e0] sm:$0xff]  ;;  %v934_v62 = vld [vmem:[%s12604_s30 + $0x9b8] sm:$0xff] }
  0xbf   : > { %2201 = vmatmul.mubr.bf16.gmra.mxu1 %v1150_v6  ;;  %1919 = vmatprep.mubr.bf16.mxu0 %v1156_v7  ;;  %v1191_v6 = vpack.c.bf16 %v869_v0, %v862_v63  ;;  %v1193_v7 = vpack.c.bf16 %v871_v3, %v864_v2  ;;  %v941_v63 = vld [vmem:[%s12604_s30 + $0x9f0] sm:$0xff]  ;;  %v1226_v3 = vpack.c.bf16 %v939_v61, %v932_v60 }
  0xc0   : > { %2208 = vmatprep.mubr.bf16.mxu1 %v1158_v8  ;;  %v861_v8 = vld [vmem:[%s12604_s30 + $0x770] sm:$0xff]  ;;  %v1248_v60 = vpack.c.bf16 %v982_v49, %v975_v47 }
  0xc1   : > { %v1190_v16 = vpack.c.bf16 %v868_v9, %v861_v8  ;;  %v940_v8 = vld [vmem:[%s12604_s30 + $0x9e8] sm:$0xff]  ;;  %v946_v9 = vld [vmem:[%s12604_s30 + $0xa18] sm:$0xff] }
  0xc6   : > { %1920 = vmatmul.mubr.bf16.gmra.mxu0 %v1155_v17  ;;  %v1192_v17 = vpack.c.bf16 %v870_v11, %v863_v10  ;;  %v953_v10 = vld [vmem:[%s12604_s30 + $0xa50] sm:$0xff]  ;;  %v948_v11 = vld [vmem:[%s12604_s30 + $0xa28] sm:$0xff] }
  0xc7   : > { %2209 = vmatmul.mubr.bf16.gmra.mxu1 %v1157_v18  ;;  %1927 = vmatprep.mubr.bf16.mxu0 %v1163_v19  ;;  %v1198_v18 = vpack.c.bf16 %v883_v13, %v876_v12  ;;  %v1200_v19 = vpack.c.bf16 %v885_v15, %v878_v14  ;;  %v955_v12 = vld [vmem:[%s12604_s30 + $0xa60] sm:$0xff]  ;;  %v1233_v15 = vpack.c.bf16 %v953_v10, %v946_v9  ;;  %v996_v10 = vld [vmem:[%s12604_s30 + $0xba8] sm:$0xff] }
  0xc8   : > { %2216 = vmatprep.mubr.bf16.mxu1 %v1165_v20  ;;  %v875_v20 = vld [vmem:[%s12604_s30 + $0x7e0] sm:$0xff] }
  0xc9   : > { %v1197_v28 = vpack.c.bf16 %v882_v21, %v875_v20  ;;  %v954_v20 = vld [vmem:[%s12604_s30 + $0xa58] sm:$0xff]  ;;  %v960_v21 = vld [vmem:[%s12604_s30 + $0xa88] sm:$0xff] }
  0xce   : > { %1928 = vmatmul.mubr.bf16.gmra.mxu0 %v1162_v30  ;;  %v1205_v30 = vpack.c.bf16 %v897_v25, %v890_v24  ;;  %v969_v24 = vld [vmem:[%s12604_s30 + $0xad0] sm:$0xff] }
  0xcf   : > { %2217 = vmatmul.mubr.bf16.gmra.mxu1 %v1164_v31  ;;  %1935 = vmatprep.mubr.bf16.mxu0 %v1170_v32  ;;  %v1207_v31 = vpack.c.bf16 %v899_v27, %v892_v26  ;;  %v889_v32 = vld [vmem:[%s12604_s30 + $0x850] sm:$0xff]  ;;  %v1240_v27 = vpack.c.bf16 %v967_v22, %v960_v21 }
  0xd0   : > { %2224 = vmatprep.mubr.bf16.mxu1 %v1172_v33  ;;  %v896_v33 = vld [vmem:[%s12604_s30 + $0x888] sm:$0xff] }
  0xd1   : > { %v1204_v40 = vpack.c.bf16 %v896_v33, %v889_v32  ;;  %v968_v32 = vld [vmem:[%s12604_s30 + $0xac8] sm:$0xff]  ;;  %v974_v33 = vld [vmem:[%s12604_s30 + $0xaf8] sm:$0xff] }
  0xd6   : > { %1936 = vmatmul.mubr.bf16.gmra.mxu0 %v1169_v42  ;;  %v1212_v42 = vpack.c.bf16 %v911_v37, %v904_v36  ;;  %v983_v36 = vld [vmem:[%s12604_s30 + $0xb40] sm:$0xff] }
  0xd7   : > { %2225 = vmatmul.mubr.bf16.gmra.mxu1 %v1171_v43  ;;  %1943 = vmatprep.mubr.bf16.mxu0 %v1177_v44  ;;  %v1214_v43 = vpack.c.bf16 %v913_v39, %v906_v38  ;;  %v903_v44 = vld [vmem:[%s12604_s30 + $0x8c0] sm:$0xff]  ;;  %v1247_v39 = vpack.c.bf16 %v981_v34, %v974_v33  ;;  %v1010_v34 = vld [vmem:[%s12604_s30 + $0xc18] sm:$0xff] }
  0xd8   : > { %2232 = vmatprep.mubr.bf16.mxu1 %v1179_v45  ;;  %v910_v45 = vld [vmem:[%s12604_s30 + $0x8f8] sm:$0xff] }
  0xd9   : > { %v1211_v52 = vpack.c.bf16 %v910_v45, %v903_v44  ;;  %v973_v45 = vld [vmem:[%s12604_s30 + $0xaf0] sm:$0xff] }
  0xde   : > { %1944 = vmatmul.mubr.bf16.gmra.mxu0 %v1176_v55  ;;  %v1221_v55 = vpack.c.bf16 %v927_v51, %v920_v50  ;;  %v988_v50 = vld [vmem:[%s12604_s30 + $0xb68] sm:$0xff]  ;;  %v995_v51 = vld [vmem:[%s12604_s30 + $0xba0] sm:$0xff] }
  0xdf   : > { %2233 = vmatmul.mubr.bf16.gmra.mxu1 %v1178_v56  ;;  %1951 = vmatprep.mubr.bf16.mxu0 %v1184_v57  ;;  %v917_v56 = vld [vmem:[%s12604_s30 + $0x930] sm:$0xff]  ;;  %v924_v57 = vld [vmem:[%s12604_s30 + $0x968] sm:$0xff]  ;;  %v1254_v61 = vpack.c.bf16 %v995_v51, %v988_v50 }
  0xe0   : > { %2240 = vmatprep.mubr.bf16.mxu1 %v1186_v58  ;;  %v919_v58 = vld [vmem:[%s12604_s30 + $0x940] sm:$0xff]  ;;  %v1218_v0 = vpack.c.bf16 %v924_v57, %v917_v56  ;;  %v1246_v57 = vpack.c.bf16 %v980_v46, %v973_v45 }
  0xe1   : > { %v1220_v2 = vpack.c.bf16 %v926_v59, %v919_v58 }
  0xe6   : > { %1952 = vmatmul.mubr.bf16.gmra.mxu0 %v1183_v4  ;;  %v1228_v4 = vpack.c.bf16 %v941_v63, %v934_v62 }
  0xe7   : > { %2241 = vmatmul.mubr.bf16.gmra.mxu1 %v1185_v5  ;;  %1959 = vmatprep.mubr.bf16.mxu0 %v1191_v6  ;;  %v931_v5 = vld [vmem:[%s12604_s30 + $0x9a0] sm:$0xff]  ;;  %v938_v6 = vld [vmem:[%s12604_s30 + $0x9d8] sm:$0xff] }
  0xe8   : > { %2248 = vmatprep.mubr.bf16.mxu1 %v1193_v7  ;;  %v933_v7 = vld [vmem:[%s12604_s30 + $0x9b0] sm:$0xff]  ;;  %v1225_v13 = vpack.c.bf16 %v938_v6, %v931_v5  ;;  %v987_v6 = vld [vmem:[%s12604_s30 + $0xb60] sm:$0xff] }
  0xe9   : > { %v1227_v14 = vpack.c.bf16 %v940_v8, %v933_v7  ;;  %v994_v7 = vld [vmem:[%s12604_s30 + $0xb98] sm:$0xff]  ;;  %v989_v8 = vld [vmem:[%s12604_s30 + $0xb70] sm:$0xff] }
  0xea   : > { %v1255_v21 = vpack.c.bf16 %v996_v10, %v989_v8 }
  0xee   : > { %1960 = vmatmul.mubr.bf16.gmra.mxu0 %v1190_v16  ;;  %v1235_v16 = vpack.c.bf16 %v955_v12, %v948_v11  ;;  %v1002_v11 = vld [vmem:[%s12604_s30 + $0xbd8] sm:$0xff]  ;;  %v1009_v12 = vld [vmem:[%s12604_s30 + $0xc10] sm:$0xff] }
  0xef   : > { %2249 = vmatmul.mubr.bf16.gmra.mxu1 %v1192_v17  ;;  %1967 = vmatprep.mubr.bf16.mxu0 %v1198_v18  ;;  %v945_v17 = vld [vmem:[%s12604_s30 + $0xa10] sm:$0xff]  ;;  %v952_v18 = vld [vmem:[%s12604_s30 + $0xa48] sm:$0xff]  ;;  %v1261_v22 = vpack.c.bf16 %v1009_v12, %v1002_v11 }
  0xf0   : > { %2256 = vmatprep.mubr.bf16.mxu1 %v1200_v19  ;;  %v947_v19 = vld [vmem:[%s12604_s30 + $0xa20] sm:$0xff]  ;;  %v1232_v25 = vpack.c.bf16 %v952_v18, %v945_v17  ;;  %v1253_v18 = vpack.c.bf16 %v994_v7, %v987_v6 }
  0xf1   : > { %v1234_v26 = vpack.c.bf16 %v954_v20, %v947_v19 }
  0xf6   : > { %1968 = vmatmul.mubr.bf16.gmra.mxu0 %v1197_v28  ;;  %v1242_v28 = vpack.c.bf16 %v969_v24, %v962_v23 }
  0xf7   : > { %2257 = vmatmul.mubr.bf16.gmra.mxu1 %v1199_v29  ;;  %1975 = vmatprep.mubr.bf16.mxu0 %v1205_v30  ;;  %v959_v29 = vld [vmem:[%s12604_s30 + $0xa80] sm:$0xff]  ;;  %v966_v30 = vld [vmem:[%s12604_s30 + $0xab8] sm:$0xff] }
  0xf8   : > { %2264 = vmatprep.mubr.bf16.mxu1 %v1207_v31  ;;  %v961_v31 = vld [vmem:[%s12604_s30 + $0xa90] sm:$0xff]  ;;  %v1239_v37 = vpack.c.bf16 %v966_v30, %v959_v29 }
  0xf9   : > { %v1241_v38 = vpack.c.bf16 %v968_v32, %v961_v31  ;;  %v1001_v30 = vld [vmem:[%s12604_s30 + $0xbd0] sm:$0xff]  ;;  %v1008_v31 = vld [vmem:[%s12604_s30 + $0xc08] sm:$0xff]  ;;  %v1003_v32 = vld [vmem:[%s12604_s30 + $0xbe0] sm:$0xff] }
  0xfa   : > { %v1262_v46 = vpack.c.bf16 %v1010_v34, %v1003_v32 }
  0xfe   : > { %1976 = vmatmul.mubr.bf16.gmra.mxu0 %v1204_v40  ;;  %v12944_v40 = vld [vmem:[%s16027_s23] ss:$0 sm:$0xff] }
  0xff   : > { %2265 = vmatmul.mubr.bf16.gmra.mxu1 %v1206_v41  ;;  %1983 = vmatprep.mubr.bf16.mxu0 %v1212_v42  ;;  %v1249_v41 = vpack.c.bf16 %v983_v36, %v976_v35  ;;  %v1016_v35 = vld [vmem:[%s12604_s30 + $0xc48] sm:$0xff]  ;;  %v1023_v36 = vld [vmem:[%s12604_s30 + $0xc80] sm:$0xff] }
 0x100   : > { %2272 = vmatprep.mubr.bf16.mxu1 %v1214_v43  ;;  %v1268_v47 = vpack.c.bf16 %v1023_v36, %v1016_v35 }
 0x106   : > { %1984 = vmatmul.mubr.bf16.gmra.mxu0 %v1211_v52 }
 0x107   : > { %2273 = vmatmul.mubr.bf16.gmra.mxu1 %v1213_v53  ;;  %1991 = vmatprep.mubr.bf16.mxu0 %v1219_v54  ;;  %v990_v54 = vld [vmem:[%s12604_s30 + $0xb78] sm:$0xff] }
 0x108   : > { %2280 = vmatprep.mubr.bf16.mxu1 %v1221_v55  ;;  %v997_v55 = vld [vmem:[%s12604_s30 + $0xbb0] sm:$0xff] }
 0x109   : > { %v1256_v63 = vpack.c.bf16 %v997_v55, %v990_v54 }
 0x10e   : > { %1992 = vmatmul.mubr.bf16.gmra.mxu0 %v1218_v0 }
 0x10f   : > { %2281 = vmatmul.mubr.bf16.gmra.mxu1 %v1220_v2  ;;  %1999 = vmatprep.mubr.bf16.mxu0 %v1226_v3 }
 0x110   : > { %2288 = vmatprep.mubr.bf16.mxu1 %v1228_v4 }
 0x116   : > { %2000 = vmatmul.mubr.bf16.gmra.mxu0 %v1225_v13 }
 0x117   : > { %2289 = vmatmul.mubr.bf16.gmra.mxu1 %v1227_v14  ;;  %2007 = vmatprep.mubr.bf16.mxu0 %v1233_v15  ;;  %v1004_v15 = vld [vmem:[%s12604_s30 + $0xbe8] sm:$0xff] }
 0x118   : > { %2296 = vmatprep.mubr.bf16.mxu1 %v1235_v16  ;;  %v1011_v16 = vld [vmem:[%s12604_s30 + $0xc20] sm:$0xff] }
 0x119   : > { %v1263_v24 = vpack.c.bf16 %v1011_v16, %v1004_v15 }
 0x11e   : > { %2008 = vmatmul.mubr.bf16.gmra.mxu0 %v1232_v25 }
 0x11f   : > { %2297 = vmatmul.mubr.bf16.gmra.mxu1 %v1234_v26  ;;  %2015 = vmatprep.mubr.bf16.mxu0 %v1240_v27 }
 0x120   : > { %2304 = vmatprep.mubr.bf16.mxu1 %v1242_v28 }
 0x126   : > { %v1825_v42 = vpop.f32.mrf.mxu0  ;;  %2016 = vmatmul.mubr.bf16.gmra.mxu0 %v1239_v37 }
 0x127   : > { %v1826_v43 = vadd.f32 %v12944_v40, %v1825_v42  ;;  %v2114_v44 = vpop.f32.mrf.mxu1  ;;  %2305 = vmatmul.mubr.bf16.gmra.mxu1 %v1241_v38  ;;  %2023 = vmatprep.mubr.bf16.mxu0 %v1247_v39  ;;  %v1018_v39 = vld [vmem:[%s12604_s30 + $0xc58] sm:$0xff] }
 0x128   : > { %v1827_v48 = vpop.f32.mrf.mxu0  ;;  %2312 = vmatprep.mubr.bf16.mxu1 %v1249_v41  ;;  %v1025_v41 = vld [vmem:[%s12604_s30 + $0xc90] sm:$0xff] }
 0x129   : > { %v12953_v52 = vadd.f32 %v2114_v44, %v1826_v43  ;;  %v2116_v53 = vpop.f32.mrf.mxu1  ;;  %v1260_v43 = vpack.c.bf16 %v1008_v31, %v1001_v30  ;;  %v1270_v49 = vpack.c.bf16 %v1025_v41, %v1018_v39  ;;  %v1046_v30 = vld [vmem:[%s12604_s30 + $0xd38] sm:$0xff]  ;;  %v1053_v31 = vld [vmem:[%s12604_s30 + $0xd70] sm:$0xff] }
 0x12a   : > { %v1828_v56 = vpop.f32.mrf.mxu0  ;;  %v12991_v53 = vld [vmem:[%s16028_s3 + $0x38] sm:$0xff]   ;;  %v1284_v41 = vpack.c.bf16 %v1053_v31, %v1046_v30 }
 0x12b   : > { %v1829_v58 = vadd.f32 %v12944_v40, %v1828_v56  ;;  %v2117_v59 = vpop.f32.mrf.mxu1  ;;  %10830 = vmatprep.subr.bf16.mxu1 %v12991_v53 }
 0x12c   : > { %v1830_v62 = vpop.f32.mrf.mxu0 }
 0x12d   : > { %v12958_v0 = vadd.f32 %v2117_v59, %v1829_v58  ;;  %v2119_v2 = vpop.f32.mrf.mxu1  ;;  %v1022_v58 = vld [vmem:[%s12604_s30 + $0xc78] sm:$0xff]  ;;  %v1017_v59 = vld [vmem:[%s12604_s30 + $0xc50] sm:$0xff] }
 0x12e   : > { %v1833_v3 = vpop.f32.mrf.mxu0  ;;  %2024 = vmatmul.mubr.bf16.gmra.mxu0 %v1246_v57  ;;  %v1015_v57 = vld [vmem:[%s12604_s30 + $0xc40] sm:$0xff]  ;;  %v1030_v62 = vld [vmem:[%s12604_s30 + $0xcb8] sm:$0xff] }
 0x12f   : > { %v1834_v4 = vadd.f32 %v12944_v40, %v1833_v3  ;;  %v2122_v5 = vpop.f32.mrf.mxu1  ;;  %2313 = vmatmul.mubr.bf16.gmra.mxu1 %v1248_v60  ;;  %2031 = vmatprep.mubr.bf16.mxu0 %v1254_v61  ;;  %v1024_v61 = vld [vmem:[%s12604_s30 + $0xc88] sm:$0xff]  ;;  %v1267_v7 = vpack.c.bf16 %v1022_v58, %v1015_v57 }
 0x130   : > { %v1835_v9 = vpop.f32.mrf.mxu0  ;;  %2320 = vmatprep.mubr.bf16.mxu1 %v1256_v63  ;;  %v1037_v63 = vld [vmem:[%s12604_s30 + $0xcf0] sm:$0xff]  ;;  %v1269_v10 = vpack.c.bf16 %v1024_v61, %v1017_v59  ;;  %v1060_v59 = vld [vmem:[%s12604_s30 + $0xda8] sm:$0xff] }
 0x131   : > { %v12967_v13 = vadd.f32 %v2122_v5, %v1834_v4  ;;  %v2124_v14 = vpop.f32.mrf.mxu1  ;;  %v1032_v4 = vld [vmem:[%s12604_s30 + $0xcc8] sm:$0xff]  ;;  %v1039_v5 = vld [vmem:[%s12604_s30 + $0xd00] sm:$0xff]  ;;  %v1275_v11 = vpack.c.bf16 %v1037_v63, %v1030_v62 }
 0x132   : > { %v1836_v17 = vpop.f32.mrf.mxu0  ;;  %v1277_v14 = vpack.c.bf16 %v1039_v5, %v1032_v4 }
 0x133   : > { %v1837_v19 = vadd.f32 %v12944_v40, %v1836_v17  ;;  %v2125_v20 = vpop.f32.mrf.mxu1 }
 0x134   : > { %v1838_v23 = vpop.f32.mrf.mxu0 }
 0x135   : > { %v12972_v25 = vadd.f32 %v2125_v20, %v1837_v19  ;;  %v2127_v26 = vpop.f32.mrf.mxu1  ;;  %v1029_v20 = vld [vmem:[%s12604_s30 + $0xcb0] sm:$0xff] }
 0x136   : > { %v1841_v27 = vpop.f32.mrf.mxu0  ;;  %2032 = vmatmul.mubr.bf16.gmra.mxu0 %v1253_v18  ;;  %v1044_v26 = vld [vmem:[%s12604_s30 + $0xd28] sm:$0xff] }
 0x137   : > { %v1842_v28 = vadd.f32 %v12944_v40, %v1841_v27  ;;  %v2130_v29 = vpop.f32.mrf.mxu1  ;;  %2321 = vmatmul.mubr.bf16.gmra.mxu1 %v1255_v21  ;;  %2039 = vmatprep.mubr.bf16.mxu0 %v1261_v22  ;;  %v1036_v21 = vld [vmem:[%s12604_s30 + $0xce8] sm:$0xff]  ;;  %v1031_v22 = vld [vmem:[%s12604_s30 + $0xcc0] sm:$0xff] }
 0x138   : > { %v1843_v33 = vpop.f32.mrf.mxu0  ;;  %2328 = vmatprep.mubr.bf16.mxu1 %v1263_v24  ;;  %v1038_v24 = vld [vmem:[%s12604_s30 + $0xcf8] sm:$0xff]  ;;  %v1051_v27 = vld [vmem:[%s12604_s30 + $0xd60] sm:$0xff] }
 0x139   : > { %v12981_v37 = vadd.f32 %v2130_v29, %v1842_v28  ;;  %v2132_v38 = vpop.f32.mrf.mxu1  ;;  %v1274_v33 = vpack.c.bf16 %v1036_v21, %v1029_v20  ;;  %v1276_v36 = vpack.c.bf16 %v1038_v24, %v1031_v22  ;;  %v628_v20 = vld [vmem:[%s12604_s30 + $0x28] sm:$0xff]  ;;  %v635_v21 = vld [vmem:[%s12604_s30 + $0x60] sm:$0xff]  ;;  %v629_v24 = vld [vmem:[%s12604_s30 + $0x30] sm:$0xff] }
 0x13a   : > { %v1844_v42 = vpop.f32.mrf.mxu0  ;;  %v1282_v38 = vpack.c.bf16 %v1051_v27, %v1044_v26  ;;  %v636_v26 = vld [vmem:[%s12604_s30 + $0x68] sm:$0xff] }
 0x13b   : > { %v1845_v44 = vadd.f32 %v12944_v40, %v1844_v42  ;;  %v2133_v45 = vpop.f32.mrf.mxu1 }
 0x13c   : > { %v1846_v48 = vpop.f32.mrf.mxu0 }
 0x13d   : > { %v12986_v50 = vadd.f32 %v2133_v45, %v1845_v44  ;;  %v2135_v51 = vpop.f32.mrf.mxu1  ;;  %v1050_v48 = vld [vmem:[%s12604_s30 + $0xd58] sm:$0xff] }
 0x13e   : > { %v1849_v54 = vpop.f32.mrf.mxu0  ;;  %2040 = vmatmul.mubr.bf16.gmra.mxu0 %v1260_v43 }
 0x13f   : > { %v1850_v55 = vadd.f32 %v12944_v40, %v1849_v54  ;;  %v2138_v56 = vpop.f32.mrf.mxu1  ;;  %2329 = vmatmul.mubr.bf16.gmra.mxu1 %v1262_v46  ;;  %2047 = vmatprep.mubr.bf16.mxu0 %v1268_v47  ;;  %v1043_v47 = vld [vmem:[%s12604_s30 + $0xd20] sm:$0xff]  ;;  %v1052_v54 = vld [vmem:[%s12604_s30 + $0xd68] sm:$0xff] }
 0x140   : > { %v1851_v60 = vpop.f32.mrf.mxu0  ;;  %2336 = vmatprep.mubr.bf16.mxu1 %v1270_v49  ;;  %v1045_v49 = vld [vmem:[%s12604_s30 + $0xd30] sm:$0xff]  ;;  %v1281_v62 = vpack.c.bf16 %v1050_v48, %v1043_v47  ;;  %v650_v48 = vld [vmem:[%s12604_s30 + $0xd8] sm:$0xff] }
 0x141   : > { %v13001_v2 = vadd.f32 %v2138_v56, %v1850_v55  ;;  %v2140_v3 = vpop.f32.mrf.mxu1  ;;  %v1058_v55 = vld [vmem:[%s12604_s30 + $0xd98] sm:$0xff]  ;;  %v1065_v56 = vld [vmem:[%s12604_s30 + $0xdd0] sm:$0xff]  ;;  %v1067_v60 = vld [vmem:[%s12604_s30 + $0xde0] sm:$0xff]  ;;  %v1283_v4 = vpack.c.bf16 %v1052_v54, %v1045_v49 }
 0x142   : > { %v1852_v6 = vpop.f32.mrf.mxu0  ;;  %v1289_v5 = vpack.c.bf16 %v1065_v56, %v1058_v55  ;;  %v642_v49 = vld [vmem:[%s12604_s30 + $0x98] sm:$0xff]  ;;  %v657_v56 = vld [vmem:[%s12604_s30 + $0x110] sm:$0xff] }
 0x143   : > { %v1853_v8 = vadd.f32 %v12944_v40, %v1852_v6  ;;  %v2141_v9 = vpop.f32.mrf.mxu1 }
 0x144   : > { %v1854_v12 = vpop.f32.mrf.mxu0 }
 0x145   : > { %v13006_v15 = vadd.f32 %v2141_v9, %v1853_v8  ;;  %v2143_v16 = vpop.f32.mrf.mxu1 }
 0x146   : > { %v1857_v17 = vpop.f32.mrf.mxu0  ;;  %2048 = vmatmul.mubr.bf16.gmra.mxu0 %v1267_v7  ;;  %v1291_v7 = vpack.c.bf16 %v1067_v60, %v1060_v59  ;;  %v1064_v16 = vld [vmem:[%s12604_s30 + $0xdc8] sm:$0xff] }
 0x147   : > { %v1858_v18 = vadd.f32 %v12944_v40, %v1857_v17  ;;  %v2146_v19 = vpop.f32.mrf.mxu1  ;;  %2337 = vmatmul.mubr.bf16.gmra.mxu1 %v1269_v10  ;;  %2055 = vmatprep.mubr.bf16.mxu0 %v1275_v11  ;;  %v1059_v17 = vld [vmem:[%s12604_s30 + $0xda0] sm:$0xff] }
 0x148   : > { %v1859_v23 = vpop.f32.mrf.mxu0  ;;  %2344 = vmatprep.mubr.bf16.mxu1 %v1277_v14  ;;  %v1057_v14 = vld [vmem:[%s12604_s30 + $0xd90] sm:$0xff] }
 0x149   : > { %v13015_v28 = vadd.f32 %v2146_v19, %v1858_v18  ;;  %v2148_v29 = vpop.f32.mrf.mxu1  ;;  %v1066_v19 = vld [vmem:[%s12604_s30 + $0xdd8] sm:$0xff] }
 0x14a   : > { %v1860_v32 = vpop.f32.mrf.mxu0  ;;  %v1288_v29 = vpack.c.bf16 %v1064_v16, %v1057_v14  ;;  %v641_v14 = vld [vmem:[%s12604_s30 + $0x90] sm:$0xff]  ;;  %v648_v16 = vld [vmem:[%s12604_s30 + $0xc8] sm:$0xff] }
 0x14b   : > { %v1861_v34 = vadd.f32 %v12944_v40, %v1860_v32  ;;  %v2149_v35 = vpop.f32.mrf.mxu1  ;;  %v1290_v32 = vpack.c.bf16 %v1066_v19, %v1059_v17  ;;  %v656_v17 = vld [vmem:[%s12604_s30 + $0x108] sm:$0xff]  ;;  %v663_v19 = vld [vmem:[%s12604_s30 + $0x140] sm:$0xff] }
 0x14c   : > { %v1862_v39 = vpop.f32.mrf.mxu0 }
 0x14d   : > { %v13020_v42 = vadd.f32 %v2149_v35, %v1861_v34  ;;  %v2151_v43 = vpop.f32.mrf.mxu1  ;;  %v1077_v35 = vpack.c.bf16 %v636_v26, %v629_v24  ;;  %v685_v26 = vld [vmem:[%s12604_s30 + $0x1f0] sm:$0xff] }
 0x14e   : > { %v1865_v44 = vpop.f32.mrf.mxu0  ;;  %2056 = vmatmul.mubr.bf16.gmra.mxu0 %v1274_v33  ;;  %v1076_v33 = vpack.c.bf16 %v635_v21, %v628_v20  ;;  %v671_v20 = vld [vmem:[%s12604_s30 + $0x180] sm:$0xff]  ;;  %v678_v21 = vld [vmem:[%s12604_s30 + $0x1b8] sm:$0xff] }
 0x14f   : > { %v1866_v45 = vadd.f32 %v12944_v40, %v1865_v44  ;;  %v2154_v46 = vpop.f32.mrf.mxu1  ;;  %2345 = vmatmul.mubr.bf16.gmra.mxu1 %v1276_v36  ;;  %2063 = vmatprep.mubr.bf16.mxu0 %v1282_v38  ;;  %v627_v44 = vld [vmem:[%s12604_s30 + $0x20] sm:$0xff] }
 0x150   : > { %v1867_v51 = vpop.f32.mrf.mxu0  ;;  %2352 = vmatprep.mubr.bf16.mxu1 %v1284_v41 }
 0x151   : > { %v13029_v57 = vadd.f32 %v2154_v46, %v1866_v45  ;;  %v2156_v58 = vpop.f32.mrf.mxu1  ;;  %v634_v45 = vld [vmem:[%s12604_s30 + $0x58] sm:$0xff]  ;;  %v643_v46 = vld [vmem:[%s12604_s30 + $0xa0] sm:$0xff]  ;;  %v649_v51 = vld [vmem:[%s12604_s30 + $0xd0] sm:$0xff] }
 0x152   : > { %v1868_v61 = vpop.f32.mrf.mxu0  ;;  %v664_v58 = vld [vmem:[%s12604_s30 + $0x148] sm:$0xff]  ;;  %v1075_v60 = vpack.c.bf16 %v634_v45, %v627_v44 }
 0x153   : > { %v1869_v63 = vadd.f32 %v12944_v40, %v1868_v61  ;;  %v2157_v3 = vpop.f32.mrf.mxu1 }
 0x154   : > { %v1870_v6 = vpop.f32.mrf.mxu0 }
 0x155   : > { %v13034_v8 = vadd.f32 %v2157_v3, %v1869_v63  ;;  %v2159_v9 = vpop.f32.mrf.mxu1  ;;  %v1084_v63 = vpack.c.bf16 %v650_v48, %v643_v46  ;;  %v1083_v3 = vpack.c.bf16 %v649_v51, %v642_v49  ;;  %v662_v48 = vld [vmem:[%s12604_s30 + $0x138] sm:$0xff] }
 0x156   : > { %v1873_v10 = vpop.f32.mrf.mxu0  ;;  %2064 = vmatmul.mubr.bf16.gmra.mxu0 %v1281_v62  ;;  %v11613_v9 = vld [vmem:[%s16028_s3 + $0x30] sm:$0xff]   ;;  %v670_v49 = vld [vmem:[%s12604_s30 + $0x178] sm:$0xff] }
 0x157   : > { %v1874_v11 = vadd.f32 %v12944_v40, %v1873_v10  ;;  %v2162_v12 = vpop.f32.mrf.mxu1  ;;  %2353 = vmatmul.mubr.bf16.gmra.mxu1 %v1283_v4  ;;  %2071 = vmatprep.mubr.bf16.mxu0 %v1289_v5  ;;  %v1091_v5 = vpack.c.bf16 %v664_v58, %v657_v56  ;;  %v699_v56 = vld [vmem:[%s12604_s30 + $0x260] sm:$0xff]  ;;  %v706_v58 = vld [vmem:[%s12604_s30 + $0x298] sm:$0xff] }
 0x158   : > { %v1875_v18 = vpop.f32.mrf.mxu0  ;;  %2360 = vmatprep.mubr.bf16.mxu1 %v1291_v7 }
 0x159   : > { %v13043_v22 = vadd.f32 %v2162_v12, %v1874_v11  ;;  %v2164_v23 = vpop.f32.mrf.mxu1 }
 0x15a   : > { %v1876_v27 = vpop.f32.mrf.mxu0 }
 0x15b   : > { %v1877_v30 = vadd.f32 %v12944_v40, %v1876_v27  ;;  %v2165_v31 = vpop.f32.mrf.mxu1  ;;  %v692_v27 = vld [vmem:[%s12604_s30 + $0x228] sm:$0xff] }
 0x15c   : > { %v1878_v34 = vpop.f32.mrf.mxu0 }
 0x15d   : > { %v13048_v36 = vadd.f32 %v2165_v31, %v1877_v30  ;;  %v2167_v38 = vpop.f32.mrf.mxu1  ;;  %v1082_v31 = vpack.c.bf16 %v648_v16, %v641_v14  ;;  %v1090_v34 = vpack.c.bf16 %v663_v19, %v656_v17  ;;  %v669_v19 = vld [vmem:[%s12604_s30 + $0x170] sm:$0xff] }
 0x15e   : > { %v1881_v39 = vpop.f32.mrf.mxu0  ;;  %2072 = vmatmul.mubr.bf16.gmra.mxu0 %v1288_v29  ;;  %v11614_v29 = vld [vmem:[%s16028_s3 + $0x28] sm:$0xff]   ;;  %v1105_v38 = vpack.c.bf16 %v692_v27, %v685_v26  ;;  %v691_v26 = vld [vmem:[%s12604_s30 + $0x220] sm:$0xff] }
 0x15f   : > { %v1882_v41 = vadd.f32 %v12944_v40, %v1881_v39  ;;  %v2170_v43 = vpop.f32.mrf.mxu1  ;;  %2361 = vmatmul.mubr.bf16.gmra.mxu1 %v1290_v32  ;;  %2401 = vmatprep.mubr.bf16.mxu0 %v1076_v33  ;;  %v727_v27 = vld [vmem:[%s12604_s30 + $0x340] sm:$0xff] }
 0x160   : > { %v1883_v47 = vpop.f32.mrf.mxu0  ;;  %10766 = vmatprep.mubr.msk.bf16.mxu1 %vm1694_vm0, %v1077_v35  ;;  %v1098_v35 = vpack.c.bf16 %v678_v21, %v671_v20  ;;  %v676_v20 = vld [vmem:[%s12604_s30 + $0x1a8] sm:$0xff] }
 0x161   : > { %v13058_v54 = vadd.f32 %v2170_v43, %v1882_v41  ;;  %v2172_v55 = vpop.f32.mrf.mxu1  ;;  %v11615_v43 = vld [vmem:[%s16028_s3 + $0x20] sm:$0xff]   ;;  %v684_v21 = vld [vmem:[%s12604_s30 + $0x1e8] sm:$0xff] }
 0x162   : > { %v1884_v59 = vpop.f32.mrf.mxu0  ;;  %v655_v47 = vld [vmem:[%s12604_s30 + $0x100] sm:$0xff]  ;;  %v677_v55 = vld [vmem:[%s12604_s30 + $0x1b0] sm:$0xff] }
 0x163   : > { %v1885_v61 = vadd.f32 %v12944_v40, %v1884_v59  ;;  %v2173_v62 = vpop.f32.mrf.mxu1 }
 0x164   : > { %v1886_v4 = vpop.f32.mrf.mxu0 }
 0x165   : > { %v13063_v6 = vadd.f32 %v2173_v62, %v1885_v61  ;;  %v2175_v7 = vpop.f32.mrf.mxu1  ;;  %v713_v61 = vld [vmem:[%s12604_s30 + $0x2d0] sm:$0xff]  ;;  %v720_v62 = vld [vmem:[%s12604_s30 + $0x308] sm:$0xff] }
 0x166   : > { %v1889_v10 = vpop.f32.mrf.mxu0  ;;  %2402 = vmatmul.mubr.bf16.vlgmr.msra.gmra.mxu0 %v1075_v60  ;;  %v1097_v7 = vpack.c.bf16 %v677_v55, %v670_v49 }
 0x167   : > { %v1890_v11 = vadd.f32 %v12944_v40, %v1889_v10  ;;  %v2178_v12 = vpop.f32.mrf.mxu1  ;;  %10767 = vmatmul.mubr.msk.bf16.vlgmr.msra.gmra.mxu1 %vm1694_vm0, %v1084_v63  ;;  %2409 = vmatprep.mubr.bf16.mxu0 %v1083_v3  ;;  %v1089_v3 = vpack.c.bf16 %v662_v48, %v655_v47  ;;  %v11616_v48 = vld [vmem:[%s16028_s3 + $0x18] sm:$0xff]  }
 0x168   : > { %v1891_v18 = vpop.f32.mrf.mxu0  ;;  %10770 = vmatprep.mubr.msk.bf16.mxu1 %vm1694_vm0, %v1091_v5  ;;  %10831 = vmatpush3.bf16.msra.mxu1 %v12991_v53 }
 0x169   : > { %v13078_v23 = vadd.f32 %v2178_v12, %v1890_v11  ;;  %v2180_v24 = vpop.f32.mrf.mxu1  ;;  %10832 = vmatprep.subr.bf16.mxu1 %v11613_v9  ;;  %v1119_v11 = vpack.c.bf16 %v720_v62, %v713_v61  ;;  %v705_v62 = vld [vmem:[%s12604_s30 + $0x290] sm:$0xff] }
 0x16a   : > { %v1892_v30 = vpop.f32.mrf.mxu0 }
 0x16b   : > { %v1893_v32 = vadd.f32 %v12944_v40, %v1892_v30  ;;  %v2181_v33 = vpop.f32.mrf.mxu1 }
 0x16c   : > { %v1894_v53 = vpop.f32.mrf.mxu0  ;;  %10833 = vmatpush3.bf16.msra.mxu1 %v11613_v9  ;;  %v1112_v9 = vpack.c.bf16 %v706_v58, %v699_v56  ;;  %v683_v56 = vld [vmem:[%s12604_s30 + $0x1e0] sm:$0xff]  ;;  %v690_v58 = vld [vmem:[%s12604_s30 + $0x218] sm:$0xff] }
 0x16d   : > { %v13086_v39 = vadd.f32 %v2181_v33, %v1893_v32  ;;  %v2183_v41 = vpop.f32.mrf.mxu1  ;;  %10834 = vmatprep.subr.bf16.mxu1 %v11614_v29  ;;  %v741_v32 = vld [vmem:[%s12604_s30 + $0x3b0] sm:$0xff]  ;;  %v748_v33 = vld [vmem:[%s12604_s30 + $0x3e8] sm:$0xff] }
 0x16e   : > { %v1897_v44 = vpop.f32.mrf.mxu0  ;;  %2410 = vmatmul.mubr.bf16.gmra.mxu0 %v1082_v31  ;;  %v1104_v41 = vpack.c.bf16 %v691_v26, %v684_v21 }
 0x16f   : > { %v1898_v45 = vadd.f32 %v12944_v40, %v1897_v44  ;;  %v2186_v46 = vpop.f32.mrf.mxu1  ;;  %2417 = vmatprep.mubr.bf16.mxu0 %v1090_v34  ;;  %10771 = vmatmul.mubr.msk.bf16.gmra.mxu1 %vm1694_vm0, %v1098_v35  ;;  %v1096_v35 = vpack.c.bf16 %v676_v20, %v669_v19 }
 0x170   : > { %v1899_v51 = vpop.f32.mrf.mxu0  ;;  %10774 = vmatprep.mubr.msk.bf16.mxu1 %vm1694_vm0, %v1105_v38  ;;  %10835 = vmatpush3.bf16.msra.mxu1 %v11614_v29  ;;  %v734_v29 = vld [vmem:[%s12604_s30 + $0x378] sm:$0xff] }
 0x171   : > { %v13100_v59 = vadd.f32 %v2186_v46, %v1898_v45  ;;  %v2188_v60 = vpop.f32.mrf.mxu1  ;;  %10836 = vmatprep.subr.bf16.mxu1 %v11615_v43  ;;  %v1133_v45 = vpack.c.bf16 %v748_v33, %v741_v32  ;;  %v704_v32 = vld [vmem:[%s12604_s30 + $0x288] sm:$0xff] }
 0x172   : > { %v1900_v63 = vpop.f32.mrf.mxu0  ;;  %v698_v60 = vld [vmem:[%s12604_s30 + $0x258] sm:$0xff]  ;;  %v712_v33 = vld [vmem:[%s12604_s30 + $0x2c8] sm:$0xff] }
 0x173   : > { %v1901_v4 = vadd.f32 %v12944_v40, %v1900_v63  ;;  %v2189_v5 = vpop.f32.mrf.mxu1  ;;  %v755_v63 = vld [vmem:[%s12604_s30 + $0x420] sm:$0xff] }
 0x174   : > { %v1902_v10 = vpop.f32.mrf.mxu0  ;;  %10837 = vmatpush3.bf16.msra.mxu1 %v11615_v43  ;;  %v1126_v43 = vpack.c.bf16 %v734_v29, %v727_v27 }
 0x175   : > { %v13105_v12 = vadd.f32 %v2189_v5, %v1901_v4  ;;  %v2191_v14 = vpop.f32.mrf.mxu1  ;;  %10838 = vmatprep.subr.bf16.mxu1 %v11616_v48 }
 0x176   : > { %v1905_v16 = vpop.f32.mrf.mxu0  ;;  %2418 = vmatmul.mubr.bf16.gmra.mxu0 %v1089_v3  ;;  %v762_v3 = vld [vmem:[%s12604_s30 + $0x458] sm:$0xff] }
 0x177   : > { %v1906_v17 = vadd.f32 %v12944_v40, %v1905_v16  ;;  %v2194_v18 = vpop.f32.mrf.mxu1  ;;  %2425 = vmatprep.mubr.bf16.mxu0 %v1097_v7  ;;  %10775 = vmatmul.mubr.msk.bf16.gmra.mxu1 %vm1694_vm0, %v1112_v9  ;;  %v769_v7 = vld [vmem:[%s12604_s30 + $0x490] sm:$0xff]  ;;  %v776_v9 = vld [vmem:[%s12604_s30 + $0x4c8] sm:$0xff] }
 0x178   : > { %v1907_v24 = vpop.f32.mrf.mxu0  ;;  %10778 = vmatprep.mubr.msk.bf16.mxu1 %vm1694_vm0, %v1119_v11  ;;  %10839 = vmatpush3.bf16.msra.mxu1 %v11616_v48  ;;  %v1103_v11 = vpack.c.bf16 %v690_v58, %v683_v56  ;;  %v1147_v20 = vpack.c.bf16 %v776_v9, %v769_v7 }
 0x179   : > { %v13116_v30 = vadd.f32 %v2194_v18, %v1906_v17  ;;  %v2196_v31 = vpop.f32.mrf.mxu1  ;;  %v1111_v17 = vpack.c.bf16 %v705_v62, %v698_v60  ;;  %v1140_v18 = vpack.c.bf16 %v762_v3, %v755_v63  ;;  %v11618_v3 = vld [vmem:[%s16028_s3 + $0x10] sm:$0xff]  }
 0x17a   : > { %v1908_v34 = vpop.f32.mrf.mxu0  ;;  %v697_v31 = vld [vmem:[%s12604_s30 + $0x250] sm:$0xff]  ;;  %10840 = vmatprep.subr.bf16.mxu1 %v11618_v3 }
 0x17b   : > { %v1909_v53 = vadd.f32 %v12944_v40, %v1908_v34  ;;  %v2197_v38 = vpop.f32.mrf.mxu1 }
 0x17c   : > { %v1910_v44 = vpop.f32.mrf.mxu0  ;;  %10841 = vmatpush3.bf16.msra.mxu1 %v11618_v3 }
 0x17d   : > { %v13121_v46 = vadd.f32 %v2197_v38, %v1909_v53  ;;  %v2199_v47 = vpop.f32.mrf.mxu1  ;;  %v783_v53 = vld [vmem:[%s12604_s30 + $0x500] sm:$0xff]  ;;  %v790_v38 = vld [vmem:[%s12604_s30 + $0x538] sm:$0xff]  ;;  %v797_v44 = vld [vmem:[%s12604_s30 + $0x570] sm:$0xff] }
 0x17e   : > { %v1913_v49 = vpop.f32.mrf.mxu0  ;;  %2426 = vmatmul.mubr.bf16.gmra.mxu0 %v1096_v35  ;;  %v719_v35 = vld [vmem:[%s12604_s30 + $0x300] sm:$0xff]  ;;  %v11617_v47 = vld [vmem:[%s16029_s5 + $0x38] sm:$0xff]   ;;  %v1154_v58 = vpack.c.bf16 %v790_v38, %v783_v53 }
 0x17f   : > { %v1914_v51 = vadd.f32 %v12944_v40, %v1913_v49  ;;  %v2202_v55 = vpop.f32.mrf.mxu1  ;;  %2433 = vmatprep.mubr.bf16.mxu0 %v1104_v41  ;;  %10779 = vmatmul.mubr.msk.bf16.gmra.mxu1 %vm1694_vm0, %v1126_v43  ;;  %v1110_v49 = vpack.c.bf16 %v704_v32, %v697_v31  ;;  %v1118_v56 = vpack.c.bf16 %v719_v35, %v712_v33 }
 0x180   : > { %v1915_v61 = vpop.f32.mrf.mxu0  ;;  %10782 = vmatprep.mubr.msk.bf16.mxu1 %vm1694_vm0, %v1133_v45  ;;  %v804_v45 = vld [vmem:[%s12604_s30 + $0x5a8] sm:$0xff]  ;;  %10910 = vmatprep.subr.bf16.mxu0 %v11617_v47 }
 0x181   : > { %v13135_v4 = vadd.f32 %v2202_v55, %v1914_v51  ;;  %v2204_v5 = vpop.f32.mrf.mxu1  ;;  %v1161_v61 = vpack.c.bf16 %v804_v45, %v797_v44  ;;  %10911 = vmatpush3.bf16.msra.mxu0 %v11617_v47 }
 0x182   : > { %v1916_v10 = vpop.f32.mrf.mxu0 }
 0x183   : > { %v1917_v14 = vadd.f32 %v12944_v40, %v1916_v10  ;;  %v2205_v16 = vpop.f32.mrf.mxu1  ;;  %v711_v10 = vld [vmem:[%s12604_s30 + $0x2c0] sm:$0xff] }
 0x184   : > { %v1918_v19 = vpop.f32.mrf.mxu0 }
 0x185   : > { %v13140_v21 = vadd.f32 %v2205_v16, %v1917_v14  ;;  %v2207_v24 = vpop.f32.mrf.mxu1  ;;  %v726_v14 = vld [vmem:[%s12604_s30 + $0x338] sm:$0xff] }
 0x186   : > { %v1921_v26 = vpop.f32.mrf.mxu0  ;;  %2434 = vmatmul.mubr.bf16.gmra.mxu0 %v1103_v11  ;;  %v718_v11 = vld [vmem:[%s12604_s30 + $0x2f8] sm:$0xff] }
 0x187   : > { %v1922_v27 = vadd.f32 %v12944_v40, %v1921_v26  ;;  %v2210_v29 = vpop.f32.mrf.mxu1  ;;  %2441 = vmatprep.mubr.bf16.mxu0 %v1111_v17  ;;  %10783 = vmatmul.mubr.msk.bf16.gmra.mxu1 %vm1694_vm0, %v1140_v18  ;;  %v733_v17 = vld [vmem:[%s12604_s30 + $0x370] sm:$0xff]  ;;  %v811_v18 = vld [vmem:[%s12604_s30 + $0x5e0] sm:$0xff]  ;;  %v818_v19 = vld [vmem:[%s12604_s30 + $0x618] sm:$0xff]  ;;  %v1117_v31 = vpack.c.bf16 %v718_v11, %v711_v10 }
 0x188   : > { %v1923_v34 = vpop.f32.mrf.mxu0  ;;  %10786 = vmatprep.mubr.msk.bf16.mxu1 %vm1694_vm0, %v1147_v20  ;;  %v825_v26 = vld [vmem:[%s12604_s30 + $0x650] sm:$0xff]  ;;  %v1168_v35 = vpack.c.bf16 %v818_v19, %v811_v18 }
 0x189   : > { %v13151_v41 = vadd.f32 %v2210_v29, %v1922_v27  ;;  %v2212_v43 = vpop.f32.mrf.mxu1  ;;  %v832_v27 = vld [vmem:[%s12604_s30 + $0x688] sm:$0xff]  ;;  %v1125_v34 = vpack.c.bf16 %v733_v17, %v726_v14 }
 0x18a   : > { %v1924_v48 = vpop.f32.mrf.mxu0  ;;  %v1175_v38 = vpack.c.bf16 %v832_v27, %v825_v26  ;;  %v11619_v27 = vld [vmem:[%s16028_s3 + $0x8] sm:$0xff]  }
 0x18b   : > { %v1925_v51 = vadd.f32 %v12944_v40, %v1924_v48  ;;  %v2213_v55 = vpop.f32.mrf.mxu1  ;;  %10842 = vmatprep.subr.bf16.mxu1 %v11619_v27 }
 0x18c   : > { %v1926_v60 = vpop.f32.mrf.mxu0  ;;  %10843 = vmatpush3.bf16.msra.mxu1 %v11619_v27  ;;  %v775_v27 = vld [vmem:[%s12604_s30 + $0x4c0] sm:$0xff] }
 0x18d   : > { %v13159_v62 = vadd.f32 %v2213_v55, %v1925_v51  ;;  %v2215_v63 = vpop.f32.mrf.mxu1  ;;  %v732_v51 = vld [vmem:[%s12604_s30 + $0x368] sm:$0xff]  ;;  %v839_v60 = vld [vmem:[%s12604_s30 + $0x6c0] sm:$0xff] }
 0x18e   : > { %v1929_v5 = vpop.f32.mrf.mxu0  ;;  %2442 = vmatmul.mubr.bf16.gmra.mxu0 %v1110_v49  ;;  %v725_v49 = vld [vmem:[%s12604_s30 + $0x330] sm:$0xff]  ;;  %v740_v55 = vld [vmem:[%s12604_s30 + $0x3a8] sm:$0xff] }
 0x18f   : > { %v1930_v7 = vadd.f32 %v12944_v40, %v1929_v5  ;;  %v2218_v9 = vpop.f32.mrf.mxu1  ;;  %2449 = vmatprep.mubr.bf16.mxu0 %v1118_v56  ;;  %10787 = vmatmul.mubr.msk.bf16.gmra.mxu1 %vm1694_vm0, %v1154_v58  ;;  %v747_v58 = vld [vmem:[%s12604_s30 + $0x3e0] sm:$0xff]  ;;  %v853_v5 = vld [vmem:[%s12604_s30 + $0x730] sm:$0xff]  ;;  %v1124_v10 = vpack.c.bf16 %v732_v51, %v725_v49  ;;  %v888_v51 = vld [vmem:[%s12604_s30 + $0x848] sm:$0xff] }
 0x190   : > { %v1931_v16 = vpop.f32.mrf.mxu0  ;;  %10790 = vmatprep.mubr.msk.bf16.mxu1 %vm1694_vm0, %v1161_v61  ;;  %v846_v61 = vld [vmem:[%s12604_s30 + $0x6f8] sm:$0xff]  ;;  %v881_v49 = vld [vmem:[%s12604_s30 + $0x810] sm:$0xff] }
 0x191   : > { %v13173_v20 = vadd.f32 %v2218_v9, %v1930_v7  ;;  %v2220_v24 = vpop.f32.mrf.mxu1  ;;  %v860_v7 = vld [vmem:[%s12604_s30 + $0x768] sm:$0xff]  ;;  %v1132_v16 = vpack.c.bf16 %v747_v58, %v740_v55  ;;  %v1182_v17 = vpack.c.bf16 %v846_v61, %v839_v60 }
 0x192   : > { %v1932_v29 = vpop.f32.mrf.mxu0  ;;  %v1189_v19 = vpack.c.bf16 %v860_v7, %v853_v5  ;;  %v1203_v7 = vpack.c.bf16 %v888_v51, %v881_v49 }
 0x193   : > { %v1933_v32 = vadd.f32 %v12944_v40, %v1932_v29  ;;  %v2221_v33 = vpop.f32.mrf.mxu1 }
 0x194   : > { %v1934_v53 = vpop.f32.mrf.mxu0 }
 0x195   : > { %v13178_v43 = vadd.f32 %v2221_v33, %v1933_v32  ;;  %v2223_v44 = vpop.f32.mrf.mxu1  ;;  %v739_v33 = vld [vmem:[%s12604_s30 + $0x3a0] sm:$0xff] }
 0x196   : > { %v1937_v45 = vpop.f32.mrf.mxu0  ;;  %2450 = vmatmul.mubr.bf16.gmra.mxu0 %v1117_v31  ;;  %v867_v44 = vld [vmem:[%s12604_s30 + $0x7a0] sm:$0xff] }
 0x197   : > { %v1938_v47 = vadd.f32 %v12944_v40, %v1937_v45  ;;  %v2226_v48 = vpop.f32.mrf.mxu1  ;;  %2457 = vmatprep.mubr.bf16.mxu0 %v1125_v34  ;;  %10791 = vmatmul.mubr.msk.bf16.gmra.mxu1 %vm1694_vm0, %v1168_v35  ;;  %v746_v34 = vld [vmem:[%s12604_s30 + $0x3d8] sm:$0xff] }
 0x198   : > { %v1939_v56 = vpop.f32.mrf.mxu0  ;;  %10794 = vmatprep.mubr.msk.bf16.mxu1 %vm1694_vm0, %v1175_v38  ;;  %v754_v35 = vld [vmem:[%s12604_s30 + $0x418] sm:$0xff]  ;;  %v761_v38 = vld [vmem:[%s12604_s30 + $0x450] sm:$0xff] }
 0x199   : > { %v13189_v63 = vadd.f32 %v2226_v48, %v1938_v47  ;;  %v2228_v3 = vpop.f32.mrf.mxu1  ;;  %v874_v45 = vld [vmem:[%s12604_s30 + $0x7d8] sm:$0xff]  ;;  %v1131_v56 = vpack.c.bf16 %v746_v34, %v739_v33  ;;  %v1139_v61 = vpack.c.bf16 %v761_v38, %v754_v35  ;;  %v909_v34 = vld [vmem:[%s12604_s30 + $0x8f0] sm:$0xff]  ;;  %v916_v35 = vld [vmem:[%s12604_s30 + $0x928] sm:$0xff] }
 0x19a   : > { %v1940_v9 = vpop.f32.mrf.mxu0  ;;  %v1196_v3 = vpack.c.bf16 %v874_v45, %v867_v44 }
 0x19b   : > { %v1941_v11 = vadd.f32 %v12944_v40, %v1940_v9  ;;  %v2229_v14 = vpop.f32.mrf.mxu1 }
 0x19c   : > { %v1942_v18 = vpop.f32.mrf.mxu0 }
 0x19d   : > { %v13194_v24 = vadd.f32 %v2229_v14, %v1941_v11  ;;  %v2231_v26 = vpop.f32.mrf.mxu1  ;;  %v760_v18 = vld [vmem:[%s12604_s30 + $0x448] sm:$0xff] }
 0x19e   : > { %v1945_v29 = vpop.f32.mrf.mxu0  ;;  %2458 = vmatmul.mubr.bf16.gmra.mxu0 %v1124_v10 }
 0x19f   : > { %v1946_v31 = vadd.f32 %v12944_v40, %v1945_v29  ;;  %v2234_v32 = vpop.f32.mrf.mxu1  ;;  %2465 = vmatprep.mubr.bf16.mxu0 %v1132_v16  ;;  %10795 = vmatmul.mubr.msk.bf16.gmra.mxu1 %vm1694_vm0, %v1182_v17  ;;  %v753_v17 = vld [vmem:[%s12604_s30 + $0x410] sm:$0xff]  ;;  %v895_v29 = vld [vmem:[%s12604_s30 + $0x880] sm:$0xff] }
 0x1a0   : > { %v1947_v53 = vpop.f32.mrf.mxu0  ;;  %10798 = vmatprep.mubr.msk.bf16.mxu1 %vm1694_vm0, %v1189_v19  ;;  %v768_v19 = vld [vmem:[%s12604_s30 + $0x488] sm:$0xff]  ;;  %v1138_v38 = vpack.c.bf16 %v760_v18, %v753_v17  ;;  %v789_v17 = vld [vmem:[%s12604_s30 + $0x530] sm:$0xff]  ;;  %v923_v18 = vld [vmem:[%s12604_s30 + $0x960] sm:$0xff] }
 0x1a1   : > { %v13208_v47 = vadd.f32 %v2234_v32, %v1946_v31  ;;  %v2236_v48 = vpop.f32.mrf.mxu1  ;;  %v902_v31 = vld [vmem:[%s12604_s30 + $0x8b8] sm:$0xff] }
 0x1a2   : > { %v1948_v55 = vpop.f32.mrf.mxu0  ;;  %v1146_v48 = vpack.c.bf16 %v775_v27, %v768_v19  ;;  %v1210_v49 = vpack.c.bf16 %v902_v31, %v895_v29  ;;  %v930_v19 = vld [vmem:[%s12604_s30 + $0x998] sm:$0xff]  ;;  %v937_v29 = vld [vmem:[%s12604_s30 + $0x9d0] sm:$0xff] }
 0x1a3   : > { %v1949_v58 = vadd.f32 %v12944_v40, %v1948_v55  ;;  %v2237_v60 = vpop.f32.mrf.mxu1  ;;  %v1217_v55 = vpack.c.bf16 %v916_v35, %v909_v34  ;;  %v13253_v34 = vld [vmem:[%s16027_s23] ss:$0 sm:$0xff] }
 0x1a4   : > { %v1950_v5 = vpop.f32.mrf.mxu0 }
 0x1a5   : > { %v13213_v9 = vadd.f32 %v2237_v60, %v1949_v58  ;;  %v2239_v10 = vpop.f32.mrf.mxu1 }
 0x1a6   : > { %v1953_v11 = vpop.f32.mrf.mxu0  ;;  %2466 = vmatmul.mubr.bf16.gmra.mxu0 %v1131_v56  ;;  %v11620_v56 = vld [vmem:[%s16029_s5 + $0x30] sm:$0xff]   ;;  %v767_v10 = vld [vmem:[%s12604_s30 + $0x480] sm:$0xff] }
 0x1a7   : > { %v1954_v14 = vadd.f32 %v12944_v40, %v1953_v11  ;;  %v2242_v16 = vpop.f32.mrf.mxu1  ;;  %2473 = vmatprep.mubr.bf16.mxu0 %v1139_v61  ;;  %10799 = vmatmul.mubr.msk.bf16.gmra.mxu1 %vm1694_vm0, %v1196_v3  ;;  %v11621_v61 = vld [vmem:[%s16028_s3] sm:$0xff]   ;;  %v774_v11 = vld [vmem:[%s12604_s30 + $0x4b8] sm:$0xff]  ;;  %s16008_s3 = scalar_lea.sflag [#allocation3], %s13848_s27 }
 0x1a8   : > { %v1955_v26 = vpop.f32.mrf.mxu0  ;;  %10802 = vmatprep.mubr.msk.bf16.mxu1 %vm1694_vm0, %v1203_v7  ;;  %10912 = vmatprep.subr.bf16.mxu0 %v11620_v56 }
 0x1a9   : > { %v13224_v32 = vadd.f32 %v2242_v16, %v1954_v14  ;;  %v2244_v33 = vpop.f32.mrf.mxu1  ;;  %v782_v14 = vld [vmem:[%s12604_s30 + $0x4f8] sm:$0xff]  ;;  %10913 = vmatpush3.bf16.msra.mxu0 %v11620_v56  ;;  %10844 = vmatprep.subr.bf16.mxu1 %v11621_v61 }
 0x1aa   : > { %v1956_v53 = vpop.f32.mrf.mxu0  ;;  %v1145_v33 = vpack.c.bf16 %v774_v11, %v767_v10  ;;  %10845 = vmatpush3.bf16.msra.mxu1 %v11621_v61  ;;  %v781_v61 = vld [vmem:[%s12604_s30 + $0x4f0] sm:$0xff]  ;;  %v803_v10 = vld [vmem:[%s12604_s30 + $0x5a0] sm:$0xff] }
 0x1ab   : > { %v1957_v44 = vadd.f32 %v12944_v40, %v1956_v53  ;;  %v2245_v45 = vpop.f32.mrf.mxu1  ;;  %v951_v11 = vld [vmem:[%s12604_s30 + $0xa40] sm:$0xff] }
 0x1ac   : > { %v1958_v51 = vpop.f32.mrf.mxu0 }
 0x1ad   : > { %v13232_v58 = vadd.f32 %v2245_v45, %v1957_v44  ;;  %v2247_v60 = vpop.f32.mrf.mxu1  ;;  %v1224_v44 = vpack.c.bf16 %v930_v19, %v923_v18  ;;  %v965_v18 = vld [vmem:[%s12604_s30 + $0xab0] sm:$0xff]  ;;  %v972_v19 = vld [vmem:[%s12604_s30 + $0xae8] sm:$0xff] }
 0x1ae   : > { %v1961_v3 = vpop.f32.mrf.mxu0  ;;  %2474 = vmatmul.mubr.bf16.gmra.mxu0 %v1138_v38  ;;  %v1153_v38 = vpack.c.bf16 %v789_v17, %v782_v14  ;;  %v958_v14 = vld [vmem:[%s12604_s30 + $0xa78] sm:$0xff] }
 0x1af   : > { %v1962_v5 = vadd.f32 %v12944_v40, %v1961_v3  ;;  %v2250_v7 = vpop.f32.mrf.mxu1  ;;  %2481 = vmatprep.mubr.bf16.mxu0 %v1146_v48  ;;  %10803 = vmatmul.mubr.msk.bf16.gmra.mxu1 %vm1694_vm0, %v1210_v49  ;;  %v944_v40 = vld [vmem:[%s12604_s30 + $0xa08] sm:$0xff] }
 0x1b0   : > { %v1963_v16 = vpop.f32.mrf.mxu0  ;;  %10806 = vmatprep.mubr.msk.bf16.mxu1 %vm1694_vm0, %v1217_v55  ;;  %v1231_v48 = vpack.c.bf16 %v944_v40, %v937_v29  ;;  %v788_v3 = vld [vmem:[%s12604_s30 + $0x528] sm:$0xff] }
 0x1b1   : > { %v13246_v26 = vadd.f32 %v2250_v7, %v1962_v5  ;;  %v2252_v27 = vpop.f32.mrf.mxu1  ;;  %v796_v5 = vld [vmem:[%s12604_s30 + $0x568] sm:$0xff]  ;;  %v1152_v29 = vpack.c.bf16 %v788_v3, %v781_v61  ;;  %v810_v61 = vld [vmem:[%s12604_s30 + $0x5d8] sm:$0xff] }
 0x1b2   : > { %v1964_v31 = vpop.f32.mrf.mxu0 }
 0x1b3   : > { %v1965_v35 = vadd.f32 %v13253_v34, %v1964_v31  ;;  %v2253_v53 = vpop.f32.mrf.mxu1 }
 0x1b4   : > { %v1966_v45 = vpop.f32.mrf.mxu0 }
 0x1b5   : > { %v13256_v49 = vadd.f32 %v2253_v53, %v1965_v35  ;;  %v2255_v51 = vpop.f32.mrf.mxu1  ;;  %v1238_v35 = vpack.c.bf16 %v958_v14, %v951_v11 }
 0x1b6   : > { %v1969_v55 = vpop.f32.mrf.mxu0  ;;  %2482 = vmatmul.mubr.bf16.gmra.mxu0 %v1145_v33  ;;  %v1160_v33 = vpack.c.bf16 %v803_v10, %v796_v5  ;;  %v817_v5 = vld [vmem:[%s12604_s30 + $0x610] sm:$0xff]  ;;  %v986_v10 = vld [vmem:[%s12604_s30 + $0xb58] sm:$0xff] }
 0x1b7   : > { %v1970_v56 = vadd.f32 %v13253_v34, %v1969_v55  ;;  %v2258_v60 = vpop.f32.mrf.mxu1  ;;  %2489 = vmatprep.mubr.bf16.mxu0 %v1153_v38  ;;  %10807 = vmatmul.mubr.msk.bf16.gmra.mxu1 %vm1694_vm0, %v1224_v44  ;;  %v1245_v38 = vpack.c.bf16 %v972_v19, %v965_v18  ;;  %v1000_v18 = vld [vmem:[%s12604_s30 + $0xbc8] sm:$0xff] }
 0x1b8   : > { %v1971_v7 = vpop.f32.mrf.mxu0  ;;  %10810 = vmatprep.mubr.msk.bf16.mxu1 %vm1694_vm0, %v1231_v48 }
 0x1b9   : > { %v13267_v16 = vadd.f32 %v2258_v60, %v1970_v56  ;;  %v2260_v17 = vpop.f32.mrf.mxu1  ;;  %v795_v56 = vld [vmem:[%s12604_s30 + $0x560] sm:$0xff]  ;;  %v802_v60 = vld [vmem:[%s12604_s30 + $0x598] sm:$0xff] }
 0x1ba   : > { %v1972_v27 = vpop.f32.mrf.mxu0  ;;  %v979_v7 = vld [vmem:[%s12604_s30 + $0xb20] sm:$0xff]  ;;  %v993_v17 = vld [vmem:[%s12604_s30 + $0xb90] sm:$0xff] }
 0x1bb   : > { %v1973_v40 = vadd.f32 %v13253_v34, %v1972_v27  ;;  %v2261_v31 = vpop.f32.mrf.mxu1  ;;  %v1159_v27 = vpack.c.bf16 %v802_v60, %v795_v56  ;;  %v809_v56 = vld [vmem:[%s12604_s30 + $0x5d0] sm:$0xff]  ;;  %v816_v60 = vld [vmem:[%s12604_s30 + $0x608] sm:$0xff] }
 0x1bc   : > { %v1974_v53 = vpop.f32.mrf.mxu0 }
 0x1bd   : > { %v13272_v44 = vadd.f32 %v2261_v31, %v1973_v40  ;;  %v2263_v45 = vpop.f32.mrf.mxu1  ;;  %v1167_v31 = vpack.c.bf16 %v817_v5, %v810_v61  ;;  %v1259_v53 = vpack.c.bf16 %v1000_v18, %v993_v17  ;;  %v824_v61 = vld [vmem:[%s12604_s30 + $0x648] sm:$0xff]  ;;  %v831_v5 = vld [vmem:[%s12604_s30 + $0x680] sm:$0xff]  ;;  %v1021_v18 = vld [vmem:[%s12604_s30 + $0xc70] sm:$0xff] }
 0x1be   : > { %v1977_v48 = vpop.f32.mrf.mxu0  ;;  %2490 = vmatmul.mubr.bf16.gmra.mxu0 %v1152_v29 }
 0x1bf   : > { %v1978_v51 = vadd.f32 %v13253_v34, %v1977_v48  ;;  %v2266_v55 = vpop.f32.mrf.mxu1  ;;  %2497 = vmatprep.mubr.bf16.mxu0 %v1160_v33  ;;  %10811 = vmatmul.mubr.msk.bf16.gmra.mxu1 %vm1694_vm0, %v1238_v35  ;;  %v1252_v33 = vpack.c.bf16 %v986_v10, %v979_v7  ;;  %v1007_v7 = vld [vmem:[%s12604_s30 + $0xc00] sm:$0xff]  ;;  %v1014_v10 = vld [vmem:[%s12604_s30 + $0xc38] sm:$0xff] }
 0x1c0   : > { %v1979_v3 = vpop.f32.mrf.mxu0  ;;  %10814 = vmatprep.mubr.msk.bf16.mxu1 %vm1694_vm0, %v1245_v38 }
 0x1c1   : > { %v13283_v11 = vadd.f32 %v2266_v55, %v1978_v51  ;;  %v2268_v14 = vpop.f32.mrf.mxu1 }
 0x1c2   : > { %v1980_v19 = vpop.f32.mrf.mxu0 }
 0x1c3   : > { %v1981_v29 = vadd.f32 %v13253_v34, %v1980_v19  ;;  %v2269_v40 = vpop.f32.mrf.mxu1  ;;  %v1028_v19 = vld [vmem:[%s12604_s30 + $0xca8] sm:$0xff] }
 0x1c4   : > { %v1982_v35 = vpop.f32.mrf.mxu0 }
 0x1c5   : > { %v13288_v38 = vadd.f32 %v2269_v40, %v1981_v29  ;;  %v2271_v45 = vpop.f32.mrf.mxu1  ;;  %v1166_v29 = vpack.c.bf16 %v816_v60, %v809_v56  ;;  %v1266_v35 = vpack.c.bf16 %v1014_v10, %v1007_v7  ;;  %v838_v7 = vld [vmem:[%s12604_s30 + $0x6b8] sm:$0xff] }
 0x1c6   : > { %v1985_v48 = vpop.f32.mrf.mxu0  ;;  %2498 = vmatmul.mubr.bf16.gmra.mxu0 %v1159_v27 }
 0x1c7   : > { %v1986_v51 = vadd.f32 %v13253_v34, %v1985_v48  ;;  %v2274_v55 = vpop.f32.mrf.mxu1  ;;  %2505 = vmatprep.mubr.bf16.mxu0 %v1167_v31  ;;  %10815 = vmatmul.mubr.msk.bf16.gmra.mxu1 %vm1694_vm0, %v1252_v33  ;;  %v1174_v33 = vpack.c.bf16 %v831_v5, %v824_v61  ;;  %v1273_v48 = vpack.c.bf16 %v1028_v19, %v1021_v18  ;;  %v830_v5 = vld [vmem:[%s12604_s30 + $0x678] sm:$0xff]  ;;  %v1035_v18 = vld [vmem:[%s12604_s30 + $0xce0] sm:$0xff] }
 0x1c8   : > { %v1987_v3 = vpop.f32.mrf.mxu0  ;;  %10818 = vmatprep.mubr.msk.bf16.mxu1 %vm1694_vm0, %v1259_v53  ;;  %v11622_v53 = vld [vmem:[%s16029_s5 + $0x28] sm:$0xff]   ;;  %v1042_v19 = vld [vmem:[%s12604_s30 + $0xd18] sm:$0xff] }
 0x1c9   : > { %v13299_v14 = vadd.f32 %v2274_v55, %v1986_v51  ;;  %v2276_v17 = vpop.f32.mrf.mxu1  ;;  %10914 = vmatprep.subr.bf16.mxu0 %v11622_v53  ;;  %v823_v3 = vld [vmem:[%s12604_s30 + $0x640] sm:$0xff] }
 0x1ca   : > { %v1988_v27 = vpop.f32.mrf.mxu0  ;;  %v845_v17 = vld [vmem:[%s12604_s30 + $0x6f0] sm:$0xff]  ;;  %10915 = vmatpush3.bf16.msra.mxu0 %v11622_v53 }
 0x1cb   : > { %v1989_v40 = vadd.f32 %v13253_v34, %v1988_v27  ;;  %v2277_v31 = vpop.f32.mrf.mxu1 }
 0x1cc   : > { %v1990_v45 = vpop.f32.mrf.mxu0 }
 0x1cd   : > { %v13307_v51 = vadd.f32 %v2277_v31, %v1989_v40  ;;  %v2279_v55 = vpop.f32.mrf.mxu1  ;;  %v1049_v40 = vld [vmem:[%s12604_s30 + $0xd50] sm:$0xff]  ;;  %v1056_v31 = vld [vmem:[%s12604_s30 + $0xd88] sm:$0xff] }
 0x1ce   : > { %v1993_v56 = vpop.f32.mrf.mxu0  ;;  %2506 = vmatmul.mubr.bf16.gmra.mxu0 %v1166_v29  ;;  %v1287_v1 = vpack.c.bf16 %v1056_v31, %v1049_v40 }
 0x1cf   : > { %v1994_v60 = vadd.f32 %v13253_v34, %v1993_v56  ;;  %v2282_v61 = vpop.f32.mrf.mxu1  ;;  %2513 = vmatprep.mubr.bf16.mxu0 %v1174_v33  ;;  %10819 = vmatmul.mubr.msk.bf16.gmra.mxu1 %vm1694_vm0, %v1266_v35  ;;  %v1173_v33 = vpack.c.bf16 %v830_v5, %v823_v3  ;;  %v1181_v56 = vpack.c.bf16 %v845_v17, %v838_v7  ;;  %v837_v3 = vld [vmem:[%s12604_s30 + $0x6b0] sm:$0xff]  ;;  %v844_v5 = vld [vmem:[%s12604_s30 + $0x6e8] sm:$0xff]  ;;  %v859_v17 = vld [vmem:[%s12604_s30 + $0x760] sm:$0xff] }
 0x1d0   : > { %v1995_v10 = vpop.f32.mrf.mxu0  ;;  %10822 = vmatprep.mubr.msk.bf16.mxu1 %vm1694_vm0, %v1273_v48 }
 0x1d1   : > { %v13318_v27 = vadd.f32 %v2282_v61, %v1994_v60  ;;  %v2284_v29 = vpop.f32.mrf.mxu1  ;;  %v1280_v10 = vpack.c.bf16 %v1042_v19, %v1035_v18  ;;  %v1063_v18 = vld [vmem:[%s12604_s30 + $0xdc0] sm:$0xff]  ;;  %v1070_v19 = vld [vmem:[%s12604_s30 + $0xdf8] sm:$0xff] }
 0x1d2   : > { %v1996_v45 = vpop.f32.mrf.mxu0 }
 0x1d3   : > { %16030 = vst [vmem:[#allocation12_spill] sm:$0xff] %v13318_v27  ;;  %v1997_v55 = vadd.f32 %v13253_v34, %v1996_v45  ;;  %v2285_v35 = vpop.f32.mrf.mxu1  ;;  %v852_v45 = vld [vmem:[%s12604_s30 + $0x728] sm:$0xff] }
 0x1d4   : > { %v1998_v48 = vpop.f32.mrf.mxu0 }
 0x1d5   : > { %v13323_v53 = vadd.f32 %v2285_v35, %v1997_v55  ;;  %v2287_v60 = vpop.f32.mrf.mxu1  ;;  %v1180_v55 = vpack.c.bf16 %v844_v5, %v837_v3  ;;  %v1188_v48 = vpack.c.bf16 %v859_v17, %v852_v45  ;;  %v866_v5 = vld [vmem:[%s12604_s30 + $0x798] sm:$0xff] }
 0x1d6   : > { %v2001_v61 = vpop.f32.mrf.mxu0  ;;  %2514 = vmatmul.mubr.bf16.gmra.mxu0 %v1173_v33 }
 0x1d7   : > { %v2002_v29 = vadd.f32 %v13253_v34, %v2001_v61  ;;  %v2290_v27 = vpop.f32.mrf.mxu1  ;;  %2521 = vmatprep.mubr.bf16.mxu0 %v1181_v56  ;;  %10823 = vmatmul.mubr.msk.bf16.gmra.mxu1 %vm1694_vm0, %v1280_v10  ;;  %v1294_v10 = vpack.c.bf16 %v1070_v19, %v1063_v18 }
 0x1d8   : > { %v2003_v7 = vpop.f32.mrf.mxu0  ;;  %10826 = vmatprep.mubr.msk.bf16.mxu1 %vm1694_vm0, %v1287_v1 }
 0x1d9   : > { %v13334_v40 = vadd.f32 %v2290_v27, %v2002_v29  ;;  %v2292_v31 = vpop.f32.mrf.mxu1 }
 0x1da   : > { %v2004_v33 = vpop.f32.mrf.mxu0  ;;  %v851_v31 = vld [vmem:[%s12604_s30 + $0x720] sm:$0xff] }
 0x1db   : > { %16031 = vst [vmem:[#allocation13_spill] sm:$0xff] %v13334_v40  ;;  %v2005_v35 = vadd.f32 %v13253_v34, %v2004_v33  ;;  %v2293_v56 = vpop.f32.mrf.mxu1  ;;  %v858_v40 = vld [vmem:[%s12604_s30 + $0x758] sm:$0xff]  ;;  %v873_v33 = vld [vmem:[%s12604_s30 + $0x7d0] sm:$0xff] }
 0x1dc   : > { %v2006_v60 = vpop.f32.mrf.mxu0  ;;  %v1187_v19 = vpack.c.bf16 %v858_v40, %v851_v31  ;;  %v887_v40 = vld [vmem:[%s12604_s30 + $0x840] sm:$0xff] }
 0x1dd   : > { %v13337_v61 = vadd.f32 %v2293_v56, %v2005_v35  ;;  %v2295_v1 = vpop.f32.mrf.mxu1  ;;  %v1195_v56 = vpack.c.bf16 %v873_v33, %v866_v5 }
 0x1de   : > { %v2009_v7 = vpop.f32.mrf.mxu0  ;;  %2522 = vmatmul.mubr.bf16.gmra.mxu0 %v1180_v55 }
 0x1df   : > { %16032 = vst [vmem:[#allocation14_spill] sm:$0xff] %v13337_v61  ;;  %v2010_v27 = vadd.f32 %v13253_v34, %v2009_v7  ;;  %v2298_v29 = vpop.f32.mrf.mxu1  ;;  %2529 = vmatprep.mubr.bf16.mxu0 %v1188_v48  ;;  %10827 = vmatmul.mubr.msk.bf16.gmra.mxu1 %vm1694_vm0, %v1294_v10 }
 0x1e0   : > { %v2011_v3 = vpop.f32.mrf.mxu0 }
 0x1e1   : > { %v13345_v45 = vadd.f32 %v2298_v29, %v2010_v27  ;;  %v2300_v17 = vpop.f32.mrf.mxu1  ;;  %v865_v29 = vld [vmem:[%s12604_s30 + $0x790] sm:$0xff]  ;;  %v872_v3 = vld [vmem:[%s12604_s30 + $0x7c8] sm:$0xff] }
 0x1e2   : > { %v2012_v18 = vpop.f32.mrf.mxu0  ;;  %v1194_v33 = vpack.c.bf16 %v872_v3, %v865_v29  ;;  %v879_v3 = vld [vmem:[%s12604_s30 + $0x800] sm:$0xff] }
 0x1e3   : > { %16033 = vst [vmem:[#allocation15_spill] sm:$0xff] %v13345_v45  ;;  %v2013_v55 = vadd.f32 %v13253_v34, %v2012_v18  ;;  %v2301_v35 = vpop.f32.mrf.mxu1  ;;  %v880_v45 = vld [vmem:[%s12604_s30 + $0x808] sm:$0xff] }
 0x1e4   : > { %v2014_v48 = vpop.f32.mrf.mxu0 }
 0x1e5   : > { %v13348_v60 = vadd.f32 %v2301_v35, %v2013_v55  ;;  %v2303_v10 = vpop.f32.mrf.mxu1 }
 0x1e6   : > { %v2017_v1 = vpop.f32.mrf.mxu0  ;;  %2530 = vmatmul.mubr.bf16.gmra.mxu0 %v1187_v19  ;;  %v1202_v19 = vpack.c.bf16 %v887_v40, %v880_v45  ;;  %v894_v40 = vld [vmem:[%s12604_s30 + $0x878] sm:$0xff] }
 0x1e7   : > { %16034 = vst [vmem:[#allocation16_spill] sm:$0xff] %v13348_v60  ;;  %v2018_v7 = vadd.f32 %v13253_v34, %v2017_v1  ;;  %v2306_v27 = vpop.f32.mrf.mxu1  ;;  %2537 = vmatprep.mubr.bf16.mxu0 %v1195_v56  ;;  %v11623_v56 = vld [vmem:[%s16029_s5 + $0x20] sm:$0xff]   ;;  %v908_v60 = vld [vmem:[%s12604_s30 + $0x8e8] sm:$0xff] }
 0x1e8   : > { %v2019_v17 = vpop.f32.mrf.mxu0  ;;  %10916 = vmatprep.subr.bf16.mxu0 %v11623_v56 }
 0x1e9   : > { %v13355_v31 = vadd.f32 %v2306_v27, %v2018_v7  ;;  %v2308_v18 = vpop.f32.mrf.mxu1  ;;  %v886_v17 = vld [vmem:[%s12604_s30 + $0x838] sm:$0xff]  ;;  %10917 = vmatpush3.bf16.msra.mxu0 %v11623_v56 }
 0x1ea   : > { %v2020_v5 = vpop.f32.mrf.mxu0  ;;  %v901_v18 = vld [vmem:[%s12604_s30 + $0x8b0] sm:$0xff] }
 0x1eb   : > { %16035 = vst [vmem:[#allocation17_spill] sm:$0xff] %v13355_v31  ;;  %v2021_v55 = vadd.f32 %v13253_v34, %v2020_v5  ;;  %v2309_v35 = vpop.f32.mrf.mxu1 }
 0x1ec   : > { %v2022_v48 = vpop.f32.mrf.mxu0 }
 0x1ed   : > { %v13361_v10 = vadd.f32 %v2309_v35, %v2021_v55  ;;  %v2311_v1 = vpop.f32.mrf.mxu1  ;;  %v1201_v48 = vpack.c.bf16 %v886_v17, %v879_v3  ;;  %v915_v3 = vld [vmem:[%s12604_s30 + $0x920] sm:$0xff] }
 0x1ee   : > { %v2025_v7 = vpop.f32.mrf.mxu0  ;;  %2538 = vmatmul.mubr.bf16.gmra.mxu0 %v1194_v33 }
 0x1ef   : > { %16036 = vst [vmem:[#allocation18_spill] sm:$0xff] %v13361_v10  ;;  %v2026_v27 = vadd.f32 %v13253_v34, %v2025_v7  ;;  %v2314_v29 = vpop.f32.mrf.mxu1  ;;  %2545 = vmatprep.mubr.bf16.mxu0 %v1202_v19  ;;  %v1209_v7 = vpack.c.bf16 %v901_v18, %v894_v40 }
 0x1f0   : > { %v2027_v45 = vpop.f32.mrf.mxu0 }
 0x1f1   : > { %v13368_v5 = vadd.f32 %v2314_v29, %v2026_v27  ;;  %v2316_v55 = vpop.f32.mrf.mxu1  ;;  %v893_v29 = vld [vmem:[%s12604_s30 + $0x870] sm:$0xff] }
 0x1f2   : > { %v2028_v35 = vpop.f32.mrf.mxu0  ;;  %v900_v55 = vld [vmem:[%s12604_s30 + $0x8a8] sm:$0xff] }
 0x1f3   : > { %16037 = vst [vmem:[#allocation19_spill] sm:$0xff] %v13368_v5  ;;  %v2029_v33 = vadd.f32 %v13253_v34, %v2028_v35  ;;  %v2317_v1 = vpop.f32.mrf.mxu1  ;;  %v1208_v35 = vpack.c.bf16 %v900_v55, %v893_v29  ;;  %v929_v29 = vld [vmem:[%s12604_s30 + $0x990] sm:$0xff] }
 0x1f4   : > { %v2030_v19 = vpop.f32.mrf.mxu0 }
 0x1f5   : > { %v13371_v10 = vadd.f32 %v2317_v1, %v2029_v33  ;;  %v2319_v56 = vpop.f32.mrf.mxu1  ;;  %v1216_v1 = vpack.c.bf16 %v915_v3, %v908_v60 }
 0x1f6   : > { %v2033_v45 = vpop.f32.mrf.mxu0  ;;  %2546 = vmatmul.mubr.bf16.gmra.mxu0 %v1201_v48 }
 0x1f7   : > { %16038 = vst [vmem:[#allocation20_spill] sm:$0xff] %v13371_v10  ;;  %v2034_v31 = vadd.f32 %v13253_v34, %v2033_v45  ;;  %v2322_v27 = vpop.f32.mrf.mxu1  ;;  %2553 = vmatprep.mubr.bf16.mxu0 %v1209_v7  ;;  %v922_v10 = vld [vmem:[%s12604_s30 + $0x958] sm:$0xff] }
 0x1f8   : > { %v2035_v5 = vpop.f32.mrf.mxu0 }
 0x1f9   : > { %v13378_v17 = vadd.f32 %v2322_v27, %v2034_v31  ;;  %v2324_v40 = vpop.f32.mrf.mxu1  ;;  %v907_v27 = vld [vmem:[%s12604_s30 + $0x8e0] sm:$0xff] }
 0x1fa   : > { %v2036_v18 = vpop.f32.mrf.mxu0  ;;  %v914_v40 = vld [vmem:[%s12604_s30 + $0x918] sm:$0xff] }
 0x1fb   : > { %16039 = vst [vmem:[#allocation21_spill] sm:$0xff] %v13378_v17  ;;  %v2037_v48 = vadd.f32 %v13253_v34, %v2036_v18  ;;  %v2325_v33 = vpop.f32.mrf.mxu1  ;;  %v1215_v18 = vpack.c.bf16 %v914_v40, %v907_v27  ;;  %v943_v27 = vld [vmem:[%s12604_s30 + $0xa00] sm:$0xff] }
 0x1fc   : > { %v2038_v19 = vpop.f32.mrf.mxu0 }
 0x1fd   : > { %v13381_v7 = vadd.f32 %v2325_v33, %v2037_v48  ;;  %v2327_v56 = vpop.f32.mrf.mxu1  ;;  %v1223_v33 = vpack.c.bf16 %v929_v29, %v922_v10 }
 0x1fe   : > { %v2041_v5 = vpop.f32.mrf.mxu0  ;;  %2554 = vmatmul.mubr.bf16.gmra.mxu0 %v1208_v35 }
 0x1ff   : > { %16040 = vst [vmem:[#allocation22_spill] sm:$0xff] %v13381_v7  ;;  %v2042_v45 = vadd.f32 %v13253_v34, %v2041_v5  ;;  %v2330_v31 = vpop.f32.mrf.mxu1  ;;  %2561 = vmatprep.mubr.bf16.mxu0 %v1216_v1  ;;  %v936_v7 = vld [vmem:[%s12604_s30 + $0x9c8] sm:$0xff] }
 0x200   : > { %v2043_v17 = vpop.f32.mrf.mxu0 }
 0x201   : > { %v13388_v55 = vadd.f32 %v2330_v31, %v2042_v45  ;;  %v2332_v60 = vpop.f32.mrf.mxu1  ;;  %v921_v31 = vld [vmem:[%s12604_s30 + $0x950] sm:$0xff] }
 0x202   : > { %v2044_v3 = vpop.f32.mrf.mxu0  ;;  %v928_v60 = vld [vmem:[%s12604_s30 + $0x988] sm:$0xff] }
 0x203   : > { %16041 = vst [vmem:[#allocation23_spill] sm:$0xff] %v13388_v55  ;;  %v2045_v35 = vadd.f32 %v13253_v34, %v2044_v3  ;;  %v2333_v48 = vpop.f32.mrf.mxu1  ;;  %v1222_v29 = vpack.c.bf16 %v928_v60, %v921_v31  ;;  %v935_v31 = vld [vmem:[%s12604_s30 + $0x9c0] sm:$0xff]  ;;  %v942_v60 = vld [vmem:[%s12604_s30 + $0x9f8] sm:$0xff] }
 0x204   : > { %v2046_v19 = vpop.f32.mrf.mxu0 }
 0x205   : > { %v13391_v1 = vadd.f32 %v2333_v48, %v2045_v35  ;;  %v2335_v56 = vpop.f32.mrf.mxu1 }
 0x206   : > { %v2049_v17 = vpop.f32.mrf.mxu0  ;;  %2562 = vmatmul.mubr.bf16.gmra.mxu0 %v1215_v18  ;;  %v1230_v18 = vpack.c.bf16 %v943_v27, %v936_v7  ;;  %v950_v27 = vld [vmem:[%s12604_s30 + $0xa38] sm:$0xff] }
 0x207   : > { %16042 = vst [vmem:[#allocation24_spill] sm:$0xff] %v13391_v1  ;;  %v2050_v5 = vadd.f32 %v13253_v34, %v2049_v17  ;;  %v2338_v45 = vpop.f32.mrf.mxu1  ;;  %2569 = vmatprep.mubr.bf16.mxu0 %v1223_v33  ;;  %v11624_v33 = vld [vmem:[%s16029_s5 + $0x18] sm:$0xff]   ;;  %v964_v1 = vld [vmem:[%s12604_s30 + $0xaa8] sm:$0xff] }
 0x208   : > { %v2051_v55 = vpop.f32.mrf.mxu0  ;;  %10918 = vmatprep.subr.bf16.mxu0 %v11624_v33 }
 0x209   : > { %v13398_v40 = vadd.f32 %v2338_v45, %v2050_v5  ;;  %v2340_v3 = vpop.f32.mrf.mxu1  ;;  %10919 = vmatpush3.bf16.msra.mxu0 %v11624_v33 }
 0x20a   : > { %v2052_v10 = vpop.f32.mrf.mxu0  ;;  %v957_v3 = vld [vmem:[%s12604_s30 + $0xa70] sm:$0xff] }
 0x20b   : > { %16043 = vst [vmem:[#allocation25_spill] sm:$0xff] %v13398_v40  ;;  %v2053_v35 = vadd.f32 %v13253_v34, %v2052_v10  ;;  %v2341_v48 = vpop.f32.mrf.mxu1 }
 0x20c   : > { %v2054_v55 = vpop.f32.mrf.mxu0 }
 0x20d   : > { %v13404_v19 = vadd.f32 %v2341_v48, %v2053_v35  ;;  %v2343_v56 = vpop.f32.mrf.mxu1  ;;  %v1229_v55 = vpack.c.bf16 %v942_v60, %v935_v31  ;;  %v971_v31 = vld [vmem:[%s12604_s30 + $0xae0] sm:$0xff] }
 0x20e   : > { %v2057_v17 = vpop.f32.mrf.mxu0  ;;  %2570 = vmatmul.mubr.bf16.gmra.mxu0 %v1222_v29 }
 0x20f   : > { %16044 = vst [vmem:[#allocation26_spill] sm:$0xff] %v13404_v19  ;;  %v2058_v5 = vadd.f32 %v13253_v34, %v2057_v17  ;;  %v2346_v45 = vpop.f32.mrf.mxu1  ;;  %2577 = vmatprep.mubr.bf16.mxu0 %v1230_v18  ;;  %v1237_v17 = vpack.c.bf16 %v957_v3, %v950_v27 }
 0x210   : > { %v2059_v7 = vpop.f32.mrf.mxu0 }
 0x211   : > { %v13411_v10 = vadd.f32 %v2346_v45, %v2058_v5  ;;  %v2348_v35 = vpop.f32.mrf.mxu1  ;;  %v949_v45 = vld [vmem:[%s12604_s30 + $0xa30] sm:$0xff] }
 0x212   : > { %v2060_v48 = vpop.f32.mrf.mxu0  ;;  %v956_v35 = vld [vmem:[%s12604_s30 + $0xa68] sm:$0xff] }
 0x213   : > { %16045 = vst [vmem:[#allocation27_spill] sm:$0xff] %v13411_v10  ;;  %v2061_v29 = vadd.f32 %v13253_v34, %v2060_v48  ;;  %v2349_v56 = vpop.f32.mrf.mxu1  ;;  %v1236_v48 = vpack.c.bf16 %v956_v35, %v949_v45  ;;  %v985_v45 = vld [vmem:[%s12604_s30 + $0xb50] sm:$0xff] }
 0x214   : > { %v2062_v18 = vpop.f32.mrf.mxu0 }
 0x215   : > { %v13414_v19 = vadd.f32 %v2349_v56, %v2061_v29  ;;  %v2351_v33 = vpop.f32.mrf.mxu1  ;;  %v1244_v56 = vpack.c.bf16 %v971_v31, %v964_v1 }
 0x216   : > { %v2065_v7 = vpop.f32.mrf.mxu0  ;;  %2578 = vmatmul.mubr.bf16.gmra.mxu0 %v1229_v55 }
 0x217   : > { %16046 = vst [vmem:[#allocation28_spill] sm:$0xff] %v13414_v19  ;;  %v2066_v40 = vadd.f32 %v13253_v34, %v2065_v7  ;;  %v2354_v5 = vpop.f32.mrf.mxu1  ;;  %2585 = vmatprep.mubr.bf16.mxu0 %v1237_v17  ;;  %v978_v19 = vld [vmem:[%s12604_s30 + $0xb18] sm:$0xff] }
 0x218   : > { %v2067_v10 = vpop.f32.mrf.mxu0 }
 0x219   : > { %v13421_v60 = vadd.f32 %v2354_v5, %v2066_v40  ;;  %v2356_v27 = vpop.f32.mrf.mxu1  ;;  %v963_v5 = vld [vmem:[%s12604_s30 + $0xaa0] sm:$0xff] }
 0x21a   : > { %v2068_v3 = vpop.f32.mrf.mxu0  ;;  %v970_v27 = vld [vmem:[%s12604_s30 + $0xad8] sm:$0xff] }
 0x21b   : > { %16047 = vst [vmem:[#allocation29_spill] sm:$0xff] %v13421_v60  ;;  %v2069_v55 = vadd.f32 %v13253_v34, %v2068_v3  ;;  %v2357_v29 = vpop.f32.mrf.mxu1  ;;  %v1243_v3 = vpack.c.bf16 %v970_v27, %v963_v5  ;;  %v999_v5 = vld [vmem:[%s12604_s30 + $0xbc0] sm:$0xff] }
 0x21c   : > { %v2070_v18 = vpop.f32.mrf.mxu0 }
 0x21d   : > { %v13424_v17 = vadd.f32 %v2357_v29, %v2069_v55  ;;  %v2359_v33 = vpop.f32.mrf.mxu1  ;;  %v1251_v29 = vpack.c.bf16 %v985_v45, %v978_v19 }
 0x21e   : > { %v2073_v10 = vpop.f32.mrf.mxu0  ;;  %2586 = vmatmul.mubr.bf16.gmra.mxu0 %v1236_v48 }
 0x21f   : > { %16048 = vst [vmem:[#allocation30_spill] sm:$0xff] %v13424_v17  ;;  %v2074_v7 = vadd.f32 %v13253_v34, %v2073_v10  ;;  %v2362_v40 = vpop.f32.mrf.mxu1  ;;  %2593 = vmatprep.mubr.bf16.mxu0 %v1244_v56  ;;  %v977_v17 = vld [vmem:[%s12604_s30 + $0xb10] sm:$0xff] }
 0x220   : > { %v2075_v60 = vpop.f32.mrf.mxu0 }
 0x221   : > { %v13431_v35 = vadd.f32 %v2362_v40, %v2074_v7  ;;  %v2364_v1 = vpop.f32.mrf.mxu1  ;;  %v984_v7 = vld [vmem:[%s12604_s30 + $0xb48] sm:$0xff] }
 0x222   : > { %v2076_v31 = vpop.f32.mrf.mxu0  ;;  %v1250_v19 = vpack.c.bf16 %v984_v7, %v977_v17  ;;  %v991_v17 = vld [vmem:[%s12604_s30 + $0xb80] sm:$0xff] }
 0x223   : > { %16049 = vst [vmem:[#allocation31_spill] sm:$0xff] %v13431_v35  ;;  %v2077_v48 = vadd.f32 %v13253_v34, %v2076_v31  ;;  %v2365_v55 = vpop.f32.mrf.mxu1  ;;  %v992_v35 = vld [vmem:[%s12604_s30 + $0xb88] sm:$0xff] }
 0x224   : > { %v2078_v18 = vpop.f32.mrf.mxu0 }
 0x225   : > { %v13434_v56 = vadd.f32 %v2365_v55, %v2077_v48  ;;  %v2367_v33 = vpop.f32.mrf.mxu1  ;;  %v1258_v48 = vpack.c.bf16 %v999_v5, %v992_v35 }
 0x226   : > { %v2403_v60 = vpop.f32.mrf.mxu0  ;;  %2594 = vmatmul.mubr.bf16.gmra.mxu0 %v1243_v3  ;;  %v11625_v3 = vld [vmem:[%s16029_s5 + $0x10] sm:$0xff]  }
 0x227   : > { %16050 = vst [vmem:[#allocation32_spill] sm:$0xff] %v13434_v56  ;;  %v10768_v10 = vpop.f32.mrf.mxu1  ;;  %2601 = vmatprep.mubr.bf16.mxu0 %v1251_v29  ;;  %v2404_v40 = vadd.f32 %v2403_v60, %v12953_v52  ;;  %10920 = vmatprep.subr.bf16.mxu0 %v11625_v3 }
 0x228   : > { %v2405_v1 = vpop.f32.mrf.mxu0  ;;  %10921 = vmatpush3.bf16.msra.mxu0 %v11625_v3 }
 0x229   : > { %v2692_v27 = vpop.f32.mrf.mxu1 }
 0x22a   : > { %v2406_v34 = vpop.f32.mrf.mxu0  ;;  %v2693_v55 = vadd.f32 %v2692_v27, %v2404_v40  ;;  %v1013_v40 = vld [vmem:[%s12604_s30 + $0xc30] sm:$0xff] }
 0x22b   : > { %v2407_v45 = vadd.f32 %v2406_v34, %v12958_v0  ;;  %v10769_v31 = vpop.f32.mrf.mxu1  ;;  %v998_v0 = vld [vmem:[%s12604_s30 + $0xbb8] sm:$0xff] }
 0x22c   : > { %v2408_v29 = vpop.f32.mrf.mxu0  ;;  %v2947_v35 = vmax.f32 %v2693_v55, 0.0  ;;  %v1006_v34 = vld [vmem:[%s12604_s30 + $0xbf8] sm:$0xff]  ;;  %v1257_v61 = vpack.c.bf16 %v998_v0, %v991_v17  ;;  %v1005_v17 = vld [vmem:[%s12604_s30 + $0xbf0] sm:$0xff]  ;;  %v1012_v0 = vld [vmem:[%s12604_s30 + $0xc28] sm:$0xff] }
 0x22d   : > { %v2695_v52 = vpop.f32.mrf.mxu1 }
 0x22e   : > { %v2696_v18 = vadd.f32 %v2695_v52, %v2407_v45  ;;  %v2411_v33 = vpop.f32.mrf.mxu0  ;;  %2602 = vmatmul.mubr.bf16.gmra.mxu0 %v1250_v19 }
 0x22f   : > { %v2412_v60 = vadd.f32 %v2411_v33, %v12967_v13  ;;  %2609 = vmatprep.mubr.bf16.mxu0 %v1258_v48  ;;  %v10772_v7 = vpop.f32.mrf.mxu1  ;;  %v1265_v48 = vpack.c.bf16 %v1013_v40, %v1006_v34 }
 0x230   : > { %v2948_v1 = vmax.f32 %v2696_v18, 0.0  ;;  %v2413_v5 = vpop.f32.mrf.mxu0 }
 0x231   : > { %v2708_v27 = vpop.f32.mrf.mxu1  ;;  %v2701_v45 = vadd.f32 %v10768_v10, %v2412_v60  ;;  %v1020_v60 = vld [vmem:[%s12604_s30 + $0xc68] sm:$0xff] }
 0x232   : > { %v2414_v29 = vpop.f32.mrf.mxu0  ;;  %v3011_v56 = vpack.c.bf16 %v2948_v1, %v2947_v35  ;;  %v1027_v1 = vld [vmem:[%s12604_s30 + $0xca0] sm:$0xff] }
 0x233   : > { %v2415_v19 = vadd.f32 %v2414_v29, %v12972_v25  ;;  %v10773_v13 = vpop.f32.mrf.mxu1  ;;  %v2949_v33 = vmax.f32 %v2701_v45, 0.0 }
 0x234   : > { %10846 = vmatprep.mubr.bf16.mxu1 %v3011_v56  ;;  %v2416_v3 = vpop.f32.mrf.mxu0 }
 0x235   : > { %v2704_v55 = vadd.f32 %v10769_v31, %v2415_v19  ;;  %v2711_v52 = vpop.f32.mrf.mxu1  ;;  %v1264_v31 = vpack.c.bf16 %v1012_v0, %v1005_v17  ;;  %v1019_v17 = vld [vmem:[%s12604_s30 + $0xc60] sm:$0xff]  ;;  %v1034_v0 = vld [vmem:[%s12604_s30 + $0xcd8] sm:$0xff] }
 0x236   : > { %v2419_v18 = vpop.f32.mrf.mxu0  ;;  %2610 = vmatmul.mubr.bf16.gmra.mxu0 %v1257_v61 }
 0x237   : > { %v2950_v5 = vmax.f32 %v2704_v55, 0.0  ;;  %v2420_v35 = vadd.f32 %v2419_v18, %v12981_v37  ;;  %2617 = vmatprep.mubr.bf16.mxu0 %v1265_v48  ;;  %v13454_v10 = vpop.f32.mrf.mxu1  ;;  %v1272_v37 = vpack.c.bf16 %v1027_v1, %v1020_v60 }
 0x238   : > { %v2421_v25 = vpop.f32.mrf.mxu0 }
 0x239   : > { %v3012_v34 = vpack.c.bf16 %v2950_v5, %v2949_v33  ;;  %v2724_v40 = vpop.f32.mrf.mxu1  ;;  %v2709_v29 = vadd.f32 %v2708_v27, %v2420_v35  ;;  %v1026_v27 = vld [vmem:[%s12604_s30 + $0xc98] sm:$0xff]  ;;  %v1041_v25 = vld [vmem:[%s12604_s30 + $0xd10] sm:$0xff] }
 0x23a   : > { %v2422_v56 = vpop.f32.mrf.mxu0 }
 0x23b   : > { %v2423_v61 = vadd.f32 %v2422_v56, %v12986_v50  ;;  %10847 = vmatmul.mubr.bf16.vlgmr.msra.gmra.mxu1 %v3012_v34  ;;  %v13459_v45 = vpop.f32.mrf.mxu1  ;;  %v2951_v18 = vmax.f32 %v2709_v29, 0.0  ;;  %v1271_v34 = vpack.c.bf16 %v1026_v27, %v1019_v17  ;;  %v1040_v17 = vld [vmem:[%s12604_s30 + $0xd08] sm:$0xff]  ;;  %v1055_v27 = vld [vmem:[%s12604_s30 + $0xd80] sm:$0xff] }
 0x23c   : > { %v2424_v19 = vpop.f32.mrf.mxu0 }
 0x23d   : > { %v2712_v48 = vadd.f32 %v2711_v52, %v2423_v61  ;;  %v2727_v3 = vpop.f32.mrf.mxu1 }
 0x23e   : > { %v2427_v55 = vpop.f32.mrf.mxu0  ;;  %2618 = vmatmul.mubr.bf16.gmra.mxu0 %v1264_v31 }
 0x23f   : > { %v2952_v33 = vmax.f32 %v2712_v48, 0.0  ;;  %v2428_v5 = vadd.f32 %v2427_v55, %v13001_v2  ;;  %2625 = vmatprep.mubr.bf16.mxu0 %v1272_v37  ;;  %v13464_v35 = vpop.f32.mrf.mxu1  ;;  %v1279_v2 = vpack.c.bf16 %v1041_v25, %v1034_v0 }
 0x240   : > { %v2429_v50 = vpop.f32.mrf.mxu0 }
 0x241   : > { %v3013_v60 = vpack.c.bf16 %v2952_v33, %v2951_v18  ;;  %v13468_v1 = vpop.f32.mrf.mxu1  ;;  %v2717_v56 = vadd.f32 %v10772_v7, %v2428_v5  ;;  %v1033_v33 = vld [vmem:[%s12604_s30 + $0xcd0] sm:$0xff] }
 0x242   : > { %v2430_v52 = vpop.f32.mrf.mxu0  ;;  %v1278_v25 = vpack.c.bf16 %v1040_v17, %v1033_v33  ;;  %v1069_v33 = vld [vmem:[%s12604_s30 + $0xdf0] sm:$0xff] }
 0x243   : > { %v2431_v31 = vadd.f32 %v2430_v52, %v13006_v15  ;;  %10850 = vmatprep.mubr.bf16.mxu1 %v3013_v60  ;;  %v13471_v29 = vpop.f32.mrf.mxu1  ;;  %v2953_v48 = vmax.f32 %v2717_v56, 0.0  ;;  %v1048_v15 = vld [vmem:[%s12604_s30 + $0xd48] sm:$0xff] }
 0x244   : > { %v2432_v61 = vpop.f32.mrf.mxu0 }
 0x245   : > { %v2720_v37 = vadd.f32 %v10773_v13, %v2431_v31  ;;  %v2743_v7 = vpop.f32.mrf.mxu1 }
 0x246   : > { %v2435_v19 = vpop.f32.mrf.mxu0  ;;  %2626 = vmatmul.mubr.bf16.gmra.mxu0 %v1271_v34  ;;  %v1286_v34 = vpack.c.bf16 %v1055_v27, %v1048_v15 }
 0x247   : > { %v2954_v55 = vmax.f32 %v2720_v37, 0.0  ;;  %v2436_v18 = vadd.f32 %v2435_v19, %v13015_v28  ;;  %2633 = vmatprep.mubr.bf16.mxu0 %v1279_v2  ;;  %v13478_v60 = vpop.f32.mrf.mxu1  ;;  %v11626_v28 = vld [vmem:[%s16029_s5 + $0x8] sm:$0xff]  }
 0x248   : > { %v2437_v5 = vpop.f32.mrf.mxu0  ;;  %10922 = vmatprep.subr.bf16.mxu0 %v11626_v28 }
 0x249   : > { %v3014_v50 = vpack.c.bf16 %v2954_v55, %v2953_v48  ;;  %v2725_v13 = vadd.f32 %v2724_v40, %v2436_v18  ;;  %v13484_v2 = vpop.f32.mrf.mxu1  ;;  %v1054_v48 = vld [vmem:[%s12604_s30 + $0xd78] sm:$0xff]  ;;  %10923 = vmatpush3.bf16.msra.mxu0 %v11626_v28 }
 0x24a   : > { %v2438_v0 = vpop.f32.mrf.mxu0  ;;  %v1062_v18 = vld [vmem:[%s12604_s30 + $0xdb8] sm:$0xff] }
 0x24b   : > { %v2439_v52 = vadd.f32 %v2438_v0, %v13020_v42  ;;  %10851 = vmatmul.mubr.bf16.gmra.mxu1 %v3014_v50  ;;  %v2955_v37 = vmax.f32 %v2725_v13, 0.0  ;;  %v1047_v42 = vld [vmem:[%s12604_s30 + $0xd40] sm:$0xff]  ;;  %v13491_v5 = vpop.f32.mrf.mxu1 }
 0x24c   : > { %v2440_v56 = vpop.f32.mrf.mxu0  ;;  %v1285_v15 = vpack.c.bf16 %v1054_v48, %v1047_v42 }
 0x24d   : > { %v2728_v31 = vadd.f32 %v2727_v3, %v2439_v52  ;;  %v2759_v13 = vpop.f32.mrf.mxu1 }
 0x24e   : > { %v2443_v61 = vpop.f32.mrf.mxu0  ;;  %2634 = vmatmul.mubr.bf16.gmra.mxu0 %v1278_v25 }
 0x24f   : > { %v2956_v40 = vmax.f32 %v2728_v31, 0.0  ;;  %v2444_v19 = vadd.f32 %v2443_v61, %v13029_v57  ;;  %2641 = vmatprep.mubr.bf16.mxu0 %v1286_v34  ;;  %v1293_v57 = vpack.c.bf16 %v1069_v33, %v1062_v18  ;;  %v1061_v31 = vld [vmem:[%s12604_s30 + $0xdb0] sm:$0xff]  ;;  %v1068_v61 = vld [vmem:[%s12604_s30 + $0xde8] sm:$0xff]  ;;  %s9977_s30 = sshll.u32 %s13848_s27, 9 }
 0x250   : > { %v2445_v55 = vpop.f32.mrf.mxu0  ;;  %s13857_s21 = scalar_lea.vmem [#allocation2], %s9977_s30  ;;  %s14597_s30 = scalar_lea.vmem [#allocation4], %s11390_s19  }
 0x251   : > { %v3015_v17 = vpack.c.bf16 %v2956_v40, %v2955_v37  ;;  %v2733_v27 = vadd.f32 %v13454_v10, %v2444_v19  ;;  %v13499_v37 = vpop.f32.mrf.mxu1  ;;  %v1292_v19 = vpack.c.bf16 %v1068_v61, %v1061_v31 }
 0x252   : > { %v2446_v3 = vpop.f32.mrf.mxu0 }
 0x253   : > { %v2447_v50 = vadd.f32 %v2446_v3, %v13034_v8  ;;  %10854 = vmatprep.mubr.bf16.mxu1 %v3015_v17  ;;  %v2957_v34 = vmax.f32 %v2733_v27, 0.0  ;;  %v2772_v48 = vpop.f32.mrf.mxu1 }
 0x254   : > { %v2448_v0 = vpop.f32.mrf.mxu0 }
 0x255   : > { %v2736_v25 = vadd.f32 %v13459_v45, %v2447_v50 }
 0x256   : > { %v2451_v52 = vpop.f32.mrf.mxu0  ;;  %2642 = vmatmul.mubr.bf16.gmra.mxu0 %v1285_v15  ;;  %v13504_v15 = vpop.f32.mrf.mxu1 }
 0x257   : > { %v2958_v28 = vmax.f32 %v2736_v25, 0.0  ;;  %v2452_v56 = vadd.f32 %v2451_v52, %v13043_v22  ;;  %2649 = vmatprep.mubr.bf16.mxu0 %v1293_v57 }
 0x258   : > { %v2453_v10 = vpop.f32.mrf.mxu0 }
 0x259   : > { %v3016_v40 = vpack.c.bf16 %v2958_v28, %v2957_v34  ;;  %v2741_v42 = vadd.f32 %v13468_v1, %v2452_v56 }
 0x25a   : > { %v2454_v8 = vpop.f32.mrf.mxu0 }
 0x25b   : > { %v2455_v45 = vadd.f32 %v2454_v8, %v13048_v36  ;;  %10855 = vmatmul.mubr.bf16.gmra.mxu1 %v3016_v40  ;;  %v2959_v22 = vmax.f32 %v2741_v42, 0.0  ;;  %v2775_v36 = vpop.f32.mrf.mxu1 }
 0x25c   : > { %v2456_v55 = vpop.f32.mrf.mxu0 }
 0x25d   : > { %v2744_v18 = vadd.f32 %v2743_v7, %v2455_v45  ;;  %v13509_v52 = vpop.f32.mrf.mxu1 }
 0x25e   : > { %v2459_v33 = vpop.f32.mrf.mxu0  ;;  %2650 = vmatmul.mubr.bf16.gmra.mxu0 %v1292_v19 }
 0x25f   : > { %v2960_v17 = vmax.f32 %v2744_v18, 0.0  ;;  %v2460_v3 = vadd.f32 %v2459_v33, %v13058_v54  ;;  %v2788_v10 = vpop.f32.mrf.mxu1 }
 0x260   : > { %v2461_v27 = vpop.f32.mrf.mxu0 }
 0x261   : > { %v3017_v50 = vpack.c.bf16 %v2960_v17, %v2959_v22  ;;  %v2749_v0 = vadd.f32 %v13464_v35, %v2460_v3  ;;  %v13517_v42 = vpop.f32.mrf.mxu1 }
 0x262   : > { %v2462_v57 = vpop.f32.mrf.mxu0 }
 0x263   : > { %v2463_v1 = vadd.f32 %v2462_v57, %v13063_v6  ;;  %10858 = vmatprep.mubr.bf16.mxu1 %v3017_v50  ;;  %v2961_v28 = vmax.f32 %v2749_v0, 0.0  ;;  %v2791_v22 = vpop.f32.mrf.mxu1 }
 0x264   : > { %v2464_v25 = vpop.f32.mrf.mxu0 }
 0x265   : > { %v2752_v7 = vadd.f32 %v13471_v29, %v2463_v1  ;;  %v11627_v29 = vld [vmem:[%s16029_s5] sm:$0xff]   ;;  %v13522_v27 = vpop.f32.mrf.mxu1 }
 0x266   : > { %v2467_v34 = vpop.f32.mrf.mxu0  ;;  %10924 = vmatprep.subr.bf16.mxu0 %v11627_v29 }
 0x267   : > { %v2962_v56 = vmax.f32 %v2752_v7, 0.0  ;;  %v2468_v54 = vadd.f32 %v2467_v34, %v13078_v23  ;;  %10925 = vmatpush3.bf16.msra.mxu0 %v11627_v29 }
 0x268   : > { %v2469_v31 = vpop.f32.mrf.mxu0 }
 0x269   : > { %v3018_v61 = vpack.c.bf16 %v2962_v56, %v2961_v28  ;;  %v2757_v35 = vadd.f32 %v13484_v2, %v2468_v54 }
 0x26a   : > { %v2470_v40 = vpop.f32.mrf.mxu0 }
 0x26b   : > { %v2471_v6 = vadd.f32 %v2470_v40, %v13086_v39  ;;  %10859 = vmatmul.mubr.bf16.gmra.mxu1 %v3018_v61  ;;  %v2963_v23 = vmax.f32 %v2757_v35, 0.0 }
 0x26c   : > { %v2472_v8 = vpop.f32.mrf.mxu0 }
 0x26d   : > { %v2760_v19 = vadd.f32 %v2759_v13, %v2471_v6 }
 0x26e   : > { %v2475_v45 = vpop.f32.mrf.mxu0 }
 0x26f   : > { %v2964_v55 = vmax.f32 %v2760_v19, 0.0  ;;  %v2476_v18 = vadd.f32 %v2475_v45, %v13100_v59  ;;  %v2804_v59 = vpop.f32.mrf.mxu1 }
 0x270   : > { %v2477_v33 = vpop.f32.mrf.mxu0 }
 0x271   : > { %v3019_v2 = vpack.c.bf16 %v2964_v55, %v2963_v23  ;;  %v2765_v17 = vadd.f32 %v13478_v60, %v2476_v18 }
 0x272   : > { %v2478_v39 = vpop.f32.mrf.mxu0 }
 0x273   : > { %v2479_v3 = vadd.f32 %v2478_v39, %v13105_v12  ;;  %10862 = vmatprep.mubr.bf16.mxu1 %v3019_v2  ;;  %v2965_v0 = vmax.f32 %v2765_v17, 0.0  ;;  %v13527_v12 = vpop.f32.mrf.mxu1 }
 0x274   : > { %v2480_v13 = vpop.f32.mrf.mxu0 }
 0x275   : > { %v2768_v50 = vadd.f32 %v13491_v5, %v2479_v3  ;;  %v2807_v6 = vpop.f32.mrf.mxu1 }
 0x276   : > { %v2483_v57 = vpop.f32.mrf.mxu0 }
 0x277   : > { %v2966_v1 = vmax.f32 %v2768_v50, 0.0  ;;  %v2484_v25 = vadd.f32 %v2483_v57, %v13116_v30  ;;  %v13530_v8 = vpop.f32.mrf.mxu1 }
 0x278   : > { %v2485_v7 = vpop.f32.mrf.mxu0 }
 0x279   : > { %v3020_v34 = vpack.c.bf16 %v2966_v1, %v2965_v0  ;;  %v2773_v56 = vadd.f32 %v2772_v48, %v2484_v25 }
 0x27a   : > { %v2486_v28 = vpop.f32.mrf.mxu0 }
 0x27b   : > { %v2487_v60 = vadd.f32 %v2486_v28, %v13121_v46  ;;  %10863 = vmatmul.mubr.bf16.gmra.mxu1 %v3020_v34  ;;  %v2967_v40 = vmax.f32 %v2773_v56, 0.0 }
 0x27c   : > { %v2488_v54 = vpop.f32.mrf.mxu0 }
 0x27d   : > { %v2776_v31 = vadd.f32 %v2775_v36, %v2487_v60  ;;  %v13535_v36 = vpop.f32.mrf.mxu1 }
 0x27e   : > { %v2491_v61 = vpop.f32.mrf.mxu0 }
 0x27f   : > { %v2968_v5 = vmax.f32 %v2776_v31, 0.0  ;;  %v2492_v35 = vadd.f32 %v2491_v61, %v13135_v4  ;;  %v13538_v17 = vpop.f32.mrf.mxu1 }
 0x280   : > { %v2493_v29 = vpop.f32.mrf.mxu0 }
 0x281   : > { %v3021_v30 = vpack.c.bf16 %v2968_v5, %v2967_v40  ;;  %v2781_v48 = vadd.f32 %v13499_v37, %v2492_v35  ;;  %v2823_v57 = vpop.f32.mrf.mxu1 }
 0x282   : > { %v2494_v19 = vpop.f32.mrf.mxu0 }
 0x283   : > { %v2495_v46 = vadd.f32 %v2494_v19, %v13140_v21  ;;  %10866 = vmatprep.mubr.bf16.mxu1 %v3021_v30  ;;  %v2969_v18 = vmax.f32 %v2781_v48, 0.0  ;;  %v13542_v7 = vpop.f32.mrf.mxu1 }
 0x284   : > { %v2496_v45 = vpop.f32.mrf.mxu0 }
 0x285   : > { %v2784_v23 = vadd.f32 %v13504_v15, %v2495_v46 }
 0x286   : > { %v2499_v55 = vpop.f32.mrf.mxu0 }
 0x287   : > { %v2970_v33 = vmax.f32 %v2784_v23, 0.0  ;;  %v2500_v4 = vadd.f32 %v2499_v55, %v13151_v41 }
 0x288   : > { %v2501_v2 = vpop.f32.mrf.mxu0 }
 0x289   : > { %v3022_v39 = vpack.c.bf16 %v2970_v33, %v2969_v18  ;;  %v2789_v13 = vadd.f32 %v2788_v10, %v2500_v4 }
 0x28a   : > { %v2502_v3 = vpop.f32.mrf.mxu0 }
 0x28b   : > { %v2503_v37 = vadd.f32 %v2502_v3, %v13159_v62  ;;  %10867 = vmatmul.mubr.bf16.gmra.mxu1 %v3022_v39  ;;  %v2971_v0 = vmax.f32 %v2789_v13, 0.0  ;;  %v13546_v62 = vpop.f32.mrf.mxu1 }
 0x28c   : > { %v2504_v21 = vpop.f32.mrf.mxu0 }
 0x28d   : > { %v2792_v50 = vadd.f32 %v2791_v22, %v2503_v37  ;;  %v13550_v40 = vpop.f32.mrf.mxu1 }
 0x28e   : > { %v2507_v15 = vpop.f32.mrf.mxu0 }
 0x28f   : > { %v2972_v1 = vmax.f32 %v2792_v50, 0.0  ;;  %v2508_v25 = vadd.f32 %v2507_v15, %v13173_v20 }
 0x290   : > { %v2509_v41 = vpop.f32.mrf.mxu0 }
 0x291   : > { %v3023_v34 = vpack.c.bf16 %v2972_v1, %v2971_v0  ;;  %v2797_v56 = vadd.f32 %v13509_v52, %v2508_v25 }
 0x292   : > { %v2510_v28 = vpop.f32.mrf.mxu0 }
 0x293   : > { %v2511_v10 = vadd.f32 %v2510_v28, %v13178_v43  ;;  %10870 = vmatprep.mubr.bf16.mxu1 %v3023_v34  ;;  %v2973_v31 = vmax.f32 %v2797_v56, 0.0  ;;  %v2839_v43 = vpop.f32.mrf.mxu1 }
 0x294   : > { %v2512_v60 = vpop.f32.mrf.mxu0 }
 0x295   : > { %v2800_v22 = vadd.f32 %v13517_v42, %v2511_v10  ;;  %v13553_v46 = vpop.f32.mrf.mxu1 }
 0x296   : > { %v2515_v54 = vpop.f32.mrf.mxu0 }
 0x297   : > { %v2974_v61 = vmax.f32 %v2800_v22, 0.0  ;;  %v2516_v20 = vadd.f32 %v2515_v54, %v13189_v63  ;;  %v13556_v33 = vpop.f32.mrf.mxu1 }
 0x298   : > { %v2517_v5 = vpop.f32.mrf.mxu0 }
 0x299   : > { %v3024_v35 = vpack.c.bf16 %v2974_v61, %v2973_v31  ;;  %v2805_v30 = vadd.f32 %v2804_v59, %v2516_v20  ;;  %v13561_v39 = vpop.f32.mrf.mxu1 }
 0x29a   : > { %v2518_v29 = vpop.f32.mrf.mxu0 }
 0x29b   : > { %v2519_v52 = vadd.f32 %v2518_v29, %v13194_v24  ;;  %10871 = vmatmul.mubr.bf16.gmra.mxu1 %v3024_v35  ;;  %v2975_v45 = vmax.f32 %v2805_v30, 0.0  ;;  %v2855_v15 = vpop.f32.mrf.mxu1 }
 0x29c   : > { %v2520_v19 = vpop.f32.mrf.mxu0 }
 0x29d   : > { %v2808_v48 = vadd.f32 %v2807_v6, %v2519_v52  ;;  %v13566_v41 = vpop.f32.mrf.mxu1 }
 0x29e   : > { %v2523_v42 = vpop.f32.mrf.mxu0 }
 0x29f   : > { %v2976_v23 = vmax.f32 %v2808_v48, 0.0  ;;  %v2524_v55 = vadd.f32 %v2523_v42, %v13208_v47  ;;  %v13569_v60 = vpop.f32.mrf.mxu1 }
 0x2a0   : > { %v2525_v63 = vpop.f32.mrf.mxu0 }
 0x2a1   : > { %v3025_v18 = vpack.c.bf16 %v2976_v23, %v2975_v45  ;;  %v2813_v59 = vadd.f32 %v13522_v27, %v2524_v55  ;;  %v13574_v31 = vpop.f32.mrf.mxu1 }
 0x2a2   : > { %v2526_v4 = vpop.f32.mrf.mxu0 }
 0x2a3   : > { %v2527_v24 = vadd.f32 %v2526_v4, %v13213_v9  ;;  %10874 = vmatprep.mubr.bf16.mxu1 %v3025_v18  ;;  %v2977_v13 = vmax.f32 %v2813_v59, 0.0  ;;  %v13577_v30 = vpop.f32.mrf.mxu1 }
 0x2a4   : > { %v2528_v2 = vpop.f32.mrf.mxu0 }
 0x2a5   : > { %v2816_v6 = vadd.f32 %v13527_v12, %v2527_v24 }
 0x2a6   : > { %v2531_v3 = vpop.f32.mrf.mxu0 }
 0x2a7   : > { %v2978_v37 = vmax.f32 %v2816_v6, 0.0  ;;  %v2532_v47 = vadd.f32 %v2531_v3, %v13224_v32 }
 0x2a8   : > { %v2533_v21 = vpop.f32.mrf.mxu0 }
 0x2a9   : > { %v3026_v50 = vpack.c.bf16 %v2978_v37, %v2977_v13  ;;  %v2821_v1 = vadd.f32 %v13535_v36, %v2532_v47 }
 0x2aa   : > { %v2534_v0 = vpop.f32.mrf.mxu0 }
 0x2ab   : > { %v2535_v27 = vadd.f32 %v2534_v0, %v13232_v58  ;;  %10875 = vmatmul.mubr.bf16.gmra.mxu1 %v3026_v50  ;;  %v2979_v34 = vmax.f32 %v2821_v1, 0.0 }
 0x2ac   : > { %v2536_v9 = vpop.f32.mrf.mxu0 }
 0x2ad   : > { %v2824_v25 = vadd.f32 %v2823_v57, %v2535_v27 }
 0x2ae   : > { %v2539_v12 = vpop.f32.mrf.mxu0 }
 0x2af   : > { %v2980_v28 = vmax.f32 %v2824_v25, 0.0  ;;  %v2540_v56 = vadd.f32 %v2539_v12, %v13246_v26  ;;  %v16051_v25 = vld [vmem:[#allocation12_spill] sm:$0xff] }
 0x2b0   : > { %v2541_v10 = vpop.f32.mrf.mxu0 }
 0x2b1   : > { %v3027_v32 = vpack.c.bf16 %v2980_v28, %v2979_v34  ;;  %v2829_v54 = vadd.f32 %v13530_v8, %v2540_v56 }
 0x2b2   : > { %v2542_v22 = vpop.f32.mrf.mxu0 }
 0x2b3   : > { %v2543_v36 = vadd.f32 %v2542_v22, %v13256_v49  ;;  %10878 = vmatprep.mubr.bf16.mxu1 %v3027_v32  ;;  %v2981_v20 = vmax.f32 %v2829_v54, 0.0 }
 0x2b4   : > { %v2544_v58 = vpop.f32.mrf.mxu0 }
 0x2b5   : > { %v2832_v57 = vadd.f32 %v13538_v17, %v2543_v36  ;;  %v13581_v17 = vpop.f32.mrf.mxu1 }
 0x2b6   : > { %v2547_v61 = vpop.f32.mrf.mxu0 }
 0x2b7   : > { %v2982_v5 = vmax.f32 %v2832_v57, 0.0  ;;  %v2548_v26 = vadd.f32 %v2547_v61, %v13267_v16  ;;  %v13584_v18 = vpop.f32.mrf.mxu1  ;;  %v16053_v57 = vld [vmem:[#allocation13_spill] sm:$0xff] }
 0x2b8   : > { %v2549_v35 = vpop.f32.mrf.mxu0 }
 0x2b9   : > { %v3028_v29 = vpack.c.bf16 %v2982_v5, %v2981_v20  ;;  %v2837_v8 = vadd.f32 %v13546_v62, %v2548_v26  ;;  %v13589_v24 = vpop.f32.mrf.mxu1  ;;  %v16054_v35 = vld [vmem:[#allocation14_spill] sm:$0xff] }
 0x2ba   : > { %v2550_v52 = vpop.f32.mrf.mxu0 }
 0x2bb   : > { %v2551_v49 = vadd.f32 %v2550_v52, %v13272_v44  ;;  %10879 = vmatmul.mubr.bf16.gmra.mxu1 %v3028_v29  ;;  %v2983_v45 = vmax.f32 %v2837_v8, 0.0  ;;  %v13592_v47 = vpop.f32.mrf.mxu1 }
 0x2bc   : > { %v2552_v19 = vpop.f32.mrf.mxu0 }
 0x2bd   : > { %v2840_v48 = vadd.f32 %v2839_v43, %v2551_v49 }
 0x2be   : > { %v2555_v42 = vpop.f32.mrf.mxu0 }
 0x2bf   : > { %v2984_v23 = vmax.f32 %v2840_v48, 0.0  ;;  %v2556_v55 = vadd.f32 %v2555_v42, %v13283_v11  ;;  %v16055_v42 = vld [vmem:[#allocation15_spill] sm:$0xff] }
 0x2c0   : > { %v2557_v16 = vpop.f32.mrf.mxu0 }
 0x2c1   : > { %v3029_v63 = vpack.c.bf16 %v2984_v23, %v2983_v45  ;;  %v2845_v59 = vadd.f32 %v13542_v7, %v2556_v55 }
 0x2c2   : > { %v2558_v4 = vpop.f32.mrf.mxu0 }
 0x2c3   : > { %v2559_v62 = vadd.f32 %v2558_v4, %v13288_v38  ;;  %10882 = vmatprep.mubr.bf16.mxu1 %v3029_v63  ;;  %v2985_v6 = vmax.f32 %v2845_v59, 0.0  ;;  %v16056_v4 = vld [vmem:[#allocation16_spill] sm:$0xff] }
 0x2c4   : > { %v2560_v44 = vpop.f32.mrf.mxu0 }
 0x2c5   : > { %v2848_v43 = vadd.f32 %v13550_v40, %v2559_v62  ;;  %v13596_v40 = vpop.f32.mrf.mxu1 }
 0x2c6   : > { %v2563_v2 = vpop.f32.mrf.mxu0 }
 0x2c7   : > { %v2986_v3 = vmax.f32 %v2848_v43, 0.0  ;;  %v2564_v11 = vadd.f32 %v2563_v2, %v13299_v14  ;;  %v13599_v28 = vpop.f32.mrf.mxu1 }
 0x2c8   : > { %v2565_v13 = vpop.f32.mrf.mxu0 }
 0x2c9   : > { %v3030_v37 = vpack.c.bf16 %v2986_v3, %v2985_v6  ;;  %v2853_v7 = vadd.f32 %v13556_v33, %v2564_v11  ;;  %v13607_v22 = vpop.f32.mrf.mxu1  ;;  %v16057_v11 = vld [vmem:[#allocation17_spill] sm:$0xff] }
 0x2ca   : > { %v2566_v21 = vpop.f32.mrf.mxu0 }
 0x2cb   : > { %v2567_v38 = vadd.f32 %v2566_v21, %v13307_v51  ;;  %10883 = vmatmul.mubr.bf16.gmra.mxu1 %v3030_v37  ;;  %v2987_v27 = vmax.f32 %v2853_v7, 0.0 }
 0x2cc   : > { %v2568_v50 = vpop.f32.mrf.mxu0 }
 0x2cd   : > { %v2856_v0 = vadd.f32 %v2855_v15, %v2567_v38  ;;  %v11628_v15 = vld [vmem:[%s16052_s7 + $0x38] sm:$0xff]   ;;  %v16058_v50 = vld [vmem:[#allocation18_spill] sm:$0xff] }
 0x2ce   : > { %v2571_v1 = vpop.f32.mrf.mxu0  ;;  %10990 = vmatprep.subr.bf16.mxu1 %v11628_v15 }
 0x2cf   : > { %v2988_v9 = vmax.f32 %v2856_v0, 0.0  ;;  %v2572_v12 = vadd.f32 %v2571_v1, %v16051_v25  ;;  %10991 = vmatpush3.bf16.msra.mxu1 %v11628_v15  ;;  %v16060_v15 = vld [vmem:[#allocation20_spill] sm:$0xff] }
 0x2d0   : > { %v2573_v14 = vpop.f32.mrf.mxu0 }
 0x2d1   : > { %v3031_v34 = vpack.c.bf16 %v2988_v9, %v2987_v27  ;;  %v2861_v10 = vadd.f32 %v13553_v46, %v2572_v12  ;;  %v16059_v14 = vld [vmem:[#allocation19_spill] sm:$0xff] }
 0x2d2   : > { %v2574_v56 = vpop.f32.mrf.mxu0 }
 0x2d3   : > { %v2575_v33 = vadd.f32 %v2574_v56, %v13323_v53  ;;  %10886 = vmatprep.mubr.bf16.mxu1 %v3031_v34  ;;  %v2989_v36 = vmax.f32 %v2861_v10, 0.0  ;;  %v13610_v53 = vpop.f32.mrf.mxu1 }
 0x2d4   : > { %v2576_v51 = vpop.f32.mrf.mxu0 }
 0x2d5   : > { %v2864_v32 = vadd.f32 %v13561_v39, %v2575_v33  ;;  %v13615_v8 = vpop.f32.mrf.mxu1 }
 0x2d6   : > { %v2579_v54 = vpop.f32.mrf.mxu0 }
 0x2d7   : > { %v2990_v58 = vmax.f32 %v2864_v32, 0.0  ;;  %v2580_v61 = vadd.f32 %v2579_v54, %v16053_v57  ;;  %v13618_v16 = vpop.f32.mrf.mxu1 }
 0x2d8   : > { %v2581_v46 = vpop.f32.mrf.mxu0 }
 0x2d9   : > { %v3032_v20 = vpack.c.bf16 %v2990_v58, %v2989_v36  ;;  %v2869_v26 = vadd.f32 %v13569_v60, %v2580_v61  ;;  %v13626_v43 = vpop.f32.mrf.mxu1 }
 0x2da   : > { %v2582_v5 = vpop.f32.mrf.mxu0 }
 0x2db   : > { %v2583_v29 = vadd.f32 %v2582_v5, %v16054_v35  ;;  %10887 = vmatmul.mubr.bf16.gmra.mxu1 %v3032_v20  ;;  %v2991_v19 = vmax.f32 %v2869_v26, 0.0  ;;  %v13629_v21 = vpop.f32.mrf.mxu1  ;;  %v16061_v20 = vld [vmem:[#allocation21_spill] sm:$0xff] }
 0x2dc   : > { %v2584_v39 = vpop.f32.mrf.mxu0 }
 0x2dd   : > { %v2872_v52 = vadd.f32 %v13577_v30, %v2583_v29  ;;  %v11629_v30 = vld [vmem:[%s16052_s7 + $0x30] sm:$0xff]   ;;  %v13634_v27 = vpop.f32.mrf.mxu1 }
 0x2de   : > { %v2587_v49 = vpop.f32.mrf.mxu0  ;;  %10992 = vmatprep.subr.bf16.mxu1 %v11629_v30 }
 0x2df   : > { %v2992_v48 = vmax.f32 %v2872_v52, 0.0  ;;  %v2588_v45 = vadd.f32 %v2587_v49, %v16055_v42  ;;  %10993 = vmatpush3.bf16.msra.mxu1 %v11629_v30  ;;  %v13637_v10 = vpop.f32.mrf.mxu1  ;;  %v16062_v52 = vld [vmem:[#allocation22_spill] sm:$0xff] }
 0x2e0   : > { %v2589_v23 = vpop.f32.mrf.mxu0 }
 0x2e1   : > { %v3033_v55 = vpack.c.bf16 %v2992_v48, %v2991_v19  ;;  %v2877_v60 = vadd.f32 %v13566_v41, %v2588_v45  ;;  %v13645_v58 = vpop.f32.mrf.mxu1  ;;  %v13656_v45 = vld [vmem:[%s16063_s4] ss:$0 sm:$0xff] }
 0x2e2   : > { %v2590_v63 = vpop.f32.mrf.mxu0 }
 0x2e3   : > { %v2591_v59 = vadd.f32 %v2590_v63, %v16056_v4  ;;  %10890 = vmatprep.mubr.bf16.mxu1 %v3033_v55  ;;  %v2993_v6 = vmax.f32 %v2877_v60, 0.0  ;;  %v13648_v35 = vpop.f32.mrf.mxu1  ;;  %v16064_v60 = vld [vmem:[#allocation23_spill] sm:$0xff] }
 0x2e4   : > { %v2592_v62 = vpop.f32.mrf.mxu0 }
 0x2e5   : > { %v2880_v44 = vadd.f32 %v13574_v31, %v2591_v59 }
 0x2e6   : > { %v2595_v2 = vpop.f32.mrf.mxu0 }
 0x2e7   : > { %v2994_v3 = vmax.f32 %v2880_v44, 0.0  ;;  %v2596_v13 = vadd.f32 %v2595_v2, %v16057_v11 }
 0x2e8   : > { %v2597_v41 = vpop.f32.mrf.mxu0 }
 0x2e9   : > { %v3034_v37 = vpack.c.bf16 %v2994_v3, %v2993_v6  ;;  %v2885_v38 = vadd.f32 %v13584_v18, %v2596_v13  ;;  %v16065_v41 = vld [vmem:[#allocation24_spill] sm:$0xff] }
 0x2ea   : > { %v2598_v7 = vpop.f32.mrf.mxu0 }
 0x2eb   : > { %v2599_v0 = vadd.f32 %v2598_v7, %v16058_v50  ;;  %10891 = vmatmul.mubr.bf16.gmra.mxu1 %v3034_v37  ;;  %v2995_v25 = vmax.f32 %v2885_v38, 0.0 }
 0x2ec   : > { %v2600_v31 = vpop.f32.mrf.mxu0 }
 0x2ed   : > { %v2888_v1 = vadd.f32 %v13592_v47, %v2599_v0  ;;  %v11630_v47 = vld [vmem:[%s16052_s7 + $0x28] sm:$0xff]   ;;  %v11631_v0 = vld [vmem:[%s16052_s7 + $0x20] sm:$0xff]  }
 0x2ee   : > { %v2603_v9 = vpop.f32.mrf.mxu0  ;;  %10994 = vmatprep.subr.bf16.mxu1 %v11630_v47 }
 0x2ef   : > { %v2996_v12 = vmax.f32 %v2888_v1, 0.0  ;;  %v2604_v34 = vadd.f32 %v2603_v9, %v16059_v14  ;;  %10995 = vmatpush3.bf16.msra.mxu1 %v11630_v47 }
 0x2f0   : > { %v2605_v56 = vpop.f32.mrf.mxu0  ;;  %10996 = vmatprep.subr.bf16.mxu1 %v11631_v0 }
 0x2f1   : > { %v3035_v33 = vpack.c.bf16 %v2996_v12, %v2995_v25  ;;  %v2893_v18 = vadd.f32 %v13581_v17, %v2604_v34  ;;  %v16066_v34 = vld [vmem:[#allocation25_spill] sm:$0xff] }
 0x2f2   : > { %v2606_v51 = vpop.f32.mrf.mxu0 }
 0x2f3   : > { %v2607_v32 = vadd.f32 %v2606_v51, %v16060_v15  ;;  %10894 = vmatprep.mubr.bf16.mxu1 %v3035_v33  ;;  %v2997_v61 = vmax.f32 %v2893_v18, 0.0  ;;  %10997 = vmatpush3.bf16.msra.mxu1 %v11631_v0 }
 0x2f4   : > { %v2608_v54 = vpop.f32.mrf.mxu0 }
 0x2f5   : > { %v2896_v36 = vadd.f32 %v13589_v24, %v2607_v32  ;;  %v16067_v32 = vld [vmem:[#allocation26_spill] sm:$0xff] }
 0x2f6   : > { %v2611_v57 = vpop.f32.mrf.mxu0 }
 0x2f7   : > { %v2998_v46 = vmax.f32 %v2896_v36, 0.0  ;;  %v2612_v5 = vadd.f32 %v2611_v57, %v16061_v20 }
 0x2f8   : > { %v2613_v17 = vpop.f32.mrf.mxu0 }
 0x2f9   : > { %v3036_v26 = vpack.c.bf16 %v2998_v46, %v2997_v61  ;;  %v2901_v39 = vadd.f32 %v13599_v28, %v2612_v5  ;;  %v16068_v5 = vld [vmem:[#allocation27_spill] sm:$0xff] }
 0x2fa   : > { %v2614_v29 = vpop.f32.mrf.mxu0 }
 0x2fb   : > { %v2615_v49 = vadd.f32 %v2614_v29, %v16062_v52  ;;  %v10848_v19 = vpop.f32.mrf.mxu1  ;;  %10895 = vmatmul.mubr.bf16.gmra.mxu1 %v3036_v26  ;;  %v2999_v55 = vmax.f32 %v2901_v39, 0.0 }
 0x2fc   : > { %v2616_v24 = vpop.f32.mrf.mxu0  ;;  %v3157_v44 = vadd.f32 %v10848_v19, %v13656_v45 }
 0x2fd   : > { %v2904_v48 = vadd.f32 %v13610_v53, %v2615_v49  ;;  %v3148_v42 = vpop.f32.mrf.mxu1 }
 0x2fe   : > { %v2619_v23 = vpop.f32.mrf.mxu0  ;;  %v3149_v28 = vadd.f32 %v13656_v45, %v3148_v42  ;;  %v3405_v31 = vmax.f32 %v3157_v44, 0.0 }
 0x2ff   : > { %v3000_v63 = vmax.f32 %v2904_v48, 0.0  ;;  %v2620_v4 = vadd.f32 %v2619_v23, %v16064_v60  ;;  %v10849_v59 = vpop.f32.mrf.mxu1  ;;  %v16069_v23 = vld [vmem:[#allocation28_spill] sm:$0xff] }
 0x300   : > { %v3160_v62 = vadd.f32 %v10849_v59, %v13656_v45  ;;  %v2621_v30 = vpop.f32.mrf.mxu0  ;;  %v3403_v7 = vmax.f32 %v3149_v28, 0.0  ;;  %v11632_v59 = vld [vmem:[%s16052_s7 + $0x18] sm:$0xff]  }
 0x301   : > { %v3151_v53 = vpop.f32.mrf.mxu1  ;;  %v3037_v2 = vpack.c.bf16 %v3000_v63, %v2999_v55  ;;  %v2909_v11 = vadd.f32 %v13596_v40, %v2620_v4  ;;  %10998 = vmatprep.subr.bf16.mxu1 %v11632_v59 }
 0x302   : > { %v3152_v6 = vadd.f32 %v13656_v45, %v3151_v53  ;;  %v2622_v3 = vpop.f32.mrf.mxu0  ;;  %v3406_v13 = vmax.f32 %v3160_v62, 0.0  ;;  %10999 = vmatpush3.bf16.msra.mxu1 %v11632_v59 }
 0x303   : > { %v2623_v37 = vadd.f32 %v2622_v3, %v16065_v41  ;;  %10898 = vmatprep.mubr.bf16.mxu1 %v3037_v2  ;;  %v3001_v12 = vmax.f32 %v2909_v11, 0.0 }
 0x304   : > { %v3404_v38 = vmax.f32 %v3152_v6, 0.0  ;;  %v2624_v50 = vpop.f32.mrf.mxu0  ;;  %v3468_v14 = vpack.c.bf16 %v3406_v13, %v3405_v31  ;;  %v16070_v6 = vld [vmem:[#allocation29_spill] sm:$0xff] }
 0x305   : > { %v2912_v1 = vadd.f32 %v13607_v22, %v2623_v37 }
 0x306   : > { %v2627_v9 = vpop.f32.mrf.mxu0  ;;  %v3467_v25 = vpack.c.bf16 %v3404_v38, %v3403_v7  ;;  %v16071_v7 = vld [vmem:[#allocation30_spill] sm:$0xff] }
 0x307   : > { %v3002_v40 = vmax.f32 %v2912_v1, 0.0  ;;  %v2628_v56 = vadd.f32 %v2627_v9, %v16066_v34 }
 0x308   : > { %v2629_v33 = vpop.f32.mrf.mxu0  ;;  %10926 = vmatprep.mubr.bf16.mxu0 %v3467_v25 }
 0x309   : > { %v3038_v51 = vpack.c.bf16 %v3002_v40, %v3001_v12  ;;  %10927 = vmatmul.mubr.bf16.vlgmr.msra.gmra.mxu0 %v3468_v14  ;;  %v2917_v15 = vadd.f32 %v13618_v16, %v2628_v56  ;;  %v16072_v12 = vld [vmem:[#allocation31_spill] sm:$0xff] }
 0x30a   : > { %v2630_v18 = vpop.f32.mrf.mxu0 }
 0x30b   : > { %v2631_v54 = vadd.f32 %v2630_v18, %v16067_v32  ;;  %v10852_v47 = vpop.f32.mrf.mxu1  ;;  %10899 = vmatmul.mubr.bf16.gmra.mxu1 %v3038_v51  ;;  %v3003_v46 = vmax.f32 %v2917_v15, 0.0 }
 0x30c   : > { %v2632_v22 = vpop.f32.mrf.mxu0  ;;  %v3173_v16 = vadd.f32 %v10852_v47, %v13656_v45  ;;  %v16073_v47 = vld [vmem:[#allocation32_spill] sm:$0xff] }
 0x30d   : > { %v2920_v36 = vadd.f32 %v13629_v21, %v2631_v54  ;;  %v3164_v57 = vpop.f32.mrf.mxu1 }
 0x30e   : > { %v2635_v61 = vpop.f32.mrf.mxu0  ;;  %v3165_v29 = vadd.f32 %v13656_v45, %v3164_v57  ;;  %v3409_v28 = vmax.f32 %v3173_v16, 0.0 }
 0x30f   : > { %v3004_v20 = vmax.f32 %v2920_v36, 0.0  ;;  %v2636_v17 = vadd.f32 %v2635_v61, %v16068_v5  ;;  %v10853_v26 = vpop.f32.mrf.mxu1 }
 0x310   : > { %v3176_v39 = vadd.f32 %v10853_v26, %v13656_v45  ;;  %v2637_v52 = vpop.f32.mrf.mxu0  ;;  %v3407_v63 = vmax.f32 %v3165_v29, 0.0 }
 0x311   : > { %v3167_v49 = vpop.f32.mrf.mxu1  ;;  %v3039_v19 = vpack.c.bf16 %v3004_v20, %v3003_v46  ;;  %v2925_v21 = vadd.f32 %v13615_v8, %v2636_v17  ;;  %v11633_v46 = vld [vmem:[%s16052_s7 + $0x10] sm:$0xff]  }
 0x312   : > { %v3168_v24 = vadd.f32 %v13656_v45, %v3167_v49  ;;  %v2638_v48 = vpop.f32.mrf.mxu0  ;;  %v3410_v42 = vmax.f32 %v3176_v39, 0.0  ;;  %11000 = vmatprep.subr.bf16.mxu1 %v11633_v46 }
 0x313   : > { %v2639_v55 = vadd.f32 %v2638_v48, %v16069_v23  ;;  %10902 = vmatprep.mubr.bf16.mxu1 %v3039_v19  ;;  %v3005_v53 = vmax.f32 %v2925_v21, 0.0  ;;  %11001 = vmatpush3.bf16.msra.mxu1 %v11633_v46 }
 0x314   : > { %v3408_v60 = vmax.f32 %v3168_v24, 0.0  ;;  %v2640_v4 = vpop.f32.mrf.mxu0  ;;  %v3470_v2 = vpack.c.bf16 %v3410_v42, %v3409_v28 }
 0x315   : > { %v2928_v62 = vadd.f32 %v13626_v43, %v2639_v55 }
 0x316   : > { %v2643_v30 = vpop.f32.mrf.mxu0  ;;  %v3469_v44 = vpack.c.bf16 %v3408_v60, %v3407_v63  ;;  %v11634_v63 = vld [vmem:[%s16052_s7 + $0x8] sm:$0xff]  }
 0x317   : > { %v3006_v8 = vmax.f32 %v2928_v62, 0.0  ;;  %v2644_v3 = vadd.f32 %v2643_v30, %v16070_v6  ;;  %11002 = vmatprep.subr.bf16.mxu1 %v11634_v63 }
 0x318   : > { %v2645_v11 = vpop.f32.mrf.mxu0  ;;  %10930 = vmatprep.mubr.bf16.mxu0 %v3469_v44  ;;  %11003 = vmatpush3.bf16.msra.mxu1 %v11634_v63 }
 0x319   : > { %v3040_v13 = vpack.c.bf16 %v3006_v8, %v3005_v53  ;;  %10931 = vmatmul.mubr.bf16.gmra.mxu0 %v3470_v2  ;;  %v2933_v37 = vadd.f32 %v13637_v10, %v2644_v3 }
 0x31a   : > { %v2646_v41 = vpop.f32.mrf.mxu0 }
 0x31b   : > { %v2647_v38 = vadd.f32 %v2646_v41, %v16071_v7  ;;  %v10856_v50 = vpop.f32.mrf.mxu1  ;;  %10903 = vmatmul.mubr.bf16.gmra.mxu1 %v3040_v13  ;;  %v3007_v9 = vmax.f32 %v2933_v37, 0.0  ;;  %v11635_v41 = vld [vmem:[%s16052_s7] sm:$0xff]  }
 0x31c   : > { %v2648_v43 = vpop.f32.mrf.mxu0  ;;  %v3189_v10 = vadd.f32 %v10856_v50, %v13656_v45  ;;  %11004 = vmatprep.subr.bf16.mxu1 %v11635_v41 }
 0x31d   : > { %v2936_v0 = vadd.f32 %v13648_v35, %v2647_v38  ;;  %v3180_v31 = vpop.f32.mrf.mxu1  ;;  %11005 = vmatpush3.bf16.msra.mxu1 %v11635_v41 }
 0x31e   : > { %v2651_v1 = vpop.f32.mrf.mxu0  ;;  %v3181_v34 = vadd.f32 %v13656_v45, %v3180_v31  ;;  %v3413_v20 = vmax.f32 %v3189_v10, 0.0 }
 0x31f   : > { %v3008_v25 = vmax.f32 %v2936_v0, 0.0  ;;  %v2652_v14 = vadd.f32 %v2651_v1, %v16072_v12  ;;  %v10857_v40 = vpop.f32.mrf.mxu1 }
 0x320   : > { %v3192_v56 = vadd.f32 %v10857_v40, %v13656_v45  ;;  %v2653_v33 = vpop.f32.mrf.mxu0  ;;  %v3411_v36 = vmax.f32 %v3181_v34, 0.0 }
 0x321   : > { %v3183_v51 = vpop.f32.mrf.mxu1  ;;  %v3041_v18 = vpack.c.bf16 %v3008_v25, %v3007_v9  ;;  %v2941_v35 = vadd.f32 %v13634_v27, %v2652_v14 }
 0x322   : > { %v3184_v15 = vadd.f32 %v13656_v45, %v3183_v51  ;;  %v2654_v32 = vpop.f32.mrf.mxu0  ;;  %v3414_v54 = vmax.f32 %v3192_v56, 0.0 }
 0x323   : > { %v2655_v22 = vadd.f32 %v2654_v32, %v16073_v47  ;;  %10906 = vmatprep.mubr.bf16.mxu1 %v3041_v18  ;;  %v3009_v26 = vmax.f32 %v2941_v35, 0.0 }
 0x324   : > { %v3412_v57 = vmax.f32 %v3184_v15, 0.0  ;;  %v2656_v61 = vpop.f32.mrf.mxu0  ;;  %v3472_v29 = vpack.c.bf16 %v3414_v54, %v3413_v20 }
 0x325   : > { %v2944_v5 = vadd.f32 %v13645_v58, %v2655_v22 }
 0x326   : > { %v3471_v17 = vpack.c.bf16 %v3412_v57, %v3411_v36 }
 0x327   : > { %v3010_v39 = vmax.f32 %v2944_v5, 0.0 }
 0x328   : > { %10934 = vmatprep.mubr.bf16.mxu0 %v3471_v17 }
 0x329   : > { %v3042_v27 = vpack.c.bf16 %v3010_v39, %v3009_v26  ;;  %10935 = vmatmul.mubr.bf16.gmra.mxu0 %v3472_v29 }
 0x32b   : > { %v10860_v52 = vpop.f32.mrf.mxu1  ;;  %10907 = vmatmul.mubr.bf16.gmra.mxu1 %v3042_v27 }
 0x32c   : > { %v3205_v48 = vadd.f32 %v10860_v52, %v13656_v45 }
 0x32d   : > { %v3196_v16 = vpop.f32.mrf.mxu1 }
 0x32e   : > { %v3197_v19 = vadd.f32 %v13656_v45, %v3196_v16  ;;  %v3417_v60 = vmax.f32 %v3205_v48, 0.0 }
 0x32f   : > { %v10861_v49 = vpop.f32.mrf.mxu1 }
 0x330   : > { %v3208_v24 = vadd.f32 %v10861_v49, %v13656_v45  ;;  %v3415_v23 = vmax.f32 %v3197_v19, 0.0 }
 0x331   : > { %v3199_v58 = vpop.f32.mrf.mxu1 }
 0x332   : > { %v3200_v21 = vadd.f32 %v13656_v45, %v3199_v58  ;;  %v3418_v42 = vmax.f32 %v3208_v24, 0.0 }
 0x334   : > { %v3416_v55 = vmax.f32 %v3200_v21, 0.0  ;;  %v3474_v59 = vpack.c.bf16 %v3418_v42, %v3417_v60 }
 0x336   : > { %v3473_v4 = vpack.c.bf16 %v3416_v55, %v3415_v23 }
 0x338   : > { %10938 = vmatprep.mubr.bf16.mxu0 %v3473_v4 }
 0x339   : > { %10939 = vmatmul.mubr.bf16.gmra.mxu0 %v3474_v59 }
 0x33b   : > { %v10864_v28 = vpop.f32.mrf.mxu1 }
 0x33c   : > { %v3221_v2 = vadd.f32 %v10864_v28, %v13656_v45 }
 0x33d   : > { %v3212_v62 = vpop.f32.mrf.mxu1 }
 0x33e   : > { %v3213_v44 = vadd.f32 %v13656_v45, %v3212_v62  ;;  %v3421_v37 = vmax.f32 %v3221_v2, 0.0 }
 0x33f   : > { %v10865_v30 = vpop.f32.mrf.mxu1 }
 0x340   : > { %v3224_v53 = vadd.f32 %v10865_v30, %v13656_v45  ;;  %v3419_v11 = vmax.f32 %v3213_v44, 0.0 }
 0x341   : > { %v3215_v8 = vpop.f32.mrf.mxu1 }
 0x342   : > { %v3216_v6 = vadd.f32 %v13656_v45, %v3215_v8  ;;  %v3422_v3 = vmax.f32 %v3224_v53, 0.0 }
 0x344   : > { %v3420_v13 = vmax.f32 %v3216_v6, 0.0  ;;  %v3476_v38 = vpack.c.bf16 %v3422_v3, %v3421_v37 }
 0x346   : > { %v3475_v7 = vpack.c.bf16 %v3420_v13, %v3419_v11 }
 0x348   : > { %10942 = vmatprep.mubr.bf16.mxu0 %v3475_v7 }
 0x349   : > { %10943 = vmatmul.mubr.bf16.gmra.mxu0 %v3476_v38 }
 0x34b   : > { %v10868_v50 = vpop.f32.mrf.mxu1 }
 0x34c   : > { %v3237_v9 = vadd.f32 %v10868_v50, %v13656_v45 }
 0x34d   : > { %v3228_v43 = vpop.f32.mrf.mxu1 }
 0x34e   : > { %v3229_v31 = vadd.f32 %v13656_v45, %v3228_v43  ;;  %v3425_v56 = vmax.f32 %v3237_v9, 0.0 }
 0x34f   : > { %v10869_v0 = vpop.f32.mrf.mxu1 }
 0x350   : > { %v3240_v1 = vadd.f32 %v10869_v0, %v13656_v45  ;;  %v3423_v40 = vmax.f32 %v3229_v31, 0.0 }
 0x351   : > { %v3231_v25 = vpop.f32.mrf.mxu1 }
 0x352   : > { %v3232_v12 = vadd.f32 %v13656_v45, %v3231_v25  ;;  %v3426_v14 = vmax.f32 %v3240_v1, 0.0 }
 0x354   : > { %v3424_v34 = vmax.f32 %v3232_v12, 0.0  ;;  %v3478_v10 = vpack.c.bf16 %v3426_v14, %v3425_v56 }
 0x356   : > { %v3477_v33 = vpack.c.bf16 %v3424_v34, %v3423_v40 }
 0x358   : > { %10946 = vmatprep.mubr.bf16.mxu0 %v3477_v33 }
 0x359   : > { %10947 = vmatmul.mubr.bf16.gmra.mxu0 %v3478_v10 }
 0x35b   : > { %v10872_v51 = vpop.f32.mrf.mxu1 }
 0x35c   : > { %v3253_v54 = vadd.f32 %v10872_v51, %v13656_v45 }
 0x35d   : > { %v3244_v18 = vpop.f32.mrf.mxu1 }
 0x35e   : > { %v3245_v32 = vadd.f32 %v13656_v45, %v3244_v18  ;;  %v3429_v46 = vmax.f32 %v3253_v54, 0.0  ;;  %v11636_v18 = vld [vmem:[%s15988_s9 + $0x38] sm:$0xff]  }
 0x35f   : > { %v10873_v15 = vpop.f32.mrf.mxu1  ;;  %11070 = vmatprep.subr.bf16.mxu0 %v11636_v18 }
 0x360   : > { %v3256_v35 = vadd.f32 %v10873_v15, %v13656_v45  ;;  %v3427_v57 = vmax.f32 %v3245_v32, 0.0  ;;  %11071 = vmatpush3.bf16.msra.mxu0 %v11636_v18 }
 0x361   : > { %v3247_v47 = vpop.f32.mrf.mxu1 }
 0x362   : > { %v3248_v22 = vadd.f32 %v13656_v45, %v3247_v47  ;;  %v3430_v36 = vmax.f32 %v3256_v35, 0.0 }
 0x364   : > { %v3428_v61 = vmax.f32 %v3248_v22, 0.0  ;;  %v3480_v5 = vpack.c.bf16 %v3430_v36, %v3429_v46 }
 0x366   : > { %v3479_v20 = vpack.c.bf16 %v3428_v61, %v3427_v57 }
 0x368   : > { %10950 = vmatprep.mubr.bf16.mxu0 %v3479_v20 }
 0x369   : > { %10951 = vmatmul.mubr.bf16.gmra.mxu0 %v3480_v5 }
 0x36b   : > { %v10876_v17 = vpop.f32.mrf.mxu1 }
 0x36c   : > { %v3269_v52 = vadd.f32 %v10876_v17, %v13656_v45 }
 0x36d   : > { %v3260_v26 = vpop.f32.mrf.mxu1 }
 0x36e   : > { %v3261_v39 = vadd.f32 %v13656_v45, %v3260_v26  ;;  %v3433_v58 = vmax.f32 %v3269_v52, 0.0 }
 0x36f   : > { %v10877_v29 = vpop.f32.mrf.mxu1 }
 0x370   : > { %v3272_v27 = vadd.f32 %v10877_v29, %v13656_v45  ;;  %v3431_v24 = vmax.f32 %v3261_v39, 0.0  ;;  %v11637_v29 = vld [vmem:[%s15988_s9 + $0x30] sm:$0xff]  }
 0x371   : > { %v3263_v16 = vpop.f32.mrf.mxu1  ;;  %11072 = vmatprep.subr.bf16.mxu0 %v11637_v29 }
 0x372   : > { %v3264_v49 = vadd.f32 %v13656_v45, %v3263_v16  ;;  %v3434_v19 = vmax.f32 %v3272_v27, 0.0  ;;  %11073 = vmatpush3.bf16.msra.mxu0 %v11637_v29 }
 0x374   : > { %v3432_v48 = vmax.f32 %v3264_v49, 0.0  ;;  %v3482_v42 = vpack.c.bf16 %v3434_v19, %v3433_v58 }
 0x376   : > { %v3481_v21 = vpack.c.bf16 %v3432_v48, %v3431_v24 }
 0x378   : > { %10954 = vmatprep.mubr.bf16.mxu0 %v3481_v21 }
 0x379   : > { %10955 = vmatmul.mubr.bf16.gmra.mxu0 %v3482_v42 }
 0x37b   : > { %v10880_v23 = vpop.f32.mrf.mxu1 }
 0x37c   : > { %v3285_v59 = vadd.f32 %v10880_v23, %v13656_v45 }
 0x37d   : > { %v3276_v55 = vpop.f32.mrf.mxu1 }
 0x37e   : > { %v3277_v60 = vadd.f32 %v13656_v45, %v3276_v55  ;;  %v3437_v2 = vmax.f32 %v3285_v59, 0.0 }
 0x37f   : > { %v10881_v63 = vpop.f32.mrf.mxu1 }
 0x380   : > { %v3288_v4 = vadd.f32 %v10881_v63, %v13656_v45  ;;  %v3435_v44 = vmax.f32 %v3277_v60, 0.0  ;;  %v11638_v60 = vld [vmem:[%s15988_s9 + $0x28] sm:$0xff]  }
 0x381   : > { %v3279_v28 = vpop.f32.mrf.mxu1  ;;  %11074 = vmatprep.subr.bf16.mxu0 %v11638_v60 }
 0x382   : > { %v3280_v62 = vadd.f32 %v13656_v45, %v3279_v28  ;;  %v3438_v30 = vmax.f32 %v3288_v4, 0.0  ;;  %11075 = vmatpush3.bf16.msra.mxu0 %v11638_v60 }
 0x384   : > { %v3436_v53 = vmax.f32 %v3280_v62, 0.0  ;;  %v3484_v6 = vpack.c.bf16 %v3438_v30, %v3437_v2 }
 0x386   : > { %v3483_v8 = vpack.c.bf16 %v3436_v53, %v3435_v44 }
 0x388   : > { %10958 = vmatprep.mubr.bf16.mxu0 %v3483_v8 }
 0x389   : > { %10959 = vmatmul.mubr.bf16.gmra.mxu0 %v3484_v6  ;;  %v13757_v6 = vld [vmem:[%s16074_s6] ss:$0 sm:$0xff] }
 0x38b   : > { %v10884_v3 = vpop.f32.mrf.mxu1 }
 0x38c   : > { %v3301_v7 = vadd.f32 %v10884_v3, %v13656_v45 }
 0x38d   : > { %v3292_v11 = vpop.f32.mrf.mxu1 }
 0x38e   : > { %v3293_v41 = vadd.f32 %v13656_v45, %v3292_v11  ;;  %v3441_v1 = vmax.f32 %v3301_v7, 0.0 }
 0x38f   : > { %v10885_v13 = vpop.f32.mrf.mxu1 }
 0x390   : > { %v3304_v37 = vadd.f32 %v10885_v13, %v13656_v45  ;;  %v3439_v0 = vmax.f32 %v3293_v41, 0.0 }
 0x391   : > { %v3295_v38 = vpop.f32.mrf.mxu1 }
 0x392   : > { %v3296_v50 = vadd.f32 %v13656_v45, %v3295_v38  ;;  %v3442_v43 = vmax.f32 %v3304_v37, 0.0 }
 0x394   : > { %v3440_v31 = vmax.f32 %v3296_v50, 0.0  ;;  %v3486_v25 = vpack.c.bf16 %v3442_v43, %v3441_v1 }
 0x396   : > { %v3485_v9 = vpack.c.bf16 %v3440_v31, %v3439_v0 }
 0x398   : > { %10962 = vmatprep.mubr.bf16.mxu0 %v3485_v9 }
 0x399   : > { %10963 = vmatmul.mubr.bf16.gmra.mxu0 %v3486_v25 }
 0x39b   : > { %v10888_v12 = vpop.f32.mrf.mxu1 }
 0x39c   : > { %v3317_v33 = vadd.f32 %v10888_v12, %v13656_v45 }
 0x39d   : > { %v3308_v14 = vpop.f32.mrf.mxu1 }
 0x39e   : > { %v3309_v34 = vadd.f32 %v13656_v45, %v3308_v14  ;;  %v3445_v54 = vmax.f32 %v3317_v33, 0.0 }
 0x39f   : > { %v10889_v40 = vpop.f32.mrf.mxu1 }
 0x3a0   : > { %v3320_v56 = vadd.f32 %v10889_v40, %v13656_v45  ;;  %v3443_v32 = vmax.f32 %v3309_v34, 0.0  ;;  %v11639_v40 = vld [vmem:[%s15988_s9 + $0x20] sm:$0xff]  }
 0x3a1   : > { %v3311_v10 = vpop.f32.mrf.mxu1  ;;  %11076 = vmatprep.subr.bf16.mxu0 %v11639_v40 }
 0x3a2   : > { %v3312_v51 = vadd.f32 %v13656_v45, %v3311_v10  ;;  %v3446_v15 = vmax.f32 %v3320_v56, 0.0  ;;  %11077 = vmatpush3.bf16.msra.mxu0 %v11639_v40 }
 0x3a4   : > { %v3444_v35 = vmax.f32 %v3312_v51, 0.0  ;;  %v3488_v22 = vpack.c.bf16 %v3446_v15, %v3445_v54 }
 0x3a6   : > { %v3487_v47 = vpack.c.bf16 %v3444_v35, %v3443_v32 }
 0x3a8   : > { %10966 = vmatprep.mubr.bf16.mxu0 %v3487_v47 }
 0x3a9   : > { %10967 = vmatmul.mubr.bf16.gmra.mxu0 %v3488_v22 }
 0x3ab   : > { %v10892_v36 = vpop.f32.mrf.mxu1 }
 0x3ac   : > { %v3333_v5 = vadd.f32 %v10892_v36, %v13656_v45 }
 0x3ad   : > { %v3324_v57 = vpop.f32.mrf.mxu1 }
 0x3ae   : > { %v3325_v46 = vadd.f32 %v13656_v45, %v3324_v57  ;;  %v3449_v16 = vmax.f32 %v3333_v5, 0.0 }
 0x3af   : > { %v10893_v61 = vpop.f32.mrf.mxu1 }
 0x3b0   : > { %v3336_v20 = vadd.f32 %v10893_v61, %v13656_v45  ;;  %v3447_v27 = vmax.f32 %v3325_v46, 0.0 }
 0x3b1   : > { %v3327_v17 = vpop.f32.mrf.mxu1 }
 0x3b2   : > { %v3328_v26 = vadd.f32 %v13656_v45, %v3327_v17  ;;  %v3450_v39 = vmax.f32 %v3336_v20, 0.0 }
 0x3b4   : > { %v3448_v52 = vmax.f32 %v3328_v26, 0.0  ;;  %v3490_v19 = vpack.c.bf16 %v3450_v39, %v3449_v16 }
 0x3b6   : > { %v3489_v49 = vpack.c.bf16 %v3448_v52, %v3447_v27 }
 0x3b8   : > { %10970 = vmatprep.mubr.bf16.mxu0 %v3489_v49 }
 0x3b9   : > { %10971 = vmatmul.mubr.bf16.gmra.mxu0 %v3490_v19 }
 0x3bb   : > { %v10896_v24 = vpop.f32.mrf.mxu1 }
 0x3bc   : > { %v3349_v23 = vadd.f32 %v10896_v24, %v13656_v45 }
 0x3bd   : > { %v3340_v48 = vpop.f32.mrf.mxu1 }
 0x3be   : > { %v3341_v21 = vadd.f32 %v13656_v45, %v3340_v48  ;;  %v3453_v62 = vmax.f32 %v3349_v23, 0.0  ;;  %v11640_v48 = vld [vmem:[%s15988_s9 + $0x18] sm:$0xff]  }
 0x3bf   : > { %v10897_v58 = vpop.f32.mrf.mxu1  ;;  %11078 = vmatprep.subr.bf16.mxu0 %v11640_v48 }
 0x3c0   : > { %v3352_v42 = vadd.f32 %v10897_v58, %v13656_v45  ;;  %v3451_v59 = vmax.f32 %v3341_v21, 0.0  ;;  %11079 = vmatpush3.bf16.msra.mxu0 %v11640_v48 }
 0x3c1   : > { %v3343_v55 = vpop.f32.mrf.mxu1 }
 0x3c2   : > { %v3344_v63 = vadd.f32 %v13656_v45, %v3343_v55  ;;  %v3454_v4 = vmax.f32 %v3352_v42, 0.0 }
 0x3c4   : > { %v3452_v28 = vmax.f32 %v3344_v63, 0.0  ;;  %v3492_v44 = vpack.c.bf16 %v3454_v4, %v3453_v62 }
 0x3c6   : > { %v3491_v30 = vpack.c.bf16 %v3452_v28, %v3451_v59 }
 0x3c8   : > { %10974 = vmatprep.mubr.bf16.mxu0 %v3491_v30 }
 0x3c9   : > { %v10928_v53 = vpop.f32.mrf.mxu0  ;;  %10975 = vmatmul.mubr.bf16.gmra.mxu0 %v3492_v44 }
 0x3ca   : > { %v3613_v37 = vadd.f32 %v10928_v53, %v13757_v6 }
 0x3cb   : > { %v10900_v2 = vpop.f32.mrf.mxu1  ;;  %v3604_v8 = vpop.f32.mrf.mxu0 }
 0x3cc   : > { %v3605_v13 = vadd.f32 %v13757_v6, %v3604_v8  ;;  %v3365_v31 = vadd.f32 %v10900_v2, %v13656_v45  ;;  %v3861_v34 = vmax.f32 %v3613_v37, 0.0 }
 0x3cd   : > { %v3356_v3 = vpop.f32.mrf.mxu1  ;;  %v10929_v11 = vpop.f32.mrf.mxu0 }
 0x3ce   : > { %v3616_v41 = vadd.f32 %v10929_v11, %v13757_v6  ;;  %v3357_v50 = vadd.f32 %v13656_v45, %v3356_v3  ;;  %v3859_v25 = vmax.f32 %v3605_v13, 0.0  ;;  %v3457_v18 = vmax.f32 %v3365_v31, 0.0 }
 0x3cf   : > { %v10901_v7 = vpop.f32.mrf.mxu1  ;;  %v3607_v38 = vpop.f32.mrf.mxu0 }
 0x3d0   : > { %v3368_v43 = vadd.f32 %v10901_v7, %v13656_v45  ;;  %v3608_v0 = vadd.f32 %v13757_v6, %v3607_v38  ;;  %v3862_v1 = vmax.f32 %v3616_v41, 0.0  ;;  %v3455_v33 = vmax.f32 %v3357_v50, 0.0 }
 0x3d1   : > { %v3359_v9 = vpop.f32.mrf.mxu1 }
 0x3d2   : > { %v3860_v12 = vmax.f32 %v3608_v0, 0.0  ;;  %v3360_v14 = vadd.f32 %v13656_v45, %v3359_v9  ;;  %v3458_v56 = vmax.f32 %v3368_v43, 0.0  ;;  %v3924_v15 = vpack.c.bf16 %v3862_v1, %v3861_v34  ;;  %v11641_v9 = vld [vmem:[%s15988_s9 + $0x10] sm:$0xff]  }
 0x3d3   : > { %11080 = vmatprep.subr.bf16.mxu0 %v11641_v9 }
 0x3d4   : > { %v3456_v10 = vmax.f32 %v3360_v14, 0.0  ;;  %v3923_v51 = vpack.c.bf16 %v3860_v12, %v3859_v25  ;;  %v3494_v35 = vpack.c.bf16 %v3458_v56, %v3457_v18  ;;  %11081 = vmatpush3.bf16.msra.mxu0 %v11641_v9 }
 0x3d6   : > { %11006 = vmatprep.mubr.bf16.mxu1 %v3923_v51  ;;  %v3493_v32 = vpack.c.bf16 %v3456_v10, %v3455_v33 }
 0x3d7   : > { %11007 = vmatmul.mubr.bf16.vlgmr.msra.gmra.mxu1 %v3924_v15 }
 0x3d8   : > { %10978 = vmatprep.mubr.bf16.mxu0 %v3493_v32 }
 0x3d9   : > { %v10932_v54 = vpop.f32.mrf.mxu0  ;;  %10979 = vmatmul.mubr.bf16.gmra.mxu0 %v3494_v35 }
 0x3da   : > { %v3629_v20 = vadd.f32 %v10932_v54, %v13757_v6 }
 0x3db   : > { %v10904_v47 = vpop.f32.mrf.mxu1  ;;  %v3620_v22 = vpop.f32.mrf.mxu0 }
 0x3dc   : > { %v3621_v61 = vadd.f32 %v13757_v6, %v3620_v22  ;;  %v3381_v27 = vadd.f32 %v10904_v47, %v13656_v45  ;;  %v3865_v58 = vmax.f32 %v3629_v20, 0.0 }
 0x3dd   : > { %v3372_v36 = vpop.f32.mrf.mxu1  ;;  %v10933_v57 = vpop.f32.mrf.mxu0 }
 0x3de   : > { %v3632_v46 = vadd.f32 %v10933_v57, %v13757_v6  ;;  %v3373_v26 = vadd.f32 %v13656_v45, %v3372_v36  ;;  %v3863_v49 = vmax.f32 %v3621_v61, 0.0  ;;  %v3461_v63 = vmax.f32 %v3381_v27, 0.0 }
 0x3df   : > { %v10905_v5 = vpop.f32.mrf.mxu1  ;;  %v3623_v17 = vpop.f32.mrf.mxu0 }
 0x3e0   : > { %v3384_v29 = vadd.f32 %v10905_v5, %v13656_v45  ;;  %v3624_v39 = vadd.f32 %v13757_v6, %v3623_v17  ;;  %v3866_v52 = vmax.f32 %v3632_v46, 0.0  ;;  %v3459_v42 = vmax.f32 %v3373_v26, 0.0  ;;  %v11642_v46 = vld [vmem:[%s15988_s9 + $0x8] sm:$0xff]  }
 0x3e1   : > { %v3375_v16 = vpop.f32.mrf.mxu1  ;;  %11082 = vmatprep.subr.bf16.mxu0 %v11642_v46 }
 0x3e2   : > { %v3864_v19 = vmax.f32 %v3624_v39, 0.0  ;;  %v3376_v24 = vadd.f32 %v13656_v45, %v3375_v16  ;;  %v3462_v21 = vmax.f32 %v3384_v29, 0.0  ;;  %v3926_v60 = vpack.c.bf16 %v3866_v52, %v3865_v58  ;;  %11083 = vmatpush3.bf16.msra.mxu0 %v11642_v46 }
 0x3e4   : > { %v3460_v23 = vmax.f32 %v3376_v24, 0.0  ;;  %v3925_v55 = vpack.c.bf16 %v3864_v19, %v3863_v49  ;;  %v3496_v59 = vpack.c.bf16 %v3462_v21, %v3461_v63  ;;  %v11643_v21 = vld [vmem:[%s15988_s9] sm:$0xff]  }
 0x3e5   : > { %11084 = vmatprep.subr.bf16.mxu0 %v11643_v21 }
 0x3e6   : > { %11010 = vmatprep.mubr.bf16.mxu1 %v3925_v55  ;;  %v3495_v4 = vpack.c.bf16 %v3460_v23, %v3459_v42  ;;  %11085 = vmatpush3.bf16.msra.mxu0 %v11643_v21 }
 0x3e7   : > { %11011 = vmatmul.mubr.bf16.gmra.mxu1 %v3926_v60 }
 0x3e8   : > { %10982 = vmatprep.mubr.bf16.mxu0 %v3495_v4 }
 0x3e9   : > { %v10936_v28 = vpop.f32.mrf.mxu0  ;;  %10983 = vmatmul.mubr.bf16.gmra.mxu0 %v3496_v59 }
 0x3ea   : > { %v3645_v3 = vadd.f32 %v10936_v28, %v13757_v6 }
 0x3eb   : > { %v10908_v62 = vpop.f32.mrf.mxu1  ;;  %v3636_v30 = vpop.f32.mrf.mxu0 }
 0x3ec   : > { %v3637_v2 = vadd.f32 %v13757_v6, %v3636_v30  ;;  %v3397_v38 = vadd.f32 %v10908_v62, %v13656_v45  ;;  %v3869_v25 = vmax.f32 %v3645_v3, 0.0 }
 0x3ed   : > { %v3388_v44 = vpop.f32.mrf.mxu1  ;;  %v10937_v53 = vpop.f32.mrf.mxu0 }
 0x3ee   : > { %v3648_v8 = vadd.f32 %v10937_v53, %v13757_v6  ;;  %v3389_v41 = vadd.f32 %v13656_v45, %v3388_v44  ;;  %v3867_v0 = vmax.f32 %v3637_v2, 0.0  ;;  %v3465_v56 = vmax.f32 %v3397_v38, 0.0 }
 0x3ef   : > { %v10909_v11 = vpop.f32.mrf.mxu1  ;;  %v3639_v13 = vpop.f32.mrf.mxu0 }
 0x3f0   : > { %v3400_v37 = vadd.f32 %v10909_v11, %v13656_v45  ;;  %v3640_v7 = vadd.f32 %v13757_v6, %v3639_v13  ;;  %v3870_v50 = vmax.f32 %v3648_v8, 0.0  ;;  %v3463_v14 = vmax.f32 %v3389_v41, 0.0 }
 0x3f1   : > { %v3391_v43 = vpop.f32.mrf.mxu1 }
 0x3f2   : > { %v3868_v31 = vmax.f32 %v3640_v7, 0.0  ;;  %v3392_v1 = vadd.f32 %v13656_v45, %v3391_v43  ;;  %v3466_v12 = vmax.f32 %v3400_v37, 0.0  ;;  %v3928_v33 = vpack.c.bf16 %v3870_v50, %v3869_v25 }
 0x3f4   : > { %v3464_v40 = vmax.f32 %v3392_v1, 0.0  ;;  %v3927_v34 = vpack.c.bf16 %v3868_v31, %v3867_v0  ;;  %v3498_v51 = vpack.c.bf16 %v3466_v12, %v3465_v56 }
 0x3f6   : > { %11014 = vmatprep.mubr.bf16.mxu1 %v3927_v34  ;;  %v3497_v10 = vpack.c.bf16 %v3464_v40, %v3463_v14 }
 0x3f7   : > { %11015 = vmatmul.mubr.bf16.gmra.mxu1 %v3928_v33 }
 0x3f8   : > { %10986 = vmatprep.mubr.bf16.mxu0 %v3497_v10 }
 0x3f9   : > { %v10940_v18 = vpop.f32.mrf.mxu0  ;;  %10987 = vmatmul.mubr.bf16.gmra.mxu0 %v3498_v51 }
 0x3fa   : > { %v3661_v54 = vadd.f32 %v10940_v18, %v13757_v6 }
 0x3fb   : > { %v3652_v45 = vpop.f32.mrf.mxu0 }
 0x3fc   : > { %v3653_v32 = vadd.f32 %v13757_v6, %v3652_v45  ;;  %v3873_v20 = vmax.f32 %v3661_v54, 0.0 }
 0x3fd   : > { %v10941_v15 = vpop.f32.mrf.mxu0 }
 0x3fe   : > { %v3664_v35 = vadd.f32 %v10941_v15, %v13757_v6  ;;  %v3871_v57 = vmax.f32 %v3653_v32, 0.0 }
 0x3ff   : > { %v3655_v47 = vpop.f32.mrf.mxu0 }
 0x400   : > { %v3656_v22 = vadd.f32 %v13757_v6, %v3655_v47  ;;  %v3874_v36 = vmax.f32 %v3664_v35, 0.0 }
 0x402   : > { %v3872_v61 = vmax.f32 %v3656_v22, 0.0  ;;  %v3930_v17 = vpack.c.bf16 %v3874_v36, %v3873_v20 }
 0x404   : > { %v3929_v5 = vpack.c.bf16 %v3872_v61, %v3871_v57 }
 0x406   : > { %11018 = vmatprep.mubr.bf16.mxu1 %v3929_v5 }
 0x407   : > { %11019 = vmatmul.mubr.bf16.gmra.mxu1 %v3930_v17 }
 0x409   : > { %v10944_v26 = vpop.f32.mrf.mxu0 }
 0x40a   : > { %v3677_v16 = vadd.f32 %v10944_v26, %v13757_v6 }
 0x40b   : > { %v3668_v29 = vpop.f32.mrf.mxu0 }
 0x40c   : > { %v3669_v27 = vadd.f32 %v13757_v6, %v3668_v29  ;;  %v3877_v42 = vmax.f32 %v3677_v16, 0.0 }
 0x40d   : > { %v10945_v39 = vpop.f32.mrf.mxu0 }
 0x40e   : > { %v3680_v52 = vadd.f32 %v10945_v39, %v13757_v6  ;;  %v3875_v48 = vmax.f32 %v3669_v27, 0.0 }
 0x40f   : > { %v3671_v49 = vpop.f32.mrf.mxu0 }
 0x410   : > { %v3672_v19 = vadd.f32 %v13757_v6, %v3671_v49  ;;  %v3878_v24 = vmax.f32 %v3680_v52, 0.0 }
 0x412   : > { %v3876_v58 = vmax.f32 %v3672_v19, 0.0  ;;  %v3932_v55 = vpack.c.bf16 %v3878_v24, %v3877_v42 }
 0x414   : > { %v3931_v23 = vpack.c.bf16 %v3876_v58, %v3875_v48 }
 0x416   : > { %11022 = vmatprep.mubr.bf16.mxu1 %v3931_v23 }
 0x417   : > { %11023 = vmatmul.mubr.bf16.gmra.mxu1 %v3932_v55 }
 0x419   : > { %v10948_v63 = vpop.f32.mrf.mxu0 }
 0x41a   : > { %v3693_v62 = vadd.f32 %v10948_v63, %v13757_v6 }
 0x41b   : > { %v3684_v60 = vpop.f32.mrf.mxu0 }
 0x41c   : > { %v3685_v59 = vadd.f32 %v13757_v6, %v3684_v60  ;;  %v3881_v3 = vmax.f32 %v3693_v62, 0.0 }
 0x41d   : > { %v10949_v4 = vpop.f32.mrf.mxu0 }
 0x41e   : > { %v3696_v28 = vadd.f32 %v10949_v4, %v13757_v6  ;;  %v3879_v2 = vmax.f32 %v3685_v59, 0.0 }
 0x41f   : > { %v3687_v30 = vpop.f32.mrf.mxu0 }
 0x420   : > { %v3688_v44 = vadd.f32 %v13757_v6, %v3687_v30  ;;  %v3882_v53 = vmax.f32 %v3696_v28, 0.0 }
 0x422   : > { %v3880_v8 = vmax.f32 %v3688_v44, 0.0  ;;  %v3934_v13 = vpack.c.bf16 %v3882_v53, %v3881_v3 }
 0x424   : > { %v3933_v11 = vpack.c.bf16 %v3880_v8, %v3879_v2 }
 0x426   : > { %11026 = vmatprep.mubr.bf16.mxu1 %v3933_v11 }
 0x427   : > { %11027 = vmatmul.mubr.bf16.gmra.mxu1 %v3934_v13 }
 0x429   : > { %v10952_v41 = vpop.f32.mrf.mxu0 }
 0x42a   : > { %v3709_v43 = vadd.f32 %v10952_v41, %v13757_v6 }
 0x42b   : > { %v3700_v37 = vpop.f32.mrf.mxu0 }
 0x42c   : > { %v3701_v38 = vadd.f32 %v13757_v6, %v3700_v37  ;;  %v3885_v12 = vmax.f32 %v3709_v43, 0.0  ;;  %v11644_v37 = vld [vmem:[%s15990_s11 + $0x38] sm:$0xff]  }
 0x42d   : > { %v10953_v7 = vpop.f32.mrf.mxu0  ;;  %11150 = vmatprep.subr.bf16.mxu1 %v11644_v37 }
 0x42e   : > { %v3712_v50 = vadd.f32 %v10953_v7, %v13757_v6  ;;  %v3883_v9 = vmax.f32 %v3701_v38, 0.0  ;;  %11151 = vmatpush3.bf16.msra.mxu1 %v11644_v37 }
 0x42f   : > { %v3703_v0 = vpop.f32.mrf.mxu0 }
 0x430   : > { %v3704_v31 = vadd.f32 %v13757_v6, %v3703_v0  ;;  %v3886_v1 = vmax.f32 %v3712_v50, 0.0 }
 0x432   : > { %v3884_v25 = vmax.f32 %v3704_v31, 0.0  ;;  %v3936_v40 = vpack.c.bf16 %v3886_v1, %v3885_v12 }
 0x434   : > { %v3935_v14 = vpack.c.bf16 %v3884_v25, %v3883_v9 }
 0x436   : > { %11030 = vmatprep.mubr.bf16.mxu1 %v3935_v14 }
 0x437   : > { %11031 = vmatmul.mubr.bf16.gmra.mxu1 %v3936_v40 }
 0x439   : > { %v10956_v34 = vpop.f32.mrf.mxu0 }
 0x43a   : > { %v3725_v18 = vadd.f32 %v10956_v34, %v13757_v6 }
 0x43b   : > { %v3716_v56 = vpop.f32.mrf.mxu0 }
 0x43c   : > { %v3717_v10 = vadd.f32 %v13757_v6, %v3716_v56  ;;  %v3889_v47 = vmax.f32 %v3725_v18, 0.0 }
 0x43d   : > { %v10957_v33 = vpop.f32.mrf.mxu0 }
 0x43e   : > { %v3728_v51 = vadd.f32 %v10957_v33, %v13757_v6  ;;  %v3887_v35 = vmax.f32 %v3717_v10, 0.0  ;;  %v11645_v33 = vld [vmem:[%s15990_s11 + $0x30] sm:$0xff]  }
 0x43f   : > { %v3719_v45 = vpop.f32.mrf.mxu0  ;;  %11152 = vmatprep.subr.bf16.mxu1 %v11645_v33 }
 0x440   : > { %v3720_v15 = vadd.f32 %v13757_v6, %v3719_v45  ;;  %v3890_v32 = vmax.f32 %v3728_v51, 0.0  ;;  %11153 = vmatpush3.bf16.msra.mxu1 %v11645_v33 }
 0x442   : > { %v3888_v54 = vmax.f32 %v3720_v15, 0.0  ;;  %v3938_v36 = vpack.c.bf16 %v3890_v32, %v3889_v47 }
 0x444   : > { %v3937_v22 = vpack.c.bf16 %v3888_v54, %v3887_v35 }
 0x446   : > { %11034 = vmatprep.mubr.bf16.mxu1 %v3937_v22 }
 0x447   : > { %11035 = vmatmul.mubr.bf16.gmra.mxu1 %v3938_v36 }
 0x449   : > { %v10960_v57 = vpop.f32.mrf.mxu0 }
 0x44a   : > { %v3741_v17 = vadd.f32 %v10960_v57, %v13757_v6 }
 0x44b   : > { %v3732_v61 = vpop.f32.mrf.mxu0 }
 0x44c   : > { %v3733_v20 = vadd.f32 %v13757_v6, %v3732_v61  ;;  %v3893_v16 = vmax.f32 %v3741_v17, 0.0 }
 0x44d   : > { %v10961_v46 = vpop.f32.mrf.mxu0 }
 0x44e   : > { %v3744_v5 = vadd.f32 %v10961_v46, %v13757_v6  ;;  %v3891_v27 = vmax.f32 %v3733_v20, 0.0  ;;  %v11646_v20 = vld [vmem:[%s15990_s11 + $0x28] sm:$0xff]  }
 0x44f   : > { %v3735_v26 = vpop.f32.mrf.mxu0  ;;  %11154 = vmatprep.subr.bf16.mxu1 %v11646_v20 }
 0x450   : > { %v3736_v29 = vadd.f32 %v13757_v6, %v3735_v26  ;;  %v3894_v39 = vmax.f32 %v3744_v5, 0.0  ;;  %11155 = vmatpush3.bf16.msra.mxu1 %v11646_v20 }
 0x452   : > { %v3892_v52 = vmax.f32 %v3736_v29, 0.0  ;;  %v3940_v19 = vpack.c.bf16 %v3894_v39, %v3893_v16 }
 0x454   : > { %v3939_v49 = vpack.c.bf16 %v3892_v52, %v3891_v27  ;;  %v13854_v52 = vld [vmem:[%s15987_s8] ss:$0 sm:$0xff] }
 0x456   : > { %11038 = vmatprep.mubr.bf16.mxu1 %v3939_v49 }
 0x457   : > { %11039 = vmatmul.mubr.bf16.gmra.mxu1 %v3940_v19 }
 0x459   : > { %v10964_v24 = vpop.f32.mrf.mxu0 }
 0x45a   : > { %v3757_v23 = vadd.f32 %v10964_v24, %v13757_v6 }
 0x45b   : > { %v3748_v48 = vpop.f32.mrf.mxu0 }
 0x45c   : > { %v3749_v21 = vadd.f32 %v13757_v6, %v3748_v48  ;;  %v3897_v28 = vmax.f32 %v3757_v23, 0.0 }
 0x45d   : > { %v10965_v58 = vpop.f32.mrf.mxu0 }
 0x45e   : > { %v3760_v42 = vadd.f32 %v10965_v58, %v13757_v6  ;;  %v3895_v4 = vmax.f32 %v3749_v21, 0.0 }
 0x45f   : > { %v3751_v55 = vpop.f32.mrf.mxu0 }
 0x460   : > { %v3752_v63 = vadd.f32 %v13757_v6, %v3751_v55  ;;  %v3898_v60 = vmax.f32 %v3760_v42, 0.0 }
 0x462   : > { %v3896_v59 = vmax.f32 %v3752_v63, 0.0  ;;  %v3942_v30 = vpack.c.bf16 %v3898_v60, %v3897_v28 }
 0x464   : > { %v3941_v62 = vpack.c.bf16 %v3896_v59, %v3895_v4 }
 0x466   : > { %11042 = vmatprep.mubr.bf16.mxu1 %v3941_v62 }
 0x467   : > { %11043 = vmatmul.mubr.bf16.gmra.mxu1 %v3942_v30 }
 0x469   : > { %v10968_v44 = vpop.f32.mrf.mxu0 }
 0x46a   : > { %v3773_v11 = vadd.f32 %v10968_v44, %v13757_v6  ;;  %v11647_v44 = vld [vmem:[%s15990_s11 + $0x20] sm:$0xff]  }
 0x46b   : > { %v3764_v53 = vpop.f32.mrf.mxu0  ;;  %11156 = vmatprep.subr.bf16.mxu1 %v11647_v44 }
 0x46c   : > { %v3765_v8 = vadd.f32 %v13757_v6, %v3764_v53  ;;  %v3901_v43 = vmax.f32 %v3773_v11, 0.0  ;;  %11157 = vmatpush3.bf16.msra.mxu1 %v11647_v44 }
 0x46d   : > { %v10969_v2 = vpop.f32.mrf.mxu0 }
 0x46e   : > { %v3776_v3 = vadd.f32 %v10969_v2, %v13757_v6  ;;  %v3899_v38 = vmax.f32 %v3765_v8, 0.0 }
 0x46f   : > { %v3767_v13 = vpop.f32.mrf.mxu0 }
 0x470   : > { %v3768_v41 = vadd.f32 %v13757_v6, %v3767_v13  ;;  %v3902_v7 = vmax.f32 %v3776_v3, 0.0 }
 0x472   : > { %v3900_v50 = vmax.f32 %v3768_v41, 0.0  ;;  %v3944_v31 = vpack.c.bf16 %v3902_v7, %v3901_v43 }
 0x474   : > { %v3943_v0 = vpack.c.bf16 %v3900_v50, %v3899_v38 }
 0x476   : > { %11046 = vmatprep.mubr.bf16.mxu1 %v3943_v0 }
 0x477   : > { %11047 = vmatmul.mubr.bf16.gmra.mxu1 %v3944_v31 }
 0x479   : > { %v10972_v1 = vpop.f32.mrf.mxu0 }
 0x47a   : > { %v3789_v40 = vadd.f32 %v10972_v1, %v13757_v6 }
 0x47b   : > { %v3780_v9 = vpop.f32.mrf.mxu0 }
 0x47c   : > { %v3781_v12 = vadd.f32 %v13757_v6, %v3780_v9  ;;  %v3905_v45 = vmax.f32 %v3789_v40, 0.0 }
 0x47d   : > { %v10973_v25 = vpop.f32.mrf.mxu0 }
 0x47e   : > { %v3792_v14 = vadd.f32 %v10973_v25, %v13757_v6  ;;  %v3903_v51 = vmax.f32 %v3781_v12, 0.0 }
 0x47f   : > { %v3783_v34 = vpop.f32.mrf.mxu0 }
 0x480   : > { %v3784_v56 = vadd.f32 %v13757_v6, %v3783_v34  ;;  %v3906_v10 = vmax.f32 %v3792_v14, 0.0 }
 0x482   : > { %v3904_v18 = vmax.f32 %v3784_v56, 0.0  ;;  %v3946_v32 = vpack.c.bf16 %v3906_v10, %v3905_v45 }
 0x484   : > { %v3945_v15 = vpack.c.bf16 %v3904_v18, %v3903_v51  ;;  %v11648_v51 = vld [vmem:[%s15990_s11 + $0x18] sm:$0xff]  }
 0x485   : > { %11158 = vmatprep.subr.bf16.mxu1 %v11648_v51 }
 0x486   : > { %11050 = vmatprep.mubr.bf16.mxu1 %v3945_v15  ;;  %11159 = vmatpush3.bf16.msra.mxu1 %v11648_v51 }
 0x487   : > { %11051 = vmatmul.mubr.bf16.gmra.mxu1 %v3946_v32 }
 0x489   : > { %v10976_v35 = vpop.f32.mrf.mxu0 }
 0x48a   : > { %v3805_v57 = vadd.f32 %v10976_v35, %v13757_v6 }
 0x48b   : > { %v3796_v54 = vpop.f32.mrf.mxu0 }
 0x48c   : > { %v3797_v22 = vadd.f32 %v13757_v6, %v3796_v54  ;;  %v3909_v29 = vmax.f32 %v3805_v57, 0.0 }
 0x48d   : > { %v10977_v47 = vpop.f32.mrf.mxu0 }
 0x48e   : > { %v3808_v36 = vadd.f32 %v10977_v47, %v13757_v6  ;;  %v3907_v17 = vmax.f32 %v3797_v22, 0.0 }
 0x48f   : > { %v3799_v61 = vpop.f32.mrf.mxu0 }
 0x490   : > { %v3800_v46 = vadd.f32 %v13757_v6, %v3799_v61  ;;  %v3910_v5 = vmax.f32 %v3808_v36, 0.0 }
 0x492   : > { %v3908_v26 = vmax.f32 %v3800_v46, 0.0  ;;  %v3948_v27 = vpack.c.bf16 %v3910_v5, %v3909_v29 }
 0x494   : > { %v3947_v39 = vpack.c.bf16 %v3908_v26, %v3907_v17 }
 0x496   : > { %11054 = vmatprep.mubr.bf16.mxu1 %v3947_v39 }
 0x497   : > { %v11008_v16 = vpop.f32.mrf.mxu1  ;;  %11055 = vmatmul.mubr.bf16.gmra.mxu1 %v3948_v27 }
 0x498   : > { %v4069_v49 = vadd.f32 %v11008_v16, %v13854_v52 }
 0x499   : > { %v10980_v19 = vpop.f32.mrf.mxu0  ;;  %v4060_v24 = vpop.f32.mrf.mxu1 }
 0x49a   : > { %7902 = vst [vmem:[%s13857_s21 + $0x10] sm:$0xff] %v4069_v49  ;;  %v4061_v48 = vadd.f32 %v13854_v52, %v4060_v24  ;;  %v3821_v59 = vadd.f32 %v10980_v19, %v13757_v6 }
 0x49b   : > { %v3812_v58 = vpop.f32.mrf.mxu0  ;;  %v11009_v21 = vpop.f32.mrf.mxu1 }
 0x49c   : > { %7900 = vst [vmem:[%s13857_s21] sm:$0xff] %v4061_v48  ;;  %v4072_v42 = vadd.f32 %v11009_v21, %v13854_v52  ;;  %v3813_v63 = vadd.f32 %v13757_v6, %v3812_v58  ;;  %v3913_v11 = vmax.f32 %v3821_v59, 0.0  ;;  %v11649_v58 = vld [vmem:[%s15990_s11 + $0x10] sm:$0xff]  }
 0x49d   : > { %v10981_v23 = vpop.f32.mrf.mxu0  ;;  %v4063_v55 = vpop.f32.mrf.mxu1  ;;  %11160 = vmatprep.subr.bf16.mxu1 %v11649_v58 }
 0x49e   : > { %7903 = vst [vmem:[%s13857_s21 + $0x18] sm:$0xff] %v4072_v42  ;;  %v3824_v60 = vadd.f32 %v10981_v23, %v13757_v6  ;;  %v4064_v4 = vadd.f32 %v13854_v52, %v4063_v55  ;;  %v4316_v53 = vpack.c.bf16 %v4072_v42, %v4069_v49  ;;  %v3911_v8 = vmax.f32 %v3813_v63, 0.0  ;;  %11161 = vmatpush3.bf16.msra.mxu1 %v11649_v58 }
 0x49f   : > { %v3815_v28 = vpop.f32.mrf.mxu0 }
 0x4a0   : > { %v4315_v62 = vpack.c.bf16 %v4064_v4, %v4061_v48  ;;  %7901 = vst [vmem:[%s13857_s21 + $0x8] sm:$0xff] %v4064_v4  ;;  %v3816_v30 = vadd.f32 %v13757_v6, %v3815_v28  ;;  %v3914_v2 = vmax.f32 %v3824_v60, 0.0 }
 0x4a2   : > { %v3912_v3 = vmax.f32 %v3816_v30, 0.0  ;;  %11086 = vmatprep.mubr.bf16.mxu0 %v4315_v62  ;;  %v3950_v41 = vpack.c.bf16 %v3914_v2, %v3913_v11 }
 0x4a3   : > { %11087 = vmatmul.mubr.bf16.vlgmr.msra.gmra.mxu0 %v4316_v53 }
 0x4a4   : > { %v3949_v13 = vpack.c.bf16 %v3912_v3, %v3911_v8  ;;  %v11650_v3 = vld [vmem:[%s15990_s11 + $0x8] sm:$0xff]  }
 0x4a5   : > { %11162 = vmatprep.subr.bf16.mxu1 %v11650_v3 }
 0x4a6   : > { %11058 = vmatprep.mubr.bf16.mxu1 %v3949_v13  ;;  %11163 = vmatpush3.bf16.msra.mxu1 %v11650_v3 }
 0x4a7   : > { %v11012_v37 = vpop.f32.mrf.mxu1  ;;  %11059 = vmatmul.mubr.bf16.gmra.mxu1 %v3950_v41 }
 0x4a8   : > { %v4085_v7 = vadd.f32 %v11012_v37, %v13854_v52 }
 0x4a9   : > { %v10984_v38 = vpop.f32.mrf.mxu0  ;;  %v4076_v50 = vpop.f32.mrf.mxu1 }
 0x4aa   : > { %7906 = vst [vmem:[%s13857_s21 + $0x30] sm:$0xff] %v4085_v7  ;;  %v4077_v43 = vadd.f32 %v13854_v52, %v4076_v50  ;;  %v3837_v34 = vadd.f32 %v10984_v38, %v13757_v6 }
 0x4ab   : > { %v3828_v0 = vpop.f32.mrf.mxu0  ;;  %v11013_v31 = vpop.f32.mrf.mxu1 }
 0x4ac   : > { %7904 = vst [vmem:[%s13857_s21 + $0x20] sm:$0xff] %v4077_v43  ;;  %v4088_v1 = vadd.f32 %v11013_v31, %v13854_v52  ;;  %v3829_v12 = vadd.f32 %v13757_v6, %v3828_v0  ;;  %v3917_v35 = vmax.f32 %v3837_v34, 0.0 }
 0x4ad   : > { %v10985_v9 = vpop.f32.mrf.mxu0  ;;  %v4079_v25 = vpop.f32.mrf.mxu1 }
 0x4ae   : > { %7907 = vst [vmem:[%s13857_s21 + $0x38] sm:$0xff] %v4088_v1  ;;  %v3840_v14 = vadd.f32 %v10985_v9, %v13757_v6  ;;  %v4080_v40 = vadd.f32 %v13854_v52, %v4079_v25  ;;  %v4318_v18 = vpack.c.bf16 %v4088_v1, %v4085_v7  ;;  %v3915_v15 = vmax.f32 %v3829_v12, 0.0  ;;  %v11651_v1 = vld [vmem:[%s15990_s11] sm:$0xff]  }
 0x4af   : > { %v3831_v56 = vpop.f32.mrf.mxu0  ;;  %11164 = vmatprep.subr.bf16.mxu1 %v11651_v1 }
 0x4b0   : > { %v4317_v33 = vpack.c.bf16 %v4080_v40, %v4077_v43  ;;  %7905 = vst [vmem:[%s13857_s21 + $0x28] sm:$0xff] %v4080_v40  ;;  %v3832_v10 = vadd.f32 %v13757_v6, %v3831_v56  ;;  %v3918_v45 = vmax.f32 %v3840_v14, 0.0  ;;  %11165 = vmatpush3.bf16.msra.mxu1 %v11651_v1 }
 0x4b2   : > { %v3916_v32 = vmax.f32 %v3832_v10, 0.0  ;;  %11090 = vmatprep.mubr.bf16.mxu0 %v4317_v33  ;;  %v3952_v47 = vpack.c.bf16 %v3918_v45, %v3917_v35 }
 0x4b3   : > { %11091 = vmatmul.mubr.bf16.gmra.mxu0 %v4318_v18 }
 0x4b4   : > { %v3951_v54 = vpack.c.bf16 %v3916_v32, %v3915_v15 }
 0x4b6   : > { %11062 = vmatprep.mubr.bf16.mxu1 %v3951_v54 }
 0x4b7   : > { %v11016_v22 = vpop.f32.mrf.mxu1  ;;  %11063 = vmatmul.mubr.bf16.gmra.mxu1 %v3952_v47 }
 0x4b8   : > { %v4101_v36 = vadd.f32 %v11016_v22, %v13854_v52 }
 0x4b9   : > { %v10988_v57 = vpop.f32.mrf.mxu0  ;;  %v4092_v61 = vpop.f32.mrf.mxu1 }
 0x4ba   : > { %7910 = vst [vmem:[%s13857_s21 + $0x50] sm:$0xff] %v4101_v36  ;;  %v4093_v46 = vadd.f32 %v13854_v52, %v4092_v61  ;;  %v3853_v49 = vadd.f32 %v10988_v57, %v13757_v6 }
 0x4bb   : > { %v3844_v20 = vpop.f32.mrf.mxu0  ;;  %v11017_v5 = vpop.f32.mrf.mxu1 }
 0x4bc   : > { %7908 = vst [vmem:[%s13857_s21 + $0x40] sm:$0xff] %v4093_v46  ;;  %v4104_v17 = vadd.f32 %v11017_v5, %v13854_v52  ;;  %v3845_v39 = vadd.f32 %v13757_v6, %v3844_v20  ;;  %v3921_v63 = vmax.f32 %v3853_v49, 0.0 }
 0x4bd   : > { %v10989_v26 = vpop.f32.mrf.mxu0  ;;  %v4095_v29 = vpop.f32.mrf.mxu1 }
 0x4be   : > { %7911 = vst [vmem:[%s13857_s21 + $0x58] sm:$0xff] %v4104_v17  ;;  %v3856_v27 = vadd.f32 %v10989_v26, %v13757_v6  ;;  %v4096_v16 = vadd.f32 %v13854_v52, %v4095_v29  ;;  %v4320_v21 = vpack.c.bf16 %v4104_v17, %v4101_v36  ;;  %v3919_v23 = vmax.f32 %v3845_v39, 0.0 }
 0x4bf   : > { %v3847_v19 = vpop.f32.mrf.mxu0 }
 0x4c0   : > { %v4319_v24 = vpack.c.bf16 %v4096_v16, %v4093_v46  ;;  %7909 = vst [vmem:[%s13857_s21 + $0x48] sm:$0xff] %v4096_v16  ;;  %v3848_v48 = vadd.f32 %v13757_v6, %v3847_v19  ;;  %v3922_v42 = vmax.f32 %v3856_v27, 0.0 }
 0x4c2   : > { %v3920_v55 = vmax.f32 %v3848_v48, 0.0  ;;  %11094 = vmatprep.mubr.bf16.mxu0 %v4319_v24  ;;  %v3954_v4 = vpack.c.bf16 %v3922_v42, %v3921_v63 }
 0x4c3   : > { %11095 = vmatmul.mubr.bf16.gmra.mxu0 %v4320_v21 }
 0x4c4   : > { %v3953_v60 = vpack.c.bf16 %v3920_v55, %v3919_v23 }
 0x4c6   : > { %11066 = vmatprep.mubr.bf16.mxu1 %v3953_v60 }
 0x4c7   : > { %v11020_v6 = vpop.f32.mrf.mxu1  ;;  %11067 = vmatmul.mubr.bf16.gmra.mxu1 %v3954_v4 }
 0x4c8   : > { %v4117_v59 = vadd.f32 %v11020_v6, %v13854_v52 }
 0x4c9   : > { %v4108_v28 = vpop.f32.mrf.mxu1 }
 0x4ca   : > { %7914 = vst [vmem:[%s13857_s21 + $0x70] sm:$0xff] %v4117_v59  ;;  %v4109_v62 = vadd.f32 %v13854_v52, %v4108_v28 }
 0x4cb   : > { %v11021_v30 = vpop.f32.mrf.mxu1 }
 0x4cc   : > { %7912 = vst [vmem:[%s13857_s21 + $0x60] sm:$0xff] %v4109_v62  ;;  %v4120_v44 = vadd.f32 %v11021_v30, %v13854_v52 }
 0x4cd   : > { %v4111_v53 = vpop.f32.mrf.mxu1 }
 0x4ce   : > { %7915 = vst [vmem:[%s13857_s21 + $0x78] sm:$0xff] %v4120_v44  ;;  %v4112_v2 = vadd.f32 %v13854_v52, %v4111_v53  ;;  %v4322_v11 = vpack.c.bf16 %v4120_v44, %v4117_v59 }
 0x4d0   : > { %v4321_v8 = vpack.c.bf16 %v4112_v2, %v4109_v62  ;;  %7913 = vst [vmem:[%s13857_s21 + $0x68] sm:$0xff] %v4112_v2 }
 0x4d2   : > { %11098 = vmatprep.mubr.bf16.mxu0 %v4321_v8 }
 0x4d3   : > { %11099 = vmatmul.mubr.bf16.gmra.mxu0 %v4322_v11 }
 0x4d7   : > { %v11024_v13 = vpop.f32.mrf.mxu1 }
 0x4d8   : > { %v4133_v41 = vadd.f32 %v11024_v13, %v13854_v52 }
 0x4d9   : > { %v4124_v37 = vpop.f32.mrf.mxu1 }
 0x4da   : > { %7918 = vst [vmem:[%s13857_s21 + $0x90] sm:$0xff] %v4133_v41  ;;  %v4125_v7 = vadd.f32 %v13854_v52, %v4124_v37 }
 0x4db   : > { %v11025_v38 = vpop.f32.mrf.mxu1 }
 0x4dc   : > { %7916 = vst [vmem:[%s13857_s21 + $0x80] sm:$0xff] %v4125_v7  ;;  %v4136_v50 = vadd.f32 %v11025_v38, %v13854_v52  ;;  %v11652_v38 = vld [vmem:[%s15992_s13 + $0x38] sm:$0xff]  }
 0x4dd   : > { %v4127_v43 = vpop.f32.mrf.mxu1  ;;  %11230 = vmatprep.subr.bf16.mxu0 %v11652_v38 }
 0x4de   : > { %7919 = vst [vmem:[%s13857_s21 + $0x98] sm:$0xff] %v4136_v50  ;;  %v4128_v0 = vadd.f32 %v13854_v52, %v4127_v43  ;;  %v4324_v9 = vpack.c.bf16 %v4136_v50, %v4133_v41  ;;  %11231 = vmatpush3.bf16.msra.mxu0 %v11652_v38 }
 0x4e0   : > { %v4323_v31 = vpack.c.bf16 %v4128_v0, %v4125_v7  ;;  %7917 = vst [vmem:[%s13857_s21 + $0x88] sm:$0xff] %v4128_v0 }
 0x4e2   : > { %11102 = vmatprep.mubr.bf16.mxu0 %v4323_v31 }
 0x4e3   : > { %11103 = vmatmul.mubr.bf16.gmra.mxu0 %v4324_v9 }
 0x4e7   : > { %v11028_v25 = vpop.f32.mrf.mxu1 }
 0x4e8   : > { %v4149_v12 = vadd.f32 %v11028_v25, %v13854_v52 }
 0x4e9   : > { %v4140_v14 = vpop.f32.mrf.mxu1 }
 0x4ea   : > { %7922 = vst [vmem:[%s13857_s21 + $0xb0] sm:$0xff] %v4149_v12  ;;  %v4141_v40 = vadd.f32 %v13854_v52, %v4140_v14 }
 0x4eb   : > { %v11029_v34 = vpop.f32.mrf.mxu1 }
 0x4ec   : > { %7920 = vst [vmem:[%s13857_s21 + $0xa0] sm:$0xff] %v4141_v40  ;;  %v4152_v56 = vadd.f32 %v11029_v34, %v13854_v52  ;;  %v11653_v34 = vld [vmem:[%s15992_s13 + $0x30] sm:$0xff]  }
 0x4ed   : > { %v4143_v33 = vpop.f32.mrf.mxu1  ;;  %11232 = vmatprep.subr.bf16.mxu0 %v11653_v34 }
 0x4ee   : > { %7923 = vst [vmem:[%s13857_s21 + $0xb8] sm:$0xff] %v4152_v56  ;;  %v4144_v10 = vadd.f32 %v13854_v52, %v4143_v33  ;;  %v4326_v18 = vpack.c.bf16 %v4152_v56, %v4149_v12  ;;  %11233 = vmatpush3.bf16.msra.mxu0 %v11653_v34 }
 0x4f0   : > { %v4325_v51 = vpack.c.bf16 %v4144_v10, %v4141_v40  ;;  %7921 = vst [vmem:[%s13857_s21 + $0xa8] sm:$0xff] %v4144_v10 }
 0x4f2   : > { %11106 = vmatprep.mubr.bf16.mxu0 %v4325_v51 }
 0x4f3   : > { %11107 = vmatmul.mubr.bf16.gmra.mxu0 %v4326_v18 }
 0x4f7   : > { %v11032_v45 = vpop.f32.mrf.mxu1 }
 0x4f8   : > { %v4165_v15 = vadd.f32 %v11032_v45, %v13854_v52 }
 0x4f9   : > { %v4156_v32 = vpop.f32.mrf.mxu1 }
 0x4fa   : > { %7926 = vst [vmem:[%s13857_s21 + $0xd0] sm:$0xff] %v4165_v15  ;;  %v4157_v35 = vadd.f32 %v13854_v52, %v4156_v32 }
 0x4fb   : > { %v11033_v54 = vpop.f32.mrf.mxu1 }
 0x4fc   : > { %7924 = vst [vmem:[%s13857_s21 + $0xc0] sm:$0xff] %v4157_v35  ;;  %v4168_v47 = vadd.f32 %v11033_v54, %v13854_v52 }
 0x4fd   : > { %v4159_v22 = vpop.f32.mrf.mxu1 }
 0x4fe   : > { %7927 = vst [vmem:[%s13857_s21 + $0xd8] sm:$0xff] %v4168_v47  ;;  %v4160_v36 = vadd.f32 %v13854_v52, %v4159_v22  ;;  %v4328_v61 = vpack.c.bf16 %v4168_v47, %v4165_v15  ;;  %v11654_v47 = vld [vmem:[%s15992_s13 + $0x28] sm:$0xff]  }
 0x4ff   : > { %11234 = vmatprep.subr.bf16.mxu0 %v11654_v47 }
 0x500   : > { %v4327_v57 = vpack.c.bf16 %v4160_v36, %v4157_v35  ;;  %7925 = vst [vmem:[%s13857_s21 + $0xc8] sm:$0xff] %v4160_v36  ;;  %11235 = vmatpush3.bf16.msra.mxu0 %v11654_v47 }
 0x502   : > { %11110 = vmatprep.mubr.bf16.mxu0 %v4327_v57 }
 0x503   : > { %11111 = vmatmul.mubr.bf16.gmra.mxu0 %v4328_v61 }
 0x507   : > { %v11036_v46 = vpop.f32.mrf.mxu1 }
 0x508   : > { %v4181_v20 = vadd.f32 %v11036_v46, %v13854_v52 }
 0x509   : > { %v4172_v5 = vpop.f32.mrf.mxu1 }
 0x50a   : > { %7930 = vst [vmem:[%s13857_s21 + $0xf0] sm:$0xff] %v4181_v20  ;;  %v4173_v17 = vadd.f32 %v13854_v52, %v4172_v5  ;;  %v14001_v5 = vld [vmem:[%s15989_s10] ss:$0 sm:$0xff] }
 0x50b   : > { %v11037_v26 = vpop.f32.mrf.mxu1 }
 0x50c   : > { %7928 = vst [vmem:[%s13857_s21 + $0xe0] sm:$0xff] %v4173_v17  ;;  %v4184_v29 = vadd.f32 %v11037_v26, %v13854_v52 }
 0x50d   : > { %v4175_v39 = vpop.f32.mrf.mxu1 }
 0x50e   : > { %7931 = vst [vmem:[%s13857_s21 + $0xf8] sm:$0xff] %v4184_v29  ;;  %v4176_v27 = vadd.f32 %v13854_v52, %v4175_v39  ;;  %v4330_v49 = vpack.c.bf16 %v4184_v29, %v4181_v20 }
 0x510   : > { %v4329_v16 = vpack.c.bf16 %v4176_v27, %v4173_v17  ;;  %7929 = vst [vmem:[%s13857_s21 + $0xe8] sm:$0xff] %v4176_v27 }
 0x512   : > { %11114 = vmatprep.mubr.bf16.mxu0 %v4329_v16 }
 0x513   : > { %11115 = vmatmul.mubr.bf16.gmra.mxu0 %v4330_v49 }
 0x517   : > { %v11040_v19 = vpop.f32.mrf.mxu1 }
 0x518   : > { %v4197_v24 = vadd.f32 %v11040_v19, %v13854_v52 }
 0x519   : > { %v4188_v48 = vpop.f32.mrf.mxu1 }
 0x51a   : > { %7934 = vst [vmem:[%s13857_s21 + $0x110] sm:$0xff] %v4197_v24  ;;  %v4189_v58 = vadd.f32 %v13854_v52, %v4188_v48 }
 0x51b   : > { %v11041_v21 = vpop.f32.mrf.mxu1 }
 0x51c   : > { %7932 = vst [vmem:[%s13857_s21 + $0x100] sm:$0xff] %v4189_v58  ;;  %v4200_v42 = vadd.f32 %v11041_v21, %v13854_v52 }
 0x51d   : > { %v4191_v23 = vpop.f32.mrf.mxu1 }
 0x51e   : > { %7935 = vst [vmem:[%s13857_s21 + $0x118] sm:$0xff] %v4200_v42  ;;  %v4192_v55 = vadd.f32 %v13854_v52, %v4191_v23  ;;  %v4332_v60 = vpack.c.bf16 %v4200_v42, %v4197_v24 }
 0x520   : > { %v4331_v63 = vpack.c.bf16 %v4192_v55, %v4189_v58  ;;  %7933 = vst [vmem:[%s13857_s21 + $0x108] sm:$0xff] %v4192_v55 }
 0x522   : > { %11118 = vmatprep.mubr.bf16.mxu0 %v4331_v63  ;;  %v11655_v63 = vld [vmem:[%s15992_s13 + $0x20] sm:$0xff]  }
 0x523   : > { %11119 = vmatmul.mubr.bf16.gmra.mxu0 %v4332_v60  ;;  %11236 = vmatprep.subr.bf16.mxu0 %v11655_v63 }
 0x524   : > { %11237 = vmatpush3.bf16.msra.mxu0 %v11655_v63 }
 0x527   : > { %v11044_v4 = vpop.f32.mrf.mxu1 }
 0x528   : > { %v4213_v6 = vadd.f32 %v11044_v4, %v13854_v52 }
 0x529   : > { %v4204_v59 = vpop.f32.mrf.mxu1 }
 0x52a   : > { %7938 = vst [vmem:[%s13857_s21 + $0x130] sm:$0xff] %v4213_v6  ;;  %v4205_v28 = vadd.f32 %v13854_v52, %v4204_v59 }
 0x52b   : > { %v11045_v62 = vpop.f32.mrf.mxu1 }
 0x52c   : > { %7936 = vst [vmem:[%s13857_s21 + $0x120] sm:$0xff] %v4205_v28  ;;  %v4216_v30 = vadd.f32 %v11045_v62, %v13854_v52 }
 0x52d   : > { %v4207_v44 = vpop.f32.mrf.mxu1 }
 0x52e   : > { %7939 = vst [vmem:[%s13857_s21 + $0x138] sm:$0xff] %v4216_v30  ;;  %v4208_v53 = vadd.f32 %v13854_v52, %v4207_v44  ;;  %v4334_v8 = vpack.c.bf16 %v4216_v30, %v4213_v6 }
 0x530   : > { %v4333_v2 = vpack.c.bf16 %v4208_v53, %v4205_v28  ;;  %7937 = vst [vmem:[%s13857_s21 + $0x128] sm:$0xff] %v4208_v53 }
 0x532   : > { %11122 = vmatprep.mubr.bf16.mxu0 %v4333_v2 }
 0x533   : > { %11123 = vmatmul.mubr.bf16.gmra.mxu0 %v4334_v8 }
 0x537   : > { %v11048_v3 = vpop.f32.mrf.mxu1 }
 0x538   : > { %v4229_v11 = vadd.f32 %v11048_v3, %v13854_v52 }
 0x539   : > { %v4220_v13 = vpop.f32.mrf.mxu1 }
 0x53a   : > { %7942 = vst [vmem:[%s13857_s21 + $0x150] sm:$0xff] %v4229_v11  ;;  %v4221_v41 = vadd.f32 %v13854_v52, %v4220_v13 }
 0x53b   : > { %v11049_v37 = vpop.f32.mrf.mxu1 }
 0x53c   : > { %7940 = vst [vmem:[%s13857_s21 + $0x140] sm:$0xff] %v4221_v41  ;;  %v4232_v7 = vadd.f32 %v11049_v37, %v13854_v52 }
 0x53d   : > { %v4223_v50 = vpop.f32.mrf.mxu1 }
 0x53e   : > { %7943 = vst [vmem:[%s13857_s21 + $0x158] sm:$0xff] %v4232_v7  ;;  %v4224_v43 = vadd.f32 %v13854_v52, %v4223_v50  ;;  %v4336_v31 = vpack.c.bf16 %v4232_v7, %v4229_v11 }
 0x540   : > { %v4335_v0 = vpack.c.bf16 %v4224_v43, %v4221_v41  ;;  %7941 = vst [vmem:[%s13857_s21 + $0x148] sm:$0xff] %v4224_v43 }
 0x542   : > { %11126 = vmatprep.mubr.bf16.mxu0 %v4335_v0 }
 0x543   : > { %11127 = vmatmul.mubr.bf16.gmra.mxu0 %v4336_v31 }
 0x547   : > { %v11052_v1 = vpop.f32.mrf.mxu1 }
 0x548   : > { %v4245_v9 = vadd.f32 %v11052_v1, %v13854_v52 }
 0x549   : > { %v4236_v25 = vpop.f32.mrf.mxu1 }
 0x54a   : > { %7946 = vst [vmem:[%s13857_s21 + $0x170] sm:$0xff] %v4245_v9  ;;  %v4237_v12 = vadd.f32 %v13854_v52, %v4236_v25  ;;  %v11656_v25 = vld [vmem:[%s15992_s13 + $0x18] sm:$0xff]  }
 0x54b   : > { %v11053_v14 = vpop.f32.mrf.mxu1  ;;  %11238 = vmatprep.subr.bf16.mxu0 %v11656_v25 }
 0x54c   : > { %7944 = vst [vmem:[%s13857_s21 + $0x160] sm:$0xff] %v4237_v12  ;;  %v4248_v40 = vadd.f32 %v11053_v14, %v13854_v52  ;;  %11239 = vmatpush3.bf16.msra.mxu0 %v11656_v25 }
 0x54d   : > { %v4239_v56 = vpop.f32.mrf.mxu1 }
 0x54e   : > { %7947 = vst [vmem:[%s13857_s21 + $0x178] sm:$0xff] %v4248_v40  ;;  %v4240_v33 = vadd.f32 %v13854_v52, %v4239_v56  ;;  %v4338_v51 = vpack.c.bf16 %v4248_v40, %v4245_v9 }
 0x550   : > { %v4337_v10 = vpack.c.bf16 %v4240_v33, %v4237_v12  ;;  %7945 = vst [vmem:[%s13857_s21 + $0x168] sm:$0xff] %v4240_v33 }
 0x552   : > { %11130 = vmatprep.mubr.bf16.mxu0 %v4337_v10 }
 0x553   : > { %11131 = vmatmul.mubr.bf16.gmra.mxu0 %v4338_v51 }
 0x557   : > { %v11056_v18 = vpop.f32.mrf.mxu1 }
 0x558   : > { %v4261_v45 = vadd.f32 %v11056_v18, %v13854_v52 }
 0x559   : > { %v4252_v15 = vpop.f32.mrf.mxu1 }
 0x55a   : > { %7950 = vst [vmem:[%s13857_s21 + $0x190] sm:$0xff] %v4261_v45  ;;  %v4253_v32 = vadd.f32 %v13854_v52, %v4252_v15 }
 0x55b   : > { %v11057_v35 = vpop.f32.mrf.mxu1 }
 0x55c   : > { %7948 = vst [vmem:[%s13857_s21 + $0x180] sm:$0xff] %v4253_v32  ;;  %v4264_v54 = vadd.f32 %v11057_v35, %v13854_v52 }
 0x55d   : > { %v4255_v22 = vpop.f32.mrf.mxu1 }
 0x55e   : > { %7951 = vst [vmem:[%s13857_s21 + $0x198] sm:$0xff] %v4264_v54  ;;  %v4256_v36 = vadd.f32 %v13854_v52, %v4255_v22  ;;  %v4340_v61 = vpack.c.bf16 %v4264_v54, %v4261_v45 }
 0x560   : > { %v4339_v57 = vpack.c.bf16 %v4256_v36, %v4253_v32  ;;  %7949 = vst [vmem:[%s13857_s21 + $0x188] sm:$0xff] %v4256_v36 }
 0x562   : > { %11134 = vmatprep.mubr.bf16.mxu0 %v4339_v57 }
 0x563   : > { %v11088_v46 = vpop.f32.mrf.mxu0  ;;  %11135 = vmatmul.mubr.bf16.gmra.mxu0 %v4340_v61 }
 0x564   : > { %v4461_v16 = vadd.f32 %v11088_v46, %v14001_v5 }
 0x565   : > { %v4452_v20 = vpop.f32.mrf.mxu0 }
 0x566   : > { %v4453_v29 = vadd.f32 %v14001_v5, %v4452_v20  ;;  %v4709_v60 = vmax.f32 %v4461_v16, 0.0 }
 0x567   : > { %v11060_v17 = vpop.f32.mrf.mxu1  ;;  %v11089_v26 = vpop.f32.mrf.mxu0 }
 0x568   : > { %v4277_v39 = vadd.f32 %v11060_v17, %v13854_v52  ;;  %v4464_v27 = vadd.f32 %v11089_v26, %v14001_v5  ;;  %v4707_v42 = vmax.f32 %v4453_v29, 0.0 }
 0x569   : > { %v4268_v49 = vpop.f32.mrf.mxu1  ;;  %v4455_v19 = vpop.f32.mrf.mxu0 }
 0x56a   : > { %7954 = vst [vmem:[%s13857_s21 + $0x1b0] sm:$0xff] %v4277_v39  ;;  %v4269_v24 = vadd.f32 %v13854_v52, %v4268_v49  ;;  %v4456_v48 = vadd.f32 %v14001_v5, %v4455_v19  ;;  %v4710_v58 = vmax.f32 %v4464_v27, 0.0 }
 0x56b   : > { %v11061_v21 = vpop.f32.mrf.mxu1 }
 0x56c   : > { %7952 = vst [vmem:[%s13857_s21 + $0x1a0] sm:$0xff] %v4269_v24  ;;  %v4708_v23 = vmax.f32 %v4456_v48, 0.0  ;;  %v4280_v55 = vadd.f32 %v11061_v21, %v13854_v52  ;;  %v4772_v28 = vpack.c.bf16 %v4710_v58, %v4709_v60 }
 0x56d   : > { %v4271_v4 = vpop.f32.mrf.mxu1 }
 0x56e   : > { %7955 = vst [vmem:[%s13857_s21 + $0x1b8] sm:$0xff] %v4280_v55  ;;  %v4272_v6 = vadd.f32 %v13854_v52, %v4271_v4  ;;  %v4771_v59 = vpack.c.bf16 %v4708_v23, %v4707_v42  ;;  %v4342_v30 = vpack.c.bf16 %v4280_v55, %v4277_v39  ;;  %v11657_v39 = vld [vmem:[%s15992_s13 + $0x10] sm:$0xff]  }
 0x56f   : > { %11240 = vmatprep.subr.bf16.mxu0 %v11657_v39 }
 0x570   : > { %v4341_v62 = vpack.c.bf16 %v4272_v6, %v4269_v24  ;;  %7953 = vst [vmem:[%s13857_s21 + $0x1a8] sm:$0xff] %v4272_v6  ;;  %11166 = vmatprep.mubr.bf16.mxu1 %v4771_v59  ;;  %11241 = vmatpush3.bf16.msra.mxu0 %v11657_v39 }
 0x571   : > { %11167 = vmatmul.mubr.bf16.vlgmr.msra.gmra.mxu1 %v4772_v28 }
 0x572   : > { %11138 = vmatprep.mubr.bf16.mxu0 %v4341_v62  ;;  %v11658_v62 = vld [vmem:[%s15992_s13 + $0x8] sm:$0xff]  }
 0x573   : > { %v11092_v44 = vpop.f32.mrf.mxu0  ;;  %11139 = vmatmul.mubr.bf16.gmra.mxu0 %v4342_v30  ;;  %11242 = vmatprep.subr.bf16.mxu0 %v11658_v62 }
 0x574   : > { %v4477_v41 = vadd.f32 %v11092_v44, %v14001_v5  ;;  %11243 = vmatpush3.bf16.msra.mxu0 %v11658_v62 }
 0x575   : > { %v4468_v53 = vpop.f32.mrf.mxu0 }
 0x576   : > { %v4469_v3 = vadd.f32 %v14001_v5, %v4468_v53  ;;  %v4713_v12 = vmax.f32 %v4477_v41, 0.0 }
 0x577   : > { %v11064_v2 = vpop.f32.mrf.mxu1  ;;  %v11093_v8 = vpop.f32.mrf.mxu0 }
 0x578   : > { %v4293_v11 = vadd.f32 %v11064_v2, %v13854_v52  ;;  %v4480_v13 = vadd.f32 %v11093_v8, %v14001_v5  ;;  %v4711_v31 = vmax.f32 %v4469_v3, 0.0 }
 0x579   : > { %v4284_v37 = vpop.f32.mrf.mxu1  ;;  %v4471_v7 = vpop.f32.mrf.mxu0 }
 0x57a   : > { %7958 = vst [vmem:[%s13857_s21 + $0x1d0] sm:$0xff] %v4293_v11  ;;  %v4285_v38 = vadd.f32 %v13854_v52, %v4284_v37  ;;  %v4472_v50 = vadd.f32 %v14001_v5, %v4471_v7  ;;  %v4714_v43 = vmax.f32 %v4480_v13, 0.0 }
 0x57b   : > { %v11065_v0 = vpop.f32.mrf.mxu1 }
 0x57c   : > { %7956 = vst [vmem:[%s13857_s21 + $0x1c0] sm:$0xff] %v4285_v38  ;;  %v4712_v1 = vmax.f32 %v4472_v50, 0.0  ;;  %v4296_v9 = vadd.f32 %v11065_v0, %v13854_v52  ;;  %v4774_v56 = vpack.c.bf16 %v4714_v43, %v4713_v12  ;;  %v11659_v0 = vld [vmem:[%s15992_s13] sm:$0xff]  }
 0x57d   : > { %v4287_v14 = vpop.f32.mrf.mxu1  ;;  %11244 = vmatprep.subr.bf16.mxu0 %v11659_v0 }
 0x57e   : > { %7959 = vst [vmem:[%s13857_s21 + $0x1d8] sm:$0xff] %v4296_v9  ;;  %v4288_v40 = vadd.f32 %v13854_v52, %v4287_v14  ;;  %v4773_v34 = vpack.c.bf16 %v4712_v1, %v4711_v31  ;;  %v4344_v10 = vpack.c.bf16 %v4296_v9, %v4293_v11  ;;  %11245 = vmatpush3.bf16.msra.mxu0 %v11659_v0 }
 0x580   : > { %v4343_v33 = vpack.c.bf16 %v4288_v40, %v4285_v38  ;;  %7957 = vst [vmem:[%s13857_s21 + $0x1c8] sm:$0xff] %v4288_v40  ;;  %11170 = vmatprep.mubr.bf16.mxu1 %v4773_v34 }
 0x581   : > { %11171 = vmatmul.mubr.bf16.gmra.mxu1 %v4774_v56 }
 0x582   : > { %11142 = vmatprep.mubr.bf16.mxu0 %v4343_v33 }
 0x583   : > { %v11096_v51 = vpop.f32.mrf.mxu0  ;;  %11143 = vmatmul.mubr.bf16.gmra.mxu0 %v4344_v10 }
 0x584   : > { %v4493_v47 = vadd.f32 %v11096_v51, %v14001_v5 }
 0x585   : > { %v4484_v18 = vpop.f32.mrf.mxu0 }
 0x586   : > { %v4485_v32 = vadd.f32 %v14001_v5, %v4484_v18  ;;  %v4717_v27 = vmax.f32 %v4493_v47, 0.0 }
 0x587   : > { %v11068_v45 = vpop.f32.mrf.mxu1  ;;  %v11097_v15 = vpop.f32.mrf.mxu0 }
 0x588   : > { %v4309_v35 = vadd.f32 %v11068_v45, %v13854_v52  ;;  %v4496_v54 = vadd.f32 %v11097_v15, %v14001_v5  ;;  %v4715_v17 = vmax.f32 %v4485_v32, 0.0 }
 0x589   : > { %v4300_v22 = vpop.f32.mrf.mxu1  ;;  %v4487_v36 = vpop.f32.mrf.mxu0 }
 0x58a   : > { %7962 = vst [vmem:[%s13857_s21 + $0x1f0] sm:$0xff] %v4309_v35  ;;  %v4301_v57 = vadd.f32 %v13854_v52, %v4300_v22  ;;  %v4488_v61 = vadd.f32 %v14001_v5, %v4487_v36  ;;  %v4718_v46 = vmax.f32 %v4496_v54, 0.0 }
 0x58b   : > { %v11069_v20 = vpop.f32.mrf.mxu1 }
 0x58c   : > { %7960 = vst [vmem:[%s13857_s21 + $0x1e0] sm:$0xff] %v4301_v57  ;;  %v4716_v26 = vmax.f32 %v4488_v61, 0.0  ;;  %v4312_v29 = vadd.f32 %v11069_v20, %v13854_v52  ;;  %v4776_v24 = vpack.c.bf16 %v4718_v46, %v4717_v27 }
 0x58d   : > { %v4303_v16 = vpop.f32.mrf.mxu1 }
 0x58e   : > { %7963 = vst [vmem:[%s13857_s21 + $0x1f8] sm:$0xff] %v4312_v29  ;;  %v4304_v49 = vadd.f32 %v13854_v52, %v4303_v16  ;;  %v4775_v19 = vpack.c.bf16 %v4716_v26, %v4715_v17  ;;  %v4346_v58 = vpack.c.bf16 %v4312_v29, %v4309_v35 }
 0x590   : > { %v4345_v48 = vpack.c.bf16 %v4304_v49, %v4301_v57  ;;  %7961 = vst [vmem:[%s13857_s21 + $0x1e8] sm:$0xff] %v4304_v49  ;;  %11174 = vmatprep.mubr.bf16.mxu1 %v4775_v19 }
 0x591   : > { %11175 = vmatmul.mubr.bf16.gmra.mxu1 %v4776_v24 }
 0x592   : > { %11146 = vmatprep.mubr.bf16.mxu0 %v4345_v48 }
 0x593   : > { %v11100_v21 = vpop.f32.mrf.mxu0  ;;  %11147 = vmatmul.mubr.bf16.gmra.mxu0 %v4346_v58 }
 0x594   : > { %v4509_v52 = vadd.f32 %v11100_v21, %v14001_v5 }
 0x595   : > { %v4500_v42 = vpop.f32.mrf.mxu0 }
 0x596   : > { %v4501_v55 = vadd.f32 %v14001_v5, %v4500_v42  ;;  %v4721_v30 = vmax.f32 %v4509_v52, 0.0 }
 0x597   : > { %v11101_v23 = vpop.f32.mrf.mxu0 }
 0x598   : > { %v4512_v63 = vadd.f32 %v11101_v23, %v14001_v5  ;;  %v4719_v59 = vmax.f32 %v4501_v55, 0.0 }
 0x599   : > { %v4503_v60 = vpop.f32.mrf.mxu0 }
 0x59a   : > { %v4504_v4 = vadd.f32 %v14001_v5, %v4503_v60  ;;  %v4722_v6 = vmax.f32 %v4512_v63, 0.0 }
 0x59c   : > { %v4720_v28 = vmax.f32 %v4504_v4, 0.0  ;;  %v4778_v53 = vpack.c.bf16 %v4722_v6, %v4721_v30 }
 0x59e   : > { %v4777_v44 = vpack.c.bf16 %v4720_v28, %v4719_v59 }
 0x5a0   : > { %11178 = vmatprep.mubr.bf16.mxu1 %v4777_v44 }
 0x5a1   : > { %11179 = vmatmul.mubr.bf16.gmra.mxu1 %v4778_v53 }
 0x5a3   : > { %v11104_v2 = vpop.f32.mrf.mxu0 }
 0x5a4   : > { %v4525_v41 = vadd.f32 %v11104_v2, %v14001_v5 }
 0x5a5   : > { %v4516_v8 = vpop.f32.mrf.mxu0 }
 0x5a6   : > { %v4517_v11 = vadd.f32 %v14001_v5, %v4516_v8  ;;  %v4725_v31 = vmax.f32 %v4525_v41, 0.0 }
 0x5a7   : > { %v11105_v3 = vpop.f32.mrf.mxu0 }
 0x5a8   : > { %v4528_v13 = vadd.f32 %v11105_v3, %v14001_v5  ;;  %v4723_v50 = vmax.f32 %v4517_v11, 0.0 }
 0x5a9   : > { %v4519_v37 = vpop.f32.mrf.mxu0 }
 0x5aa   : > { %v4520_v7 = vadd.f32 %v14001_v5, %v4519_v37  ;;  %v4726_v38 = vmax.f32 %v4528_v13, 0.0 }
 0x5ac   : > { %v4724_v43 = vmax.f32 %v4520_v7, 0.0  ;;  %v4780_v9 = vpack.c.bf16 %v4726_v38, %v4725_v31 }
 0x5ae   : > { %v4779_v1 = vpack.c.bf16 %v4724_v43, %v4723_v50 }
 0x5b0   : > { %11182 = vmatprep.mubr.bf16.mxu1 %v4779_v1 }
 0x5b1   : > { %11183 = vmatmul.mubr.bf16.gmra.mxu1 %v4780_v9 }
 0x5b3   : > { %v11108_v25 = vpop.f32.mrf.mxu0 }
 0x5b4   : > { %v4541_v56 = vadd.f32 %v11108_v25, %v14001_v5 }
 0x5b5   : > { %v4532_v12 = vpop.f32.mrf.mxu0 }
 0x5b6   : > { %v4533_v40 = vadd.f32 %v14001_v5, %v4532_v12  ;;  %v4729_v15 = vmax.f32 %v4541_v56, 0.0 }
 0x5b7   : > { %v11109_v14 = vpop.f32.mrf.mxu0 }
 0x5b8   : > { %v4544_v34 = vadd.f32 %v11109_v14, %v14001_v5  ;;  %v4727_v18 = vmax.f32 %v4533_v40, 0.0 }
 0x5b9   : > { %v4535_v33 = vpop.f32.mrf.mxu0 }
 0x5ba   : > { %v4536_v10 = vadd.f32 %v14001_v5, %v4535_v33  ;;  %v4730_v51 = vmax.f32 %v4544_v34, 0.0 }
 0x5bc   : > { %v4728_v45 = vmax.f32 %v4536_v10, 0.0  ;;  %v4782_v35 = vpack.c.bf16 %v4730_v51, %v4729_v15 }
 0x5be   : > { %v4781_v32 = vpack.c.bf16 %v4728_v45, %v4727_v18 }
 0x5c0   : > { %11186 = vmatprep.mubr.bf16.mxu1 %v4781_v32 }
 0x5c1   : > { %11187 = vmatmul.mubr.bf16.gmra.mxu1 %v4782_v35 }
 0x5c3   : > { %v11112_v54 = vpop.f32.mrf.mxu0 }
 0x5c4   : > { %v4557_v61 = vadd.f32 %v11112_v54, %v14001_v5 }
 0x5c5   : > { %v4548_v47 = vpop.f32.mrf.mxu0 }
 0x5c6   : > { %v4549_v36 = vadd.f32 %v14001_v5, %v4548_v47  ;;  %v4733_v39 = vmax.f32 %v4557_v61, 0.0  ;;  %v11660_v47 = vld [vmem:[%s15994_s15 + $0x188] ss:$28 sps:$4 sm:$0xff]  }
 0x5c7   : > { %v11113_v22 = vpop.f32.mrf.mxu0 }
 0x5c8   : > { %v4560_v57 = vadd.f32 %v11113_v22, %v14001_v5  ;;  %v4731_v26 = vmax.f32 %v4549_v36, 0.0  ;;  %v11662_v22 = vld [vmem:[%s15994_s15 + $0x18c] ss:$28 sps:$4 sm:$0xff]  }
 0x5c9   : > { %v4551_v46 = vpop.f32.mrf.mxu0  ;;  %6104 = vmatprep.subr.bf16.mxu1 %v11662_v22 }
 0x5ca   : > { %v4552_v20 = vadd.f32 %v14001_v5, %v4551_v46  ;;  %v4734_v17 = vmax.f32 %v4560_v57, 0.0  ;;  %6105 = vmatpush1.bf16.msra.mxu1 %v11660_v47 }
 0x5cc   : > { %v4732_v29 = vmax.f32 %v4552_v20, 0.0  ;;  %v4784_v16 = vpack.c.bf16 %v4734_v17, %v4733_v39 }
 0x5ce   : > { %v4783_v27 = vpack.c.bf16 %v4732_v29, %v4731_v26 }
 0x5d0   : > { %11190 = vmatprep.mubr.bf16.mxu1 %v4783_v27 }
 0x5d1   : > { %11191 = vmatmul.mubr.bf16.gmra.mxu1 %v4784_v16 }
 0x5d3   : > { %v11116_v49 = vpop.f32.mrf.mxu0 }
 0x5d4   : > { %v4573_v21 = vadd.f32 %v11116_v49, %v14001_v5 }
 0x5d5   : > { %v4564_v19 = vpop.f32.mrf.mxu0 }
 0x5d6   : > { %v4565_v48 = vadd.f32 %v14001_v5, %v4564_v19  ;;  %v4737_v60 = vmax.f32 %v4573_v21, 0.0 }
 0x5d7   : > { %v11117_v24 = vpop.f32.mrf.mxu0 }
 0x5d8   : > { %v4576_v58 = vadd.f32 %v11117_v24, %v14001_v5  ;;  %v4735_v63 = vmax.f32 %v4565_v48, 0.0  ;;  %v11663_v48 = vld [vmem:[%s15994_s15 + $0x150] ss:$28 sps:$4 sm:$0xff]  }
 0x5d9   : > { %v4567_v42 = vpop.f32.mrf.mxu0 }
 0x5da   : > { %v4568_v23 = vadd.f32 %v14001_v5, %v4567_v42  ;;  %v4738_v55 = vmax.f32 %v4576_v58, 0.0  ;;  %v11665_v58 = vld [vmem:[%s15994_s15 + $0x154] ss:$28 sps:$4 sm:$0xff]  }
 0x5db   : > { %6106 = vmatprep.subr.bf16.mxu1 %v11665_v58 }
 0x5dc   : > { %v4736_v52 = vmax.f32 %v4568_v23, 0.0  ;;  %v4786_v6 = vpack.c.bf16 %v4738_v55, %v4737_v60  ;;  %6107 = vmatpush1.bf16.msra.mxu1 %v11663_v48 }
 0x5de   : > { %v4785_v4 = vpack.c.bf16 %v4736_v52, %v4735_v63 }
 0x5e0   : > { %11194 = vmatprep.mubr.bf16.mxu1 %v4785_v4 }
 0x5e1   : > { %11195 = vmatmul.mubr.bf16.gmra.mxu1 %v4786_v6 }
 0x5e3   : > { %v11120_v59 = vpop.f32.mrf.mxu0 }
 0x5e4   : > { %v4589_v53 = vadd.f32 %v11120_v59, %v14001_v5 }
 0x5e5   : > { %v4580_v28 = vpop.f32.mrf.mxu0 }
 0x5e6   : > { %v4581_v30 = vadd.f32 %v14001_v5, %v4580_v28  ;;  %v4741_v41 = vmax.f32 %v4589_v53, 0.0  ;;  %v11666_v53 = vld [vmem:[%s15994_s15 + $0x118] ss:$28 sps:$4 sm:$0xff]  }
 0x5e7   : > { %v11121_v62 = vpop.f32.mrf.mxu0 }
 0x5e8   : > { %v4592_v44 = vadd.f32 %v11121_v62, %v14001_v5  ;;  %v4739_v11 = vmax.f32 %v4581_v30, 0.0 }
 0x5e9   : > { %v4583_v2 = vpop.f32.mrf.mxu0 }
 0x5ea   : > { %v4584_v8 = vadd.f32 %v14001_v5, %v4583_v2  ;;  %v4742_v3 = vmax.f32 %v4592_v44, 0.0  ;;  %v11668_v2 = vld [vmem:[%s15994_s15 + $0x11c] ss:$28 sps:$4 sm:$0xff]  }
 0x5eb   : > { %6108 = vmatprep.subr.bf16.mxu1 %v11668_v2 }
 0x5ec   : > { %v4740_v13 = vmax.f32 %v4584_v8, 0.0  ;;  %v4788_v7 = vpack.c.bf16 %v4742_v3, %v4741_v41  ;;  %6109 = vmatpush1.bf16.msra.mxu1 %v11666_v53 }
 0x5ee   : > { %v4787_v37 = vpack.c.bf16 %v4740_v13, %v4739_v11 }
 0x5f0   : > { %11198 = vmatprep.mubr.bf16.mxu1 %v4787_v37 }
 0x5f1   : > { %11199 = vmatmul.mubr.bf16.gmra.mxu1 %v4788_v7 }
 0x5f3   : > { %v11124_v38 = vpop.f32.mrf.mxu0 }
 0x5f4   : > { %v4605_v1 = vadd.f32 %v11124_v38, %v14001_v5 }
 0x5f5   : > { %v4596_v50 = vpop.f32.mrf.mxu0 }
 0x5f6   : > { %v4597_v0 = vadd.f32 %v14001_v5, %v4596_v50  ;;  %v4745_v34 = vmax.f32 %v4605_v1, 0.0 }
 0x5f7   : > { %v11125_v43 = vpop.f32.mrf.mxu0 }
 0x5f8   : > { %v4608_v31 = vadd.f32 %v11125_v43, %v14001_v5  ;;  %v4743_v14 = vmax.f32 %v4597_v0, 0.0  ;;  %v14115_v43 = vld [vmem:[%s15991_s12] ss:$0 sm:$0xff] }
 0x5f9   : > { %v4599_v9 = vpop.f32.mrf.mxu0 }
 0x5fa   : > { %v4600_v25 = vadd.f32 %v14001_v5, %v4599_v9  ;;  %v4746_v12 = vmax.f32 %v4608_v31, 0.0 }
 0x5fc   : > { %v4744_v40 = vmax.f32 %v4600_v25, 0.0  ;;  %v4790_v33 = vpack.c.bf16 %v4746_v12, %v4745_v34 }
 0x5fe   : > { %v4789_v56 = vpack.c.bf16 %v4744_v40, %v4743_v14 }
 0x600   : > { %11202 = vmatprep.mubr.bf16.mxu1 %v4789_v56 }
 0x601   : > { %11203 = vmatmul.mubr.bf16.gmra.mxu1 %v4790_v33 }
 0x603   : > { %v11128_v10 = vpop.f32.mrf.mxu0 }
 0x604   : > { %v4621_v32 = vadd.f32 %v11128_v10, %v14001_v5 }
 0x605   : > { %v4612_v51 = vpop.f32.mrf.mxu0 }
 0x606   : > { %v4613_v45 = vadd.f32 %v14001_v5, %v4612_v51  ;;  %v4749_v46 = vmax.f32 %v4621_v32, 0.0  ;;  %v11669_v32 = vld [vmem:[%s15994_s15 + $0xe0] ss:$28 sps:$4 sm:$0xff]  }
 0x607   : > { %v11129_v18 = vpop.f32.mrf.mxu0 }
 0x608   : > { %v4624_v15 = vadd.f32 %v11129_v18, %v14001_v5  ;;  %v4747_v57 = vmax.f32 %v4613_v45, 0.0 }
 0x609   : > { %v4615_v35 = vpop.f32.mrf.mxu0 }
 0x60a   : > { %v4616_v54 = vadd.f32 %v14001_v5, %v4615_v35  ;;  %v4750_v36 = vmax.f32 %v4624_v15, 0.0  ;;  %v11671_v35 = vld [vmem:[%s15994_s15 + $0xe4] ss:$28 sps:$4 sm:$0xff]  }
 0x60b   : > { %6110 = vmatprep.subr.bf16.mxu1 %v11671_v35 }
 0x60c   : > { %v4748_v61 = vmax.f32 %v4616_v54, 0.0  ;;  %v4792_v17 = vpack.c.bf16 %v4750_v36, %v4749_v46  ;;  %6111 = vmatpush1.bf16.msra.mxu1 %v11669_v32 }
 0x60e   : > { %v4791_v20 = vpack.c.bf16 %v4748_v61, %v4747_v57 }
 0x610   : > { %11206 = vmatprep.mubr.bf16.mxu1 %v4791_v20 }
 0x611   : > { %11207 = vmatmul.mubr.bf16.gmra.mxu1 %v4792_v17 }
 0x613   : > { %v11132_v26 = vpop.f32.mrf.mxu0 }
 0x614   : > { %v4637_v49 = vadd.f32 %v11132_v26, %v14001_v5 }
 0x615   : > { %v4628_v29 = vpop.f32.mrf.mxu0 }
 0x616   : > { %v4629_v27 = vadd.f32 %v14001_v5, %v4628_v29  ;;  %v4753_v55 = vmax.f32 %v4637_v49, 0.0 }
 0x617   : > { %v11133_v39 = vpop.f32.mrf.mxu0 }
 0x618   : > { %v4640_v16 = vadd.f32 %v11133_v39, %v14001_v5  ;;  %v4751_v42 = vmax.f32 %v4629_v27, 0.0 }
 0x619   : > { %v4631_v19 = vpop.f32.mrf.mxu0 }
 0x61a   : > { %v4632_v24 = vadd.f32 %v14001_v5, %v4631_v19  ;;  %v4754_v21 = vmax.f32 %v4640_v16, 0.0 }
 0x61c   : > { %v4752_v23 = vmax.f32 %v4632_v24, 0.0  ;;  %v4794_v52 = vpack.c.bf16 %v4754_v21, %v4753_v55 }
 0x61e   : > { %v4793_v63 = vpack.c.bf16 %v4752_v23, %v4751_v42 }
 0x620   : > { %11210 = vmatprep.mubr.bf16.mxu1 %v4793_v63 }
 0x621   : > { %11211 = vmatmul.mubr.bf16.gmra.mxu1 %v4794_v52 }
 0x623   : > { %v11136_v60 = vpop.f32.mrf.mxu0 }
 0x624   : > { %v4653_v62 = vadd.f32 %v11136_v60, %v14001_v5 }
 0x625   : > { %v4644_v4 = vpop.f32.mrf.mxu0 }
 0x626   : > { %v4645_v59 = vadd.f32 %v14001_v5, %v4644_v4  ;;  %v4757_v13 = vmax.f32 %v4653_v62, 0.0 }
 0x627   : > { %v11137_v6 = vpop.f32.mrf.mxu0 }
 0x628   : > { %v4656_v28 = vadd.f32 %v11137_v6, %v14001_v5  ;;  %v4755_v3 = vmax.f32 %v4645_v59, 0.0  ;;  %v11672_v59 = vld [vmem:[%s15994_s15 + $0xa8] ss:$28 sps:$4 sm:$0xff]  }
 0x629   : > { %v4647_v30 = vpop.f32.mrf.mxu0 }
 0x62a   : > { %v4648_v44 = vadd.f32 %v14001_v5, %v4647_v30  ;;  %v4758_v8 = vmax.f32 %v4656_v28, 0.0  ;;  %v11674_v28 = vld [vmem:[%s15994_s15 + $0xac] ss:$28 sps:$4 sm:$0xff]  }
 0x62b   : > { %6112 = vmatprep.subr.bf16.mxu1 %v11674_v28 }
 0x62c   : > { %v4756_v11 = vmax.f32 %v4648_v44, 0.0  ;;  %v4796_v37 = vpack.c.bf16 %v4758_v8, %v4757_v13  ;;  %6113 = vmatpush1.bf16.msra.mxu1 %v11672_v59 }
 0x62e   : > { %v4795_v41 = vpack.c.bf16 %v4756_v11, %v4755_v3 }
 0x630   : > { %11214 = vmatprep.mubr.bf16.mxu1 %v4795_v41 }
 0x631   : > { %v11168_v7 = vpop.f32.mrf.mxu1  ;;  %11215 = vmatmul.mubr.bf16.gmra.mxu1 %v4796_v37 }
 0x632   : > { %v4917_v25 = vadd.f32 %v11168_v7, %v14115_v43 }
 0x633   : > { %v11140_v38 = vpop.f32.mrf.mxu0  ;;  %v4908_v50 = vpop.f32.mrf.mxu1 }
 0x634   : > { %v4909_v1 = vadd.f32 %v14115_v43, %v4908_v50  ;;  %v4669_v33 = vadd.f32 %v11140_v38, %v14001_v5  ;;  %v5165_v54 = vmax.f32 %v4917_v25, 0.0 }
 0x635   : > { %v4660_v0 = vpop.f32.mrf.mxu0  ;;  %v11169_v31 = vpop.f32.mrf.mxu1 }
 0x636   : > { %v4920_v9 = vadd.f32 %v11169_v31, %v14115_v43  ;;  %v4661_v40 = vadd.f32 %v14001_v5, %v4660_v0  ;;  %v5163_v18 = vmax.f32 %v4909_v1, 0.0  ;;  %v4761_v61 = vmax.f32 %v4669_v33, 0.0 }
 0x637   : > { %v11141_v12 = vpop.f32.mrf.mxu0  ;;  %v4911_v14 = vpop.f32.mrf.mxu1 }
 0x638   : > { %v4672_v34 = vadd.f32 %v11141_v12, %v14001_v5  ;;  %v4912_v56 = vadd.f32 %v14115_v43, %v4911_v14  ;;  %v5166_v10 = vmax.f32 %v4920_v9, 0.0  ;;  %v4759_v22 = vmax.f32 %v4661_v40, 0.0 }
 0x639   : > { %v4663_v51 = vpop.f32.mrf.mxu0 }
 0x63a   : > { %v5164_v45 = vmax.f32 %v4912_v56, 0.0  ;;  %v4664_v15 = vadd.f32 %v14001_v5, %v4663_v51  ;;  %v4762_v47 = vmax.f32 %v4672_v34, 0.0  ;;  %v5228_v46 = vpack.c.bf16 %v5166_v10, %v5165_v54 }
 0x63c   : > { %v4760_v36 = vmax.f32 %v4664_v15, 0.0  ;;  %v5227_v57 = vpack.c.bf16 %v5164_v45, %v5163_v18  ;;  %v4798_v17 = vpack.c.bf16 %v4762_v47, %v4761_v61  ;;  %v11675_v45 = vld [vmem:[%s15994_s15 + $0x70] ss:$28 sps:$4 sm:$0xff]  }
 0x63d   : > { %v11677_v15 = vld [vmem:[%s15994_s15 + $0x74] ss:$28 sps:$4 sm:$0xff]  }
 0x63e   : > { %11246 = vmatprep.mubr.bf16.mxu0 %v5227_v57  ;;  %v4797_v20 = vpack.c.bf16 %v4760_v36, %v4759_v22  ;;  %6114 = vmatprep.subr.bf16.mxu1 %v11677_v15 }
 0x63f   : > { %11247 = vmatmul.mubr.bf16.vlgmr.msra.gmra.mxu0 %v5228_v46  ;;  %6115 = vmatpush1.bf16.msra.mxu1 %v11675_v45 }
 0x640   : > { %11218 = vmatprep.mubr.bf16.mxu1 %v4797_v20  ;;  %v16075_v20 = vmov 0  }
 0x641   : > { %v11172_v26 = vpop.f32.mrf.mxu1  ;;  %11219 = vmatmul.mubr.bf16.gmra.mxu1 %v4798_v17 }
 0x642   : > { %v4933_v24 = vadd.f32 %v11172_v26, %v14115_v43 }
 0x643   : > { %v11144_v29 = vpop.f32.mrf.mxu0  ;;  %v4924_v39 = vpop.f32.mrf.mxu1 }
 0x644   : > { %v4925_v49 = vadd.f32 %v14115_v43, %v4924_v39  ;;  %v4685_v55 = vadd.f32 %v11144_v29, %v14001_v5  ;;  %v5169_v62 = vmax.f32 %v4933_v24, 0.0 }
 0x645   : > { %v4676_v27 = vpop.f32.mrf.mxu0  ;;  %v11173_v16 = vpop.f32.mrf.mxu1 }
 0x646   : > { %v4936_v19 = vadd.f32 %v11173_v16, %v14115_v43  ;;  %v4677_v21 = vadd.f32 %v14001_v5, %v4676_v27  ;;  %v5167_v60 = vmax.f32 %v4925_v49, 0.0  ;;  %v4765_v8 = vmax.f32 %v4685_v55, 0.0 }
 0x647   : > { %v11145_v48 = vpop.f32.mrf.mxu0  ;;  %v4927_v58 = vpop.f32.mrf.mxu1 }
 0x648   : > { %v4688_v42 = vadd.f32 %v11145_v48, %v14001_v5  ;;  %v4928_v23 = vadd.f32 %v14115_v43, %v4927_v58  ;;  %v5170_v63 = vmax.f32 %v4936_v19, 0.0  ;;  %v4763_v44 = vmax.f32 %v4677_v21, 0.0  ;;  %v11678_v58 = vld [vmem:[%s15994_s15 + $0x38] ss:$28 sps:$4 sm:$0xff]  }
 0x649   : > { %v4679_v52 = vpop.f32.mrf.mxu0  ;;  %v11680_v21 = vld [vmem:[%s15994_s15 + $0x3c] ss:$28 sps:$4 sm:$0xff]  }
 0x64a   : > { %v5168_v4 = vmax.f32 %v4928_v23, 0.0  ;;  %v4680_v6 = vadd.f32 %v14001_v5, %v4679_v52  ;;  %v4766_v30 = vmax.f32 %v4688_v42, 0.0  ;;  %v5230_v3 = vpack.c.bf16 %v5170_v63, %v5169_v62  ;;  %6116 = vmatprep.subr.bf16.mxu1 %v11680_v21  ;;  %v11701_v21 = vld [vmem:[%s15994_s15 + $0xb4] ss:$28 sps:$4 sm:$0xff]  }
 0x64b   : > { %6117 = vmatpush1.bf16.msra.mxu1 %v11678_v58 }
 0x64c   : > { %v4764_v53 = vmax.f32 %v4680_v6, 0.0  ;;  %v5229_v2 = vpack.c.bf16 %v5168_v4, %v5167_v60  ;;  %v4800_v13 = vpack.c.bf16 %v4766_v30, %v4765_v8  ;;  %v11683_v8 = vld [vmem:[%s15994_s15 + $0x4] ss:$28 sps:$4 sm:$0xff]  }
 0x64d   : > { %6118 = vmatprep.subr.bf16.mxu1 %v11683_v8  ;;  %v11713_v8 = vld [vmem:[%s15994_s15 + $0xc] ss:$28 sps:$4 sm:$0xff]  }
 0x64e   : > { %11250 = vmatprep.mubr.bf16.mxu0 %v5229_v2  ;;  %v4799_v11 = vpack.c.bf16 %v4764_v53, %v4763_v44  ;;  %v11681_v2 = vld [vmem:[%s15994_s15] ss:$28 sps:$4 sm:$0xff]  }
 0x64f   : > { %11251 = vmatmul.mubr.bf16.gmra.mxu0 %v5230_v3  ;;  %6119 = vmatpush1.bf16.msra.mxu1 %v11681_v2 }
 0x650   : > { %11222 = vmatprep.mubr.bf16.mxu1 %v4799_v11 }
 0x651   : > { %v11176_v41 = vpop.f32.mrf.mxu1  ;;  %11223 = vmatmul.mubr.bf16.gmra.mxu1 %v4800_v13 }
 0x652   : > { %v4949_v1 = vadd.f32 %v11176_v41, %v14115_v43 }
 0x653   : > { %v11148_v37 = vpop.f32.mrf.mxu0  ;;  %v4940_v7 = vpop.f32.mrf.mxu1 }
 0x654   : > { %v4941_v0 = vadd.f32 %v14115_v43, %v4940_v7  ;;  %v4701_v34 = vadd.f32 %v11148_v37, %v14001_v5  ;;  %v5173_v32 = vmax.f32 %v4949_v1, 0.0 }
 0x655   : > { %v4692_v38 = vpop.f32.mrf.mxu0  ;;  %v11177_v50 = vpop.f32.mrf.mxu1 }
 0x656   : > { %v4952_v31 = vadd.f32 %v11177_v50, %v14115_v43  ;;  %v4693_v12 = vadd.f32 %v14001_v5, %v4692_v38  ;;  %v5171_v10 = vmax.f32 %v4941_v0, 0.0  ;;  %v4769_v36 = vmax.f32 %v4701_v34, 0.0  ;;  %v11684_v34 = vld [vmem:[%s15994_s15 + $0x190] ss:$28 sps:$4 sm:$0xff]  }
 0x657   : > { %v11149_v9 = vpop.f32.mrf.mxu0  ;;  %v4943_v25 = vpop.f32.mrf.mxu1 }
 0x658   : > { %v4704_v14 = vadd.f32 %v11149_v9, %v14001_v5  ;;  %v4944_v40 = vadd.f32 %v14115_v43, %v4943_v25  ;;  %v5174_v56 = vmax.f32 %v4952_v31, 0.0  ;;  %v4767_v54 = vmax.f32 %v4693_v12, 0.0 }
 0x659   : > { %v4695_v33 = vpop.f32.mrf.mxu0 }
 0x65a   : > { %v5172_v51 = vmax.f32 %v4944_v40, 0.0  ;;  %v4696_v18 = vadd.f32 %v14001_v5, %v4695_v33  ;;  %v4770_v35 = vmax.f32 %v4704_v14, 0.0  ;;  %v5232_v57 = vpack.c.bf16 %v5174_v56, %v5173_v32  ;;  %v11686_v56 = vld [vmem:[%s15994_s15 + $0x194] ss:$28 sps:$4 sm:$0xff]  }
 0x65b   : > { %6457 = vmatprep.subr.bf16.mxu0 %v11686_v56 }
 0x65c   : > { %v4768_v47 = vmax.f32 %v4696_v18, 0.0  ;;  %v5231_v22 = vpack.c.bf16 %v5172_v51, %v5171_v10  ;;  %v4802_v5 = vpack.c.bf16 %v4770_v35, %v4769_v36  ;;  %v11689_v10 = vld [vmem:[%s15994_s15 + $0x19c] ss:$28 sps:$4 sm:$0xff]   ;;  %6458 = vmatpush1.bf16.msra.mxu0 %v11684_v34 }
 0x65d   : > { %6810 = vmatprep.subr.bf16.mxu1 %v11689_v10 }
 0x65e   : > { %11254 = vmatprep.mubr.bf16.mxu0 %v5231_v22  ;;  %v4801_v61 = vpack.c.bf16 %v4768_v47, %v4767_v54 }
 0x65f   : > { %11255 = vmatmul.mubr.bf16.gmra.mxu0 %v5232_v57 }
 0x660   : > { %11226 = vmatprep.mubr.bf16.mxu1 %v4801_v61  ;;  %v11690_v61 = vld [vmem:[%s15994_s15 + $0x158] ss:$28 sps:$4 sm:$0xff]  }
 0x661   : > { %v11180_v46 = vpop.f32.mrf.mxu1  ;;  %11227 = vmatmul.mubr.bf16.gmra.mxu1 %v4802_v5  ;;  %v11692_v5 = vld [vmem:[%s15994_s15 + $0x15c] ss:$28 sps:$4 sm:$0xff]  }
 0x662   : > { %6136 = vmatprep.mubr.bf16.mxu1 %v16075_v20  ;;  %v4965_v27 = vadd.f32 %v11180_v46, %v14115_v43  ;;  %6459 = vmatprep.subr.bf16.mxu0 %v11692_v5 }
 0x663   : > { %v4956_v17 = vpop.f32.mrf.mxu1  ;;  %6460 = vmatpush1.bf16.msra.mxu0 %v11690_v61 }
 0x664   : > { %v4957_v29 = vadd.f32 %v14115_v43, %v4956_v17  ;;  %v5177_v42 = vmax.f32 %v4965_v27, 0.0 }
 0x665   : > { %v11181_v26 = vpop.f32.mrf.mxu1 }
 0x666   : > { %v4968_v39 = vadd.f32 %v11181_v26, %v14115_v43  ;;  %v5175_v24 = vmax.f32 %v4957_v29, 0.0  ;;  %v11695_v29 = vld [vmem:[%s15994_s15 + $0x124] ss:$28 sps:$4 sm:$0xff]  }
 0x667   : > { %v4959_v16 = vpop.f32.mrf.mxu1  ;;  %6461 = vmatprep.subr.bf16.mxu0 %v11695_v29 }
 0x668   : > { %v4960_v49 = vadd.f32 %v14115_v43, %v4959_v16  ;;  %v5178_v19 = vmax.f32 %v4968_v39, 0.0  ;;  %v11693_v39 = vld [vmem:[%s15994_s15 + $0x120] ss:$28 sps:$4 sm:$0xff]   ;;  %v11698_v16 = vld [vmem:[%s15994_s15 + $0xec] ss:$28 sps:$4 sm:$0xff]  }
 0x669   : > { %6462 = vmatpush1.bf16.msra.mxu0 %v11693_v39 }
 0x66a   : > { %v5176_v48 = vmax.f32 %v4960_v49, 0.0  ;;  %v5234_v55 = vpack.c.bf16 %v5178_v19, %v5177_v42  ;;  %v11696_v19 = vld [vmem:[%s15994_s15 + $0xe8] ss:$28 sps:$4 sm:$0xff]   ;;  %6463 = vmatprep.subr.bf16.mxu0 %v11698_v16 }
 0x66c   : > { %v5233_v23 = vpack.c.bf16 %v5176_v48, %v5175_v24 }
 0x66d   : > { %6464 = vmatpush1.bf16.msra.mxu0 %v11696_v19 }
 0x66e   : > { %11258 = vmatprep.mubr.bf16.mxu0 %v5233_v23  ;;  %6465 = vmatprep.subr.bf16.mxu0 %v11701_v21 }
 0x66f   : > { %11259 = vmatmul.mubr.bf16.gmra.mxu0 %v5234_v55  ;;  %v11699_v55 = vld [vmem:[%s15994_s15 + $0xb0] ss:$28 sps:$4 sm:$0xff]  }
 0x671   : > { %v11184_v63 = vpop.f32.mrf.mxu1  ;;  %6466 = vmatpush1.bf16.msra.mxu0 %v11699_v55 }
 0x672   : > { %v4981_v59 = vadd.f32 %v11184_v63, %v14115_v43 }
 0x673   : > { %v4972_v52 = vpop.f32.mrf.mxu1 }
 0x674   : > { %v4973_v4 = vadd.f32 %v14115_v43, %v4972_v52  ;;  %v5181_v3 = vmax.f32 %v4981_v59, 0.0  ;;  %v11704_v59 = vld [vmem:[%s15994_s15 + $0x7c] ss:$28 sps:$4 sm:$0xff]  }
 0x675   : > { %v11185_v60 = vpop.f32.mrf.mxu1  ;;  %6467 = vmatprep.subr.bf16.mxu0 %v11704_v59 }
 0x676   : > { %v4984_v6 = vadd.f32 %v11185_v60, %v14115_v43  ;;  %v5179_v44 = vmax.f32 %v4973_v4, 0.0 }
 0x677   : > { %v4975_v28 = vpop.f32.mrf.mxu1 }
 0x678   : > { %v4976_v62 = vadd.f32 %v14115_v43, %v4975_v28  ;;  %v5182_v30 = vmax.f32 %v4984_v6, 0.0  ;;  %v11702_v6 = vld [vmem:[%s15994_s15 + $0x78] ss:$28 sps:$4 sm:$0xff]  }
 0x679   : > { %6468 = vmatpush1.bf16.msra.mxu0 %v11702_v6 }
 0x67a   : > { %v5180_v53 = vmax.f32 %v4976_v62, 0.0  ;;  %v5236_v13 = vpack.c.bf16 %v5182_v30, %v5181_v3 }
 0x67c   : > { %v5235_v11 = vpack.c.bf16 %v5180_v53, %v5179_v44  ;;  %v11710_v44 = vld [vmem:[%s15994_s15 + $0x44] ss:$28 sps:$4 sm:$0xff]  }
 0x67d   : > { %v11708_v53 = vld [vmem:[%s15994_s15 + $0x40] ss:$28 sps:$4 sm:$0xff]   ;;  %6469 = vmatprep.subr.bf16.mxu0 %v11710_v44 }
 0x67e   : > { %11262 = vmatprep.mubr.bf16.mxu0 %v5235_v11  ;;  %6470 = vmatpush1.bf16.msra.mxu0 %v11708_v53  ;;  %v11711_v11 = vld [vmem:[%s15994_s15 + $0x8] ss:$28 sps:$4 sm:$0xff]  }
 0x67f   : > { %11263 = vmatmul.mubr.bf16.gmra.mxu0 %v5236_v13  ;;  %6471 = vmatprep.subr.bf16.mxu0 %v11713_v8 }
 0x681   : > { %v11188_v41 = vpop.f32.mrf.mxu1 }
 0x682   : > { %v4997_v0 = vadd.f32 %v11188_v41, %v14115_v43  ;;  %6472 = vmatpush1.bf16.msra.mxu0 %v11711_v11 }
 0x683   : > { %v4988_v37 = vpop.f32.mrf.mxu1 }
 0x684   : > { %v4989_v38 = vadd.f32 %v14115_v43, %v4988_v37  ;;  %v5185_v14 = vmax.f32 %v4997_v0, 0.0 }
 0x685   : > { %v11189_v7 = vpop.f32.mrf.mxu1 }
 0x686   : > { %v5000_v50 = vadd.f32 %v11189_v7, %v14115_v43  ;;  %v5183_v25 = vmax.f32 %v4989_v38, 0.0 }
 0x687   : > { %v4991_v31 = vpop.f32.mrf.mxu1 }
 0x688   : > { %v4992_v1 = vadd.f32 %v14115_v43, %v4991_v31  ;;  %v5186_v9 = vmax.f32 %v5000_v50, 0.0 }
 0x68a   : > { %v5184_v12 = vmax.f32 %v4992_v1, 0.0  ;;  %v5238_v33 = vpack.c.bf16 %v5186_v9, %v5185_v14 }
 0x68c   : > { %v5237_v40 = vpack.c.bf16 %v5184_v12, %v5183_v25 }
 0x68e   : > { %11266 = vmatprep.mubr.bf16.mxu0 %v5237_v40 }
 0x68f   : > { %11267 = vmatmul.mubr.bf16.gmra.mxu0 %v5238_v33 }
 0x691   : > { %v11192_v51 = vpop.f32.mrf.mxu1 }
 0x692   : > { %v5013_v35 = vadd.f32 %v11192_v51, %v14115_v43 }
 0x693   : > { %v5004_v18 = vpop.f32.mrf.mxu1 }
 0x694   : > { %v5005_v15 = vadd.f32 %v14115_v43, %v5004_v18  ;;  %v5189_v46 = vmax.f32 %v5013_v35, 0.0 }
 0x695   : > { %v11193_v45 = vpop.f32.mrf.mxu1 }
 0x696   : > { %v5016_v32 = vadd.f32 %v11193_v45, %v14115_v43  ;;  %v5187_v36 = vmax.f32 %v5005_v15, 0.0 }
 0x697   : > { %v5007_v54 = vpop.f32.mrf.mxu1 }
 0x698   : > { %v5008_v47 = vadd.f32 %v14115_v43, %v5007_v54  ;;  %v5190_v22 = vmax.f32 %v5016_v32, 0.0 }
 0x69a   : > { %v5188_v57 = vmax.f32 %v5008_v47, 0.0  ;;  %v5240_v26 = vpack.c.bf16 %v5190_v22, %v5189_v46 }
 0x69c   : > { %v5239_v17 = vpack.c.bf16 %v5188_v57, %v5187_v36 }
 0x69e   : > { %11270 = vmatprep.mubr.bf16.mxu0 %v5239_v17 }
 0x69f   : > { %11271 = vmatmul.mubr.bf16.gmra.mxu0 %v5240_v26 }
 0x6a1   : > { %v11196_v27 = vpop.f32.mrf.mxu1 }
 0x6a2   : > { %v5029_v42 = vadd.f32 %v11196_v27, %v14115_v43 }
 0x6a3   : > { %v5020_v49 = vpop.f32.mrf.mxu1 }
 0x6a4   : > { %v5021_v48 = vadd.f32 %v14115_v43, %v5020_v49  ;;  %v5193_v28 = vmax.f32 %v5029_v42, 0.0 }
 0x6a5   : > { %v11197_v24 = vpop.f32.mrf.mxu1 }
 0x6a6   : > { %v5032_v58 = vadd.f32 %v11197_v24, %v14115_v43  ;;  %v5191_v60 = vmax.f32 %v5021_v48, 0.0 }
 0x6a7   : > { %v5023_v23 = vpop.f32.mrf.mxu1 }
 0x6a8   : > { %v5024_v63 = vadd.f32 %v14115_v43, %v5023_v23  ;;  %v5194_v52 = vmax.f32 %v5032_v58, 0.0 }
 0x6aa   : > { %v5192_v4 = vmax.f32 %v5024_v63, 0.0  ;;  %v5242_v30 = vpack.c.bf16 %v5194_v52, %v5193_v28 }
 0x6ac   : > { %v5241_v62 = vpack.c.bf16 %v5192_v4, %v5191_v60 }
 0x6ae   : > { %11274 = vmatprep.mubr.bf16.mxu0 %v5241_v62 }
 0x6af   : > { %11275 = vmatmul.mubr.bf16.gmra.mxu0 %v5242_v30 }
 0x6b1   : > { %v11200_v2 = vpop.f32.mrf.mxu1 }
 0x6b2   : > { %v5045_v7 = vadd.f32 %v11200_v2, %v14115_v43 }
 0x6b3   : > { %v5036_v3 = vpop.f32.mrf.mxu1 }
 0x6b4   : > { %v5037_v41 = vadd.f32 %v14115_v43, %v5036_v3  ;;  %v5197_v9 = vmax.f32 %v5045_v7, 0.0 }
 0x6b5   : > { %v11201_v13 = vpop.f32.mrf.mxu1 }
 0x6b6   : > { %v5048_v37 = vadd.f32 %v11201_v13, %v14115_v43  ;;  %v5195_v31 = vmax.f32 %v5037_v41, 0.0 }
 0x6b7   : > { %v5039_v38 = vpop.f32.mrf.mxu1 }
 0x6b8   : > { %v5040_v50 = vadd.f32 %v14115_v43, %v5039_v38  ;;  %v5198_v0 = vmax.f32 %v5048_v37, 0.0 }
 0x6ba   : > { %v5196_v1 = vmax.f32 %v5040_v50, 0.0  ;;  %v5244_v12 = vpack.c.bf16 %v5198_v0, %v5197_v9  ;;  %v14266_v9 = vld [vmem:[%s15993_s14] ss:$0 sm:$0xff] }
 0x6bc   : > { %v5243_v25 = vpack.c.bf16 %v5196_v1, %v5195_v31 }
 0x6be   : > { %11278 = vmatprep.mubr.bf16.mxu0 %v5243_v25 }
 0x6bf   : > { %11279 = vmatmul.mubr.bf16.gmra.mxu0 %v5244_v12 }
 0x6c1   : > { %v11204_v14 = vpop.f32.mrf.mxu1 }
 0x6c2   : > { %v5061_v10 = vadd.f32 %v11204_v14, %v14115_v43 }
 0x6c3   : > { %v5052_v40 = vpop.f32.mrf.mxu1 }
 0x6c4   : > { %v5053_v56 = vadd.f32 %v14115_v43, %v5052_v40  ;;  %v5201_v35 = vmax.f32 %v5061_v10, 0.0 }
 0x6c5   : > { %v11205_v34 = vpop.f32.mrf.mxu1 }
 0x6c6   : > { %v5064_v33 = vadd.f32 %v11205_v34, %v14115_v43  ;;  %v5199_v15 = vmax.f32 %v5053_v56, 0.0 }
 0x6c7   : > { %v5055_v51 = vpop.f32.mrf.mxu1 }
 0x6c8   : > { %v5056_v18 = vadd.f32 %v14115_v43, %v5055_v51  ;;  %v5202_v45 = vmax.f32 %v5064_v33, 0.0 }
 0x6ca   : > { %v5200_v32 = vmax.f32 %v5056_v18, 0.0  ;;  %v5246_v47 = vpack.c.bf16 %v5202_v45, %v5201_v35 }
 0x6cc   : > { %v5245_v54 = vpack.c.bf16 %v5200_v32, %v5199_v15 }
 0x6ce   : > { %11282 = vmatprep.mubr.bf16.mxu0 %v5245_v54  ;;  %v11687_v54 = vld [vmem:[%s15994_s15 + $0x198] ss:$28 sps:$4 sm:$0xff]  }
 0x6cf   : > { %11283 = vmatmul.mubr.bf16.gmra.mxu0 %v5246_v47 }
 0x6d1   : > { %v11208_v22 = vpop.f32.mrf.mxu1 }
 0x6d2   : > { %v5077_v46 = vadd.f32 %v11208_v22, %v14115_v43 }
 0x6d3   : > { %v5068_v36 = vpop.f32.mrf.mxu1 }
 0x6d4   : > { %v5069_v61 = vadd.f32 %v14115_v43, %v5068_v36  ;;  %v5205_v16 = vmax.f32 %v5077_v46, 0.0 }
 0x6d5   : > { %v11209_v57 = vpop.f32.mrf.mxu1 }
 0x6d6   : > { %v5080_v5 = vadd.f32 %v11209_v57, %v14115_v43  ;;  %v5203_v39 = vmax.f32 %v5069_v61, 0.0  ;;  %v11707_v61 = vld [vmem:[%s15994_s15 + $0x164] ss:$28 sps:$4 sm:$0xff]  }
 0x6d7   : > { %v5071_v17 = vpop.f32.mrf.mxu1 }
 0x6d8   : > { %v5072_v26 = vadd.f32 %v14115_v43, %v5071_v17  ;;  %v5206_v29 = vmax.f32 %v5080_v5, 0.0 }
 0x6da   : > { %v5204_v27 = vmax.f32 %v5072_v26, 0.0  ;;  %v5248_v19 = vpack.c.bf16 %v5206_v29, %v5205_v16  ;;  %v14288_v26 = vld [vmem:[%s15994_s15 + $0x1a0] ss:$28 sps:$4 sm:$0xff]   ;;  %v11716_v16 = vld [vmem:[%s15994_s15 + $0x12c] ss:$28 sps:$4 sm:$0xff]  }
 0x6db   : > { %11310 = vmatprep.subr.bf16.mxu0 %v14288_v26 }
 0x6dc   : > { %v5247_v49 = vpack.c.bf16 %v5204_v27, %v5203_v39  ;;  %v11705_v39 = vld [vmem:[%s15994_s15 + $0x160] ss:$28 sps:$4 sm:$0xff]  }
 0x6de   : > { %11286 = vmatprep.mubr.bf16.mxu0 %v5247_v49 }
 0x6df   : > { %11287 = vmatmul.mubr.bf16.gmra.mxu0 %v5248_v19 }
 0x6e1   : > { %v11212_v24 = vpop.f32.mrf.mxu1 }
 0x6e2   : > { %v5093_v23 = vadd.f32 %v11212_v24, %v14115_v43 }
 0x6e3   : > { %v5084_v48 = vpop.f32.mrf.mxu1 }
 0x6e4   : > { %v5085_v21 = vadd.f32 %v14115_v43, %v5084_v48  ;;  %v5209_v6 = vmax.f32 %v5093_v23, 0.0 }
 0x6e5   : > { %v11213_v58 = vpop.f32.mrf.mxu1 }
 0x6e6   : > { %v5096_v42 = vadd.f32 %v11213_v58, %v14115_v43  ;;  %v5207_v60 = vmax.f32 %v5085_v21, 0.0  ;;  %v11714_v58 = vld [vmem:[%s15994_s15 + $0x128] ss:$28 sps:$4 sm:$0xff]  }
 0x6e7   : > { %v5087_v55 = vpop.f32.mrf.mxu1 }
 0x6e8   : > { %v5088_v63 = vadd.f32 %v14115_v43, %v5087_v55  ;;  %v5210_v52 = vmax.f32 %v5096_v42, 0.0  ;;  %v11719_v42 = vld [vmem:[%s15994_s15 + $0xf4] ss:$28 sps:$4 sm:$0xff]  }
 0x6ea   : > { %v5208_v4 = vmax.f32 %v5088_v63, 0.0  ;;  %v5250_v28 = vpack.c.bf16 %v5210_v52, %v5209_v6 }
 0x6ec   : > { %v5249_v59 = vpack.c.bf16 %v5208_v4, %v5207_v60  ;;  %v11717_v4 = vld [vmem:[%s15994_s15 + $0xf0] ss:$28 sps:$4 sm:$0xff]  }
 0x6ee   : > { %11290 = vmatprep.mubr.bf16.mxu0 %v5249_v59 }
 0x6ef   : > { %11291 = vmatmul.mubr.bf16.gmra.mxu0 %v5250_v28 }
 0x6f1   : > { %v11216_v62 = vpop.f32.mrf.mxu1 }
 0x6f2   : > { %v5109_v8 = vadd.f32 %v11216_v62, %v14115_v43  ;;  %v11722_v62 = vld [vmem:[%s15994_s15 + $0xbc] ss:$28 sps:$4 sm:$0xff]  }
 0x6f3   : > { %v5100_v30 = vpop.f32.mrf.mxu1 }
 0x6f4   : > { %v5101_v53 = vadd.f32 %v14115_v43, %v5100_v30  ;;  %v5213_v7 = vmax.f32 %v5109_v8, 0.0 }
 0x6f5   : > { %v11217_v44 = vpop.f32.mrf.mxu1 }
 0x6f6   : > { %v5112_v2 = vadd.f32 %v11217_v44, %v14115_v43  ;;  %v5211_v41 = vmax.f32 %v5101_v53, 0.0 }
 0x6f7   : > { %v5103_v3 = vpop.f32.mrf.mxu1 }
 0x6f8   : > { %v5104_v11 = vadd.f32 %v14115_v43, %v5103_v3  ;;  %v5214_v13 = vmax.f32 %v5112_v2, 0.0 }
 0x6fa   : > { %v5212_v37 = vmax.f32 %v5104_v11, 0.0  ;;  %v5252_v50 = vpack.c.bf16 %v5214_v13, %v5213_v7  ;;  %v11720_v11 = vld [vmem:[%s15994_s15 + $0xb8] ss:$28 sps:$4 sm:$0xff]  }
 0x6fc   : > { %v5251_v38 = vpack.c.bf16 %v5212_v37, %v5211_v41 }
 0x6fe   : > { %11294 = vmatprep.mubr.bf16.mxu0 %v5251_v38 }
 0x6ff   : > { %v11248_v0 = vpop.f32.mrf.mxu0  ;;  %11295 = vmatmul.mubr.bf16.gmra.mxu0 %v5252_v50 }
 0x700   : > { %v5373_v46 = vadd.f32 %v11248_v0, %v14266_v9 }
 0x701   : > { %v11220_v31 = vpop.f32.mrf.mxu1  ;;  %v5364_v1 = vpop.f32.mrf.mxu0 }
 0x702   : > { %v5365_v14 = vadd.f32 %v14266_v9, %v5364_v1  ;;  %v5125_v51 = vadd.f32 %v11220_v31, %v14115_v43  ;;  %v5621_v19 = vmax.f32 %v5373_v46, 0.0 }
 0x703   : > { %v5116_v25 = vpop.f32.mrf.mxu1  ;;  %v11249_v12 = vpop.f32.mrf.mxu0 }
 0x704   : > { %v5117_v56 = vadd.f32 %v14115_v43, %v5116_v25  ;;  %v5619_v45 = vmax.f32 %v5365_v14, 0.0  ;;  %v5376_v22 = vadd.f32 %v11249_v12, %v14266_v9  ;;  %v5217_v5 = vmax.f32 %v5125_v51, 0.0 }
 0x705   : > { %v11221_v40 = vpop.f32.mrf.mxu1  ;;  %v5367_v34 = vpop.f32.mrf.mxu0 }
 0x706   : > { %v5128_v33 = vadd.f32 %v11221_v40, %v14115_v43  ;;  %v5368_v10 = vadd.f32 %v14266_v9, %v5367_v34  ;;  %v5215_v47 = vmax.f32 %v5117_v56, 0.0  ;;  %v5622_v27 = vmax.f32 %v5376_v22, 0.0 }
 0x707   : > { %v5119_v18 = vpop.f32.mrf.mxu1 }
 0x708   : > { %v5620_v15 = vmax.f32 %v5368_v10, 0.0  ;;  %v5120_v32 = vadd.f32 %v14115_v43, %v5119_v18  ;;  %v5218_v35 = vmax.f32 %v5128_v33, 0.0  ;;  %v14301_v21 = vpack.c.bf16 %v5622_v27, %v5621_v19 }
 0x70a   : > { %v14278_v36 = vpack.c.bf16 %v5620_v15, %v5619_v45  ;;  %v5216_v57 = vmax.f32 %v5120_v32, 0.0  ;;  %v5254_v29 = vpack.c.bf16 %v5218_v35, %v5217_v5 }
 0x70c   : > { %6137 = vmatmul.mubr.bf16.vlgmr.msra.gmra.mxu1 %v14278_v36  ;;  %v5253_v17 = vpack.c.bf16 %v5216_v57, %v5215_v47 }
 0x70d   : > { %6811 = vmatpush1.bf16.msra.mxu1 %v11687_v54  ;;  %6146 = vmatprep.mubr.bf16.mxu1 %v16075_v20 }
 0x70e   : > { %11298 = vmatprep.mubr.bf16.mxu0 %v5253_v17  ;;  %6812 = vmatprep.subr.bf16.mxu1 %v11707_v61 }
 0x70f   : > { %v11252_v49 = vpop.f32.mrf.mxu0  ;;  %11299 = vmatmul.mubr.bf16.gmra.mxu0 %v5254_v29 }
 0x710   : > { %v5389_v50 = vadd.f32 %v11252_v49, %v14266_v9  ;;  %v11724_v49 = vld [vmem:[%s15994_s15 + $0x80] ss:$28 sps:$4 sm:$0xff]  }
 0x711   : > { %v11224_v24 = vpop.f32.mrf.mxu1  ;;  %v5380_v48 = vpop.f32.mrf.mxu0  ;;  %6813 = vmatpush1.bf16.msra.mxu1 %v11705_v39 }
 0x712   : > { %6814 = vmatprep.subr.bf16.mxu1 %v11716_v16  ;;  %v5381_v63 = vadd.f32 %v14266_v9, %v5380_v48  ;;  %v5141_v30 = vadd.f32 %v11224_v24, %v14115_v43  ;;  %v5625_v12 = vmax.f32 %v5389_v50, 0.0 }
 0x713   : > { %v5132_v23 = vpop.f32.mrf.mxu1  ;;  %v11253_v55 = vpop.f32.mrf.mxu0 }
 0x714   : > { %6147 = vmatmul.mubr.bf16.gmra.mxu1 %v14301_v21  ;;  %v5133_v6 = vadd.f32 %v14115_v43, %v5132_v23  ;;  %v5623_v53 = vmax.f32 %v5381_v63, 0.0  ;;  %v5392_v41 = vadd.f32 %v11253_v55, %v14266_v9  ;;  %v5221_v38 = vmax.f32 %v5141_v30, 0.0 }
 0x715   : > { %v11225_v52 = vpop.f32.mrf.mxu1  ;;  %v5383_v60 = vpop.f32.mrf.mxu0  ;;  %6156 = vmatprep.mubr.bf16.mxu1 %v16075_v20  ;;  %6815 = vmatpush1.bf16.msra.mxu1 %v11714_v58 }
 0x716   : > { %v5144_v59 = vadd.f32 %v11225_v52, %v14115_v43  ;;  %v5384_v28 = vadd.f32 %v14266_v9, %v5383_v60  ;;  %6816 = vmatprep.subr.bf16.mxu1 %v11719_v42  ;;  %v5219_v13 = vmax.f32 %v5133_v6, 0.0  ;;  %v5626_v1 = vmax.f32 %v5392_v41, 0.0  ;;  %v11727_v60 = vld [vmem:[%s15994_s15 + $0x168] ss:$28 sps:$4 sm:$0xff]  }
 0x717   : > { %v5135_v44 = vpop.f32.mrf.mxu1 }
 0x718   : > { %v5624_v2 = vmax.f32 %v5384_v28, 0.0  ;;  %v5136_v8 = vadd.f32 %v14115_v43, %v5135_v44  ;;  %v5222_v3 = vmax.f32 %v5144_v59, 0.0  ;;  %v14329_v34 = vpack.c.bf16 %v5626_v1, %v5625_v12  ;;  %v11728_v1 = vld [vmem:[%s15994_s15 + $0x48] ss:$28 sps:$4 sm:$0xff]   ;;  %v11731_v12 = vld [vmem:[%s15994_s15 + $0x130] ss:$28 sps:$4 sm:$0xff]  }
 0x719   : > { %6817 = vmatpush1.bf16.msra.mxu1 %v11717_v4 }
 0x71a   : > { %v14324_v37 = vpack.c.bf16 %v5624_v2, %v5623_v53  ;;  %v5220_v7 = vmax.f32 %v5136_v8, 0.0  ;;  %6818 = vmatprep.subr.bf16.mxu1 %v11722_v62  ;;  %v5256_v31 = vpack.c.bf16 %v5222_v3, %v5221_v38 }
 0x71c   : > { %6157 = vmatmul.mubr.bf16.gmra.mxu1 %v14324_v37  ;;  %v5255_v0 = vpack.c.bf16 %v5220_v7, %v5219_v13 }
 0x71d   : > { %6166 = vmatprep.mubr.bf16.mxu1 %v16075_v20  ;;  %6819 = vmatpush1.bf16.msra.mxu1 %v11720_v11 }
 0x71e   : > { %11302 = vmatprep.mubr.bf16.mxu0 %v5255_v0 }
 0x71f   : > { %v11256_v25 = vpop.f32.mrf.mxu0  ;;  %11303 = vmatmul.mubr.bf16.gmra.mxu0 %v5256_v31 }
 0x720   : > { %v5405_v27 = vadd.f32 %v11256_v25, %v14266_v9  ;;  %v11730_v25 = vld [vmem:[%s15994_s15 + $0x4c] ss:$28 sps:$4 sm:$0xff]  }
 0x721   : > { %v11228_v14 = vpop.f32.mrf.mxu1  ;;  %v5396_v40 = vpop.f32.mrf.mxu0 }
 0x722   : > { %v5397_v10 = vadd.f32 %v14266_v9, %v5396_v40  ;;  %v5157_v35 = vadd.f32 %v11228_v14, %v14115_v43  ;;  %v5629_v58 = vmax.f32 %v5405_v27, 0.0 }
 0x723   : > { %v5148_v56 = vpop.f32.mrf.mxu1  ;;  %v11257_v33 = vpop.f32.mrf.mxu0 }
 0x724   : > { %6167 = vmatmul.mubr.bf16.gmra.mxu1 %v14329_v34  ;;  %v5149_v45 = vadd.f32 %v14115_v43, %v5148_v56  ;;  %v5627_v47 = vmax.f32 %v5397_v10, 0.0  ;;  %v5408_v46 = vadd.f32 %v11257_v33, %v14266_v9  ;;  %v5225_v39 = vmax.f32 %v5157_v35, 0.0 }
 0x725   : > { %v11229_v51 = vpop.f32.mrf.mxu1  ;;  %v5399_v18 = vpop.f32.mrf.mxu0  ;;  %6176 = vmatprep.mubr.bf16.mxu1 %v16075_v20 }
 0x726   : > { %v5160_v15 = vadd.f32 %v11229_v51, %v14115_v43  ;;  %v5400_v32 = vadd.f32 %v14266_v9, %v5399_v18  ;;  %v5223_v5 = vmax.f32 %v5149_v45, 0.0  ;;  %v5630_v24 = vmax.f32 %v5408_v46, 0.0 }
 0x727   : > { %v5151_v54 = vpop.f32.mrf.mxu1 }
 0x728   : > { %v5628_v22 = vmax.f32 %v5400_v32, 0.0  ;;  %v5152_v57 = vadd.f32 %v14115_v43, %v5151_v54  ;;  %v5226_v61 = vmax.f32 %v5160_v15, 0.0  ;;  %v11726_v43 = vld [vmem:[%s15994_s15 + $0x84] ss:$28 sps:$4 sm:$0xff]   ;;  %v14352_v23 = vpack.c.bf16 %v5630_v24, %v5629_v58 }
 0x729   : > { %6820 = vmatprep.subr.bf16.mxu1 %v11726_v43 }
 0x72a   : > { %v14340_v17 = vpack.c.bf16 %v5628_v22, %v5627_v47  ;;  %v5224_v29 = vmax.f32 %v5152_v57, 0.0  ;;  %v5258_v19 = vpack.c.bf16 %v5226_v61, %v5225_v39  ;;  %6821 = vmatpush1.bf16.msra.mxu1 %v11724_v49 }
 0x72b   : > { %6822 = vmatprep.subr.bf16.mxu1 %v11730_v25 }
 0x72c   : > { %6177 = vmatmul.mubr.bf16.gmra.mxu1 %v14340_v17  ;;  %v5257_v16 = vpack.c.bf16 %v5224_v29, %v5223_v5 }
 0x72d   : > { %6186 = vmatprep.mubr.bf16.mxu1 %v16075_v20 }
 0x72e   : > { %11306 = vmatprep.mubr.bf16.mxu0 %v5257_v16  ;;  %6823 = vmatpush1.bf16.msra.mxu1 %v11728_v1 }
 0x72f   : > { %v11260_v48 = vpop.f32.mrf.mxu0  ;;  %11307 = vmatmul.mubr.bf16.gmra.mxu0 %v5258_v19 }
 0x730   : > { %6489 = vmatprep.mubr.bf16.mxu0 %v16075_v20  ;;  %v5421_v30 = vadd.f32 %v11260_v48, %v14266_v9 }
 0x731   : > { %v5412_v42 = vpop.f32.mrf.mxu0 }
 0x732   : > { %v5413_v63 = vadd.f32 %v14266_v9, %v5412_v42  ;;  %v5633_v2 = vmax.f32 %v5421_v30, 0.0 }
 0x733   : > { %v11261_v55 = vpop.f32.mrf.mxu0 }
 0x734   : > { %6187 = vmatmul.mubr.bf16.gmra.mxu1 %v14352_v23  ;;  %v5631_v6 = vmax.f32 %v5413_v63, 0.0  ;;  %v5424_v28 = vadd.f32 %v11261_v55, %v14266_v9 }
 0x735   : > { %v5415_v52 = vpop.f32.mrf.mxu0  ;;  %6196 = vmatprep.mubr.bf16.mxu1 %v16075_v20 }
 0x736   : > { %v5416_v4 = vadd.f32 %v14266_v9, %v5415_v52  ;;  %v5634_v44 = vmax.f32 %v5424_v28, 0.0 }
 0x737   : > { %6490 = vmatmul.mubr.bf16.vlgmr.msra.gmra.mxu0 %v14278_v36 }
 0x738   : > { %v5632_v59 = vmax.f32 %v5416_v4, 0.0  ;;  %6499 = vmatprep.mubr.bf16.mxu0 %v16075_v20  ;;  %11311 = vmatpush3.bf16.msra.mxu0 %v14288_v26  ;;  %v14372_v8 = vpack.c.bf16 %v5634_v44, %v5633_v2 }
 0x739   : > { %11312 = vmatprep.subr.bf16.mxu0 %v11727_v60 }
 0x73a   : > { %v14365_v62 = vpack.c.bf16 %v5632_v59, %v5631_v6 }
 0x73c   : > { %6197 = vmatmul.mubr.bf16.gmra.mxu1 %v14365_v62  ;;  %11313 = vmatpush3.bf16.msra.mxu0 %v11727_v60 }
 0x73d   : > { %6206 = vmatprep.mubr.bf16.mxu1 %v16075_v20  ;;  %11314 = vmatprep.subr.bf16.mxu0 %v11731_v12 }
 0x73f   : > { %v11264_v53 = vpop.f32.mrf.mxu0  ;;  %6500 = vmatmul.mubr.bf16.gmra.mxu0 %v14301_v21 }
 0x740   : > { %6509 = vmatprep.mubr.bf16.mxu0 %v16075_v20  ;;  %v5437_v31 = vadd.f32 %v11264_v53, %v14266_v9  ;;  %11315 = vmatpush3.bf16.msra.mxu0 %v11731_v12 }
 0x741   : > { %v5428_v26 = vpop.f32.mrf.mxu0 }
 0x742   : > { %v5429_v11 = vadd.f32 %v14266_v9, %v5428_v26  ;;  %v5637_v56 = vmax.f32 %v5437_v31, 0.0 }
 0x743   : > { %v11265_v3 = vpop.f32.mrf.mxu0 }
 0x744   : > { %6207 = vmatmul.mubr.bf16.gmra.mxu1 %v14372_v8  ;;  %v5635_v7 = vmax.f32 %v5429_v11, 0.0  ;;  %v5440_v50 = vadd.f32 %v11265_v3, %v14266_v9 }
 0x745   : > { %v5431_v13 = vpop.f32.mrf.mxu0  ;;  %6216 = vmatprep.mubr.bf16.mxu1 %v16075_v20 }
 0x746   : > { %v5432_v41 = vadd.f32 %v14266_v9, %v5431_v13  ;;  %v5638_v14 = vmax.f32 %v5440_v50, 0.0 }
 0x747   : > { %6510 = vmatmul.mubr.bf16.gmra.mxu0 %v14324_v37 }
 0x748   : > { %v5636_v38 = vmax.f32 %v5432_v41, 0.0  ;;  %6519 = vmatprep.mubr.bf16.mxu0 %v16075_v20  ;;  %v14397_v10 = vpack.c.bf16 %v5638_v14, %v5637_v56  ;;  %v11732_v41 = vld [vmem:[%s15994_s15 + $0x10] ss:$28 sps:$4 sm:$0xff]  }
 0x74a   : > { %v14381_v0 = vpack.c.bf16 %v5636_v38, %v5635_v7  ;;  %v11734_v7 = vld [vmem:[%s15994_s15 + $0x14] ss:$28 sps:$4 sm:$0xff]  }
 0x74b   : > { %v11735_v38 = vld [vmem:[%s15994_s15 + $0xf8] ss:$28 sps:$4 sm:$0xff]   ;;  %6824 = vmatprep.subr.bf16.mxu1 %v11734_v7 }
 0x74c   : > { %6217 = vmatmul.mubr.bf16.gmra.mxu1 %v14381_v0  ;;  %11316 = vmatprep.subr.bf16.mxu0 %v11735_v38 }
 0x74d   : > { %6226 = vmatprep.mubr.bf16.mxu1 %v16075_v20  ;;  %6825 = vmatpush1.bf16.msra.mxu1 %v11732_v41 }
 0x74e   : > { %11317 = vmatpush3.bf16.msra.mxu0 %v11735_v38 }
 0x74f   : > { %v11268_v40 = vpop.f32.mrf.mxu0  ;;  %6520 = vmatmul.mubr.bf16.gmra.mxu0 %v14329_v34 }
 0x750   : > { %6529 = vmatprep.mubr.bf16.mxu0 %v16075_v20  ;;  %v5453_v22 = vadd.f32 %v11268_v40, %v14266_v9 }
 0x751   : > { %v5444_v33 = vpop.f32.mrf.mxu0 }
 0x752   : > { %v5445_v18 = vadd.f32 %v14266_v9, %v5444_v33  ;;  %v5641_v5 = vmax.f32 %v5453_v22, 0.0 }
 0x753   : > { %v11269_v51 = vpop.f32.mrf.mxu0 }
 0x754   : > { %6227 = vmatmul.mubr.bf16.gmra.mxu1 %v14397_v10  ;;  %v5639_v32 = vmax.f32 %v5445_v18, 0.0  ;;  %v5456_v54 = vadd.f32 %v11269_v51, %v14266_v9 }
 0x755   : > { %v5447_v45 = vpop.f32.mrf.mxu0  ;;  %6236 = vmatprep.mubr.bf16.mxu1 %v16075_v20 }
 0x756   : > { %v5448_v15 = vadd.f32 %v14266_v9, %v5447_v45  ;;  %v5642_v57 = vmax.f32 %v5456_v54, 0.0 }
 0x757   : > { %6530 = vmatmul.mubr.bf16.gmra.mxu0 %v14340_v17 }
 0x758   : > { %v5640_v35 = vmax.f32 %v5448_v15, 0.0  ;;  %6539 = vmatprep.mubr.bf16.mxu0 %v16075_v20  ;;  %v14413_v29 = vpack.c.bf16 %v5642_v57, %v5641_v5 }
 0x75a   : > { %v14406_v47 = vpack.c.bf16 %v5640_v35, %v5639_v32 }
 0x75c   : > { %6237 = vmatmul.mubr.bf16.gmra.mxu1 %v14406_v47 }
 0x75d   : > { %6246 = vmatprep.mubr.bf16.mxu1 %v16075_v20 }
 0x75f   : > { %v11272_v61 = vpop.f32.mrf.mxu0  ;;  %6540 = vmatmul.mubr.bf16.gmra.mxu0 %v14352_v23 }
 0x760   : > { %6549 = vmatprep.mubr.bf16.mxu0 %v16075_v20  ;;  %v5469_v58 = vadd.f32 %v11272_v61, %v14266_v9 }
 0x761   : > { %v5460_v46 = vpop.f32.mrf.mxu0 }
 0x762   : > { %v5461_v27 = vadd.f32 %v14266_v9, %v5460_v46  ;;  %v5645_v63 = vmax.f32 %v5469_v58, 0.0  ;;  %v11736_v58 = vld [vmem:[%s15994_s15 + $0xc0] ss:$28 sps:$4 sm:$0xff]  }
 0x763   : > { %v11273_v39 = vpop.f32.mrf.mxu0  ;;  %11318 = vmatprep.subr.bf16.mxu0 %v11736_v58 }
 0x764   : > { %6247 = vmatmul.mubr.bf16.gmra.mxu1 %v14413_v29  ;;  %v5643_v43 = vmax.f32 %v5461_v27, 0.0  ;;  %v5472_v24 = vadd.f32 %v11273_v39, %v14266_v9  ;;  %11319 = vmatpush3.bf16.msra.mxu0 %v11736_v58 }
 0x765   : > { %v5463_v16 = vpop.f32.mrf.mxu0  ;;  %6256 = vmatprep.mubr.bf16.mxu1 %v16075_v20 }
 0x766   : > { %v5464_v49 = vadd.f32 %v14266_v9, %v5463_v16  ;;  %v5646_v42 = vmax.f32 %v5472_v24, 0.0 }
 0x767   : > { %6550 = vmatmul.mubr.bf16.gmra.mxu0 %v14365_v62 }
 0x768   : > { %v5644_v19 = vmax.f32 %v5464_v49, 0.0  ;;  %6559 = vmatprep.mubr.bf16.mxu0 %v16075_v20  ;;  %v14429_v60 = vpack.c.bf16 %v5646_v42, %v5645_v63 }
 0x76a   : > { %v14422_v48 = vpack.c.bf16 %v5644_v19, %v5643_v43 }
 0x76c   : > { %6257 = vmatmul.mubr.bf16.gmra.mxu1 %v14422_v48 }
 0x76d   : > { %6266 = vmatprep.mubr.bf16.mxu1 %v16075_v20 }
 0x76f   : > { %v11276_v55 = vpop.f32.mrf.mxu0  ;;  %6560 = vmatmul.mubr.bf16.gmra.mxu0 %v14372_v8 }
 0x770   : > { %6569 = vmatprep.mubr.bf16.mxu0 %v16075_v20  ;;  %v5485_v26 = vadd.f32 %v11276_v55, %v14266_v9 }
 0x771   : > { %v5476_v52 = vpop.f32.mrf.mxu0 }
 0x772   : > { %v5477_v6 = vadd.f32 %v14266_v9, %v5476_v52  ;;  %v5649_v11 = vmax.f32 %v5485_v26, 0.0 }
 0x773   : > { %v11277_v4 = vpop.f32.mrf.mxu0 }
 0x774   : > { %6267 = vmatmul.mubr.bf16.gmra.mxu1 %v14429_v60  ;;  %v5647_v30 = vmax.f32 %v5477_v6, 0.0  ;;  %v5488_v53 = vadd.f32 %v11277_v4, %v14266_v9 }
 0x775   : > { %v5479_v59 = vpop.f32.mrf.mxu0  ;;  %6276 = vmatprep.mubr.bf16.mxu1 %v16075_v20 }
 0x776   : > { %v5480_v28 = vadd.f32 %v14266_v9, %v5479_v59  ;;  %v5650_v3 = vmax.f32 %v5488_v53, 0.0  ;;  %v11737_v53 = vld [vmem:[%s15994_s15 + $0x88] ss:$28 sps:$4 sm:$0xff]  }
 0x777   : > { %6570 = vmatmul.mubr.bf16.gmra.mxu0 %v14381_v0  ;;  %11320 = vmatprep.subr.bf16.mxu0 %v11737_v53 }
 0x778   : > { %v5648_v44 = vmax.f32 %v5480_v28, 0.0  ;;  %6579 = vmatprep.mubr.bf16.mxu0 %v16075_v20  ;;  %v14454_v31 = vpack.c.bf16 %v5650_v3, %v5649_v11  ;;  %11321 = vmatpush3.bf16.msra.mxu0 %v11737_v53  ;;  %v11738_v11 = vld [vmem:[%s15994_s15 + $0x50] ss:$28 sps:$4 sm:$0xff]  }
 0x779   : > { %11322 = vmatprep.subr.bf16.mxu0 %v11738_v11 }
 0x77a   : > { %v14438_v2 = vpack.c.bf16 %v5648_v44, %v5647_v30 }
 0x77c   : > { %6277 = vmatmul.mubr.bf16.gmra.mxu1 %v14438_v2  ;;  %11323 = vmatpush3.bf16.msra.mxu0 %v11738_v11 }
 0x77d   : > { %6286 = vmatprep.mubr.bf16.mxu1 %v16075_v20 }
 0x77f   : > { %v11280_v13 = vpop.f32.mrf.mxu0  ;;  %6580 = vmatmul.mubr.bf16.gmra.mxu0 %v14397_v10 }
 0x780   : > { %6589 = vmatprep.mubr.bf16.mxu0 %v16075_v20  ;;  %v5501_v18 = vadd.f32 %v11280_v13, %v14266_v9 }
 0x781   : > { %v5492_v50 = vpop.f32.mrf.mxu0 }
 0x782   : > { %v5493_v25 = vadd.f32 %v14266_v9, %v5492_v50  ;;  %v5653_v32 = vmax.f32 %v5501_v18, 0.0  ;;  %v11739_v50 = vld [vmem:[%s15994_s15 + $0x18] ss:$28 sps:$4 sm:$0xff]  }
 0x783   : > { %v11281_v1 = vpop.f32.mrf.mxu0  ;;  %11324 = vmatprep.subr.bf16.mxu0 %v11739_v50 }
 0x784   : > { %6287 = vmatmul.mubr.bf16.gmra.mxu1 %v14454_v31  ;;  %v5651_v40 = vmax.f32 %v5493_v25, 0.0  ;;  %v5504_v33 = vadd.f32 %v11281_v1, %v14266_v9  ;;  %11325 = vmatpush3.bf16.msra.mxu0 %v11739_v50 }
 0x785   : > { %v5495_v12 = vpop.f32.mrf.mxu0  ;;  %6296 = vmatprep.mubr.bf16.mxu1 %v16075_v20 }
 0x786   : > { %v5496_v14 = vadd.f32 %v14266_v9, %v5495_v12  ;;  %v5654_v45 = vmax.f32 %v5504_v33, 0.0 }
 0x787   : > { %6590 = vmatmul.mubr.bf16.gmra.mxu0 %v14406_v47 }
 0x788   : > { %v5652_v56 = vmax.f32 %v5496_v14, 0.0  ;;  %6599 = vmatprep.mubr.bf16.mxu0 %v16075_v20  ;;  %v14470_v54 = vpack.c.bf16 %v5654_v45, %v5653_v32 }
 0x78a   : > { %v14463_v51 = vpack.c.bf16 %v5652_v56, %v5651_v40 }
 0x78c   : > { %6297 = vmatmul.mubr.bf16.gmra.mxu1 %v14463_v51 }
 0x78d   : > { %6306 = vmatprep.mubr.bf16.mxu1 %v16075_v20 }
 0x78f   : > { %v11284_v15 = vpop.f32.mrf.mxu0  ;;  %6600 = vmatmul.mubr.bf16.gmra.mxu0 %v14413_v29 }
 0x790   : > { %6609 = vmatprep.mubr.bf16.mxu0 %v16075_v20  ;;  %v5517_v49 = vadd.f32 %v11284_v15, %v14266_v9 }
 0x791   : > { %v5508_v35 = vpop.f32.mrf.mxu0 }
 0x792   : > { %v5509_v57 = vadd.f32 %v14266_v9, %v5508_v35  ;;  %v5657_v24 = vmax.f32 %v5517_v49, 0.0 }
 0x793   : > { %v11285_v22 = vpop.f32.mrf.mxu0 }
 0x794   : > { %6307 = vmatmul.mubr.bf16.gmra.mxu1 %v14470_v54  ;;  %v5655_v46 = vmax.f32 %v5509_v57, 0.0  ;;  %v5520_v27 = vadd.f32 %v11285_v22, %v14266_v9  ;;  %v5781_v57 = vlaneseq }
 0x795   : > { %v5511_v61 = vpop.f32.mrf.mxu0  ;;  %6316 = vmatprep.mubr.bf16.mxu1 %v16075_v20 }
 0x796   : > { %v5512_v5 = vadd.f32 %v14266_v9, %v5511_v61  ;;  %v5658_v43 = vmax.f32 %v5520_v27, 0.0  ;;  %v14535_v27 = vshrl.u32 %v5781_v57, 7 }
 0x797   : > { %6610 = vmatmul.mubr.bf16.gmra.mxu0 %v14422_v48 }
 0x798   : > { %v5656_v39 = vmax.f32 %v5512_v5, 0.0  ;;  %6619 = vmatprep.mubr.bf16.mxu0 %v16075_v20  ;;  %v14489_v55 = vpack.c.bf16 %v5658_v43, %v5657_v24  ;;  %v5783_v24 = vsub.s32 0, %v14535_v27 }
 0x79a   : > { %v14479_v16 = vpack.c.bf16 %v5656_v39, %v5655_v46 }
 0x79c   : > { %6317 = vmatmul.mubr.bf16.gmra.mxu1 %v14479_v16 }
 0x79d   : > { %6326 = vmatprep.mubr.bf16.mxu1 %v16075_v20 }
 0x79f   : > { %v11288_v19 = vpop.f32.mrf.mxu0  ;;  %6620 = vmatmul.mubr.bf16.gmra.mxu0 %v14429_v60 }
 0x7a0   : > { %6629 = vmatprep.mubr.bf16.mxu0 %v16075_v20  ;;  %v5533_v26 = vadd.f32 %v11288_v19, %v14266_v9 }
 0x7a1   : > { %v5524_v42 = vpop.f32.mrf.mxu0 }
 0x7a2   : > { %v5525_v52 = vadd.f32 %v14266_v9, %v5524_v42  ;;  %v5661_v41 = vmax.f32 %v5533_v26, 0.0 }
 0x7a3   : > { %v11289_v63 = vpop.f32.mrf.mxu0 }
 0x7a4   : > { %6327 = vmatmul.mubr.bf16.gmra.mxu1 %v14489_v55  ;;  %v5659_v59 = vmax.f32 %v5525_v52, 0.0  ;;  %v5536_v30 = vadd.f32 %v11289_v63, %v14266_v9  ;;  %v14547_v63 = vld [vmem:[%s15995_s16] sm:$0x7f]  ;;  %v5787_v52 = vsub.s32 1, %v14535_v27 }
 0x7a5   : > { %v5527_v4 = vpop.f32.mrf.mxu0  ;;  %6336 = vmatprep.mubr.bf16.mxu1 %v16075_v20 }
 0x7a6   : > { %v5528_v6 = vadd.f32 %v14266_v9, %v5527_v4  ;;  %v5662_v3 = vmax.f32 %v5536_v30, 0.0  ;;  %v14557_v53 = vrot.slane %v14547_v63, %v5787_v52 }
 0x7a7   : > { %6630 = vmatmul.mubr.bf16.gmra.mxu0 %v14438_v2 }
 0x7a8   : > { %v5660_v28 = vmax.f32 %v5528_v6, 0.0  ;;  %6639 = vmatprep.mubr.bf16.mxu0 %v16075_v20  ;;  %v14511_v38 = vpack.c.bf16 %v5662_v3, %v5661_v41 }
 0x7aa   : > { %v14498_v44 = vpack.c.bf16 %v5660_v28, %v5659_v59  ;;  %v14553_v59 = vrot.slane %v14547_v63, %v5783_v24 }
 0x7ac   : > { %6337 = vmatmul.mubr.bf16.gmra.mxu1 %v14498_v44 }
 0x7ad   : > { %6346 = vmatprep.mubr.bf16.mxu1 %v16075_v20 }
 0x7af   : > { %v11292_v13 = vpop.f32.mrf.mxu0  ;;  %6640 = vmatmul.mubr.bf16.gmra.mxu0 %v14454_v31 }
 0x7b0   : > { %6649 = vmatprep.mubr.bf16.mxu0 %v16075_v20  ;;  %v5549_v45 = vadd.f32 %v11292_v13, %v14266_v9 }
 0x7b1   : > { %v5540_v7 = vpop.f32.mrf.mxu0 }
 0x7b2   : > { %v5541_v25 = vadd.f32 %v14266_v9, %v5540_v7  ;;  %v5665_v35 = vmax.f32 %v5549_v45, 0.0 }
 0x7b3   : > { %v11293_v1 = vpop.f32.mrf.mxu0 }
 0x7b4   : > { %6347 = vmatmul.mubr.bf16.gmra.mxu1 %v14511_v38  ;;  %v5663_v40 = vmax.f32 %v5541_v25, 0.0  ;;  %v5552_v33 = vadd.f32 %v11293_v1, %v14266_v9 }
 0x7b5   : > { %v5543_v12 = vpop.f32.mrf.mxu0  ;;  %6356 = vmatprep.mubr.bf16.mxu1 %v16075_v20 }
 0x7b6   : > { %v5544_v14 = vadd.f32 %v14266_v9, %v5543_v12  ;;  %v5666_v15 = vmax.f32 %v5552_v33, 0.0 }
 0x7b7   : > { %6650 = vmatmul.mubr.bf16.gmra.mxu0 %v14463_v51 }
 0x7b8   : > { %v5664_v56 = vmax.f32 %v5544_v14, 0.0  ;;  %6659 = vmatprep.mubr.bf16.mxu0 %v16075_v20  ;;  %v14530_v61 = vpack.c.bf16 %v5666_v15, %v5665_v35 }
 0x7ba   : > { %v14523_v18 = vpack.c.bf16 %v5664_v56, %v5663_v40 }
 0x7bc   : > { %6357 = vmatmul.mubr.bf16.gmra.mxu1 %v14523_v18 }
 0x7bd   : > { %6366 = vmatprep.mubr.bf16.mxu1 %v16075_v20 }
 0x7bf   : > { %v11296_v32 = vpop.f32.mrf.mxu0  ;;  %6660 = vmatmul.mubr.bf16.gmra.mxu0 %v14470_v54 }
 0x7c0   : > { %6669 = vmatprep.mubr.bf16.mxu0 %v16075_v20  ;;  %v5565_v4 = vadd.f32 %v11296_v32, %v14266_v9 }
 0x7c1   : > { %v5556_v22 = vpop.f32.mrf.mxu0 }
 0x7c2   : > { %v5557_v46 = vadd.f32 %v14266_v9, %v5556_v22  ;;  %v5669_v3 = vmax.f32 %v5565_v4, 0.0 }
 0x7c3   : > { %v11297_v5 = vpop.f32.mrf.mxu0 }
 0x7c4   : > { %6367 = vmatmul.mubr.bf16.gmra.mxu1 %v14530_v61  ;;  %v5667_v43 = vmax.f32 %v5557_v46, 0.0  ;;  %v5568_v58 = vadd.f32 %v11297_v5, %v14266_v9 }
 0x7c5   : > { %v5559_v39 = vpop.f32.mrf.mxu0  ;;  %6376 = vmatprep.mubr.bf16.mxu1 %v16075_v20 }
 0x7c6   : > { %v5560_v49 = vadd.f32 %v14266_v9, %v5559_v39  ;;  %v5670_v28 = vmax.f32 %v5568_v58, 0.0 }
 0x7c7   : > { %6670 = vmatmul.mubr.bf16.gmra.mxu0 %v14479_v16 }
 0x7c8   : > { %v5668_v19 = vmax.f32 %v5560_v49, 0.0  ;;  %6679 = vmatprep.mubr.bf16.mxu0 %v16075_v20  ;;  %v14563_v50 = vpack.c.bf16 %v5670_v28, %v5669_v3 }
 0x7ca   : > { %v14542_v42 = vpack.c.bf16 %v5668_v19, %v5667_v43 }
 0x7cc   : > { %v6138_v6 = vpop.f32.mrf.mxu1  ;;  %6377 = vmatmul.mubr.bf16.gmra.mxu1 %v14542_v42 }
 0x7cd   : > { %6386 = vmatprep.mubr.bf16.mxu1 %v16075_v20  ;;  %v6139_v13 = vadd.f32 %v6138_v6, %v14553_v59 }
 0x7ce   : > { %v6140_v30 = vpop.f32.mrf.mxu1 }
 0x7cf   : > { %v11300_v26 = vpop.f32.mrf.mxu0  ;;  %6680 = vmatmul.mubr.bf16.gmra.mxu0 %v14489_v55  ;;  %v6141_v25 = vadd.f32 %v6140_v30, %v14557_v53 }
 0x7d0   : > { %v6142_v11 = vpop.f32.mrf.mxu1  ;;  %6689 = vmatprep.mubr.bf16.mxu0 %v16075_v20  ;;  %v5581_v4 = vadd.f32 %v11300_v26, %v14266_v9 }
 0x7d1   : > { %v6143_v41 = vadd.f32 %v6142_v11, %v14553_v59  ;;  %v5572_v7 = vpop.f32.mrf.mxu0 }
 0x7d2   : > { %v6144_v1 = vpop.f32.mrf.mxu1  ;;  %v5573_v56 = vadd.f32 %v14266_v9, %v5572_v7 }
 0x7d3   : > { %v7452_v12 = vpack.c.bf16 %v6143_v41, %v6139_v13  ;;  %v6145_v14 = vadd.f32 %v6144_v1, %v14557_v53  ;;  %v11301_v40 = vpop.f32.mrf.mxu0  ;;  %v5673_v13 = vmax.f32 %v5581_v4, 0.0 }
 0x7d4   : > { %v6148_v33 = vpop.f32.mrf.mxu1  ;;  %6387 = vmatmul.mubr.bf16.gmra.mxu1 %v14563_v50  ;;  %v5671_v22 = vmax.f32 %v5573_v56, 0.0  ;;  %v5584_v49 = vadd.f32 %v11301_v40, %v14266_v9 }
 0x7d5   : > { %v7453_v45 = vpack.c.bf16 %v6145_v14, %v6141_v25  ;;  %v5575_v15 = vpop.f32.mrf.mxu0  ;;  %6396 = vmatprep.mubr.bf16.mxu1 %v16075_v20  ;;  %11740 = vtanh.bf16 %v7452_v12  ;;  %v6149_v46 = vadd.f32 %v6148_v33, %v14553_v59 }
 0x7d6   : > { %v5576_v32 = vadd.f32 %v14266_v9, %v5575_v15  ;;  %v6150_v35 = vpop.f32.mrf.mxu1  ;;  %v5674_v30 = vmax.f32 %v5584_v49, 0.0 }
 0x7d7   : > { %11742 = vtanh.bf16 %v7453_v45  ;;  %6690 = vmatmul.mubr.bf16.gmra.mxu0 %v14498_v44  ;;  %v6151_v24 = vadd.f32 %v6150_v35, %v14557_v53 }
 0x7d8   : > { %v5672_v57 = vmax.f32 %v5576_v32, 0.0  ;;  %v6152_v5 = vpop.f32.mrf.mxu1  ;;  %6699 = vmatprep.mubr.bf16.mxu0 %v16075_v20  ;;  %v14588_v25 = vpack.c.bf16 %v5674_v30, %v5673_v13 }
 0x7d9   : > { %v6153_v39 = vadd.f32 %v6152_v5, %v14553_v59 }
 0x7da   : > { %v14576_v43 = vpack.c.bf16 %v5672_v57, %v5671_v22  ;;  %v6154_v19 = vpop.f32.mrf.mxu1 }
 0x7db   : > { %v7459_v58 = vpack.c.bf16 %v6153_v39, %v6149_v46  ;;  %v6155_v52 = vadd.f32 %v6154_v19, %v14557_v53 }
 0x7dc   : > { %v6158_v6 = vpop.f32.mrf.mxu1  ;;  %6397 = vmatmul.mubr.bf16.gmra.mxu1 %v14576_v43 }
 0x7dd   : > { %v7460_v28 = vpack.c.bf16 %v6155_v52, %v6151_v24  ;;  %6406 = vmatprep.mubr.bf16.mxu1 %v16075_v20  ;;  %11744 = vtanh.bf16 %v7459_v58  ;;  %v6159_v26 = vadd.f32 %v6158_v6, %v14553_v59 }
 0x7de   : > { %v6160_v3 = vpop.f32.mrf.mxu1 }
 0x7df   : > { %11746 = vtanh.bf16 %v7460_v28  ;;  %v11304_v11 = vpop.f32.mrf.mxu0  ;;  %6700 = vmatmul.mubr.bf16.gmra.mxu0 %v14511_v38  ;;  %v6161_v14 = vadd.f32 %v6160_v3, %v14557_v53 }
 0x7e0   : > { %v6162_v41 = vpop.f32.mrf.mxu1  ;;  %6709 = vmatprep.mubr.bf16.mxu0 %v16075_v20 }
 0x7e1   : > { %v6163_v7 = vadd.f32 %v6162_v41, %v14553_v59  ;;  %v5588_v1 = vpop.f32.mrf.mxu0 }
 0x7e2   : > { %v6164_v12 = vpop.f32.mrf.mxu1  ;;  %v5589_v15 = vadd.f32 %v14266_v9, %v5588_v1 }
 0x7e3   : > { %v7466_v40 = vpack.c.bf16 %v6163_v7, %v6159_v26  ;;  %v6165_v56 = vadd.f32 %v6164_v12, %v14557_v53  ;;  %v11305_v33 = vpop.f32.mrf.mxu0  ;;  %v11741_v45 = vpop.eup %11740  ;;  %v5597_v7 = vadd.f32 %v11304_v11, %v14266_v9 }
 0x7e4   : > { %v6168_v32 = vpop.f32.mrf.mxu1  ;;  %6407 = vmatmul.mubr.bf16.gmra.mxu1 %v14588_v25  ;;  %v5675_v19 = vmax.f32 %v5589_v15, 0.0  ;;  %v5600_v6 = vadd.f32 %v11305_v33, %v14266_v9 }
 0x7e5   : > { %v11743_v35 = vpop.eup %11742  ;;  %v7467_v22 = vpack.c.bf16 %v6165_v56, %v6161_v14  ;;  %v5591_v57 = vpop.f32.mrf.mxu0  ;;  %6416 = vmatprep.mubr.bf16.mxu1 %v16075_v20  ;;  %11748 = vtanh.bf16 %v7466_v40  ;;  %v6169_v52 = vadd.f32 %v6168_v32, %v14553_v59  ;;  %v5677_v32 = vmax.f32 %v5597_v7, 0.0 }
 0x7e6   : > { %v10172_v5 = vcombine.low %v11741_v45, %v11743_v35  ;;  %v10176_v46 = vcombine.high %v11741_v45, %v11743_v35  ;;  %v5592_v39 = vadd.f32 %v14266_v9, %v5591_v57  ;;  %v6170_v49 = vpop.f32.mrf.mxu1  ;;  %v5678_v33 = vmax.f32 %v5600_v6, 0.0 }
 0x7e7   : > { %11750 = vtanh.bf16 %v7467_v22  ;;  %6710 = vmatmul.mubr.bf16.gmra.mxu0 %v14523_v18  ;;  %v6171_v3 = vadd.f32 %v6170_v49, %v14557_v53  ;;  %v5791_v6 = vsub.s32 2, %v14535_v27 }
 0x7e8   : > { %9148 = vst [vmem:[%s14597_s30] sm:$0xff] %v10172_v5  ;;  %9153 = vst [vmem:[%s14597_s30 + $0x1c] sm:$0xff] %v10176_v46  ;;  %v5676_v24 = vmax.f32 %v5592_v39, 0.0  ;;  %v6172_v58 = vpop.f32.mrf.mxu1  ;;  %6719 = vmatprep.mubr.bf16.mxu0 %v16075_v20  ;;  %v14618_v5 = vpack.c.bf16 %v5678_v33, %v5677_v32  ;;  %v12189_v32 = vld [vmem:[%s15993_s14] ss:$0 sm:$0xff] }
 0x7e9   : > { %v6173_v4 = vadd.f32 %v6172_v58, %v14553_v59  ;;  %v14632_v33 = vrot.slane %v14547_v63, %v5791_v6 }
 0x7ea   : > { %v14605_v28 = vpack.c.bf16 %v5676_v24, %v5675_v19  ;;  %v6174_v30 = vpop.f32.mrf.mxu1 }
 0x7eb   : > { %v7473_v13 = vpack.c.bf16 %v6173_v4, %v6169_v52  ;;  %v6175_v41 = vadd.f32 %v6174_v30, %v14557_v53  ;;  %v11745_v26 = vpop.eup %11744 }
 0x7ec   : > { %v6178_v1 = vpop.f32.mrf.mxu1  ;;  %6417 = vmatmul.mubr.bf16.gmra.mxu1 %v14605_v28 }
 0x7ed   : > { %v11747_v12 = vpop.eup %11746  ;;  %v7474_v14 = vpack.c.bf16 %v6175_v41, %v6171_v3  ;;  %6426 = vmatprep.mubr.bf16.mxu1 %v16075_v20  ;;  %11752 = vtanh.bf16 %v7473_v13  ;;  %v6179_v35 = vadd.f32 %v6178_v1, %v14553_v59  ;;  %v5795_v41 = vsub.s32 3, %v14535_v27 }
 0x7ee   : > { %v10180_v40 = vcombine.low %v11745_v26, %v11747_v12  ;;  %v10184_v56 = vcombine.high %v11745_v26, %v11747_v12  ;;  %v6180_v45 = vpop.f32.mrf.mxu1 }
 0x7ef   : > { %11754 = vtanh.bf16 %v7474_v14  ;;  %v11308_v15 = vpop.f32.mrf.mxu0  ;;  %6720 = vmatmul.mubr.bf16.gmra.mxu0 %v14530_v61  ;;  %v6181_v39 = vadd.f32 %v6180_v45, %v14557_v53 }
 0x7f0   : > { %9157 = vst [vmem:[%s14597_s30 + $0x38] sm:$0xff] %v10180_v40  ;;  %9161 = vst [vmem:[%s14597_s30 + $0x54] sm:$0xff] %v10184_v56  ;;  %v6182_v11 = vpop.f32.mrf.mxu1  ;;  %6729 = vmatprep.mubr.bf16.mxu0 %v16075_v20 }
 0x7f1   : > { %v6183_v22 = vadd.f32 %v6182_v11, %v14553_v59  ;;  %v5604_v57 = vpop.f32.mrf.mxu0 }
 0x7f2   : > { %v6184_v46 = vpop.f32.mrf.mxu1  ;;  %v5605_v52 = vadd.f32 %v14266_v9, %v5604_v57 }
 0x7f3   : > { %v7480_v49 = vpack.c.bf16 %v6183_v22, %v6179_v35  ;;  %v6185_v19 = vadd.f32 %v6184_v46, %v14557_v53  ;;  %v11309_v24 = vpop.f32.mrf.mxu0  ;;  %v11749_v58 = vpop.eup %11748  ;;  %v14641_v22 = vrot.slane %v14547_v63, %v5795_v41 }
 0x7f4   : > { %v6188_v4 = vpop.f32.mrf.mxu1  ;;  %6427 = vmatmul.mubr.bf16.gmra.mxu1 %v14618_v5  ;;  %v5679_v40 = vmax.f32 %v5605_v52, 0.0 }
 0x7f5   : > { %v11751_v30 = vpop.eup %11750  ;;  %v7481_v3 = vpack.c.bf16 %v6185_v19, %v6181_v39  ;;  %v5607_v13 = vpop.f32.mrf.mxu0  ;;  %6436 = vmatprep.mubr.bf16.mxu1 %v16075_v20  ;;  %11756 = vtanh.bf16 %v7480_v49  ;;  %v6189_v11 = vadd.f32 %v6188_v4, %v14553_v59 }
 0x7f6   : > { %v10188_v26 = vcombine.low %v11749_v58, %v11751_v30  ;;  %v10192_v7 = vcombine.high %v11749_v58, %v11751_v30  ;;  %v5608_v1 = vadd.f32 %v14266_v9, %v5607_v13  ;;  %v6190_v12 = vpop.f32.mrf.mxu1  ;;  %v5616_v9 = vadd.f32 %v12189_v32, %v11309_v24 }
 0x7f7   : > { %11758 = vtanh.bf16 %v7481_v3  ;;  %v6491_v14 = vpop.f32.mrf.mxu0  ;;  %6730 = vmatmul.mubr.bf16.gmra.mxu0 %v14542_v42  ;;  %v6191_v49 = vadd.f32 %v6190_v12, %v14557_v53  ;;  %v5613_v30 = vadd.f32 %v12189_v32, %v11308_v15 }
 0x7f8   : > { %9165 = vst [vmem:[%s14597_s30 + $0x70] sm:$0xff] %v10188_v26  ;;  %9169 = vst [vmem:[%s14597_s30 + $0x8c] sm:$0xff] %v10192_v7  ;;  %v5680_v56 = vmax.f32 %v5608_v1, 0.0  ;;  %v6192_v45 = vpop.f32.mrf.mxu1  ;;  %6739 = vmatprep.mubr.bf16.mxu0 %v16075_v20  ;;  %v6492_v24 = vadd.f32 %v6491_v14, %v14632_v33  ;;  %v5682_v13 = vmax.f32 %v5616_v9, 0.0 }
 0x7f9   : > { %v6193_v35 = vadd.f32 %v6192_v45, %v14553_v59  ;;  %v6493_v57 = vpop.f32.mrf.mxu0  ;;  %v5681_v45 = vmax.f32 %v5613_v30, 0.0 }
 0x7fa   : > { %v14643_v46 = vpack.c.bf16 %v5680_v56, %v5679_v40  ;;  %v6194_v39 = vpop.f32.mrf.mxu1  ;;  %v6494_v41 = vadd.f32 %v6493_v57, %v14641_v22 }
 0x7fb   : > { %v7487_v19 = vpack.c.bf16 %v6193_v35, %v6189_v11  ;;  %v6195_v58 = vadd.f32 %v6194_v39, %v14557_v53  ;;  %v6495_v52 = vpop.f32.mrf.mxu0  ;;  %v11753_v6 = vpop.eup %11752  ;;  %v14659_v39 = vpack.c.bf16 %v5682_v13, %v5681_v45 }
 0x7fc   : > { %v6496_v4 = vadd.f32 %v6495_v52, %v14632_v33  ;;  %v6198_v3 = vpop.f32.mrf.mxu1  ;;  %6437 = vmatmul.mubr.bf16.gmra.mxu1 %v14643_v46 }
 0x7fd   : > { %v11755_v63 = vpop.eup %11754  ;;  %11760 = vtanh.bf16 %v7487_v19  ;;  %v7488_v26 = vpack.c.bf16 %v6195_v58, %v6191_v49  ;;  %v6497_v7 = vpop.f32.mrf.mxu0  ;;  %6446 = vmatprep.mubr.bf16.mxu1 %v16075_v20  ;;  %v6199_v11 = vadd.f32 %v6198_v3, %v14553_v59 }
 0x7fe   : > { %v10196_v1 = vcombine.low %v11753_v6, %v11755_v63  ;;  %v10200_v15 = vcombine.high %v11753_v6, %v11755_v63  ;;  %v7454_v12 = vpack.c.bf16 %v6496_v4, %v6492_v24  ;;  %v6498_v14 = vadd.f32 %v6497_v7, %v14641_v22  ;;  %v6200_v40 = vpop.f32.mrf.mxu1 }
 0x7ff   : > { %11762 = vtanh.bf16 %v7488_v26  ;;  %v6501_v56 = vpop.f32.mrf.mxu0  ;;  %6740 = vmatmul.mubr.bf16.gmra.mxu0 %v14563_v50  ;;  %v6201_v19 = vadd.f32 %v6200_v40, %v14557_v53 }
 0x800   : > { %9173 = vst [vmem:[%s14597_s30 + $0xa8] sm:$0xff] %v10196_v1  ;;  %9177 = vst [vmem:[%s14597_s30 + $0xc4] sm:$0xff] %v10200_v15  ;;  %v7455_v32 = vpack.c.bf16 %v6498_v14, %v6494_v41  ;;  %v6202_v9 = vpop.f32.mrf.mxu1  ;;  %6749 = vmatprep.mubr.bf16.mxu0 %v16075_v20  ;;  %11764 = vtanh.bf16 %v7454_v12  ;;  %v6502_v24 = vadd.f32 %v6501_v56, %v14632_v33 }
 0x801   : > { %v6203_v35 = vadd.f32 %v6202_v9, %v14553_v59  ;;  %v6503_v57 = vpop.f32.mrf.mxu0 }
 0x802   : > { %11766 = vtanh.bf16 %v7455_v32  ;;  %v6204_v49 = vpop.f32.mrf.mxu1  ;;  %v6504_v13 = vadd.f32 %v6503_v57, %v14641_v22 }
 0x803   : > { %v7494_v58 = vpack.c.bf16 %v6203_v35, %v6199_v11  ;;  %v6205_v52 = vadd.f32 %v6204_v49, %v14557_v53  ;;  %v6505_v6 = vpop.f32.mrf.mxu0  ;;  %v11757_v30 = vpop.eup %11756 }
 0x804   : > { %v6506_v4 = vadd.f32 %v6505_v6, %v14632_v33  ;;  %v6208_v63 = vpop.f32.mrf.mxu1  ;;  %6447 = vmatmul.mubr.bf16.gmra.mxu1 %v14659_v39 }
 0x805   : > { %v11759_v3 = vpop.eup %11758  ;;  %11768 = vtanh.bf16 %v7494_v58  ;;  %v7495_v41 = vpack.c.bf16 %v6205_v52, %v6201_v19  ;;  %v6507_v26 = vpop.f32.mrf.mxu0  ;;  %6842 = vmatprep.mubr.bf16.mxu1 %v16075_v20  ;;  %v6209_v32 = vadd.f32 %v6208_v63, %v14553_v59 }
 0x806   : > { %v10204_v7 = vcombine.low %v11757_v30, %v11759_v3  ;;  %v10208_v1 = vcombine.high %v11757_v30, %v11759_v3  ;;  %v7461_v15 = vpack.c.bf16 %v6506_v4, %v6502_v24  ;;  %v6508_v12 = vadd.f32 %v6507_v26, %v14641_v22  ;;  %v6210_v14 = vpop.f32.mrf.mxu1 }
 0x807   : > { %11770 = vtanh.bf16 %v7495_v41  ;;  %v6511_v40 = vpop.f32.mrf.mxu0  ;;  %6750 = vmatmul.mubr.bf16.gmra.mxu0 %v14576_v43  ;;  %v6211_v49 = vadd.f32 %v6210_v14, %v14557_v53 }
 0x808   : > { %9181 = vst [vmem:[%s14597_s30 + $0xe0] sm:$0xff] %v10204_v7  ;;  %9185 = vst [vmem:[%s14597_s30 + $0xfc] sm:$0xff] %v10208_v1  ;;  %v7462_v56 = vpack.c.bf16 %v6508_v12, %v6504_v13  ;;  %v6212_v45 = vpop.f32.mrf.mxu1  ;;  %6759 = vmatprep.mubr.bf16.mxu0 %v16075_v20  ;;  %11772 = vtanh.bf16 %v7461_v15  ;;  %v6512_v6 = vadd.f32 %v6511_v40, %v14632_v33 }
 0x809   : > { %v6213_v9 = vadd.f32 %v6212_v45, %v14553_v59  ;;  %v6513_v11 = vpop.f32.mrf.mxu0 }
 0x80a   : > { %11774 = vtanh.bf16 %v7462_v56  ;;  %v6214_v35 = vpop.f32.mrf.mxu1  ;;  %v6514_v63 = vadd.f32 %v6513_v11, %v14641_v22 }
 0x80b   : > { %v11761_v57 = vpop.eup %11760  ;;  %v7501_v19 = vpack.c.bf16 %v6213_v9, %v6209_v32  ;;  %v6215_v58 = vadd.f32 %v6214_v35, %v14557_v53  ;;  %v6515_v52 = vpop.f32.mrf.mxu0 }
 0x80c   : > { %v6516_v30 = vadd.f32 %v6515_v52, %v14632_v33  ;;  %v6218_v24 = vpop.f32.mrf.mxu1  ;;  %6843 = vmatmul.mubr.bf16.vlgmr.msra.gmra.mxu1 %v14278_v36 }
 0x80d   : > { %v11763_v4 = vpop.eup %11762  ;;  %11776 = vtanh.bf16 %v7501_v19  ;;  %v7502_v3 = vpack.c.bf16 %v6215_v58, %v6211_v49  ;;  %v6517_v13 = vpop.f32.mrf.mxu0  ;;  %6852 = vmatprep.mubr.bf16.mxu1 %v16075_v20  ;;  %v6219_v56 = vadd.f32 %v6218_v24, %v14553_v59 }
 0x80e   : > { %v10212_v41 = vcombine.low %v11761_v57, %v11763_v4  ;;  %v10216_v26 = vcombine.high %v11761_v57, %v11763_v4  ;;  %v7468_v7 = vpack.c.bf16 %v6516_v30, %v6512_v6  ;;  %v6518_v1 = vadd.f32 %v6517_v13, %v14641_v22  ;;  %v6220_v15 = vpop.f32.mrf.mxu1  ;;  %v11765_v12 = vpop.eup %11764 }
 0x80f   : > { %11778 = vtanh.bf16 %v7502_v3  ;;  %v6521_v14 = vpop.f32.mrf.mxu0  ;;  %6760 = vmatmul.mubr.bf16.gmra.mxu0 %v14588_v25  ;;  %v6221_v58 = vadd.f32 %v6220_v15, %v14557_v53 }
 0x810   : > { %v11767_v40 = vpop.eup %11766  ;;  %9189 = vst [vmem:[%s14597_s30 + $0x118] sm:$0xff] %v10212_v41  ;;  %9193 = vst [vmem:[%s14597_s30 + $0x134] sm:$0xff] %v10216_v26  ;;  %v7469_v45 = vpack.c.bf16 %v6518_v1, %v6514_v63  ;;  %v6222_v32 = vpop.f32.mrf.mxu1  ;;  %6769 = vmatprep.mubr.bf16.mxu0 %v16075_v20  ;;  %11780 = vtanh.bf16 %v7468_v7  ;;  %v6522_v24 = vadd.f32 %v6521_v14, %v14632_v33 }
 0x811   : > { %v10173_v9 = vcombine.low %v11765_v12, %v11767_v40  ;;  %v10177_v11 = vcombine.high %v11765_v12, %v11767_v40  ;;  %v6223_v35 = vadd.f32 %v6222_v32, %v14553_v59  ;;  %v6523_v57 = vpop.f32.mrf.mxu0 }
 0x812   : > { %11782 = vtanh.bf16 %v7469_v45  ;;  %v6224_v49 = vpop.f32.mrf.mxu1  ;;  %v6524_v13 = vadd.f32 %v6523_v57, %v14641_v22 }
 0x813   : > { %v11769_v19 = vpop.eup %11768  ;;  %9149 = vst [vmem:[%s14597_s30 + $0x8] sm:$0xff] %v10173_v9  ;;  %9154 = vst [vmem:[%s14597_s30 + $0x24] sm:$0xff] %v10177_v11  ;;  %v7508_v52 = vpack.c.bf16 %v6223_v35, %v6219_v56  ;;  %v6225_v6 = vadd.f32 %v6224_v49, %v14557_v53  ;;  %v6525_v30 = vpop.f32.mrf.mxu0 }
 0x814   : > { %v6526_v4 = vadd.f32 %v6525_v30, %v14632_v33  ;;  %v6228_v63 = vpop.f32.mrf.mxu1  ;;  %6853 = vmatmul.mubr.bf16.gmra.mxu1 %v14301_v21 }
 0x815   : > { %v11771_v3 = vpop.eup %11770  ;;  %11784 = vtanh.bf16 %v7508_v52  ;;  %v7509_v41 = vpack.c.bf16 %v6225_v6, %v6221_v58  ;;  %v6527_v26 = vpop.f32.mrf.mxu0  ;;  %6862 = vmatprep.mubr.bf16.mxu1 %v16075_v20  ;;  %v6229_v32 = vadd.f32 %v6228_v63, %v14553_v59 }
 0x816   : > { %v10220_v7 = vcombine.low %v11769_v19, %v11771_v3  ;;  %v10224_v1 = vcombine.high %v11769_v19, %v11771_v3  ;;  %v7475_v15 = vpack.c.bf16 %v6526_v4, %v6522_v24  ;;  %v6528_v12 = vadd.f32 %v6527_v26, %v14641_v22  ;;  %v6230_v14 = vpop.f32.mrf.mxu1  ;;  %v11773_v40 = vpop.eup %11772 }
 0x817   : > { %11786 = vtanh.bf16 %v7509_v41  ;;  %v6531_v56 = vpop.f32.mrf.mxu0  ;;  %6770 = vmatmul.mubr.bf16.gmra.mxu0 %v14605_v28  ;;  %v6231_v6 = vadd.f32 %v6230_v14, %v14557_v53 }
 0x818   : > { %v11775_v45 = vpop.eup %11774  ;;  %9197 = vst [vmem:[%s14597_s30 + $0x150] sm:$0xff] %v10220_v7  ;;  %9201 = vst [vmem:[%s14597_s30 + $0x16c] sm:$0xff] %v10224_v1  ;;  %v7476_v9 = vpack.c.bf16 %v6528_v12, %v6524_v13  ;;  %v6232_v11 = vpop.f32.mrf.mxu1  ;;  %6779 = vmatprep.mubr.bf16.mxu0 %v16075_v20  ;;  %11788 = vtanh.bf16 %v7475_v15  ;;  %v6532_v63 = vadd.f32 %v6531_v56, %v14632_v33 }
 0x819   : > { %v10181_v35 = vcombine.low %v11773_v40, %v11775_v45  ;;  %v10185_v57 = vcombine.high %v11773_v40, %v11775_v45  ;;  %v6233_v49 = vadd.f32 %v6232_v11, %v14553_v59  ;;  %v6533_v19 = vpop.f32.mrf.mxu0 }
 0x81a   : > { %11790 = vtanh.bf16 %v7476_v9  ;;  %v6234_v58 = vpop.f32.mrf.mxu1  ;;  %v6534_v26 = vadd.f32 %v6533_v19, %v14641_v22 }
 0x81b   : > { %v11777_v52 = vpop.eup %11776  ;;  %9158 = vst [vmem:[%s14597_s30 + $0x40] sm:$0xff] %v10181_v35  ;;  %9162 = vst [vmem:[%s14597_s30 + $0x5c] sm:$0xff] %v10185_v57  ;;  %v7515_v30 = vpack.c.bf16 %v6233_v49, %v6229_v32  ;;  %v6235_v24 = vadd.f32 %v6234_v58, %v14557_v53  ;;  %v6535_v4 = vpop.f32.mrf.mxu0 }
 0x81c   : > { %v6536_v3 = vadd.f32 %v6535_v4, %v14632_v33  ;;  %v6238_v13 = vpop.f32.mrf.mxu1  ;;  %6863 = vmatmul.mubr.bf16.gmra.mxu1 %v14324_v37 }
 0x81d   : > { %v11779_v41 = vpop.eup %11778  ;;  %11792 = vtanh.bf16 %v7515_v30  ;;  %v7516_v7 = vpack.c.bf16 %v6235_v24, %v6231_v6  ;;  %v6537_v1 = vpop.f32.mrf.mxu0  ;;  %6872 = vmatprep.mubr.bf16.mxu1 %v16075_v20  ;;  %v6239_v11 = vadd.f32 %v6238_v13, %v14553_v59 }
 0x81e   : > { %v10228_v15 = vcombine.low %v11777_v52, %v11779_v41  ;;  %v10232_v12 = vcombine.high %v11777_v52, %v11779_v41  ;;  %v7482_v14 = vpack.c.bf16 %v6536_v3, %v6532_v63  ;;  %v6538_v40 = vadd.f32 %v6537_v1, %v14641_v22  ;;  %v6240_v56 = vpop.f32.mrf.mxu1  ;;  %v11781_v45 = vpop.eup %11780 }
 0x81f   : > { %11794 = vtanh.bf16 %v7516_v7  ;;  %v6541_v32 = vpop.f32.mrf.mxu0  ;;  %6780 = vmatmul.mubr.bf16.gmra.mxu0 %v14618_v5  ;;  %v6241_v24 = vadd.f32 %v6240_v56, %v14557_v53 }
 0x820   : > { %v11783_v9 = vpop.eup %11782  ;;  %9205 = vst [vmem:[%s14597_s30 + $0x188] sm:$0xff] %v10228_v15  ;;  %9209 = vst [vmem:[%s14597_s30 + $0x1a4] sm:$0xff] %v10232_v12  ;;  %v7483_v35 = vpack.c.bf16 %v6538_v40, %v6534_v26  ;;  %v6242_v57 = vpop.f32.mrf.mxu1  ;;  %6789 = vmatprep.mubr.bf16.mxu0 %v16075_v20  ;;  %11796 = vtanh.bf16 %v7482_v14  ;;  %v6542_v13 = vadd.f32 %v6541_v32, %v14632_v33 }
 0x821   : > { %v10189_v49 = vcombine.low %v11781_v45, %v11783_v9  ;;  %v10193_v19 = vcombine.high %v11781_v45, %v11783_v9  ;;  %v6243_v58 = vadd.f32 %v6242_v57, %v14553_v59  ;;  %v6543_v52 = vpop.f32.mrf.mxu0 }
 0x822   : > { %11798 = vtanh.bf16 %v7483_v35  ;;  %v6244_v6 = vpop.f32.mrf.mxu1  ;;  %v6544_v1 = vadd.f32 %v6543_v52, %v14641_v22 }
 0x823   : > { %v11785_v30 = vpop.eup %11784  ;;  %9166 = vst [vmem:[%s14597_s30 + $0x78] sm:$0xff] %v10189_v49  ;;  %9170 = vst [vmem:[%s14597_s30 + $0x94] sm:$0xff] %v10193_v19  ;;  %v7522_v4 = vpack.c.bf16 %v6243_v58, %v6239_v11  ;;  %v6245_v63 = vadd.f32 %v6244_v6, %v14557_v53  ;;  %v6545_v3 = vpop.f32.mrf.mxu0 }
 0x824   : > { %v6546_v41 = vadd.f32 %v6545_v3, %v14632_v33  ;;  %v6248_v26 = vpop.f32.mrf.mxu1  ;;  %6873 = vmatmul.mubr.bf16.gmra.mxu1 %v14329_v34 }
 0x825   : > { %v11787_v7 = vpop.eup %11786  ;;  %11800 = vtanh.bf16 %v7522_v4  ;;  %v7523_v15 = vpack.c.bf16 %v6245_v63, %v6241_v24  ;;  %v6547_v12 = vpop.f32.mrf.mxu0  ;;  %6882 = vmatprep.mubr.bf16.mxu1 %v16075_v20  ;;  %v6249_v57 = vadd.f32 %v6248_v26, %v14553_v59 }
 0x826   : > { %v10236_v14 = vcombine.low %v11785_v30, %v11787_v7  ;;  %v10240_v40 = vcombine.high %v11785_v30, %v11787_v7  ;;  %v7489_v56 = vpack.c.bf16 %v6546_v41, %v6542_v13  ;;  %v6548_v45 = vadd.f32 %v6547_v12, %v14641_v22  ;;  %v6250_v32 = vpop.f32.mrf.mxu1  ;;  %v11789_v9 = vpop.eup %11788 }
 0x827   : > { %11802 = vtanh.bf16 %v7523_v15  ;;  %v6551_v11 = vpop.f32.mrf.mxu0  ;;  %6790 = vmatmul.mubr.bf16.gmra.mxu0 %v14643_v46  ;;  %v6251_v63 = vadd.f32 %v6250_v32, %v14557_v53 }
 0x828   : > { %v11791_v35 = vpop.eup %11790  ;;  %9213 = vst [vmem:[%s14597_s30 + $0x1c0] sm:$0xff] %v10236_v14  ;;  %9217 = vst [vmem:[%s14597_s30 + $0x1dc] sm:$0xff] %v10240_v40  ;;  %v7490_v49 = vpack.c.bf16 %v6548_v45, %v6544_v1  ;;  %v6252_v19 = vpop.f32.mrf.mxu1  ;;  %6799 = vmatprep.mubr.bf16.mxu0 %v16075_v20  ;;  %11804 = vtanh.bf16 %v7489_v56  ;;  %v6552_v26 = vadd.f32 %v6551_v11, %v14632_v33 }
 0x829   : > { %v10197_v58 = vcombine.low %v11789_v9, %v11791_v35  ;;  %v10201_v52 = vcombine.high %v11789_v9, %v11791_v35  ;;  %v6253_v6 = vadd.f32 %v6252_v19, %v14553_v59  ;;  %v6553_v30 = vpop.f32.mrf.mxu0 }
 0x82a   : > { %11806 = vtanh.bf16 %v7490_v49  ;;  %v6254_v24 = vpop.f32.mrf.mxu1  ;;  %v6554_v12 = vadd.f32 %v6553_v30, %v14641_v22 }
 0x82b   : > { %v11793_v4 = vpop.eup %11792  ;;  %9174 = vst [vmem:[%s14597_s30 + $0xb0] sm:$0xff] %v10197_v58  ;;  %9178 = vst [vmem:[%s14597_s30 + $0xcc] sm:$0xff] %v10201_v52  ;;  %v7529_v3 = vpack.c.bf16 %v6253_v6, %v6249_v57  ;;  %v6255_v13 = vadd.f32 %v6254_v24, %v14557_v53  ;;  %v6555_v41 = vpop.f32.mrf.mxu0 }
 0x82c   : > { %v6556_v7 = vadd.f32 %v6555_v41, %v14632_v33  ;;  %v6258_v1 = vpop.f32.mrf.mxu1  ;;  %6883 = vmatmul.mubr.bf16.gmra.mxu1 %v14340_v17 }
 0x82d   : > { %v11795_v15 = vpop.eup %11794  ;;  %11808 = vtanh.bf16 %v7529_v3  ;;  %v7530_v14 = vpack.c.bf16 %v6255_v13, %v6251_v63  ;;  %v6557_v40 = vpop.f32.mrf.mxu0  ;;  %6892 = vmatprep.mubr.bf16.mxu1 %v16075_v20  ;;  %v6259_v19 = vadd.f32 %v6258_v1, %v14553_v59 }
 0x82e   : > { %v10244_v56 = vcombine.low %v11793_v4, %v11795_v15  ;;  %v10248_v45 = vcombine.high %v11793_v4, %v11795_v15  ;;  %v7496_v32 = vpack.c.bf16 %v6556_v7, %v6552_v26  ;;  %v6558_v9 = vadd.f32 %v6557_v40, %v14641_v22  ;;  %v6260_v11 = vpop.f32.mrf.mxu1  ;;  %v11797_v35 = vpop.eup %11796 }
 0x82f   : > { %11810 = vtanh.bf16 %v7530_v14  ;;  %v6561_v57 = vpop.f32.mrf.mxu0  ;;  %6800 = vmatmul.mubr.bf16.gmra.mxu0 %v14659_v39  ;;  %v6261_v13 = vadd.f32 %v6260_v11, %v14557_v53 }
 0x830   : > { %v11799_v49 = vpop.eup %11798  ;;  %9221 = vst [vmem:[%s14597_s30 + $0x1f8] sm:$0xff] %v10244_v56  ;;  %9225 = vst [vmem:[%s14597_s30 + $0x214] sm:$0xff] %v10248_v45  ;;  %v7497_v58 = vpack.c.bf16 %v6558_v9, %v6554_v12  ;;  %v6262_v52 = vpop.f32.mrf.mxu1  ;;  %11326 = vmatprep.mubr.bf16.mxu0 %v14278_v36  ;;  %11812 = vtanh.bf16 %v7496_v32  ;;  %v6562_v1 = vadd.f32 %v6561_v57, %v14632_v33 }
 0x831   : > { %v10205_v6 = vcombine.low %v11797_v35, %v11799_v49  ;;  %v10209_v30 = vcombine.high %v11797_v35, %v11799_v49  ;;  %v6263_v24 = vadd.f32 %v6262_v52, %v14553_v59  ;;  %v6563_v4 = vpop.f32.mrf.mxu0 }
 0x832   : > { %11814 = vtanh.bf16 %v7497_v58  ;;  %v6264_v63 = vpop.f32.mrf.mxu1  ;;  %v6564_v14 = vadd.f32 %v6563_v4, %v14641_v22 }
 0x833   : > { %v11801_v3 = vpop.eup %11800  ;;  %9182 = vst [vmem:[%s14597_s30 + $0xe8] sm:$0xff] %v10205_v6  ;;  %9186 = vst [vmem:[%s14597_s30 + $0x104] sm:$0xff] %v10209_v30  ;;  %v7536_v41 = vpack.c.bf16 %v6263_v24, %v6259_v19  ;;  %v6265_v26 = vadd.f32 %v6264_v63, %v14557_v53  ;;  %v6565_v7 = vpop.f32.mrf.mxu0 }
 0x834   : > { %v6566_v36 = vadd.f32 %v6565_v7, %v14632_v33  ;;  %v6268_v15 = vpop.f32.mrf.mxu1  ;;  %6893 = vmatmul.mubr.bf16.gmra.mxu1 %v14352_v23 }
 0x835   : > { %v11803_v12 = vpop.eup %11802  ;;  %11816 = vtanh.bf16 %v7536_v41  ;;  %v7537_v40 = vpack.c.bf16 %v6265_v26, %v6261_v13  ;;  %v6567_v56 = vpop.f32.mrf.mxu0  ;;  %6902 = vmatprep.mubr.bf16.mxu1 %v16075_v20  ;;  %v6269_v58 = vadd.f32 %v6268_v15, %v14553_v59 }
 0x836   : > { %v10252_v45 = vcombine.low %v11801_v3, %v11803_v12  ;;  %v10256_v32 = vcombine.high %v11801_v3, %v11803_v12  ;;  %v7503_v9 = vpack.c.bf16 %v6566_v36, %v6562_v1  ;;  %v6568_v11 = vadd.f32 %v6567_v56, %v14641_v22  ;;  %v6270_v35 = vpop.f32.mrf.mxu1  ;;  %v11805_v57 = vpop.eup %11804 }
 0x837   : > { %11818 = vtanh.bf16 %v7537_v40  ;;  %v6571_v49 = vpop.f32.mrf.mxu0  ;;  %11327 = vmatmul.mubr.bf16.vlgmr.msra.gmra.mxu0 %v14301_v21  ;;  %v6271_v13 = vadd.f32 %v6270_v35, %v14557_v53 }
 0x838   : > { %v11807_v19 = vpop.eup %11806  ;;  %9229 = vst [vmem:[%s14597_s30 + $0x230] sm:$0xff] %v10252_v45  ;;  %9233 = vst [vmem:[%s14597_s30 + $0x24c] sm:$0xff] %v10256_v32  ;;  %v7504_v52 = vpack.c.bf16 %v6568_v11, %v6564_v14  ;;  %v6272_v6 = vpop.f32.mrf.mxu1  ;;  %11330 = vmatprep.mubr.bf16.mxu0 %v14324_v37  ;;  %11820 = vtanh.bf16 %v7503_v9  ;;  %v6572_v1 = vadd.f32 %v6571_v49, %v14632_v33 }
 0x839   : > { %v10213_v30 = vcombine.low %v11805_v57, %v11807_v19  ;;  %v10217_v24 = vcombine.high %v11805_v57, %v11807_v19  ;;  %v6273_v4 = vadd.f32 %v6272_v6, %v14553_v59  ;;  %v6573_v63 = vpop.f32.mrf.mxu0 }
 0x83a   : > { %11822 = vtanh.bf16 %v7504_v52  ;;  %v6274_v3 = vpop.f32.mrf.mxu1  ;;  %v6574_v12 = vadd.f32 %v6573_v63, %v14641_v22 }
 0x83b   : > { %v11809_v21 = vpop.eup %11808  ;;  %9190 = vst [vmem:[%s14597_s30 + $0x120] sm:$0xff] %v10213_v30  ;;  %9194 = vst [vmem:[%s14597_s30 + $0x13c] sm:$0xff] %v10217_v24  ;;  %v7543_v41 = vpack.c.bf16 %v6273_v4, %v6269_v58  ;;  %v6275_v26 = vadd.f32 %v6274_v3, %v14557_v53  ;;  %v6575_v7 = vpop.f32.mrf.mxu0 }
 0x83c   : > { %v6576_v37 = vadd.f32 %v6575_v7, %v14632_v33  ;;  %v6278_v36 = vpop.f32.mrf.mxu1  ;;  %6903 = vmatmul.mubr.bf16.gmra.mxu1 %v14365_v62 }
 0x83d   : > { %v11811_v15 = vpop.eup %11810  ;;  %11824 = vtanh.bf16 %v7543_v41  ;;  %v7544_v14 = vpack.c.bf16 %v6275_v26, %v6271_v13  ;;  %v6577_v40 = vpop.f32.mrf.mxu0  ;;  %6912 = vmatprep.mubr.bf16.mxu1 %v16075_v20  ;;  %v6279_v19 = vadd.f32 %v6278_v36, %v14553_v59 }
 0x83e   : > { %v10260_v56 = vcombine.low %v11809_v21, %v11811_v15  ;;  %v10264_v45 = vcombine.high %v11809_v21, %v11811_v15  ;;  %v7510_v32 = vpack.c.bf16 %v6576_v37, %v6572_v1  ;;  %v6578_v9 = vadd.f32 %v6577_v40, %v14641_v22  ;;  %v6280_v11 = vpop.f32.mrf.mxu1  ;;  %v11813_v35 = vpop.eup %11812 }
 0x83f   : > { %11826 = vtanh.bf16 %v7544_v14  ;;  %v6581_v57 = vpop.f32.mrf.mxu0  ;;  %11331 = vmatmul.mubr.bf16.gmra.mxu0 %v14329_v34  ;;  %v6281_v3 = vadd.f32 %v6280_v11, %v14557_v53 }
 0x840   : > { %v11815_v49 = vpop.eup %11814  ;;  %9237 = vst [vmem:[%s14597_s30 + $0x268] sm:$0xff] %v10260_v56  ;;  %9241 = vst [vmem:[%s14597_s30 + $0x284] sm:$0xff] %v10264_v45  ;;  %v7511_v58 = vpack.c.bf16 %v6578_v9, %v6574_v12  ;;  %v6282_v52 = vpop.f32.mrf.mxu1  ;;  %11334 = vmatprep.mubr.bf16.mxu0 %v14340_v17  ;;  %11828 = vtanh.bf16 %v7510_v32  ;;  %v6582_v26 = vadd.f32 %v6581_v57, %v14632_v33 }
 0x841   : > { %v10221_v6 = vcombine.low %v11813_v35, %v11815_v49  ;;  %v10225_v30 = vcombine.high %v11813_v35, %v11815_v49  ;;  %v6283_v24 = vadd.f32 %v6282_v52, %v14553_v59  ;;  %v6583_v4 = vpop.f32.mrf.mxu0 }
 0x842   : > { %11830 = vtanh.bf16 %v7511_v58  ;;  %v6284_v63 = vpop.f32.mrf.mxu1  ;;  %v6584_v37 = vadd.f32 %v6583_v4, %v14641_v22 }
 0x843   : > { %v11817_v34 = vpop.eup %11816  ;;  %9198 = vst [vmem:[%s14597_s30 + $0x158] sm:$0xff] %v10221_v6  ;;  %9202 = vst [vmem:[%s14597_s30 + $0x174] sm:$0xff] %v10225_v30  ;;  %v7550_v21 = vpack.c.bf16 %v6283_v24, %v6279_v19  ;;  %v6285_v13 = vadd.f32 %v6284_v63, %v14557_v53  ;;  %v6585_v41 = vpop.f32.mrf.mxu0 }
 0x844   : > { %v6586_v17 = vadd.f32 %v6585_v41, %v14632_v33  ;;  %v6288_v7 = vpop.f32.mrf.mxu1  ;;  %6913 = vmatmul.mubr.bf16.gmra.mxu1 %v14372_v8 }
 0x845   : > { %v11819_v1 = vpop.eup %11818  ;;  %11832 = vtanh.bf16 %v7550_v21  ;;  %v7551_v36 = vpack.c.bf16 %v6285_v13, %v6281_v3  ;;  %v6587_v15 = vpop.f32.mrf.mxu0  ;;  %6922 = vmatprep.mubr.bf16.mxu1 %v16075_v20  ;;  %v6289_v35 = vadd.f32 %v6288_v7, %v14553_v59 }
 0x846   : > { %v10268_v12 = vcombine.low %v11817_v34, %v11819_v1  ;;  %v10272_v14 = vcombine.high %v11817_v34, %v11819_v1  ;;  %v7517_v40 = vpack.c.bf16 %v6586_v17, %v6582_v26  ;;  %v6588_v56 = vadd.f32 %v6587_v15, %v14641_v22  ;;  %v6290_v45 = vpop.f32.mrf.mxu1  ;;  %v11821_v32 = vpop.eup %11820 }
 0x847   : > { %11834 = vtanh.bf16 %v7551_v36  ;;  %v6591_v9 = vpop.f32.mrf.mxu0  ;;  %11335 = vmatmul.mubr.bf16.gmra.mxu0 %v14352_v23  ;;  %v6291_v24 = vadd.f32 %v6290_v45, %v14557_v53 }
 0x848   : > { %v11823_v11 = vpop.eup %11822  ;;  %9245 = vst [vmem:[%s14597_s30 + $0x2a0] sm:$0xff] %v10268_v12  ;;  %9249 = vst [vmem:[%s14597_s30 + $0x2bc] sm:$0xff] %v10272_v14  ;;  %v7518_v57 = vpack.c.bf16 %v6588_v56, %v6584_v37  ;;  %v6292_v49 = vpop.f32.mrf.mxu1  ;;  %11338 = vmatprep.mubr.bf16.mxu0 %v14365_v62  ;;  %11836 = vtanh.bf16 %v7517_v40  ;;  %v6592_v3 = vadd.f32 %v6591_v9, %v14632_v33 }
 0x849   : > { %v10229_v19 = vcombine.low %v11821_v32, %v11823_v11  ;;  %v10233_v58 = vcombine.high %v11821_v32, %v11823_v11  ;;  %v6293_v52 = vadd.f32 %v6292_v49, %v14553_v59  ;;  %v6593_v6 = vpop.f32.mrf.mxu0 }
 0x84a   : > { %11838 = vtanh.bf16 %v7518_v57  ;;  %v6294_v30 = vpop.f32.mrf.mxu1  ;;  %v6594_v41 = vadd.f32 %v6593_v6, %v14641_v22 }
 0x84b   : > { %v11825_v23 = vpop.eup %11824  ;;  %9206 = vst [vmem:[%s14597_s30 + $0x190] sm:$0xff] %v10229_v19  ;;  %9210 = vst [vmem:[%s14597_s30 + $0x1ac] sm:$0xff] %v10233_v58  ;;  %v7557_v4 = vpack.c.bf16 %v6293_v52, %v6289_v35  ;;  %v6295_v63 = vadd.f32 %v6294_v30, %v14557_v53  ;;  %v6595_v34 = vpop.f32.mrf.mxu0 }
 0x84c   : > { %v6596_v62 = vadd.f32 %v6595_v34, %v14632_v33  ;;  %v6298_v21 = vpop.f32.mrf.mxu1  ;;  %6923 = vmatmul.mubr.bf16.gmra.mxu1 %v14381_v0 }
 0x84d   : > { %v11827_v13 = vpop.eup %11826  ;;  %11840 = vtanh.bf16 %v7557_v4  ;;  %v7558_v26 = vpack.c.bf16 %v6295_v63, %v6291_v24  ;;  %v6597_v17 = vpop.f32.mrf.mxu0  ;;  %6932 = vmatprep.mubr.bf16.mxu1 %v16075_v20  ;;  %v6299_v56 = vadd.f32 %v6298_v21, %v14553_v59 }
 0x84e   : > { %v10276_v7 = vcombine.low %v11825_v23, %v11827_v13  ;;  %v10280_v1 = vcombine.high %v11825_v23, %v11827_v13  ;;  %v7524_v37 = vpack.c.bf16 %v6596_v62, %v6592_v3  ;;  %v6598_v36 = vadd.f32 %v6597_v17, %v14641_v22  ;;  %v6300_v15 = vpop.f32.mrf.mxu1  ;;  %v11829_v12 = vpop.eup %11828 }
 0x84f   : > { %11842 = vtanh.bf16 %v7558_v26  ;;  %v6601_v14 = vpop.f32.mrf.mxu0  ;;  %11339 = vmatmul.mubr.bf16.gmra.mxu0 %v14372_v8  ;;  %v6301_v19 = vadd.f32 %v6300_v15, %v14557_v53 }
 0x850   : > { %v11831_v40 = vpop.eup %11830  ;;  %9253 = vst [vmem:[%s14597_s30 + $0x2d8] sm:$0xff] %v10276_v7  ;;  %9257 = vst [vmem:[%s14597_s30 + $0x2f4] sm:$0xff] %v10280_v1  ;;  %v7525_v45 = vpack.c.bf16 %v6598_v36, %v6594_v41  ;;  %v6302_v32 = vpop.f32.mrf.mxu1  ;;  %11342 = vmatprep.mubr.bf16.mxu0 %v14381_v0  ;;  %11844 = vtanh.bf16 %v7524_v37  ;;  %v6602_v30 = vadd.f32 %v6601_v14, %v14632_v33 }
 0x851   : > { %v10237_v9 = vcombine.low %v11829_v12, %v11831_v40  ;;  %v10241_v11 = vcombine.high %v11829_v12, %v11831_v40  ;;  %v6303_v35 = vadd.f32 %v6302_v32, %v14553_v59  ;;  %v6603_v57 = vpop.f32.mrf.mxu0 }
 0x852   : > { %11846 = vtanh.bf16 %v7525_v45  ;;  %v6304_v49 = vpop.f32.mrf.mxu1  ;;  %v6604_v4 = vadd.f32 %v6603_v57, %v14641_v22 }
 0x853   : > { %v11833_v8 = vpop.eup %11832  ;;  %9214 = vst [vmem:[%s14597_s30 + $0x1c8] sm:$0xff] %v10237_v9  ;;  %9218 = vst [vmem:[%s14597_s30 + $0x1e4] sm:$0xff] %v10241_v11  ;;  %v7564_v58 = vpack.c.bf16 %v6303_v35, %v6299_v56  ;;  %v6305_v52 = vadd.f32 %v6304_v49, %v14557_v53  ;;  %v6605_v6 = vpop.f32.mrf.mxu0 }
 0x854   : > { %v6606_v0 = vadd.f32 %v6605_v6, %v14632_v33  ;;  %v6308_v23 = vpop.f32.mrf.mxu1  ;;  %6933 = vmatmul.mubr.bf16.gmra.mxu1 %v14397_v10 }
 0x855   : > { %v11835_v24 = vpop.eup %11834  ;;  %11848 = vtanh.bf16 %v7564_v58  ;;  %v7565_v63 = vpack.c.bf16 %v6305_v52, %v6301_v19  ;;  %v6607_v34 = vpop.f32.mrf.mxu0  ;;  %6942 = vmatprep.mubr.bf16.mxu1 %v16075_v20  ;;  %v6309_v1 = vadd.f32 %v6308_v23, %v14553_v59 }
 0x856   : > { %v10284_v3 = vcombine.low %v11833_v8, %v11835_v24  ;;  %v10288_v62 = vcombine.high %v11833_v8, %v11835_v24  ;;  %v7531_v21 = vpack.c.bf16 %v6606_v0, %v6602_v30  ;;  %v6608_v13 = vadd.f32 %v6607_v34, %v14641_v22  ;;  %v6310_v41 = vpop.f32.mrf.mxu1  ;;  %v11837_v26 = vpop.eup %11836 }
 0x857   : > { %11850 = vtanh.bf16 %v7565_v63  ;;  %v6611_v17 = vpop.f32.mrf.mxu0  ;;  %11343 = vmatmul.mubr.bf16.gmra.mxu0 %v14397_v10  ;;  %v6311_v45 = vadd.f32 %v6310_v41, %v14557_v53 }
 0x858   : > { %v11839_v7 = vpop.eup %11838  ;;  %9261 = vst [vmem:[%s14597_s30 + $0x310] sm:$0xff] %v10284_v3  ;;  %9265 = vst [vmem:[%s14597_s30 + $0x32c] sm:$0xff] %v10288_v62  ;;  %v7532_v37 = vpack.c.bf16 %v6608_v13, %v6604_v4  ;;  %v6312_v36 = vpop.f32.mrf.mxu1  ;;  %11346 = vmatprep.mubr.bf16.mxu0 %v14406_v47  ;;  %11852 = vtanh.bf16 %v7531_v21  ;;  %v6612_v35 = vadd.f32 %v6611_v17, %v14632_v33 }
 0x859   : > { %v10245_v15 = vcombine.low %v11837_v26, %v11839_v7  ;;  %v10249_v12 = vcombine.high %v11837_v26, %v11839_v7  ;;  %v6313_v14 = vadd.f32 %v6312_v36, %v14553_v59  ;;  %v6613_v40 = vpop.f32.mrf.mxu0 }
 0x85a   : > { %11854 = vtanh.bf16 %v7532_v37  ;;  %v6314_v56 = vpop.f32.mrf.mxu1  ;;  %v6614_v19 = vadd.f32 %v6613_v40, %v14641_v22 }
 0x85b   : > { %v11841_v10 = vpop.eup %11840  ;;  %9222 = vst [vmem:[%s14597_s30 + $0x200] sm:$0xff] %v10245_v15  ;;  %9226 = vst [vmem:[%s14597_s30 + $0x21c] sm:$0xff] %v10249_v12  ;;  %v7571_v32 = vpack.c.bf16 %v6313_v14, %v6309_v1  ;;  %v6315_v9 = vadd.f32 %v6314_v56, %v14557_v53  ;;  %v6615_v11 = vpop.f32.mrf.mxu0 }
 0x85c   : > { %v6616_v57 = vadd.f32 %v6615_v11, %v14632_v33  ;;  %v6318_v49 = vpop.f32.mrf.mxu1  ;;  %6943 = vmatmul.mubr.bf16.gmra.mxu1 %v14406_v47 }
 0x85d   : > { %v11843_v8 = vpop.eup %11842  ;;  %11856 = vtanh.bf16 %v7571_v32  ;;  %v7572_v58 = vpack.c.bf16 %v6315_v9, %v6311_v45  ;;  %v6617_v52 = vpop.f32.mrf.mxu0  ;;  %6952 = vmatprep.mubr.bf16.mxu1 %v16075_v20  ;;  %v6319_v34 = vadd.f32 %v6318_v49, %v14553_v59 }
 0x85e   : > { %v10292_v6 = vcombine.low %v11841_v10, %v11843_v8  ;;  %v10296_v30 = vcombine.high %v11841_v10, %v11843_v8  ;;  %v7538_v0 = vpack.c.bf16 %v6616_v57, %v6612_v35  ;;  %v6618_v23 = vadd.f32 %v6617_v52, %v14641_v22  ;;  %v6320_v24 = vpop.f32.mrf.mxu1  ;;  %v11845_v4 = vpop.eup %11844 }
 0x85f   : > { %11858 = vtanh.bf16 %v7572_v58  ;;  %v6621_v63 = vpop.f32.mrf.mxu0  ;;  %11347 = vmatmul.mubr.bf16.gmra.mxu0 %v14413_v29  ;;  %v6321_v1 = vadd.f32 %v6320_v24, %v14557_v53 }
 0x860   : > { %v11847_v47 = vpop.eup %11846  ;;  %9269 = vst [vmem:[%s14597_s30 + $0x348] sm:$0xff] %v10292_v6  ;;  %9273 = vst [vmem:[%s14597_s30 + $0x364] sm:$0xff] %v10296_v30  ;;  %v7539_v3 = vpack.c.bf16 %v6618_v23, %v6614_v19  ;;  %v6322_v62 = vpop.f32.mrf.mxu1  ;;  %11350 = vmatprep.mubr.bf16.mxu0 %v14422_v48  ;;  %11860 = vtanh.bf16 %v7538_v0  ;;  %v6622_v12 = vadd.f32 %v6621_v63, %v14632_v33 }
 0x861   : > { %v10253_v21 = vcombine.low %v11845_v4, %v11847_v47  ;;  %v10257_v13 = vcombine.high %v11845_v4, %v11847_v47  ;;  %v6323_v41 = vadd.f32 %v6322_v62, %v14553_v59  ;;  %v6623_v26 = vpop.f32.mrf.mxu0 }
 0x862   : > { %11862 = vtanh.bf16 %v7539_v3  ;;  %v6324_v17 = vpop.f32.mrf.mxu1  ;;  %v6624_v10 = vadd.f32 %v6623_v26, %v14641_v22 }
 0x863   : > { %v11849_v7 = vpop.eup %11848  ;;  %9230 = vst [vmem:[%s14597_s30 + $0x238] sm:$0xff] %v10253_v21  ;;  %9234 = vst [vmem:[%s14597_s30 + $0x254] sm:$0xff] %v10257_v13  ;;  %v7578_v37 = vpack.c.bf16 %v6323_v41, %v6319_v34  ;;  %v6325_v36 = vadd.f32 %v6324_v17, %v14557_v53  ;;  %v6625_v15 = vpop.f32.mrf.mxu0 }
 0x864   : > { %v6626_v14 = vadd.f32 %v6625_v15, %v14632_v33  ;;  %v6328_v40 = vpop.f32.mrf.mxu1  ;;  %6953 = vmatmul.mubr.bf16.gmra.mxu1 %v14413_v29 }
 0x865   : > { %v11851_v56 = vpop.eup %11850  ;;  %11864 = vtanh.bf16 %v7578_v37  ;;  %v7579_v45 = vpack.c.bf16 %v6325_v36, %v6321_v1  ;;  %v6627_v32 = vpop.f32.mrf.mxu0  ;;  %6962 = vmatprep.mubr.bf16.mxu1 %v16075_v20  ;;  %v6329_v58 = vadd.f32 %v6328_v40, %v14553_v59 }
 0x866   : > { %v10300_v9 = vcombine.low %v11849_v7, %v11851_v56  ;;  %v10304_v11 = vcombine.high %v11849_v7, %v11851_v56  ;;  %v7545_v35 = vpack.c.bf16 %v6626_v14, %v6622_v12  ;;  %v6628_v57 = vadd.f32 %v6627_v32, %v14641_v22  ;;  %v6330_v49 = vpop.f32.mrf.mxu1  ;;  %v11853_v8 = vpop.eup %11852 }
 0x867   : > { %11866 = vtanh.bf16 %v7579_v45  ;;  %v6631_v19 = vpop.f32.mrf.mxu0  ;;  %11351 = vmatmul.mubr.bf16.gmra.mxu0 %v14429_v60  ;;  %v6331_v47 = vadd.f32 %v6330_v49, %v14557_v53 }
 0x868   : > { %v11855_v29 = vpop.eup %11854  ;;  %9277 = vst [vmem:[%s14597_s30 + $0x380] sm:$0xff] %v10300_v9  ;;  %9281 = vst [vmem:[%s14597_s30 + $0x39c] sm:$0xff] %v10304_v11  ;;  %v7546_v52 = vpack.c.bf16 %v6628_v57, %v6624_v10  ;;  %v6332_v6 = vpop.f32.mrf.mxu1  ;;  %11354 = vmatprep.mubr.bf16.mxu0 %v14438_v2  ;;  %11868 = vtanh.bf16 %v7545_v35  ;;  %v6632_v21 = vadd.f32 %v6631_v19, %v14632_v33 }
 0x869   : > { %v10261_v30 = vcombine.low %v11853_v8, %v11855_v29  ;;  %v10265_v0 = vcombine.high %v11853_v8, %v11855_v29  ;;  %v6333_v23 = vadd.f32 %v6332_v6, %v14553_v59  ;;  %v6633_v24 = vpop.f32.mrf.mxu0 }
 0x86a   : > { %11870 = vtanh.bf16 %v7546_v52  ;;  %v6334_v4 = vpop.f32.mrf.mxu1  ;;  %v6634_v17 = vadd.f32 %v6633_v24, %v14641_v22 }
 0x86b   : > { %v11857_v63 = vpop.eup %11856  ;;  %9238 = vst [vmem:[%s14597_s30 + $0x270] sm:$0xff] %v10261_v30  ;;  %9242 = vst [vmem:[%s14597_s30 + $0x28c] sm:$0xff] %v10265_v0  ;;  %v7585_v34 = vpack.c.bf16 %v6333_v23, %v6329_v58  ;;  %v6335_v3 = vadd.f32 %v6334_v4, %v14557_v53  ;;  %v6635_v62 = vpop.f32.mrf.mxu0 }
 0x86c   : > { %v6636_v13 = vadd.f32 %v6635_v62, %v14632_v33  ;;  %v6338_v41 = vpop.f32.mrf.mxu1  ;;  %6963 = vmatmul.mubr.bf16.gmra.mxu1 %v14422_v48 }
 0x86d   : > { %v11859_v26 = vpop.eup %11858  ;;  %11872 = vtanh.bf16 %v7585_v34  ;;  %v7586_v7 = vpack.c.bf16 %v6335_v3, %v6331_v47  ;;  %v6637_v1 = vpop.f32.mrf.mxu0  ;;  %6972 = vmatprep.mubr.bf16.mxu1 %v16075_v20  ;;  %v6339_v10 = vadd.f32 %v6338_v41, %v14553_v59 }
 0x86e   : > { %v10308_v37 = vcombine.low %v11857_v63, %v11859_v26  ;;  %v10312_v36 = vcombine.high %v11857_v63, %v11859_v26  ;;  %v7552_v15 = vpack.c.bf16 %v6636_v13, %v6632_v21  ;;  %v6638_v12 = vadd.f32 %v6637_v1, %v14641_v22  ;;  %v6340_v14 = vpop.f32.mrf.mxu1  ;;  %v11861_v40 = vpop.eup %11860 }
 0x86f   : > { %11874 = vtanh.bf16 %v7586_v7  ;;  %v6641_v56 = vpop.f32.mrf.mxu0  ;;  %11355 = vmatmul.mubr.bf16.gmra.mxu0 %v14454_v31  ;;  %v6341_v19 = vadd.f32 %v6340_v14, %v14557_v53 }
 0x870   : > { %v11863_v48 = vpop.eup %11862  ;;  %9285 = vst [vmem:[%s14597_s30 + $0x3b8] sm:$0xff] %v10308_v37  ;;  %9289 = vst [vmem:[%s14597_s30 + $0x3d4] sm:$0xff] %v10312_v36  ;;  %v7553_v45 = vpack.c.bf16 %v6638_v12, %v6634_v17  ;;  %v6342_v32 = vpop.f32.mrf.mxu1  ;;  %11358 = vmatprep.mubr.bf16.mxu0 %v14463_v51  ;;  %11876 = vtanh.bf16 %v7552_v15  ;;  %v6642_v6 = vadd.f32 %v6641_v56, %v14632_v33 }
 0x871   : > { %v10269_v9 = vcombine.low %v11861_v40, %v11863_v48  ;;  %v10273_v11 = vcombine.high %v11861_v40, %v11863_v48  ;;  %v6343_v35 = vadd.f32 %v6342_v32, %v14553_v59  ;;  %v6643_v57 = vpop.f32.mrf.mxu0 }
 0x872   : > { %11878 = vtanh.bf16 %v7553_v45  ;;  %v6344_v49 = vpop.f32.mrf.mxu1  ;;  %v6644_v24 = vadd.f32 %v6643_v57, %v14641_v22 }
 0x873   : > { %v11865_v8 = vpop.eup %11864  ;;  %9246 = vst [vmem:[%s14597_s30 + $0x2a8] sm:$0xff] %v10269_v9  ;;  %9250 = vst [vmem:[%s14597_s30 + $0x2c4] sm:$0xff] %v10273_v11  ;;  %v7592_v29 = vpack.c.bf16 %v6343_v35, %v6339_v10  ;;  %v6345_v58 = vadd.f32 %v6344_v49, %v14557_v53  ;;  %v6645_v52 = vpop.f32.mrf.mxu0 }
 0x874   : > { %v6646_v30 = vadd.f32 %v6645_v52, %v14632_v33  ;;  %v6348_v0 = vpop.f32.mrf.mxu1  ;;  %6973 = vmatmul.mubr.bf16.gmra.mxu1 %v14429_v60 }
 0x875   : > { %v11867_v23 = vpop.eup %11866  ;;  %11880 = vtanh.bf16 %v7592_v29  ;;  %v7593_v4 = vpack.c.bf16 %v6345_v58, %v6341_v19  ;;  %v6647_v63 = vpop.f32.mrf.mxu0  ;;  %6982 = vmatprep.mubr.bf16.mxu1 %v16075_v20  ;;  %v6349_v26 = vadd.f32 %v6348_v0, %v14553_v59 }
 0x876   : > { %v10316_v47 = vcombine.low %v11865_v8, %v11867_v23  ;;  %v10320_v34 = vcombine.high %v11865_v8, %v11867_v23  ;;  %v7559_v3 = vpack.c.bf16 %v6646_v30, %v6642_v6  ;;  %v6648_v62 = vadd.f32 %v6647_v63, %v14641_v22  ;;  %v6350_v21 = vpop.f32.mrf.mxu1  ;;  %v11869_v13 = vpop.eup %11868 }
 0x877   : > { %11882 = vtanh.bf16 %v7593_v4  ;;  %v6651_v41 = vpop.f32.mrf.mxu0  ;;  %11359 = vmatmul.mubr.bf16.gmra.mxu0 %v14470_v54  ;;  %v6351_v40 = vadd.f32 %v6350_v21, %v14557_v53 }
 0x878   : > { %v11871_v60 = vpop.eup %11870  ;;  %9293 = vst [vmem:[%s14597_s30 + $0x3f0] sm:$0xff] %v10316_v47  ;;  %9297 = vst [vmem:[%s14597_s30 + $0x40c] sm:$0xff] %v10320_v34  ;;  %v7560_v17 = vpack.c.bf16 %v6648_v62, %v6644_v24  ;;  %v6352_v7 = vpop.f32.mrf.mxu1  ;;  %11362 = vmatprep.mubr.bf16.mxu0 %v14479_v16  ;;  %11884 = vtanh.bf16 %v7559_v3  ;;  %v6652_v45 = vadd.f32 %v6651_v41, %v14632_v33 }
 0x879   : > { %v10277_v1 = vcombine.low %v11869_v13, %v11871_v60  ;;  %v10281_v37 = vcombine.high %v11869_v13, %v11871_v60  ;;  %v6353_v36 = vadd.f32 %v6352_v7, %v14553_v59  ;;  %v6653_v15 = vpop.f32.mrf.mxu0 }
 0x87a   : > { %11886 = vtanh.bf16 %v7560_v17  ;;  %v6354_v12 = vpop.f32.mrf.mxu1  ;;  %v6654_v35 = vadd.f32 %v6653_v15, %v14641_v22 }
 0x87b   : > { %v11873_v14 = vpop.eup %11872  ;;  %9254 = vst [vmem:[%s14597_s30 + $0x2e0] sm:$0xff] %v10277_v1  ;;  %9258 = vst [vmem:[%s14597_s30 + $0x2fc] sm:$0xff] %v10281_v37  ;;  %v7599_v56 = vpack.c.bf16 %v6353_v36, %v6349_v26  ;;  %v6355_v48 = vadd.f32 %v6354_v12, %v14557_v53  ;;  %v6655_v10 = vpop.f32.mrf.mxu0 }
 0x87c   : > { %v6656_v32 = vadd.f32 %v6655_v10, %v14632_v33  ;;  %v6358_v9 = vpop.f32.mrf.mxu1  ;;  %6983 = vmatmul.mubr.bf16.gmra.mxu1 %v14438_v2 }
 0x87d   : > { %v11875_v11 = vpop.eup %11874  ;;  %11888 = vtanh.bf16 %v7599_v56  ;;  %v7600_v57 = vpack.c.bf16 %v6355_v48, %v6351_v40  ;;  %v6657_v49 = vpop.f32.mrf.mxu0  ;;  %6992 = vmatprep.mubr.bf16.mxu1 %v16075_v20  ;;  %v6359_v0 = vadd.f32 %v6358_v9, %v14553_v59 }
 0x87e   : > { %v10324_v8 = vcombine.low %v11873_v14, %v11875_v11  ;;  %v10328_v19 = vcombine.high %v11873_v14, %v11875_v11  ;;  %v7566_v29 = vpack.c.bf16 %v6656_v32, %v6652_v45  ;;  %v6658_v58 = vadd.f32 %v6657_v49, %v14641_v22  ;;  %v6360_v52 = vpop.f32.mrf.mxu1  ;;  %v11877_v6 = vpop.eup %11876 }
 0x87f   : > { %11890 = vtanh.bf16 %v7600_v57  ;;  %v6661_v30 = vpop.f32.mrf.mxu0  ;;  %11363 = vmatmul.mubr.bf16.gmra.mxu0 %v14489_v55  ;;  %v6361_v21 = vadd.f32 %v6360_v52, %v14557_v53 }
 0x880   : > { %v11879_v2 = vpop.eup %11878  ;;  %9301 = vst [vmem:[%s14597_s30 + $0x428] sm:$0xff] %v10324_v8  ;;  %9305 = vst [vmem:[%s14597_s30 + $0x444] sm:$0xff] %v10328_v19  ;;  %v7567_v23 = vpack.c.bf16 %v6658_v58, %v6654_v35  ;;  %v6362_v24 = vpop.f32.mrf.mxu1  ;;  %11366 = vmatprep.mubr.bf16.mxu0 %v14498_v44  ;;  %11892 = vtanh.bf16 %v7566_v29  ;;  %v6662_v26 = vadd.f32 %v6661_v30, %v14632_v33 }
 0x881   : > { %v10285_v4 = vcombine.low %v11877_v6, %v11879_v2  ;;  %v10289_v63 = vcombine.high %v11877_v6, %v11879_v2  ;;  %v6363_v47 = vadd.f32 %v6362_v24, %v14553_v59  ;;  %v6663_v34 = vpop.f32.mrf.mxu0 }
 0x882   : > { %11894 = vtanh.bf16 %v7567_v23  ;;  %v6364_v3 = vpop.f32.mrf.mxu1  ;;  %v6664_v37 = vadd.f32 %v6663_v34, %v14641_v22 }
 0x883   : > { %v11881_v62 = vpop.eup %11880  ;;  %9262 = vst [vmem:[%s14597_s30 + $0x318] sm:$0xff] %v10285_v4  ;;  %9266 = vst [vmem:[%s14597_s30 + $0x334] sm:$0xff] %v10289_v63  ;;  %v7606_v13 = vpack.c.bf16 %v6363_v47, %v6359_v0  ;;  %v6365_v41 = vadd.f32 %v6364_v3, %v14557_v53  ;;  %v6665_v60 = vpop.f32.mrf.mxu0 }
 0x884   : > { %v6666_v17 = vadd.f32 %v6665_v60, %v14632_v33  ;;  %v6368_v7 = vpop.f32.mrf.mxu1  ;;  %6993 = vmatmul.mubr.bf16.gmra.mxu1 %v14454_v31 }
 0x885   : > { %v11883_v1 = vpop.eup %11882  ;;  %11896 = vtanh.bf16 %v7606_v13  ;;  %v7607_v36 = vpack.c.bf16 %v6365_v41, %v6361_v21  ;;  %v6667_v15 = vpop.f32.mrf.mxu0  ;;  %7002 = vmatprep.mubr.bf16.mxu1 %v16075_v20  ;;  %v6369_v32 = vadd.f32 %v6368_v7, %v14553_v59 }
 0x886   : > { %v10332_v12 = vcombine.low %v11881_v62, %v11883_v1  ;;  %v10336_v14 = vcombine.high %v11881_v62, %v11883_v1  ;;  %v7573_v40 = vpack.c.bf16 %v6666_v17, %v6662_v26  ;;  %v6668_v56 = vadd.f32 %v6667_v15, %v14641_v22  ;;  %v6370_v48 = vpop.f32.mrf.mxu1  ;;  %v11885_v10 = vpop.eup %11884 }
 0x887   : > { %11898 = vtanh.bf16 %v7607_v36  ;;  %v6671_v45 = vpop.f32.mrf.mxu0  ;;  %11367 = vmatmul.mubr.bf16.gmra.mxu0 %v14511_v38  ;;  %v6371_v58 = vadd.f32 %v6370_v48, %v14557_v53 }
 0x888   : > { %v11887_v31 = vpop.eup %11886  ;;  %9309 = vst [vmem:[%s14597_s30 + $0x460] sm:$0xff] %v10332_v12  ;;  %9313 = vst [vmem:[%s14597_s30 + $0x47c] sm:$0xff] %v10336_v14  ;;  %v7574_v9 = vpack.c.bf16 %v6668_v56, %v6664_v37  ;;  %v6372_v11 = vpop.f32.mrf.mxu1  ;;  %11370 = vmatprep.mubr.bf16.mxu0 %v14523_v18  ;;  %11900 = vtanh.bf16 %v7573_v40  ;;  %v6672_v2 = vadd.f32 %v6671_v45, %v14632_v33 }
 0x889   : > { %v10293_v35 = vcombine.low %v11885_v10, %v11887_v31  ;;  %v10297_v57 = vcombine.high %v11885_v10, %v11887_v31  ;;  %v6373_v49 = vadd.f32 %v6372_v11, %v14553_v59  ;;  %v6673_v8 = vpop.f32.mrf.mxu0 }
 0x88a   : > { %11902 = vtanh.bf16 %v7574_v9  ;;  %v6374_v19 = vpop.f32.mrf.mxu1  ;;  %v6674_v4 = vadd.f32 %v6673_v8, %v14641_v22 }
 0x88b   : > { %v11889_v29 = vpop.eup %11888  ;;  %9270 = vst [vmem:[%s14597_s30 + $0x350] sm:$0xff] %v10293_v35  ;;  %9274 = vst [vmem:[%s14597_s30 + $0x36c] sm:$0xff] %v10297_v57  ;;  %v7613_v52 = vpack.c.bf16 %v6373_v49, %v6369_v32  ;;  %v6375_v6 = vadd.f32 %v6374_v19, %v14557_v53  ;;  %v6675_v30 = vpop.f32.mrf.mxu0 }
 0x88c   : > { %v6676_v0 = vadd.f32 %v6675_v30, %v14632_v33  ;;  %v6378_v23 = vpop.f32.mrf.mxu1  ;;  %7003 = vmatmul.mubr.bf16.gmra.mxu1 %v14463_v51 }
 0x88d   : > { %v11891_v24 = vpop.eup %11890  ;;  %11904 = vtanh.bf16 %v7613_v52  ;;  %v7614_v63 = vpack.c.bf16 %v6375_v6, %v6371_v58  ;;  %v6677_v47 = vpop.f32.mrf.mxu0  ;;  %7012 = vmatprep.mubr.bf16.mxu1 %v16075_v20  ;;  %v6379_v26 = vadd.f32 %v6378_v23, %v14553_v59 }
 0x88e   : > { %v10340_v34 = vcombine.low %v11889_v29, %v11891_v24  ;;  %v10344_v3 = vcombine.high %v11889_v29, %v11891_v24  ;;  %v7580_v62 = vpack.c.bf16 %v6676_v0, %v6672_v2  ;;  %v6678_v21 = vadd.f32 %v6677_v47, %v14641_v22  ;;  %v6380_v13 = vpop.f32.mrf.mxu1  ;;  %v11893_v41 = vpop.eup %11892 }
 0x88f   : > { %11906 = vtanh.bf16 %v7614_v63  ;;  %v6681_v60 = vpop.f32.mrf.mxu0  ;;  %11371 = vmatmul.mubr.bf16.gmra.mxu0 %v14530_v61  ;;  %v6381_v40 = vadd.f32 %v6380_v13, %v14557_v53 }
 0x890   : > { %v11895_v51 = vpop.eup %11894  ;;  %9317 = vst [vmem:[%s14597_s30 + $0x498] sm:$0xff] %v10340_v34  ;;  %9321 = vst [vmem:[%s14597_s30 + $0x4b4] sm:$0xff] %v10344_v3  ;;  %v7581_v17 = vpack.c.bf16 %v6678_v21, %v6674_v4  ;;  %v6382_v7 = vpop.f32.mrf.mxu1  ;;  %11374 = vmatprep.mubr.bf16.mxu0 %v14542_v42  ;;  %11908 = vtanh.bf16 %v7580_v62  ;;  %v6682_v45 = vadd.f32 %v6681_v60, %v14632_v33 }
 0x891   : > { %v10301_v1 = vcombine.low %v11893_v41, %v11895_v51  ;;  %v10305_v37 = vcombine.high %v11893_v41, %v11895_v51  ;;  %v6383_v36 = vadd.f32 %v6382_v7, %v14553_v59  ;;  %v6683_v15 = vpop.f32.mrf.mxu0 }
 0x892   : > { %11910 = vtanh.bf16 %v7581_v17  ;;  %v6384_v12 = vpop.f32.mrf.mxu1  ;;  %v6684_v11 = vadd.f32 %v6683_v15, %v14641_v22 }
 0x893   : > { %v11897_v14 = vpop.eup %11896  ;;  %9278 = vst [vmem:[%s14597_s30 + $0x388] sm:$0xff] %v10301_v1  ;;  %9282 = vst [vmem:[%s14597_s30 + $0x3a4] sm:$0xff] %v10305_v37  ;;  %v7620_v56 = vpack.c.bf16 %v6383_v36, %v6379_v26  ;;  %v6385_v48 = vadd.f32 %v6384_v12, %v14557_v53  ;;  %v6685_v10 = vpop.f32.mrf.mxu0 }
 0x894   : > { %v6686_v31 = vadd.f32 %v6685_v10, %v14632_v33  ;;  %v6388_v32 = vpop.f32.mrf.mxu1  ;;  %7013 = vmatmul.mubr.bf16.gmra.mxu1 %v14470_v54 }
 0x895   : > { %v11899_v9 = vpop.eup %11898  ;;  %11912 = vtanh.bf16 %v7620_v56  ;;  %v7621_v35 = vpack.c.bf16 %v6385_v48, %v6381_v40  ;;  %v6687_v57 = vpop.f32.mrf.mxu0  ;;  %7022 = vmatprep.mubr.bf16.mxu1 %v16075_v20  ;;  %v6389_v30 = vadd.f32 %v6388_v32, %v14553_v59 }
 0x896   : > { %v10348_v49 = vcombine.low %v11897_v14, %v11899_v9  ;;  %v10352_v8 = vcombine.high %v11897_v14, %v11899_v9  ;;  %v7587_v19 = vpack.c.bf16 %v6686_v31, %v6682_v45  ;;  %v6688_v29 = vadd.f32 %v6687_v57, %v14641_v22  ;;  %v6390_v58 = vpop.f32.mrf.mxu1  ;;  %v11901_v52 = vpop.eup %11900 }
 0x897   : > { %11914 = vtanh.bf16 %v7621_v35  ;;  %v6691_v6 = vpop.f32.mrf.mxu0  ;;  %11375 = vmatmul.mubr.bf16.gmra.mxu0 %v14563_v50  ;;  %v6391_v3 = vadd.f32 %v6390_v58, %v14557_v53 }
 0x898   : > { %v11903_v54 = vpop.eup %11902  ;;  %9325 = vst [vmem:[%s14597_s30 + $0x4d0] sm:$0xff] %v10348_v49  ;;  %9329 = vst [vmem:[%s14597_s30 + $0x4ec] sm:$0xff] %v10352_v8  ;;  %v7588_v2 = vpack.c.bf16 %v6688_v29, %v6684_v11  ;;  %v6392_v0 = vpop.f32.mrf.mxu1  ;;  %11378 = vmatprep.mubr.bf16.mxu0 %v14576_v43  ;;  %11916 = vtanh.bf16 %v7587_v19  ;;  %v6692_v41 = vadd.f32 %v6691_v6, %v14632_v33 }
 0x899   : > { %v10309_v23 = vcombine.low %v11901_v52, %v11903_v54  ;;  %v10313_v24 = vcombine.high %v11901_v52, %v11903_v54  ;;  %v6393_v4 = vadd.f32 %v6392_v0, %v14553_v59  ;;  %v6693_v63 = vpop.f32.mrf.mxu0 }
 0x89a   : > { %11918 = vtanh.bf16 %v7588_v2  ;;  %v6394_v47 = vpop.f32.mrf.mxu1  ;;  %v6694_v17 = vadd.f32 %v6693_v63, %v14641_v22 }
 0x89b   : > { %v11905_v34 = vpop.eup %11904  ;;  %9286 = vst [vmem:[%s14597_s30 + $0x3c0] sm:$0xff] %v10309_v23  ;;  %9290 = vst [vmem:[%s14597_s30 + $0x3dc] sm:$0xff] %v10313_v24  ;;  %v7627_v62 = vpack.c.bf16 %v6393_v4, %v6389_v30  ;;  %v6395_v21 = vadd.f32 %v6394_v47, %v14557_v53  ;;  %v6695_v13 = vpop.f32.mrf.mxu0 }
 0x89c   : > { %v6696_v60 = vadd.f32 %v6695_v13, %v14632_v33  ;;  %v6398_v51 = vpop.f32.mrf.mxu1  ;;  %7023 = vmatmul.mubr.bf16.gmra.mxu1 %v14479_v16 }
 0x89d   : > { %v11907_v26 = vpop.eup %11906  ;;  %11920 = vtanh.bf16 %v7627_v62  ;;  %v7628_v7 = vpack.c.bf16 %v6395_v21, %v6391_v3  ;;  %v6697_v1 = vpop.f32.mrf.mxu0  ;;  %7032 = vmatprep.mubr.bf16.mxu1 %v16075_v20  ;;  %v6399_v48 = vadd.f32 %v6398_v51, %v14553_v59 }
 0x89e   : > { %v10356_v37 = vcombine.low %v11905_v34, %v11907_v26  ;;  %v10360_v36 = vcombine.high %v11905_v34, %v11907_v26  ;;  %v7594_v15 = vpack.c.bf16 %v6696_v60, %v6692_v41  ;;  %v6698_v12 = vadd.f32 %v6697_v1, %v14641_v22  ;;  %v6400_v14 = vpop.f32.mrf.mxu1  ;;  %v11909_v40 = vpop.eup %11908 }
 0x89f   : > { %11922 = vtanh.bf16 %v7628_v7  ;;  %v6701_v56 = vpop.f32.mrf.mxu0  ;;  %11379 = vmatmul.mubr.bf16.gmra.mxu0 %v14588_v25  ;;  %v6401_v49 = vadd.f32 %v6400_v14, %v14557_v53 }
 0x8a0   : > { %v11911_v16 = vpop.eup %11910  ;;  %9333 = vst [vmem:[%s14597_s30 + $0x508] sm:$0xff] %v10356_v37  ;;  %9337 = vst [vmem:[%s14597_s30 + $0x524] sm:$0xff] %v10360_v36  ;;  %v7595_v10 = vpack.c.bf16 %v6698_v12, %v6694_v17  ;;  %v6402_v45 = vpop.f32.mrf.mxu1  ;;  %11382 = vmatprep.mubr.bf16.mxu0 %v14605_v28  ;;  %11924 = vtanh.bf16 %v7594_v15  ;;  %v6702_v58 = vadd.f32 %v6701_v56, %v14632_v33 }
 0x8a1   : > { %v10317_v31 = vcombine.low %v11909_v40, %v11911_v16  ;;  %v10321_v32 = vcombine.high %v11909_v40, %v11911_v16  ;;  %v6403_v9 = vadd.f32 %v6402_v45, %v14553_v59  ;;  %v6703_v11 = vpop.f32.mrf.mxu0 }
 0x8a2   : > { %11926 = vtanh.bf16 %v7595_v10  ;;  %v6404_v35 = vpop.f32.mrf.mxu1  ;;  %v6704_v30 = vadd.f32 %v6703_v11, %v14641_v22 }
 0x8a3   : > { %v11913_v57 = vpop.eup %11912  ;;  %9294 = vst [vmem:[%s14597_s30 + $0x3f8] sm:$0xff] %v10317_v31  ;;  %9298 = vst [vmem:[%s14597_s30 + $0x414] sm:$0xff] %v10321_v32  ;;  %v7634_v8 = vpack.c.bf16 %v6403_v9, %v6399_v48  ;;  %v6405_v19 = vadd.f32 %v6404_v35, %v14557_v53  ;;  %v6705_v29 = vpop.f32.mrf.mxu0 }
 0x8a4   : > { %v6706_v52 = vadd.f32 %v6705_v29, %v14632_v33  ;;  %v6408_v6 = vpop.f32.mrf.mxu1  ;;  %7033 = vmatmul.mubr.bf16.gmra.mxu1 %v14489_v55 }
 0x8a5   : > { %v11915_v54 = vpop.eup %11914  ;;  %11928 = vtanh.bf16 %v7634_v8  ;;  %v7635_v2 = vpack.c.bf16 %v6405_v19, %v6401_v49  ;;  %v6707_v0 = vpop.f32.mrf.mxu0  ;;  %7042 = vmatprep.mubr.bf16.mxu1 %v16075_v20  ;;  %v6409_v62 = vadd.f32 %v6408_v6, %v14553_v59 }
 0x8a6   : > { %v10364_v23 = vcombine.low %v11913_v57, %v11915_v54  ;;  %v10368_v24 = vcombine.high %v11913_v57, %v11915_v54  ;;  %v7601_v4 = vpack.c.bf16 %v6706_v52, %v6702_v58  ;;  %v6708_v63 = vadd.f32 %v6707_v0, %v14641_v22  ;;  %v6410_v47 = vpop.f32.mrf.mxu1  ;;  %v11917_v34 = vpop.eup %11916 }
 0x8a7   : > { %11930 = vtanh.bf16 %v7635_v2  ;;  %v6711_v3 = vpop.f32.mrf.mxu0  ;;  %11383 = vmatmul.mubr.bf16.gmra.mxu0 %v14618_v5  ;;  %v6411_v1 = vadd.f32 %v6410_v47, %v14557_v53 }
 0x8a8   : > { %v11919_v55 = vpop.eup %11918  ;;  %9341 = vst [vmem:[%s14597_s30 + $0x540] sm:$0xff] %v10364_v23  ;;  %9345 = vst [vmem:[%s14597_s30 + $0x55c] sm:$0xff] %v10368_v24  ;;  %v7602_v21 = vpack.c.bf16 %v6708_v63, %v6704_v30  ;;  %v6412_v13 = vpop.f32.mrf.mxu1  ;;  %11386 = vmatprep.mubr.bf16.mxu0 %v14643_v46  ;;  %11932 = vtanh.bf16 %v7601_v4  ;;  %v6712_v12 = vadd.f32 %v6711_v3, %v14632_v33 }
 0x8a9   : > { %v10325_v41 = vcombine.low %v11917_v34, %v11919_v55  ;;  %v10329_v60 = vcombine.high %v11917_v34, %v11919_v55  ;;  %v6413_v51 = vadd.f32 %v6412_v13, %v14553_v59  ;;  %v6713_v26 = vpop.f32.mrf.mxu0 }
 0x8aa   : > { %11934 = vtanh.bf16 %v7602_v21  ;;  %v6414_v17 = vpop.f32.mrf.mxu1  ;;  %v6714_v16 = vadd.f32 %v6713_v26, %v14641_v22 }
 0x8ab   : > { %v11921_v7 = vpop.eup %11920  ;;  %9302 = vst [vmem:[%s14597_s30 + $0x430] sm:$0xff] %v10325_v41  ;;  %9306 = vst [vmem:[%s14597_s30 + $0x44c] sm:$0xff] %v10329_v60  ;;  %v7641_v37 = vpack.c.bf16 %v6413_v51, %v6409_v62  ;;  %v6415_v36 = vadd.f32 %v6414_v17, %v14557_v53  ;;  %v6715_v15 = vpop.f32.mrf.mxu0 }
 0x8ac   : > { %v6716_v14 = vadd.f32 %v6715_v15, %v14632_v33  ;;  %v6418_v40 = vpop.f32.mrf.mxu1  ;;  %7043 = vmatmul.mubr.bf16.gmra.mxu1 %v14498_v44 }
 0x8ad   : > { %v11923_v56 = vpop.eup %11922  ;;  %11936 = vtanh.bf16 %v7641_v37  ;;  %v7642_v48 = vpack.c.bf16 %v6415_v36, %v6411_v1  ;;  %v6717_v10 = vpop.f32.mrf.mxu0  ;;  %7052 = vmatprep.mubr.bf16.mxu1 %v16075_v20  ;;  %v6419_v49 = vadd.f32 %v6418_v40, %v14553_v59 }
 0x8ae   : > { %v10372_v45 = vcombine.low %v11921_v7, %v11923_v56  ;;  %v10376_v31 = vcombine.high %v11921_v7, %v11923_v56  ;;  %v7608_v32 = vpack.c.bf16 %v6716_v14, %v6712_v12  ;;  %v6718_v9 = vadd.f32 %v6717_v10, %v14641_v22  ;;  %v6420_v11 = vpop.f32.mrf.mxu1  ;;  %v11925_v35 = vpop.eup %11924 }
 0x8af   : > { %11938 = vtanh.bf16 %v7642_v48  ;;  %v6721_v57 = vpop.f32.mrf.mxu0  ;;  %11387 = vmatmul.mubr.bf16.gmra.mxu0 %v14659_v39  ;;  %v6421_v2 = vadd.f32 %v6420_v11, %v14557_v53 }
 0x8b0   : > { %v11927_v44 = vpop.eup %11926  ;;  %9349 = vst [vmem:[%s14597_s30 + $0x578] sm:$0xff] %v10372_v45  ;;  %9353 = vst [vmem:[%s14597_s30 + $0x594] sm:$0xff] %v10376_v31  ;;  %v7609_v8 = vpack.c.bf16 %v6718_v9, %v6714_v16  ;;  %v6422_v19 = vpop.f32.mrf.mxu1  ;;  %11940 = vtanh.bf16 %v7608_v32  ;;  %v6722_v4 = vadd.f32 %v6721_v57, %v14632_v33 }
 0x8b1   : > { %v10333_v29 = vcombine.low %v11925_v35, %v11927_v44  ;;  %v10337_v58 = vcombine.high %v11925_v35, %v11927_v44  ;;  %v6423_v52 = vadd.f32 %v6422_v19, %v14553_v59  ;;  %v6723_v6 = vpop.f32.mrf.mxu0 }
 0x8b2   : > { %11942 = vtanh.bf16 %v7609_v8  ;;  %v6424_v54 = vpop.f32.mrf.mxu1  ;;  %v6724_v3 = vadd.f32 %v6723_v6, %v14641_v22 }
 0x8b3   : > { %v11929_v30 = vpop.eup %11928  ;;  %9310 = vst [vmem:[%s14597_s30 + $0x468] sm:$0xff] %v10333_v29  ;;  %9314 = vst [vmem:[%s14597_s30 + $0x484] sm:$0xff] %v10337_v58  ;;  %v7648_v0 = vpack.c.bf16 %v6423_v52, %v6419_v49  ;;  %v6425_v23 = vadd.f32 %v6424_v54, %v14557_v53  ;;  %v6725_v24 = vpop.f32.mrf.mxu0 }
 0x8b4   : > { %v6726_v63 = vadd.f32 %v6725_v24, %v14632_v33  ;;  %v6428_v47 = vpop.f32.mrf.mxu1  ;;  %7053 = vmatmul.mubr.bf16.gmra.mxu1 %v14511_v38 }
 0x8b5   : > { %v11931_v34 = vpop.eup %11930  ;;  %11944 = vtanh.bf16 %v7648_v0  ;;  %v7649_v55 = vpack.c.bf16 %v6425_v23, %v6421_v2  ;;  %v6727_v62 = vpop.f32.mrf.mxu0  ;;  %7062 = vmatprep.mubr.bf16.mxu1 %v16075_v20  ;;  %v6429_v7 = vadd.f32 %v6428_v47, %v14553_v59 }
 0x8b6   : > { %v10380_v21 = vcombine.low %v11929_v30, %v11931_v34  ;;  %v10384_v13 = vcombine.high %v11929_v30, %v11931_v34  ;;  %v7615_v41 = vpack.c.bf16 %v6726_v63, %v6722_v4  ;;  %v6728_v60 = vadd.f32 %v6727_v62, %v14641_v22  ;;  %v6430_v51 = vpop.f32.mrf.mxu1  ;;  %v11933_v26 = vpop.eup %11932 }
 0x8b7   : > { %11946 = vtanh.bf16 %v7649_v55  ;;  %v6731_v38 = vpop.f32.mrf.mxu0  ;;  %v6431_v16 = vadd.f32 %v6430_v51, %v14557_v53 }
 0x8b8   : > { %v11935_v17 = vpop.eup %11934  ;;  %9357 = vst [vmem:[%s14597_s30 + $0x5b0] sm:$0xff] %v10380_v21  ;;  %9361 = vst [vmem:[%s14597_s30 + $0x5cc] sm:$0xff] %v10384_v13  ;;  %v7616_v1 = vpack.c.bf16 %v6728_v60, %v6724_v3  ;;  %v6432_v37 = vpop.f32.mrf.mxu1  ;;  %11948 = vtanh.bf16 %v7615_v41  ;;  %v6732_v31 = vadd.f32 %v6731_v38, %v14632_v33 }
 0x8b9   : > { %v10341_v36 = vcombine.low %v11933_v26, %v11935_v17  ;;  %v10345_v15 = vcombine.high %v11933_v26, %v11935_v17  ;;  %v6433_v12 = vadd.f32 %v6432_v37, %v14553_v59  ;;  %v6733_v14 = vpop.f32.mrf.mxu0 }
 0x8ba   : > { %11950 = vtanh.bf16 %v7616_v1  ;;  %v6434_v40 = vpop.f32.mrf.mxu1  ;;  %v6734_v35 = vadd.f32 %v6733_v14, %v14641_v22 }
 0x8bb   : > { %v11937_v56 = vpop.eup %11936  ;;  %9318 = vst [vmem:[%s14597_s30 + $0x4a0] sm:$0xff] %v10341_v36  ;;  %9322 = vst [vmem:[%s14597_s30 + $0x4bc] sm:$0xff] %v10345_v15  ;;  %v7655_v48 = vpack.c.bf16 %v6433_v12, %v6429_v7  ;;  %v6435_v10 = vadd.f32 %v6434_v40, %v14557_v53  ;;  %v6735_v45 = vpop.f32.mrf.mxu0 }
 0x8bc   : > { %v6736_v32 = vadd.f32 %v6735_v45, %v14632_v33  ;;  %v6438_v9 = vpop.f32.mrf.mxu1  ;;  %7063 = vmatmul.mubr.bf16.gmra.mxu1 %v14523_v18 }
 0x8bd   : > { %v11939_v11 = vpop.eup %11938  ;;  %11952 = vtanh.bf16 %v7655_v48  ;;  %v7656_v57 = vpack.c.bf16 %v6435_v10, %v6431_v16  ;;  %v6737_v44 = vpop.f32.mrf.mxu0  ;;  %7072 = vmatprep.mubr.bf16.mxu1 %v16075_v20  ;;  %v6439_v54 = vadd.f32 %v6438_v9, %v14553_v59  ;;  %v5799_v16 = vsub.s32 4, %v14535_v27 }
 0x8be   : > { %v10388_v49 = vcombine.low %v11937_v56, %v11939_v11  ;;  %v10392_v8 = vcombine.high %v11937_v56, %v11939_v11  ;;  %v7622_v19 = vpack.c.bf16 %v6736_v32, %v6732_v31  ;;  %v6738_v29 = vadd.f32 %v6737_v44, %v14641_v22  ;;  %v6440_v58 = vpop.f32.mrf.mxu1  ;;  %v11941_v52 = vpop.eup %11940 }
 0x8bf   : > { %11954 = vtanh.bf16 %v7656_v57  ;;  %v6741_v18 = vpop.f32.mrf.mxu0  ;;  %v6441_v34 = vadd.f32 %v6440_v58, %v14557_v53 }
 0x8c0   : > { %v11943_v6 = vpop.eup %11942  ;;  %9365 = vst [vmem:[%s14597_s30 + $0x5e8] sm:$0xff] %v10388_v49  ;;  %9369 = vst [vmem:[%s14597_s30 + $0x604] sm:$0xff] %v10392_v8  ;;  %v7623_v30 = vpack.c.bf16 %v6738_v29, %v6734_v35  ;;  %v6442_v2 = vpop.f32.mrf.mxu1  ;;  %11956 = vtanh.bf16 %v7622_v19  ;;  %v6742_v21 = vadd.f32 %v6741_v18, %v14632_v33  ;;  %v5803_v49 = vsub.s32 5, %v14535_v27 }
 0x8c1   : > { %v10349_v0 = vcombine.low %v11941_v52, %v11943_v6  ;;  %v10353_v23 = vcombine.high %v11941_v52, %v11943_v6  ;;  %v6443_v24 = vadd.f32 %v6442_v2, %v14553_v59  ;;  %v6743_v4 = vpop.f32.mrf.mxu0 }
 0x8c2   : > { %11958 = vtanh.bf16 %v7623_v30  ;;  %v6444_v63 = vpop.f32.mrf.mxu1  ;;  %v6744_v51 = vadd.f32 %v6743_v4, %v14641_v22 }
 0x8c3   : > { %v11945_v47 = vpop.eup %11944  ;;  %9326 = vst [vmem:[%s14597_s30 + $0x4d8] sm:$0xff] %v10349_v0  ;;  %9330 = vst [vmem:[%s14597_s30 + $0x4f4] sm:$0xff] %v10353_v23  ;;  %v7662_v3 = vpack.c.bf16 %v6443_v24, %v6439_v54  ;;  %v6445_v55 = vadd.f32 %v6444_v63, %v14557_v53  ;;  %v6745_v62 = vpop.f32.mrf.mxu0 }
 0x8c4   : > { %v6746_v13 = vadd.f32 %v6745_v62, %v14632_v33  ;;  %v6448_v41 = vpop.f32.mrf.mxu1  ;;  %7073 = vmatmul.mubr.bf16.gmra.mxu1 %v14530_v61 }
 0x8c5   : > { %v11947_v60 = vpop.eup %11946  ;;  %11960 = vtanh.bf16 %v7662_v3  ;;  %v7663_v26 = vpack.c.bf16 %v6445_v55, %v6441_v34  ;;  %v6747_v38 = vpop.f32.mrf.mxu0  ;;  %7082 = vmatprep.mubr.bf16.mxu1 %v16075_v20  ;;  %v6449_v14 = vadd.f32 %v6448_v41, %v14553_v59 }
 0x8c6   : > { %v10396_v17 = vcombine.low %v11945_v47, %v11947_v60  ;;  %v10400_v7 = vcombine.high %v11945_v47, %v11947_v60  ;;  %v7629_v1 = vpack.c.bf16 %v6746_v13, %v6742_v21  ;;  %v6748_v37 = vadd.f32 %v6747_v38, %v14641_v22  ;;  %v6450_v36 = vpop.f32.mrf.mxu1  ;;  %v11949_v15 = vpop.eup %11948 }
 0x8c7   : > { %11962 = vtanh.bf16 %v7663_v26  ;;  %v6751_v12 = vpop.f32.mrf.mxu0  ;;  %v6451_v11 = vadd.f32 %v6450_v36, %v14557_v53 }
 0x8c8   : > { %v11951_v61 = vpop.eup %11950  ;;  %9373 = vst [vmem:[%s14597_s30 + $0x620] sm:$0xff] %v10396_v17  ;;  %9377 = vst [vmem:[%s14597_s30 + $0x63c] sm:$0xff] %v10400_v7  ;;  %v7630_v40 = vpack.c.bf16 %v6748_v37, %v6744_v51  ;;  %v6452_v56 = vpop.f32.mrf.mxu1  ;;  %11964 = vtanh.bf16 %v7629_v1  ;;  %v6752_v8 = vadd.f32 %v6751_v12, %v14632_v33 }
 0x8c9   : > { %v10357_v48 = vcombine.low %v11949_v15, %v11951_v61  ;;  %v10361_v10 = vcombine.high %v11949_v15, %v11951_v61  ;;  %v6453_v45 = vadd.f32 %v6452_v56, %v14553_v59  ;;  %v6753_v31 = vpop.f32.mrf.mxu0  ;;  %v15061_v59 = vld [vmem:[%s15995_s16] sm:$0x7f] }
 0x8ca   : > { %11966 = vtanh.bf16 %v7630_v40  ;;  %v6454_v32 = vpop.f32.mrf.mxu1  ;;  %v15064_v29 = vrot.slane %v15061_v59, %v5799_v16 }
 0x8cb   : > { %v11953_v9 = vpop.eup %11952  ;;  %9334 = vst [vmem:[%s14597_s30 + $0x510] sm:$0xff] %v10357_v48  ;;  %9338 = vst [vmem:[%s14597_s30 + $0x52c] sm:$0xff] %v10361_v10  ;;  %v7669_v35 = vpack.c.bf16 %v6453_v45, %v6449_v14  ;;  %v6455_v57 = vadd.f32 %v6454_v32, %v14557_v53  ;;  %v6755_v44 = vpop.f32.mrf.mxu0  ;;  %v6754_v53 = vadd.f32 %v6753_v31, %v14641_v22 }
 0x8cc   : > { %v6756_v19 = vadd.f32 %v6755_v44, %v14632_v33  ;;  %v6844_v58 = vpop.f32.mrf.mxu1  ;;  %7083 = vmatmul.mubr.bf16.gmra.mxu1 %v14542_v42  ;;  %v15071_v42 = vrot.slane %v15061_v59, %v5803_v49 }
 0x8cd   : > { %v11955_v52 = vpop.eup %11954  ;;  %11968 = vtanh.bf16 %v7669_v35  ;;  %v7670_v18 = vpack.c.bf16 %v6455_v57, %v6451_v11  ;;  %v6757_v6 = vpop.f32.mrf.mxu0  ;;  %7092 = vmatprep.mubr.bf16.mxu1 %v16075_v20  ;;  %v6845_v47 = vadd.f32 %v6844_v58, %v15064_v29 }
 0x8ce   : > { %v10404_v54 = vcombine.low %v11953_v9, %v11955_v52  ;;  %v10408_v30 = vcombine.high %v11953_v9, %v11955_v52  ;;  %v7636_v2 = vpack.c.bf16 %v6756_v19, %v6752_v8  ;;  %v6758_v0 = vadd.f32 %v6757_v6, %v14641_v22  ;;  %v6846_v23 = vpop.f32.mrf.mxu1  ;;  %v11957_v24 = vpop.eup %11956 }
 0x8cf   : > { %11970 = vtanh.bf16 %v7670_v18  ;;  %v6761_v4 = vpop.f32.mrf.mxu0  ;;  %v6847_v51 = vadd.f32 %v6846_v23, %v15071_v42 }
 0x8d0   : > { %v11959_v63 = vpop.eup %11958  ;;  %9381 = vst [vmem:[%s14597_s30 + $0x658] sm:$0xff] %v10404_v54  ;;  %9385 = vst [vmem:[%s14597_s30 + $0x674] sm:$0xff] %v10408_v30  ;;  %v7637_v34 = vpack.c.bf16 %v6758_v0, %v6754_v53  ;;  %v6848_v3 = vpop.f32.mrf.mxu1  ;;  %11972 = vtanh.bf16 %v7636_v2  ;;  %v6762_v7 = vadd.f32 %v6761_v4, %v14632_v33 }
 0x8d1   : > { %v10365_v55 = vcombine.low %v11957_v24, %v11959_v63  ;;  %v10369_v62 = vcombine.high %v11957_v24, %v11959_v63  ;;  %v6849_v21 = vadd.f32 %v6848_v3, %v15064_v29  ;;  %v6763_v13 = vpop.f32.mrf.mxu0 }
 0x8d2   : > { %11974 = vtanh.bf16 %v7637_v34  ;;  %v6850_v41 = vpop.f32.mrf.mxu1  ;;  %v6764_v15 = vadd.f32 %v6763_v13, %v14641_v22 }
 0x8d3   : > { %v11961_v60 = vpop.eup %11960  ;;  %9342 = vst [vmem:[%s14597_s30 + $0x548] sm:$0xff] %v10365_v55  ;;  %9346 = vst [vmem:[%s14597_s30 + $0x564] sm:$0xff] %v10369_v62  ;;  %v7456_v26 = vpack.c.bf16 %v6849_v21, %v6845_v47  ;;  %v6851_v38 = vadd.f32 %v6850_v41, %v15071_v42  ;;  %v6765_v17 = vpop.f32.mrf.mxu0 }
 0x8d4   : > { %v6766_v1 = vadd.f32 %v6765_v17, %v14632_v33  ;;  %v6854_v37 = vpop.f32.mrf.mxu1  ;;  %7093 = vmatmul.mubr.bf16.gmra.mxu1 %v14563_v50 }
 0x8d5   : > { %v11963_v36 = vpop.eup %11962  ;;  %11976 = vtanh.bf16 %v7456_v26  ;;  %v7457_v12 = vpack.c.bf16 %v6851_v38, %v6847_v51  ;;  %v6767_v61 = vpop.f32.mrf.mxu0  ;;  %7102 = vmatprep.mubr.bf16.mxu1 %v16075_v20  ;;  %v6855_v31 = vadd.f32 %v6854_v37, %v15064_v29 }
 0x8d6   : > { %v10412_v14 = vcombine.low %v11961_v60, %v11963_v36  ;;  %v10416_v40 = vcombine.high %v11961_v60, %v11963_v36  ;;  %v7643_v56 = vpack.c.bf16 %v6766_v1, %v6762_v7  ;;  %v6768_v16 = vadd.f32 %v6767_v61, %v14641_v22  ;;  %v6856_v48 = vpop.f32.mrf.mxu1  ;;  %v11965_v10 = vpop.eup %11964 }
 0x8d7   : > { %11978 = vtanh.bf16 %v7457_v12  ;;  %v6771_v50 = vpop.f32.mrf.mxu0  ;;  %v6857_v19 = vadd.f32 %v6856_v48, %v15071_v42 }
 0x8d8   : > { %v11967_v45 = vpop.eup %11966  ;;  %9389 = vst [vmem:[%s14597_s30 + $0x690] sm:$0xff] %v10412_v14  ;;  %9393 = vst [vmem:[%s14597_s30 + $0x6ac] sm:$0xff] %v10416_v40  ;;  %v7644_v32 = vpack.c.bf16 %v6768_v16, %v6764_v15  ;;  %v6858_v9 = vpop.f32.mrf.mxu1  ;;  %11980 = vtanh.bf16 %v7643_v56  ;;  %v6772_v18 = vadd.f32 %v6771_v50, %v14632_v33 }
 0x8d9   : > { %v10373_v11 = vcombine.low %v11965_v10, %v11967_v45  ;;  %v10377_v35 = vcombine.high %v11965_v10, %v11967_v45  ;;  %v6859_v57 = vadd.f32 %v6858_v9, %v15064_v29  ;;  %v6773_v44 = vpop.f32.mrf.mxu0 }
 0x8da   : > { %11982 = vtanh.bf16 %v7644_v32  ;;  %v6860_v49 = vpop.f32.mrf.mxu1  ;;  %v6774_v2 = vadd.f32 %v6773_v44, %v14641_v22 }
 0x8db   : > { %v11969_v8 = vpop.eup %11968  ;;  %9350 = vst [vmem:[%s14597_s30 + $0x580] sm:$0xff] %v10373_v11  ;;  %9354 = vst [vmem:[%s14597_s30 + $0x59c] sm:$0xff] %v10377_v35  ;;  %v7463_v58 = vpack.c.bf16 %v6859_v57, %v6855_v31  ;;  %v6861_v52 = vadd.f32 %v6860_v49, %v15071_v42  ;;  %v6775_v53 = vpop.f32.mrf.mxu0 }
 0x8dc   : > { %v6776_v6 = vadd.f32 %v6775_v53, %v14632_v33  ;;  %v6864_v54 = vpop.f32.mrf.mxu1  ;;  %7103 = vmatmul.mubr.bf16.gmra.mxu1 %v14576_v43 }
 0x8dd   : > { %v11971_v30 = vpop.eup %11970  ;;  %11984 = vtanh.bf16 %v7463_v58  ;;  %v7464_v0 = vpack.c.bf16 %v6861_v52, %v6857_v19  ;;  %v6777_v23 = vpop.f32.mrf.mxu0  ;;  %7112 = vmatprep.mubr.bf16.mxu1 %v16075_v20  ;;  %v6865_v62 = vadd.f32 %v6864_v54, %v15064_v29 }
 0x8de   : > { %v10420_v24 = vcombine.low %v11969_v8, %v11971_v30  ;;  %v10424_v4 = vcombine.high %v11969_v8, %v11971_v30  ;;  %v7650_v63 = vpack.c.bf16 %v6776_v6, %v6772_v18  ;;  %v6778_v47 = vadd.f32 %v6777_v23, %v14641_v22  ;;  %v6866_v34 = vpop.f32.mrf.mxu1  ;;  %v11973_v3 = vpop.eup %11972 }
 0x8df   : > { %11986 = vtanh.bf16 %v7464_v0  ;;  %v6781_v43 = vpop.f32.mrf.mxu0  ;;  %v6867_v7 = vadd.f32 %v6866_v34, %v15071_v42 }
 0x8e0   : > { %v11975_v55 = vpop.eup %11974  ;;  %9397 = vst [vmem:[%s14597_s30 + $0x6c8] sm:$0xff] %v10420_v24  ;;  %9401 = vst [vmem:[%s14597_s30 + $0x6e4] sm:$0xff] %v10424_v4  ;;  %v7651_v21 = vpack.c.bf16 %v6778_v47, %v6774_v2  ;;  %v6868_v13 = vpop.f32.mrf.mxu1  ;;  %11988 = vtanh.bf16 %v7650_v63  ;;  %v6782_v15 = vadd.f32 %v6781_v43, %v14632_v33 }
 0x8e1   : > { %v10381_v41 = vcombine.low %v11973_v3, %v11975_v55  ;;  %v10385_v60 = vcombine.high %v11973_v3, %v11975_v55  ;;  %v6869_v51 = vadd.f32 %v6868_v13, %v15064_v29  ;;  %v6783_v26 = vpop.f32.mrf.mxu0 }
 0x8e2   : > { %11990 = vtanh.bf16 %v7651_v21  ;;  %v6870_v38 = vpop.f32.mrf.mxu1  ;;  %v6784_v40 = vadd.f32 %v6783_v26, %v14641_v22 }
 0x8e3   : > { %v11977_v17 = vpop.eup %11976  ;;  %9358 = vst [vmem:[%s14597_s30 + $0x5b8] sm:$0xff] %v10381_v41  ;;  %9362 = vst [vmem:[%s14597_s30 + $0x5d4] sm:$0xff] %v10385_v60  ;;  %v7470_v1 = vpack.c.bf16 %v6869_v51, %v6865_v62  ;;  %v6871_v37 = vadd.f32 %v6870_v38, %v15071_v42  ;;  %v6785_v36 = vpop.f32.mrf.mxu0 }
 0x8e4   : > { %v6786_v12 = vadd.f32 %v6785_v36, %v14632_v33  ;;  %v6874_v61 = vpop.f32.mrf.mxu1  ;;  %7113 = vmatmul.mubr.bf16.gmra.mxu1 %v14588_v25 }
 0x8e5   : > { %v11979_v14 = vpop.eup %11978  ;;  %11992 = vtanh.bf16 %v7470_v1  ;;  %v7471_v56 = vpack.c.bf16 %v6871_v37, %v6867_v7  ;;  %v6787_v16 = vpop.f32.mrf.mxu0  ;;  %7122 = vmatprep.mubr.bf16.mxu1 %v16075_v20  ;;  %v6875_v11 = vadd.f32 %v6874_v61, %v15064_v29 }
 0x8e6   : > { %v10174_v48 = vcombine.low %v11977_v17, %v11979_v14  ;;  %v10178_v10 = vcombine.high %v11977_v17, %v11979_v14  ;;  %v7657_v50 = vpack.c.bf16 %v6786_v12, %v6782_v15  ;;  %v6788_v45 = vadd.f32 %v6787_v16, %v14641_v22  ;;  %v6876_v31 = vpop.f32.mrf.mxu1  ;;  %v11981_v32 = vpop.eup %11980 }
 0x8e7   : > { %11994 = vtanh.bf16 %v7471_v56  ;;  %v6791_v25 = vpop.f32.mrf.mxu0  ;;  %v6877_v53 = vadd.f32 %v6876_v31, %v15071_v42  ;;  %v5807_v56 = vsub.s32 6, %v14535_v27 }
 0x8e8   : > { %v11983_v9 = vpop.eup %11982  ;;  %9150 = vst [vmem:[%s14597_s30 + $0x10] sm:$0xff] %v10174_v48  ;;  %9155 = vst [vmem:[%s14597_s30 + $0x2c] sm:$0xff] %v10178_v10  ;;  %v7658_v35 = vpack.c.bf16 %v6788_v45, %v6784_v40  ;;  %v6878_v57 = vpop.f32.mrf.mxu1  ;;  %11996 = vtanh.bf16 %v7657_v50  ;;  %v6792_v30 = vadd.f32 %v6791_v25, %v14632_v33 }
 0x8e9   : > { %v10389_v44 = vcombine.low %v11981_v32, %v11983_v9  ;;  %v10393_v49 = vcombine.high %v11981_v32, %v11983_v9  ;;  %v6879_v8 = vadd.f32 %v6878_v57, %v15064_v29  ;;  %v6793_v19 = vpop.f32.mrf.mxu0  ;;  %v15148_v57 = vrot.slane %v15061_v59, %v5807_v56 }
 0x8ea   : > { %11998 = vtanh.bf16 %v7658_v35  ;;  %v6880_v58 = vpop.f32.mrf.mxu1  ;;  %v6794_v24 = vadd.f32 %v6793_v19, %v14641_v22 }
 0x8eb   : > { %v11985_v52 = vpop.eup %11984  ;;  %9366 = vst [vmem:[%s14597_s30 + $0x5f0] sm:$0xff] %v10389_v44  ;;  %9370 = vst [vmem:[%s14597_s30 + $0x60c] sm:$0xff] %v10393_v49  ;;  %v7477_v18 = vpack.c.bf16 %v6879_v8, %v6875_v11  ;;  %v6881_v6 = vadd.f32 %v6880_v58, %v15071_v42  ;;  %v6795_v54 = vpop.f32.mrf.mxu0 }
 0x8ec   : > { %v6796_v2 = vadd.f32 %v6795_v54, %v14632_v33  ;;  %v6884_v0 = vpop.f32.mrf.mxu1  ;;  %7123 = vmatmul.mubr.bf16.gmra.mxu1 %v14605_v28 }
 0x8ed   : > { %v11987_v23 = vpop.eup %11986  ;;  %12000 = vtanh.bf16 %v7477_v18  ;;  %v7478_v4 = vpack.c.bf16 %v6881_v6, %v6877_v53  ;;  %v6797_v63 = vpop.f32.mrf.mxu0  ;;  %7132 = vmatprep.mubr.bf16.mxu1 %v16075_v20  ;;  %v6885_v13 = vadd.f32 %v6884_v0, %v15064_v29 }
 0x8ee   : > { %v10182_v47 = vcombine.low %v11985_v52, %v11987_v23  ;;  %v10186_v34 = vcombine.high %v11985_v52, %v11987_v23  ;;  %v7664_v3 = vpack.c.bf16 %v6796_v2, %v6792_v30  ;;  %v6798_v43 = vadd.f32 %v6797_v63, %v14641_v22  ;;  %v6886_v55 = vpop.f32.mrf.mxu1  ;;  %v11989_v62 = vpop.eup %11988 }
 0x8ef   : > { %12002 = vtanh.bf16 %v7478_v4  ;;  %v6801_v28 = vpop.f32.mrf.mxu0  ;;  %v6887_v37 = vadd.f32 %v6886_v55, %v15071_v42 }
 0x8f0   : > { %v11991_v21 = vpop.eup %11990  ;;  %9159 = vst [vmem:[%s14597_s30 + $0x48] sm:$0xff] %v10182_v47  ;;  %9163 = vst [vmem:[%s14597_s30 + $0x64] sm:$0xff] %v10186_v34  ;;  %v7665_v41 = vpack.c.bf16 %v6798_v43, %v6794_v24  ;;  %v6888_v60 = vpop.f32.mrf.mxu1  ;;  %12004 = vtanh.bf16 %v7664_v3  ;;  %v6802_v61 = vadd.f32 %v6801_v28, %v14632_v33 }
 0x8f1   : > { %v10397_v51 = vcombine.low %v11989_v62, %v11991_v21  ;;  %v10401_v26 = vcombine.high %v11989_v62, %v11991_v21  ;;  %v6889_v38 = vadd.f32 %v6888_v60, %v15064_v29  ;;  %v6803_v17 = vpop.f32.mrf.mxu0 }
 0x8f2   : > { %12006 = vtanh.bf16 %v7665_v41  ;;  %v6890_v7 = vpop.f32.mrf.mxu1  ;;  %v6804_v48 = vadd.f32 %v6803_v17, %v14641_v22 }
 0x8f3   : > { %v11993_v1 = vpop.eup %11992  ;;  %9374 = vst [vmem:[%s14597_s30 + $0x628] sm:$0xff] %v10397_v51  ;;  %9378 = vst [vmem:[%s14597_s30 + $0x644] sm:$0xff] %v10401_v26  ;;  %v7484_v36 = vpack.c.bf16 %v6889_v38, %v6885_v13  ;;  %v6891_v15 = vadd.f32 %v6890_v7, %v15071_v42  ;;  %v6805_v12 = vpop.f32.mrf.mxu0 }
 0x8f4   : > { %v6806_v14 = vadd.f32 %v6805_v12, %v14632_v33  ;;  %v6894_v40 = vpop.f32.mrf.mxu1  ;;  %7133 = vmatmul.mubr.bf16.gmra.mxu1 %v14618_v5 }
 0x8f5   : > { %v11995_v16 = vpop.eup %11994  ;;  %12008 = vtanh.bf16 %v7484_v36  ;;  %v7485_v10 = vpack.c.bf16 %v6891_v15, %v6887_v37  ;;  %v6807_v50 = vpop.f32.mrf.mxu0  ;;  %7142 = vmatprep.mubr.bf16.mxu1 %v16075_v20  ;;  %v6895_v11 = vadd.f32 %v6894_v40, %v15064_v29 }
 0x8f6   : > { %v10190_v45 = vcombine.low %v11993_v1, %v11995_v16  ;;  %v10194_v31 = vcombine.high %v11993_v1, %v11995_v16  ;;  %v7671_v32 = vpack.c.bf16 %v6806_v14, %v6802_v61  ;;  %v6808_v33 = vadd.f32 %v6807_v50, %v14641_v22  ;;  %v6896_v25 = vpop.f32.mrf.mxu1  ;;  %v11997_v9 = vpop.eup %11996 }
 0x8f7   : > { %12010 = vtanh.bf16 %v7485_v10  ;;  %v11328_v5 = vpop.f32.mrf.mxu0  ;;  %v6897_v53 = vadd.f32 %v6896_v25, %v15071_v42 }
 0x8f8   : > { %v11999_v27 = vpop.eup %11998  ;;  %9167 = vst [vmem:[%s14597_s30 + $0x80] sm:$0xff] %v10190_v45  ;;  %9171 = vst [vmem:[%s14597_s30 + $0x9c] sm:$0xff] %v10194_v31  ;;  %v7672_v35 = vpack.c.bf16 %v6808_v33, %v6804_v48  ;;  %v6898_v44 = vpop.f32.mrf.mxu1  ;;  %12012 = vtanh.bf16 %v7671_v32  ;;  %v7206_v59 = vadd.f32 %v11328_v5, %v15148_v57 }
 0x8f9   : > { %v10405_v49 = vcombine.low %v11997_v9, %v11999_v27  ;;  %v10409_v8 = vcombine.high %v11997_v9, %v11999_v27  ;;  %v6899_v22 = vadd.f32 %v6898_v44, %v15064_v29  ;;  %v7197_v19 = vpop.f32.mrf.mxu0 }
 0x8fa   : > { %12014 = vtanh.bf16 %v7672_v35  ;;  %v6900_v58 = vpop.f32.mrf.mxu1  ;;  %v7198_v23 = vadd.f32 %v7197_v19, %v15148_v57 }
 0x8fb   : > { %v12001_v52 = vpop.eup %12000  ;;  %9382 = vst [vmem:[%s14597_s30 + $0x660] sm:$0xff] %v10405_v49  ;;  %9386 = vst [vmem:[%s14597_s30 + $0x67c] sm:$0xff] %v10409_v8  ;;  %v7491_v18 = vpack.c.bf16 %v6899_v22, %v6895_v11  ;;  %v6901_v6 = vadd.f32 %v6900_v58, %v15071_v42  ;;  %v11329_v54 = vpop.f32.mrf.mxu0 }
 0x8fc   : > { %v7209_v30 = vadd.f32 %v11329_v54, %v15148_v57  ;;  %v6904_v2 = vpop.f32.mrf.mxu1  ;;  %7143 = vmatmul.mubr.bf16.gmra.mxu1 %v14643_v46 }
 0x8fd   : > { %v12003_v0 = vpop.eup %12002  ;;  %12016 = vtanh.bf16 %v7491_v18  ;;  %v7492_v24 = vpack.c.bf16 %v6901_v6, %v6897_v53  ;;  %v7200_v4 = vpop.f32.mrf.mxu0  ;;  %7152 = vmatprep.mubr.bf16.mxu1 %v16075_v20  ;;  %v6905_v20 = vadd.f32 %v6904_v2, %v15064_v29 }
 0x8fe   : > { %v10198_v63 = vcombine.low %v12001_v52, %v12003_v0  ;;  %v10202_v47 = vcombine.high %v12001_v52, %v12003_v0  ;;  %v7465_v34 = vpack.c.bf16 %v7209_v30, %v7206_v59  ;;  %v7201_v3 = vadd.f32 %v7200_v4, %v15148_v57  ;;  %v6906_v43 = vpop.f32.mrf.mxu1  ;;  %v12005_v55 = vpop.eup %12004 }
 0x8ff   : > { %12018 = vtanh.bf16 %v7492_v24  ;;  %v11332_v46 = vpop.f32.mrf.mxu0  ;;  %v6907_v17 = vadd.f32 %v6906_v43, %v15071_v42 }
 0x900   : > { %v12007_v62 = vpop.eup %12006  ;;  %9175 = vst [vmem:[%s14597_s30 + $0xb8] sm:$0xff] %v10198_v63  ;;  %9179 = vst [vmem:[%s14597_s30 + $0xd4] sm:$0xff] %v10202_v47  ;;  %12020 = vtanh.bf16 %v7465_v34  ;;  %v7458_v28 = vpack.c.bf16 %v7201_v3, %v7198_v23  ;;  %v6908_v21 = vpop.f32.mrf.mxu1  ;;  %v7222_v36 = vadd.f32 %v11332_v46, %v15148_v57 }
 0x901   : > { %v10413_v13 = vcombine.low %v12005_v55, %v12007_v62  ;;  %v10417_v41 = vcombine.high %v12005_v55, %v12007_v62  ;;  %v6909_v60 = vadd.f32 %v6908_v21, %v15064_v29  ;;  %v7213_v51 = vpop.f32.mrf.mxu0 }
 0x902   : > { %12022 = vtanh.bf16 %v7458_v28  ;;  %v6910_v26 = vpop.f32.mrf.mxu1  ;;  %v7214_v14 = vadd.f32 %v7213_v51, %v15148_v57 }
 0x903   : > { %v12009_v38 = vpop.eup %12008  ;;  %9390 = vst [vmem:[%s14597_s30 + $0x698] sm:$0xff] %v10413_v13  ;;  %9394 = vst [vmem:[%s14597_s30 + $0x6b4] sm:$0xff] %v10417_v41  ;;  %v7498_v7 = vpack.c.bf16 %v6909_v60, %v6905_v20  ;;  %v6911_v1 = vadd.f32 %v6910_v26, %v15071_v42  ;;  %v11333_v37 = vpop.f32.mrf.mxu0 }
 0x904   : > { %v7225_v15 = vadd.f32 %v11333_v37, %v15148_v57  ;;  %v6914_v12 = vpop.f32.mrf.mxu1  ;;  %7153 = vmatmul.mubr.bf16.gmra.mxu1 %v14659_v39 }
 0x905   : > { %v12011_v61 = vpop.eup %12010  ;;  %12024 = vtanh.bf16 %v7498_v7  ;;  %v7499_v40 = vpack.c.bf16 %v6911_v1, %v6907_v17  ;;  %v7216_v56 = vpop.f32.mrf.mxu0  ;;  %v6915_v27 = vadd.f32 %v6914_v12, %v15064_v29 }
 0x906   : > { %v10206_v16 = vcombine.low %v12009_v38, %v12011_v61  ;;  %v10210_v48 = vcombine.high %v12009_v38, %v12011_v61  ;;  %v7479_v10 = vpack.c.bf16 %v7225_v15, %v7222_v36  ;;  %v7217_v50 = vadd.f32 %v7216_v56, %v15148_v57  ;;  %v6916_v45 = vpop.f32.mrf.mxu1  ;;  %v12013_v31 = vpop.eup %12012 }
 0x907   : > { %12026 = vtanh.bf16 %v7499_v40  ;;  %v11336_v32 = vpop.f32.mrf.mxu0  ;;  %v6917_v8 = vadd.f32 %v6916_v45, %v15071_v42 }
 0x908   : > { %v12015_v33 = vpop.eup %12014  ;;  %9183 = vst [vmem:[%s14597_s30 + $0xf0] sm:$0xff] %v10206_v16  ;;  %9187 = vst [vmem:[%s14597_s30 + $0x10c] sm:$0xff] %v10210_v48  ;;  %12028 = vtanh.bf16 %v7479_v10  ;;  %v7472_v39 = vpack.c.bf16 %v7217_v50, %v7214_v14  ;;  %v6918_v25 = vpop.f32.mrf.mxu1  ;;  %v7238_v52 = vadd.f32 %v11336_v32, %v15148_v57 }
 0x909   : > { %v10421_v9 = vcombine.low %v12013_v31, %v12015_v33  ;;  %v10425_v5 = vcombine.high %v12013_v31, %v12015_v33  ;;  %v6919_v11 = vadd.f32 %v6918_v25, %v15064_v29  ;;  %v7229_v35 = vpop.f32.mrf.mxu0 }
 0x90a   : > { %12030 = vtanh.bf16 %v7472_v39  ;;  %v6920_v44 = vpop.f32.mrf.mxu1  ;;  %v7230_v54 = vadd.f32 %v7229_v35, %v15148_v57 }
 0x90b   : > { %v12017_v49 = vpop.eup %12016  ;;  %9398 = vst [vmem:[%s14597_s30 + $0x6d0] sm:$0xff] %v10421_v9  ;;  %9402 = vst [vmem:[%s14597_s30 + $0x6ec] sm:$0xff] %v10425_v5  ;;  %v7505_v22 = vpack.c.bf16 %v6919_v11, %v6915_v27  ;;  %v6921_v19 = vadd.f32 %v6920_v44, %v15071_v42  ;;  %v11337_v58 = vpop.f32.mrf.mxu0 }
 0x90c   : > { %v7241_v53 = vadd.f32 %v11337_v58, %v15148_v57  ;;  %v6924_v18 = vpop.f32.mrf.mxu1 }
 0x90d   : > { %v12019_v6 = vpop.eup %12018  ;;  %12032 = vtanh.bf16 %v7505_v22  ;;  %v7506_v59 = vpack.c.bf16 %v6921_v19, %v6917_v8  ;;  %v7232_v30 = vpop.f32.mrf.mxu0  ;;  %v6925_v21 = vadd.f32 %v6924_v18, %v15064_v29 }
 0x90e   : > { %v12021_v2 = vpop.eup %12020  ;;  %v10214_v0 = vcombine.low %v12017_v49, %v12019_v6  ;;  %v10218_v23 = vcombine.high %v12017_v49, %v12019_v6  ;;  %v7493_v24 = vpack.c.bf16 %v7241_v53, %v7238_v52  ;;  %v7233_v4 = vadd.f32 %v7232_v30, %v15148_v57  ;;  %v6926_v63 = vpop.f32.mrf.mxu1 }
 0x90f   : > { %v10183_v47 = vcombine.low %v12021_v2, %v12021_v2  ;;  %v10187_v34 = vcombine.high %v12021_v2, %v12021_v2  ;;  %12034 = vtanh.bf16 %v7506_v59  ;;  %v11340_v3 = vpop.f32.mrf.mxu0  ;;  %v6927_v51 = vadd.f32 %v6926_v63, %v15071_v42 }
 0x910   : > { %v12023_v43 = vpop.eup %12022  ;;  %9191 = vst [vmem:[%s14597_s30 + $0x128] sm:$0xff] %v10214_v0  ;;  %9195 = vst [vmem:[%s14597_s30 + $0x144] sm:$0xff] %v10218_v23  ;;  %12036 = vtanh.bf16 %v7493_v24  ;;  %v7486_v55 = vpack.c.bf16 %v7233_v4, %v7230_v54  ;;  %v6928_v46 = vpop.f32.mrf.mxu1  ;;  %v7254_v7 = vadd.f32 %v11340_v3, %v15148_v57 }
 0x911   : > { %9160 = vst.msk [vmem:[%s14597_s30 + $0x50] sm:$0xf] %vm9151_vm1, %v10183_v47  ;;  %9164 = vst.msk [vmem:[%s14597_s30 + $0x6c] sm:$0xf] %vm9151_vm1, %v10187_v34  ;;  %v10175_v62 = vcombine.low %v12023_v43, %v12023_v43  ;;  %v10179_v28 = vcombine.high %v12023_v43, %v12023_v43  ;;  %v6929_v13 = vadd.f32 %v6928_v46, %v15064_v29  ;;  %v7245_v41 = vpop.f32.mrf.mxu0 }
 0x912   : > { %12038 = vtanh.bf16 %v7486_v55  ;;  %v6930_v20 = vpop.f32.mrf.mxu1  ;;  %v7246_v15 = vadd.f32 %v7245_v41, %v15148_v57 }
 0x913   : > { %v12025_v60 = vpop.eup %12024  ;;  %9152 = vst.msk [vmem:[%s14597_s30 + $0x18] sm:$0xf] %vm9151_vm1, %v10175_v62  ;;  %9156 = vst.msk [vmem:[%s14597_s30 + $0x34] sm:$0xf] %vm9151_vm1, %v10179_v28  ;;  %v7512_v26 = vpack.c.bf16 %v6929_v13, %v6925_v21  ;;  %v6931_v38 = vadd.f32 %v6930_v20, %v15071_v42  ;;  %v11341_v17 = vpop.f32.mrf.mxu0 }
 0x914   : > { %v7257_v1 = vadd.f32 %v11341_v17, %v15148_v57  ;;  %v6934_v37 = vpop.f32.mrf.mxu1 }
 0x915   : > { %v12027_v36 = vpop.eup %12026  ;;  %12040 = vtanh.bf16 %v7512_v26  ;;  %v7513_v12 = vpack.c.bf16 %v6931_v38, %v6927_v51  ;;  %v7248_v61 = vpop.f32.mrf.mxu0  ;;  %v6935_v5 = vadd.f32 %v6934_v37, %v15064_v29 }
 0x916   : > { %v12029_v14 = vpop.eup %12028  ;;  %v10222_v40 = vcombine.low %v12025_v60, %v12027_v36  ;;  %v10226_v56 = vcombine.high %v12025_v60, %v12027_v36  ;;  %v7507_v16 = vpack.c.bf16 %v7257_v1, %v7254_v7  ;;  %v7249_v48 = vadd.f32 %v7248_v61, %v15148_v57  ;;  %v6936_v10 = vpop.f32.mrf.mxu1 }
 0x917   : > { %v10199_v50 = vcombine.low %v12029_v14, %v12029_v14  ;;  %v10203_v45 = vcombine.high %v12029_v14, %v12029_v14  ;;  %12042 = vtanh.bf16 %v7513_v12  ;;  %v11344_v31 = vpop.f32.mrf.mxu0  ;;  %v6937_v49 = vadd.f32 %v6936_v10, %v15071_v42 }
 0x918   : > { %v12031_v32 = vpop.eup %12030  ;;  %9199 = vst [vmem:[%s14597_s30 + $0x160] sm:$0xff] %v10222_v40  ;;  %9203 = vst [vmem:[%s14597_s30 + $0x17c] sm:$0xff] %v10226_v56  ;;  %12044 = vtanh.bf16 %v7507_v16  ;;  %v7500_v33 = vpack.c.bf16 %v7249_v48, %v7246_v15  ;;  %v6938_v39 = vpop.f32.mrf.mxu1  ;;  %v7270_v58 = vadd.f32 %v11344_v31, %v15148_v57 }
 0x919   : > { %9176 = vst.msk [vmem:[%s14597_s30 + $0xc0] sm:$0xf] %vm9151_vm1, %v10199_v50  ;;  %9180 = vst.msk [vmem:[%s14597_s30 + $0xdc] sm:$0xf] %vm9151_vm1, %v10203_v45  ;;  %v10191_v25 = vcombine.low %v12031_v32, %v12031_v32  ;;  %v10195_v9 = vcombine.high %v12031_v32, %v12031_v32  ;;  %v6939_v27 = vadd.f32 %v6938_v39, %v15064_v29  ;;  %v7261_v11 = vpop.f32.mrf.mxu0 }
 0x91a   : > { %12046 = vtanh.bf16 %v7500_v33  ;;  %v6940_v35 = vpop.f32.mrf.mxu1  ;;  %v7262_v6 = vadd.f32 %v7261_v11, %v15148_v57 }
 0x91b   : > { %v12033_v44 = vpop.eup %12032  ;;  %9168 = vst.msk [vmem:[%s14597_s30 + $0x88] sm:$0xf] %vm9151_vm1, %v10191_v25  ;;  %9172 = vst.msk [vmem:[%s14597_s30 + $0xa4] sm:$0xf] %vm9151_vm1, %v10195_v9  ;;  %v7519_v8 = vpack.c.bf16 %v6939_v27, %v6935_v5  ;;  %v6941_v22 = vadd.f32 %v6940_v35, %v15071_v42  ;;  %v11345_v19 = vpop.f32.mrf.mxu0 }
 0x91c   : > { %v7273_v52 = vadd.f32 %v11345_v19, %v15148_v57  ;;  %v6944_v53 = vpop.f32.mrf.mxu1 }
 0x91d   : > { %v12035_v18 = vpop.eup %12034  ;;  %12048 = vtanh.bf16 %v7519_v8  ;;  %v7520_v54 = vpack.c.bf16 %v6941_v22, %v6937_v49  ;;  %v7264_v59 = vpop.f32.mrf.mxu0  ;;  %v6945_v28 = vadd.f32 %v6944_v53, %v15064_v29 }
 0x91e   : > { %v12037_v30 = vpop.eup %12036  ;;  %v10230_v2 = vcombine.low %v12033_v44, %v12035_v18  ;;  %v10234_v0 = vcombine.high %v12033_v44, %v12035_v18  ;;  %v7521_v23 = vpack.c.bf16 %v7273_v52, %v7270_v58  ;;  %v7265_v24 = vadd.f32 %v7264_v59, %v15148_v57  ;;  %v6946_v4 = vpop.f32.mrf.mxu1 }
 0x91f   : > { %v10215_v63 = vcombine.low %v12037_v30, %v12037_v30  ;;  %v10219_v47 = vcombine.high %v12037_v30, %v12037_v30  ;;  %12050 = vtanh.bf16 %v7520_v54  ;;  %v11348_v34 = vpop.f32.mrf.mxu0  ;;  %v6947_v60 = vadd.f32 %v6946_v4, %v15071_v42 }
 0x920   : > { %v12039_v3 = vpop.eup %12038  ;;  %9207 = vst [vmem:[%s14597_s30 + $0x198] sm:$0xff] %v10230_v2  ;;  %9211 = vst [vmem:[%s14597_s30 + $0x1b4] sm:$0xff] %v10234_v0  ;;  %12052 = vtanh.bf16 %v7521_v23  ;;  %v7514_v43 = vpack.c.bf16 %v7265_v24, %v7262_v6  ;;  %v6948_v55 = vpop.f32.mrf.mxu1  ;;  %v7286_v17 = vadd.f32 %v11348_v34, %v15148_v57 }
 0x921   : > { %9192 = vst.msk [vmem:[%s14597_s30 + $0x130] sm:$0xf] %vm9151_vm1, %v10215_v63  ;;  %9196 = vst.msk [vmem:[%s14597_s30 + $0x14c] sm:$0xf] %vm9151_vm1, %v10219_v47  ;;  %v10207_v46 = vcombine.low %v12039_v3, %v12039_v3  ;;  %v10211_v62 = vcombine.high %v12039_v3, %v12039_v3  ;;  %v6949_v21 = vadd.f32 %v6948_v55, %v15064_v29  ;;  %v7277_v13 = vpop.f32.mrf.mxu0 }
 0x922   : > { %12054 = vtanh.bf16 %v7514_v43  ;;  %v6950_v41 = vpop.f32.mrf.mxu1  ;;  %v7278_v36 = vadd.f32 %v7277_v13, %v15148_v57 }
 0x923   : > { %v12041_v20 = vpop.eup %12040  ;;  %9184 = vst.msk [vmem:[%s14597_s30 + $0xf8] sm:$0xf] %vm9151_vm1, %v10207_v46  ;;  %9188 = vst.msk [vmem:[%s14597_s30 + $0x114] sm:$0xf] %vm9151_vm1, %v10211_v62  ;;  %v7526_v51 = vpack.c.bf16 %v6949_v21, %v6945_v28  ;;  %v6951_v26 = vadd.f32 %v6950_v41, %v15071_v42  ;;  %v11349_v38 = vpop.f32.mrf.mxu0 }
 0x924   : > { %v7289_v7 = vadd.f32 %v11349_v38, %v15148_v57  ;;  %v6954_v1 = vpop.f32.mrf.mxu1 }
 0x925   : > { %v12043_v37 = vpop.eup %12042  ;;  %12056 = vtanh.bf16 %v7526_v51  ;;  %v7527_v15 = vpack.c.bf16 %v6951_v26, %v6947_v60  ;;  %v7280_v12 = vpop.f32.mrf.mxu0  ;;  %v6955_v9 = vadd.f32 %v6954_v1, %v15064_v29 }
 0x926   : > { %v12045_v61 = vpop.eup %12044  ;;  %v10238_v14 = vcombine.low %v12041_v20, %v12043_v37  ;;  %v10242_v40 = vcombine.high %v12041_v20, %v12043_v37  ;;  %v7535_v56 = vpack.c.bf16 %v7289_v7, %v7286_v17  ;;  %v7281_v16 = vadd.f32 %v7280_v12, %v15148_v57  ;;  %v6956_v48 = vpop.f32.mrf.mxu1 }
 0x927   : > { %v10231_v10 = vcombine.low %v12045_v61, %v12045_v61  ;;  %v10235_v50 = vcombine.high %v12045_v61, %v12045_v61  ;;  %12058 = vtanh.bf16 %v7527_v15  ;;  %v11352_v45 = vpop.f32.mrf.mxu0  ;;  %v6957_v44 = vadd.f32 %v6956_v48, %v15071_v42 }
 0x928   : > { %v12047_v31 = vpop.eup %12046  ;;  %9215 = vst [vmem:[%s14597_s30 + $0x1d0] sm:$0xff] %v10238_v14  ;;  %9219 = vst [vmem:[%s14597_s30 + $0x1ec] sm:$0xff] %v10242_v40  ;;  %12060 = vtanh.bf16 %v7535_v56  ;;  %v7528_v32 = vpack.c.bf16 %v7281_v16, %v7278_v36  ;;  %v6958_v33 = vpop.f32.mrf.mxu1  ;;  %v7302_v19 = vadd.f32 %v11352_v45, %v15148_v57 }
 0x929   : > { %9208 = vst.msk [vmem:[%s14597_s30 + $0x1a0] sm:$0xf] %vm9151_vm1, %v10231_v10  ;;  %9212 = vst.msk [vmem:[%s14597_s30 + $0x1bc] sm:$0xf] %vm9151_vm1, %v10235_v50  ;;  %v10223_v39 = vcombine.low %v12047_v31, %v12047_v31  ;;  %v10227_v25 = vcombine.high %v12047_v31, %v12047_v31  ;;  %v6959_v5 = vadd.f32 %v6958_v33, %v15064_v29  ;;  %v7293_v27 = vpop.f32.mrf.mxu0 }
 0x92a   : > { %12062 = vtanh.bf16 %v7528_v32  ;;  %v6960_v11 = vpop.f32.mrf.mxu1  ;;  %v7294_v18 = vadd.f32 %v7293_v27, %v15148_v57 }
 0x92b   : > { %v12049_v35 = vpop.eup %12048  ;;  %9200 = vst.msk [vmem:[%s14597_s30 + $0x168] sm:$0xf] %vm9151_vm1, %v10223_v39  ;;  %9204 = vst.msk [vmem:[%s14597_s30 + $0x184] sm:$0xf] %vm9151_vm1, %v10227_v25  ;;  %v7533_v49 = vpack.c.bf16 %v6959_v5, %v6955_v9  ;;  %v6961_v8 = vadd.f32 %v6960_v11, %v15071_v42  ;;  %v11353_v22 = vpop.f32.mrf.mxu0 }
 0x92c   : > { %v7305_v58 = vadd.f32 %v11353_v22, %v15148_v57  ;;  %v6964_v52 = vpop.f32.mrf.mxu1 }
 0x92d   : > { %v12051_v53 = vpop.eup %12050  ;;  %12064 = vtanh.bf16 %v7533_v49  ;;  %v7534_v6 = vpack.c.bf16 %v6961_v8, %v6957_v44  ;;  %v7296_v54 = vpop.f32.mrf.mxu0  ;;  %v6965_v62 = vadd.f32 %v6964_v52, %v15064_v29 }
 0x92e   : > { %v12053_v59 = vpop.eup %12052  ;;  %v10246_v30 = vcombine.low %v12049_v35, %v12051_v53  ;;  %v10250_v2 = vcombine.high %v12049_v35, %v12051_v53  ;;  %v7549_v0 = vpack.c.bf16 %v7305_v58, %v7302_v19  ;;  %v7297_v23 = vadd.f32 %v7296_v54, %v15148_v57  ;;  %v6966_v24 = vpop.f32.mrf.mxu1 }
 0x92f   : > { %v10247_v4 = vcombine.low %v12053_v59, %v12053_v59  ;;  %v10251_v63 = vcombine.high %v12053_v59, %v12053_v59  ;;  %12066 = vtanh.bf16 %v7534_v6  ;;  %v11356_v47 = vpop.f32.mrf.mxu0  ;;  %v6967_v20 = vadd.f32 %v6966_v24, %v15071_v42 }
 0x930   : > { %v12055_v34 = vpop.eup %12054  ;;  %9223 = vst [vmem:[%s14597_s30 + $0x208] sm:$0xff] %v10246_v30  ;;  %9227 = vst [vmem:[%s14597_s30 + $0x224] sm:$0xff] %v10250_v2  ;;  %12068 = vtanh.bf16 %v7549_v0  ;;  %v7542_v3 = vpack.c.bf16 %v7297_v23, %v7294_v18  ;;  %v6968_v43 = vpop.f32.mrf.mxu1  ;;  %v7318_v38 = vadd.f32 %v11356_v47, %v15148_v57 }
 0x931   : > { %9224 = vst.msk [vmem:[%s14597_s30 + $0x210] sm:$0xf] %vm9151_vm1, %v10247_v4  ;;  %9228 = vst.msk [vmem:[%s14597_s30 + $0x22c] sm:$0xf] %vm9151_vm1, %v10251_v63  ;;  %v10239_v55 = vcombine.low %v12055_v34, %v12055_v34  ;;  %v10243_v46 = vcombine.high %v12055_v34, %v12055_v34  ;;  %v6969_v28 = vadd.f32 %v6968_v43, %v15064_v29  ;;  %v7309_v21 = vpop.f32.mrf.mxu0 }
 0x932   : > { %12070 = vtanh.bf16 %v7542_v3  ;;  %v6970_v13 = vpop.f32.mrf.mxu1  ;;  %v7310_v37 = vadd.f32 %v7309_v21, %v15148_v57 }
 0x933   : > { %v12057_v41 = vpop.eup %12056  ;;  %9216 = vst.msk [vmem:[%s14597_s30 + $0x1d8] sm:$0xf] %vm9151_vm1, %v10239_v55  ;;  %9220 = vst.msk [vmem:[%s14597_s30 + $0x1f4] sm:$0xf] %vm9151_vm1, %v10243_v46  ;;  %v7540_v60 = vpack.c.bf16 %v6969_v28, %v6965_v62  ;;  %v6971_v51 = vadd.f32 %v6970_v13, %v15071_v42  ;;  %v11357_v26 = vpop.f32.mrf.mxu0 }
 0x934   : > { %v7321_v17 = vadd.f32 %v11357_v26, %v15148_v57  ;;  %v6974_v7 = vpop.f32.mrf.mxu1 }
 0x935   : > { %v12059_v1 = vpop.eup %12058  ;;  %12072 = vtanh.bf16 %v7540_v60  ;;  %v7541_v36 = vpack.c.bf16 %v6971_v51, %v6967_v20  ;;  %v7312_v15 = vpop.f32.mrf.mxu0  ;;  %v6975_v25 = vadd.f32 %v6974_v7, %v15064_v29 }
 0x936   : > { %v12061_v12 = vpop.eup %12060  ;;  %v10254_v61 = vcombine.low %v12057_v41, %v12059_v1  ;;  %v10258_v14 = vcombine.high %v12057_v41, %v12059_v1  ;;  %v7563_v40 = vpack.c.bf16 %v7321_v17, %v7318_v38  ;;  %v7313_v56 = vadd.f32 %v7312_v15, %v15148_v57  ;;  %v6976_v16 = vpop.f32.mrf.mxu1 }
 0x937   : > { %v10263_v48 = vcombine.low %v12061_v12, %v12061_v12  ;;  %v10267_v10 = vcombine.high %v12061_v12, %v12061_v12  ;;  %12074 = vtanh.bf16 %v7541_v36  ;;  %v11360_v50 = vpop.f32.mrf.mxu0  ;;  %v6977_v35 = vadd.f32 %v6976_v16, %v15071_v42 }
 0x938   : > { %v12063_v45 = vpop.eup %12062  ;;  %9231 = vst [vmem:[%s14597_s30 + $0x240] sm:$0xff] %v10254_v61  ;;  %9235 = vst [vmem:[%s14597_s30 + $0x25c] sm:$0xff] %v10258_v14  ;;  %12076 = vtanh.bf16 %v7563_v40  ;;  %v7556_v31 = vpack.c.bf16 %v7313_v56, %v7310_v37  ;;  %v6978_v32 = vpop.f32.mrf.mxu1  ;;  %v7334_v22 = vadd.f32 %v11360_v50, %v15148_v57 }
 0x939   : > { %9240 = vst.msk [vmem:[%s14597_s30 + $0x280] sm:$0xf] %vm9151_vm1, %v10263_v48  ;;  %9244 = vst.msk [vmem:[%s14597_s30 + $0x29c] sm:$0xf] %vm9151_vm1, %v10267_v10  ;;  %v10255_v33 = vcombine.low %v12063_v45, %v12063_v45  ;;  %v10259_v39 = vcombine.high %v12063_v45, %v12063_v45  ;;  %v6979_v9 = vadd.f32 %v6978_v32, %v15064_v29  ;;  %v7325_v5 = vpop.f32.mrf.mxu0 }
 0x93a   : > { %12078 = vtanh.bf16 %v7556_v31  ;;  %v6980_v27 = vpop.f32.mrf.mxu1  ;;  %v7326_v53 = vadd.f32 %v7325_v5, %v15148_v57 }
 0x93b   : > { %v12065_v11 = vpop.eup %12064  ;;  %9232 = vst.msk [vmem:[%s14597_s30 + $0x248] sm:$0xf] %vm9151_vm1, %v10255_v33  ;;  %9236 = vst.msk [vmem:[%s14597_s30 + $0x264] sm:$0xf] %vm9151_vm1, %v10259_v39  ;;  %v7547_v44 = vpack.c.bf16 %v6979_v9, %v6975_v25  ;;  %v6981_v49 = vadd.f32 %v6980_v27, %v15071_v42  ;;  %v11361_v8 = vpop.f32.mrf.mxu0 }
 0x93c   : > { %v7337_v19 = vadd.f32 %v11361_v8, %v15148_v57  ;;  %v6984_v58 = vpop.f32.mrf.mxu1 }
 0x93d   : > { %v12067_v52 = vpop.eup %12066  ;;  %12080 = vtanh.bf16 %v7547_v44  ;;  %v7548_v18 = vpack.c.bf16 %v6981_v49, %v6977_v35  ;;  %v7328_v6 = vpop.f32.mrf.mxu0  ;;  %v6985_v46 = vadd.f32 %v6984_v58, %v15064_v29 }
 0x93e   : > { %v12069_v54 = vpop.eup %12068  ;;  %v10262_v59 = vcombine.low %v12065_v11, %v12067_v52  ;;  %v10266_v30 = vcombine.high %v12065_v11, %v12067_v52  ;;  %v7577_v2 = vpack.c.bf16 %v7337_v19, %v7334_v22  ;;  %v7329_v0 = vadd.f32 %v7328_v6, %v15148_v57  ;;  %v6986_v23 = vpop.f32.mrf.mxu1 }
 0x93f   : > { %v10279_v24 = vcombine.low %v12069_v54, %v12069_v54  ;;  %v10283_v4 = vcombine.high %v12069_v54, %v12069_v54  ;;  %12082 = vtanh.bf16 %v7548_v18  ;;  %v11364_v63 = vpop.f32.mrf.mxu0  ;;  %v6987_v41 = vadd.f32 %v6986_v23, %v15071_v42 }
 0x940   : > { %v12071_v47 = vpop.eup %12070  ;;  %9239 = vst [vmem:[%s14597_s30 + $0x278] sm:$0xff] %v10262_v59  ;;  %9243 = vst [vmem:[%s14597_s30 + $0x294] sm:$0xff] %v10266_v30  ;;  %12084 = vtanh.bf16 %v7577_v2  ;;  %v7570_v34 = vpack.c.bf16 %v7329_v0, %v7326_v53  ;;  %v6988_v3 = vpop.f32.mrf.mxu1  ;;  %v7350_v26 = vadd.f32 %v11364_v63, %v15148_v57 }
 0x941   : > { %9256 = vst.msk [vmem:[%s14597_s30 + $0x2f0] sm:$0xf] %vm9151_vm1, %v10279_v24  ;;  %9260 = vst.msk [vmem:[%s14597_s30 + $0x30c] sm:$0xf] %vm9151_vm1, %v10283_v4  ;;  %v10271_v43 = vcombine.low %v12071_v47, %v12071_v47  ;;  %v10275_v55 = vcombine.high %v12071_v47, %v12071_v47  ;;  %v6989_v62 = vadd.f32 %v6988_v3, %v15064_v29  ;;  %v7341_v28 = vpop.f32.mrf.mxu0 }
 0x942   : > { %12086 = vtanh.bf16 %v7570_v34  ;;  %v6990_v21 = vpop.f32.mrf.mxu1  ;;  %v7342_v1 = vadd.f32 %v7341_v28, %v15148_v57 }
 0x943   : > { %v12073_v13 = vpop.eup %12072  ;;  %9248 = vst.msk [vmem:[%s14597_s30 + $0x2b8] sm:$0xf] %vm9151_vm1, %v10271_v43  ;;  %9252 = vst.msk [vmem:[%s14597_s30 + $0x2d4] sm:$0xf] %vm9151_vm1, %v10275_v55  ;;  %v7554_v20 = vpack.c.bf16 %v6989_v62, %v6985_v46  ;;  %v6991_v60 = vadd.f32 %v6990_v21, %v15071_v42  ;;  %v11365_v51 = vpop.f32.mrf.mxu0 }
 0x944   : > { %v7353_v38 = vadd.f32 %v11365_v51, %v15148_v57  ;;  %v6994_v17 = vpop.f32.mrf.mxu1 }
 0x945   : > { %v12075_v7 = vpop.eup %12074  ;;  %12088 = vtanh.bf16 %v7554_v20  ;;  %v7555_v37 = vpack.c.bf16 %v6991_v60, %v6987_v41  ;;  %v7344_v36 = vpop.f32.mrf.mxu0  ;;  %v6995_v39 = vadd.f32 %v6994_v17, %v15064_v29 }
 0x946   : > { %v12077_v15 = vpop.eup %12076  ;;  %v10270_v12 = vcombine.low %v12073_v13, %v12075_v7  ;;  %v10274_v61 = vcombine.high %v12073_v13, %v12075_v7  ;;  %v7591_v14 = vpack.c.bf16 %v7353_v38, %v7350_v26  ;;  %v7345_v40 = vadd.f32 %v7344_v36, %v15148_v57  ;;  %v6996_v56 = vpop.f32.mrf.mxu1 }
 0x947   : > { %v10295_v16 = vcombine.low %v12077_v15, %v12077_v15  ;;  %v10299_v48 = vcombine.high %v12077_v15, %v12077_v15  ;;  %12090 = vtanh.bf16 %v7555_v37  ;;  %v11368_v10 = vpop.f32.mrf.mxu0  ;;  %v6997_v11 = vadd.f32 %v6996_v56, %v15071_v42 }
 0x948   : > { %v12079_v50 = vpop.eup %12078  ;;  %9247 = vst [vmem:[%s14597_s30 + $0x2b0] sm:$0xff] %v10270_v12  ;;  %9251 = vst [vmem:[%s14597_s30 + $0x2cc] sm:$0xff] %v10274_v61  ;;  %12092 = vtanh.bf16 %v7591_v14  ;;  %v7584_v45 = vpack.c.bf16 %v7345_v40, %v7342_v1  ;;  %v6998_v31 = vpop.f32.mrf.mxu1  ;;  %v7366_v8 = vadd.f32 %v11368_v10, %v15148_v57 }
 0x949   : > { %9272 = vst.msk [vmem:[%s14597_s30 + $0x360] sm:$0xf] %vm9151_vm1, %v10295_v16  ;;  %9276 = vst.msk [vmem:[%s14597_s30 + $0x37c] sm:$0xf] %vm9151_vm1, %v10299_v48  ;;  %v10287_v32 = vcombine.low %v12079_v50, %v12079_v50  ;;  %v10291_v33 = vcombine.high %v12079_v50, %v12079_v50  ;;  %v6999_v25 = vadd.f32 %v6998_v31, %v15064_v29  ;;  %v7357_v9 = vpop.f32.mrf.mxu0 }
 0x94a   : > { %12094 = vtanh.bf16 %v7584_v45  ;;  %v7000_v5 = vpop.f32.mrf.mxu1  ;;  %v7358_v52 = vadd.f32 %v7357_v9, %v15148_v57 }
 0x94b   : > { %v12081_v27 = vpop.eup %12080  ;;  %9264 = vst.msk [vmem:[%s14597_s30 + $0x328] sm:$0xf] %vm9151_vm1, %v10287_v32  ;;  %9268 = vst.msk [vmem:[%s14597_s30 + $0x344] sm:$0xf] %vm9151_vm1, %v10291_v33  ;;  %v7561_v35 = vpack.c.bf16 %v6999_v25, %v6995_v39  ;;  %v7001_v44 = vadd.f32 %v7000_v5, %v15071_v42  ;;  %v11369_v49 = vpop.f32.mrf.mxu0 }
 0x94c   : > { %v7369_v22 = vadd.f32 %v11369_v49, %v15148_v57  ;;  %v7004_v19 = vpop.f32.mrf.mxu1 }
 0x94d   : > { %v12083_v58 = vpop.eup %12082  ;;  %12096 = vtanh.bf16 %v7561_v35  ;;  %v7562_v53 = vpack.c.bf16 %v7001_v44, %v6997_v11  ;;  %v7360_v18 = vpop.f32.mrf.mxu0  ;;  %v7005_v55 = vadd.f32 %v7004_v19, %v15064_v29 }
 0x94e   : > { %v12085_v6 = vpop.eup %12084  ;;  %v10278_v54 = vcombine.low %v12081_v27, %v12083_v58  ;;  %v10282_v59 = vcombine.high %v12081_v27, %v12083_v58  ;;  %v7605_v30 = vpack.c.bf16 %v7369_v22, %v7366_v8  ;;  %v7361_v2 = vadd.f32 %v7360_v18, %v15148_v57  ;;  %v7006_v0 = vpop.f32.mrf.mxu1 }
 0x94f   : > { %v10311_v23 = vcombine.low %v12085_v6, %v12085_v6  ;;  %v10315_v24 = vcombine.high %v12085_v6, %v12085_v6  ;;  %12098 = vtanh.bf16 %v7562_v53  ;;  %v11372_v4 = vpop.f32.mrf.mxu0  ;;  %v7007_v13 = vadd.f32 %v7006_v0, %v15071_v42 }
 0x950   : > { %v12087_v63 = vpop.eup %12086  ;;  %9255 = vst [vmem:[%s14597_s30 + $0x2e8] sm:$0xff] %v10278_v54  ;;  %9259 = vst [vmem:[%s14597_s30 + $0x304] sm:$0xff] %v10282_v59  ;;  %12100 = vtanh.bf16 %v7605_v30  ;;  %v7598_v47 = vpack.c.bf16 %v7361_v2, %v7358_v52  ;;  %v7008_v34 = vpop.f32.mrf.mxu1  ;;  %v7382_v51 = vadd.f32 %v11372_v4, %v15148_v57 }
 0x951   : > { %9288 = vst.msk [vmem:[%s14597_s30 + $0x3d0] sm:$0xf] %vm9151_vm1, %v10311_v23  ;;  %9292 = vst.msk [vmem:[%s14597_s30 + $0x3ec] sm:$0xf] %vm9151_vm1, %v10315_v24  ;;  %v10303_v3 = vcombine.low %v12087_v63, %v12087_v63  ;;  %v10307_v43 = vcombine.high %v12087_v63, %v12087_v63  ;;  %v7009_v46 = vadd.f32 %v7008_v34, %v15064_v29  ;;  %v7373_v62 = vpop.f32.mrf.mxu0 }
 0x952   : > { %12102 = vtanh.bf16 %v7598_v47  ;;  %v7010_v28 = vpop.f32.mrf.mxu1  ;;  %v7374_v7 = vadd.f32 %v7373_v62, %v15148_v57 }
 0x953   : > { %v12089_v21 = vpop.eup %12088  ;;  %9280 = vst.msk [vmem:[%s14597_s30 + $0x398] sm:$0xf] %vm9151_vm1, %v10303_v3  ;;  %9284 = vst.msk [vmem:[%s14597_s30 + $0x3b4] sm:$0xf] %vm9151_vm1, %v10307_v43  ;;  %v7568_v41 = vpack.c.bf16 %v7009_v46, %v7005_v55  ;;  %v7011_v20 = vadd.f32 %v7010_v28, %v15071_v42  ;;  %v11373_v60 = vpop.f32.mrf.mxu0 }
 0x954   : > { %v7385_v26 = vadd.f32 %v11373_v60, %v15148_v57  ;;  %v7014_v38 = vpop.f32.mrf.mxu1 }
 0x955   : > { %v12091_v17 = vpop.eup %12090  ;;  %12104 = vtanh.bf16 %v7568_v41  ;;  %v7569_v1 = vpack.c.bf16 %v7011_v20, %v7007_v13  ;;  %v7376_v37 = vpop.f32.mrf.mxu0  ;;  %v7015_v33 = vadd.f32 %v7014_v38, %v15064_v29 }
 0x956   : > { %v12093_v36 = vpop.eup %12092  ;;  %v10286_v15 = vcombine.low %v12089_v21, %v12091_v17  ;;  %v10290_v12 = vcombine.high %v12089_v21, %v12091_v17  ;;  %v7619_v61 = vpack.c.bf16 %v7385_v26, %v7382_v51  ;;  %v7377_v14 = vadd.f32 %v7376_v37, %v15148_v57  ;;  %v7016_v40 = vpop.f32.mrf.mxu1 }
 0x957   : > { %v10327_v56 = vcombine.low %v12093_v36, %v12093_v36  ;;  %v10331_v16 = vcombine.high %v12093_v36, %v12093_v36  ;;  %12106 = vtanh.bf16 %v7569_v1  ;;  %v11376_v48 = vpop.f32.mrf.mxu0  ;;  %v7017_v27 = vadd.f32 %v7016_v40, %v15071_v42 }
 0x958   : > { %v12095_v10 = vpop.eup %12094  ;;  %9263 = vst [vmem:[%s14597_s30 + $0x320] sm:$0xff] %v10286_v15  ;;  %9267 = vst [vmem:[%s14597_s30 + $0x33c] sm:$0xff] %v10290_v12  ;;  %12108 = vtanh.bf16 %v7619_v61  ;;  %v7612_v50 = vpack.c.bf16 %v7377_v14, %v7374_v7  ;;  %v7018_v45 = vpop.f32.mrf.mxu1  ;;  %v7398_v49 = vadd.f32 %v11376_v48, %v15148_v57 }
 0x959   : > { %9304 = vst.msk [vmem:[%s14597_s30 + $0x440] sm:$0xf] %vm9151_vm1, %v10327_v56  ;;  %9308 = vst.msk [vmem:[%s14597_s30 + $0x45c] sm:$0xf] %vm9151_vm1, %v10331_v16  ;;  %v10319_v31 = vcombine.low %v12095_v10, %v12095_v10  ;;  %v10323_v32 = vcombine.high %v12095_v10, %v12095_v10  ;;  %v7019_v39 = vadd.f32 %v7018_v45, %v15064_v29  ;;  %v7389_v25 = vpop.f32.mrf.mxu0 }
 0x95a   : > { %12110 = vtanh.bf16 %v7612_v50  ;;  %v7020_v9 = vpop.f32.mrf.mxu1  ;;  %v7390_v58 = vadd.f32 %v7389_v25, %v15148_v57 }
 0x95b   : > { %v12097_v5 = vpop.eup %12096  ;;  %9296 = vst.msk [vmem:[%s14597_s30 + $0x408] sm:$0xf] %vm9151_vm1, %v10319_v31  ;;  %9300 = vst.msk [vmem:[%s14597_s30 + $0x424] sm:$0xf] %vm9151_vm1, %v10323_v32  ;;  %v7575_v11 = vpack.c.bf16 %v7019_v39, %v7015_v33  ;;  %v7021_v35 = vadd.f32 %v7020_v9, %v15071_v42  ;;  %v11377_v44 = vpop.f32.mrf.mxu0 }
 0x95c   : > { %v7401_v8 = vadd.f32 %v11377_v44, %v15148_v57  ;;  %v7024_v22 = vpop.f32.mrf.mxu1 }
 0x95d   : > { %v12099_v19 = vpop.eup %12098  ;;  %12112 = vtanh.bf16 %v7575_v11  ;;  %v7576_v52 = vpack.c.bf16 %v7021_v35, %v7017_v27  ;;  %v7392_v53 = vpop.f32.mrf.mxu0  ;;  %v7025_v43 = vadd.f32 %v7024_v22, %v15064_v29 }
 0x95e   : > { %v12101_v18 = vpop.eup %12100  ;;  %v10294_v6 = vcombine.low %v12097_v5, %v12099_v19  ;;  %v10298_v54 = vcombine.high %v12097_v5, %v12099_v19  ;;  %v7633_v59 = vpack.c.bf16 %v7401_v8, %v7398_v49  ;;  %v7393_v30 = vadd.f32 %v7392_v53, %v15148_v57  ;;  %v7026_v2 = vpop.f32.mrf.mxu1 }
 0x95f   : > { %v10343_v0 = vcombine.low %v12101_v18, %v12101_v18  ;;  %v10347_v23 = vcombine.high %v12101_v18, %v12101_v18  ;;  %12114 = vtanh.bf16 %v7576_v52  ;;  %v11380_v24 = vpop.f32.mrf.mxu0  ;;  %v7027_v21 = vadd.f32 %v7026_v2, %v15071_v42 }
 0x960   : > { %v12103_v4 = vpop.eup %12102  ;;  %9271 = vst [vmem:[%s14597_s30 + $0x358] sm:$0xff] %v10294_v6  ;;  %9275 = vst [vmem:[%s14597_s30 + $0x374] sm:$0xff] %v10298_v54  ;;  %12116 = vtanh.bf16 %v7633_v59  ;;  %v7626_v63 = vpack.c.bf16 %v7393_v30, %v7390_v58  ;;  %v7028_v47 = vpop.f32.mrf.mxu1  ;;  %v7414_v60 = vadd.f32 %v11380_v24, %v15148_v57 }
 0x961   : > { %9320 = vst.msk [vmem:[%s14597_s30 + $0x4b0] sm:$0xf] %vm9151_vm1, %v10343_v0  ;;  %9324 = vst.msk [vmem:[%s14597_s30 + $0x4cc] sm:$0xf] %vm9151_vm1, %v10347_v23  ;;  %v10335_v34 = vcombine.low %v12103_v4, %v12103_v4  ;;  %v10339_v3 = vcombine.high %v12103_v4, %v12103_v4  ;;  %v7029_v55 = vadd.f32 %v7028_v47, %v15064_v29  ;;  %v7405_v46 = vpop.f32.mrf.mxu0 }
 0x962   : > { %12118 = vtanh.bf16 %v7626_v63  ;;  %v7030_v62 = vpop.f32.mrf.mxu1  ;;  %v7406_v17 = vadd.f32 %v7405_v46, %v15148_v57 }
 0x963   : > { %v12105_v28 = vpop.eup %12104  ;;  %9312 = vst.msk [vmem:[%s14597_s30 + $0x478] sm:$0xf] %vm9151_vm1, %v10335_v34  ;;  %9316 = vst.msk [vmem:[%s14597_s30 + $0x494] sm:$0xf] %vm9151_vm1, %v10339_v3  ;;  %v7582_v13 = vpack.c.bf16 %v7029_v55, %v7025_v43  ;;  %v7031_v41 = vadd.f32 %v7030_v62, %v15071_v42  ;;  %v11381_v20 = vpop.f32.mrf.mxu0 }
 0x964   : > { %v7417_v51 = vadd.f32 %v11381_v20, %v15148_v57  ;;  %v7034_v26 = vpop.f32.mrf.mxu1 }
 0x965   : > { %v12107_v38 = vpop.eup %12106  ;;  %12120 = vtanh.bf16 %v7582_v13  ;;  %v7583_v7 = vpack.c.bf16 %v7031_v41, %v7027_v21  ;;  %v7408_v1 = vpop.f32.mrf.mxu0  ;;  %v7035_v32 = vadd.f32 %v7034_v26, %v15064_v29 }
 0x966   : > { %v12109_v37 = vpop.eup %12108  ;;  %v10302_v36 = vcombine.low %v12105_v28, %v12107_v38  ;;  %v10306_v15 = vcombine.high %v12105_v28, %v12107_v38  ;;  %v7647_v12 = vpack.c.bf16 %v7417_v51, %v7414_v60  ;;  %v7409_v61 = vadd.f32 %v7408_v1, %v15148_v57  ;;  %v7036_v14 = vpop.f32.mrf.mxu1 }
 0x967   : > { %v10359_v40 = vcombine.low %v12109_v37, %v12109_v37  ;;  %v10363_v56 = vcombine.high %v12109_v37, %v12109_v37  ;;  %12122 = vtanh.bf16 %v7583_v7  ;;  %v11384_v16 = vpop.f32.mrf.mxu0  ;;  %v7037_v5 = vadd.f32 %v7036_v14, %v15071_v42 }
 0x968   : > { %v12111_v48 = vpop.eup %12110  ;;  %9279 = vst [vmem:[%s14597_s30 + $0x390] sm:$0xff] %v10302_v36  ;;  %9283 = vst [vmem:[%s14597_s30 + $0x3ac] sm:$0xff] %v10306_v15  ;;  %12124 = vtanh.bf16 %v7647_v12  ;;  %v7640_v10 = vpack.c.bf16 %v7409_v61, %v7406_v17  ;;  %v7038_v50 = vpop.f32.mrf.mxu1  ;;  %v7430_v44 = vadd.f32 %v11384_v16, %v15148_v57 }
 0x969   : > { %9336 = vst.msk [vmem:[%s14597_s30 + $0x520] sm:$0xf] %vm9151_vm1, %v10359_v40  ;;  %9340 = vst.msk [vmem:[%s14597_s30 + $0x53c] sm:$0xf] %vm9151_vm1, %v10363_v56  ;;  %v10351_v45 = vcombine.low %v12111_v48, %v12111_v48  ;;  %v10355_v31 = vcombine.high %v12111_v48, %v12111_v48  ;;  %v7039_v33 = vadd.f32 %v7038_v50, %v15064_v29  ;;  %v7421_v39 = vpop.f32.mrf.mxu0 }
 0x96a   : > { %12126 = vtanh.bf16 %v7640_v10  ;;  %v7040_v25 = vpop.f32.mrf.mxu1  ;;  %v7422_v19 = vadd.f32 %v7421_v39, %v15148_v57 }
 0x96b   : > { %v12113_v9 = vpop.eup %12112  ;;  %9328 = vst.msk [vmem:[%s14597_s30 + $0x4e8] sm:$0xf] %vm9151_vm1, %v10351_v45  ;;  %9332 = vst.msk [vmem:[%s14597_s30 + $0x504] sm:$0xf] %vm9151_vm1, %v10355_v31  ;;  %v7589_v27 = vpack.c.bf16 %v7039_v33, %v7035_v32  ;;  %v7041_v11 = vadd.f32 %v7040_v25, %v15071_v42  ;;  %v11385_v35 = vpop.f32.mrf.mxu0 }
 0x96c   : > { %v7433_v49 = vadd.f32 %v11385_v35, %v15148_v57  ;;  %v7044_v8 = vpop.f32.mrf.mxu1 }
 0x96d   : > { %v12115_v22 = vpop.eup %12114  ;;  %12128 = vtanh.bf16 %v7589_v27  ;;  %v7590_v58 = vpack.c.bf16 %v7041_v11, %v7037_v5  ;;  %v7424_v52 = vpop.f32.mrf.mxu0  ;;  %v7045_v3 = vadd.f32 %v7044_v8, %v15064_v29 }
 0x96e   : > { %v12117_v53 = vpop.eup %12116  ;;  %v10310_v18 = vcombine.low %v12113_v9, %v12115_v22  ;;  %v10314_v6 = vcombine.high %v12113_v9, %v12115_v22  ;;  %v7661_v54 = vpack.c.bf16 %v7433_v49, %v7430_v44  ;;  %v7425_v59 = vadd.f32 %v7424_v52, %v15148_v57  ;;  %v7046_v30 = vpop.f32.mrf.mxu1 }
 0x96f   : > { %v10375_v2 = vcombine.low %v12117_v53, %v12117_v53  ;;  %v10379_v0 = vcombine.high %v12117_v53, %v12117_v53  ;;  %12130 = vtanh.bf16 %v7590_v58  ;;  %v11388_v23 = vpop.f32.mrf.mxu0  ;;  %v7047_v28 = vadd.f32 %v7046_v30, %v15071_v42 }
 0x970   : > { %v12119_v24 = vpop.eup %12118  ;;  %9287 = vst [vmem:[%s14597_s30 + $0x3c8] sm:$0xff] %v10310_v18  ;;  %9291 = vst [vmem:[%s14597_s30 + $0x3e4] sm:$0xff] %v10314_v6  ;;  %12132 = vtanh.bf16 %v7661_v54  ;;  %v7654_v4 = vpack.c.bf16 %v7425_v59, %v7422_v19  ;;  %v7048_v63 = vpop.f32.mrf.mxu1  ;;  %v7446_v20 = vadd.f32 %v11388_v23, %v15148_v57 }
 0x971   : > { %9352 = vst.msk [vmem:[%s14597_s30 + $0x590] sm:$0xf] %vm9151_vm1, %v10375_v2  ;;  %9356 = vst.msk [vmem:[%s14597_s30 + $0x5ac] sm:$0xf] %vm9151_vm1, %v10379_v0  ;;  %v10367_v47 = vcombine.low %v12119_v24, %v12119_v24  ;;  %v10371_v34 = vcombine.high %v12119_v24, %v12119_v24  ;;  %v7049_v43 = vadd.f32 %v7048_v63, %v15064_v29  ;;  %v7437_v55 = vpop.f32.mrf.mxu0 }
 0x972   : > { %12134 = vtanh.bf16 %v7654_v4  ;;  %v7050_v46 = vpop.f32.mrf.mxu1  ;;  %v7438_v38 = vadd.f32 %v7437_v55, %v15148_v57 }
 0x973   : > { %v12121_v62 = vpop.eup %12120  ;;  %9344 = vst.msk [vmem:[%s14597_s30 + $0x558] sm:$0xf] %vm9151_vm1, %v10367_v47  ;;  %9348 = vst.msk [vmem:[%s14597_s30 + $0x574] sm:$0xf] %vm9151_vm1, %v10371_v34  ;;  %v7596_v21 = vpack.c.bf16 %v7049_v43, %v7045_v3  ;;  %v7051_v13 = vadd.f32 %v7050_v46, %v15071_v42  ;;  %v11389_v41 = vpop.f32.mrf.mxu0 }
 0x974   : > { %v7449_v60 = vadd.f32 %v11389_v41, %v15148_v57  ;;  %v7054_v51 = vpop.f32.mrf.mxu1 }
 0x975   : > { %v12123_v26 = vpop.eup %12122  ;;  %12136 = vtanh.bf16 %v7596_v21  ;;  %v7597_v17 = vpack.c.bf16 %v7051_v13, %v7047_v28  ;;  %v7440_v7 = vpop.f32.mrf.mxu0 }
 0x976   : > { %v12125_v1 = vpop.eup %12124  ;;  %v10318_v37 = vcombine.low %v12121_v62, %v12123_v26  ;;  %v10322_v36 = vcombine.high %v12121_v62, %v12123_v26  ;;  %v7675_v15 = vpack.c.bf16 %v7449_v60, %v7446_v20  ;;  %v7441_v12 = vadd.f32 %v7440_v7, %v15148_v57  ;;  %v7056_v61 = vpop.f32.mrf.mxu1 }
 0x977   : > { %v10391_v14 = vcombine.low %v12125_v1, %v12125_v1  ;;  %v10395_v40 = vcombine.high %v12125_v1, %v12125_v1  ;;  %12138 = vtanh.bf16 %v7597_v17  ;;  %v7055_v57 = vadd.f32 %v7054_v51, %v15064_v29 }
 0x978   : > { %v12127_v56 = vpop.eup %12126  ;;  %9295 = vst [vmem:[%s14597_s30 + $0x400] sm:$0xff] %v10318_v37  ;;  %9299 = vst [vmem:[%s14597_s30 + $0x41c] sm:$0xff] %v10322_v36  ;;  %12140 = vtanh.bf16 %v7675_v15  ;;  %v7668_v16 = vpack.c.bf16 %v7441_v12, %v7438_v38  ;;  %v7058_v48 = vpop.f32.mrf.mxu1  ;;  %v7057_v33 = vadd.f32 %v7056_v61, %v15071_v42 }
 0x979   : > { %9368 = vst.msk [vmem:[%s14597_s30 + $0x600] sm:$0xf] %vm9151_vm1, %v10391_v14  ;;  %9372 = vst.msk [vmem:[%s14597_s30 + $0x61c] sm:$0xf] %vm9151_vm1, %v10395_v40  ;;  %v10383_v10 = vcombine.low %v12127_v56, %v12127_v56  ;;  %v10387_v50 = vcombine.high %v12127_v56, %v12127_v56  ;;  %v7059_v45 = vadd.f32 %v7058_v48, %v15064_v29 }
 0x97a   : > { %12142 = vtanh.bf16 %v7668_v16  ;;  %v7060_v31 = vpop.f32.mrf.mxu1 }
 0x97b   : > { %v12129_v32 = vpop.eup %12128  ;;  %9360 = vst.msk [vmem:[%s14597_s30 + $0x5c8] sm:$0xf] %vm9151_vm1, %v10383_v10  ;;  %9364 = vst.msk [vmem:[%s14597_s30 + $0x5e4] sm:$0xf] %vm9151_vm1, %v10387_v50  ;;  %v7603_v39 = vpack.c.bf16 %v7059_v45, %v7055_v57  ;;  %v7061_v25 = vadd.f32 %v7060_v31, %v15071_v42 }
 0x97c   : > { %v7064_v9 = vpop.f32.mrf.mxu1 }
 0x97d   : > { %v12131_v5 = vpop.eup %12130  ;;  %v7604_v27 = vpack.c.bf16 %v7061_v25, %v7057_v33  ;;  %12144 = vtanh.bf16 %v7603_v39  ;;  %v7065_v18 = vadd.f32 %v7064_v9, %v15064_v29 }
 0x97e   : > { %v12133_v11 = vpop.eup %12132  ;;  %v10326_v35 = vcombine.low %v12129_v32, %v12131_v5  ;;  %v10330_v44 = vcombine.high %v12129_v32, %v12131_v5  ;;  %v7066_v49 = vpop.f32.mrf.mxu1 }
 0x97f   : > { %v10407_v8 = vcombine.low %v12133_v11, %v12133_v11  ;;  %v10411_v22 = vcombine.high %v12133_v11, %v12133_v11  ;;  %12146 = vtanh.bf16 %v7604_v27  ;;  %v7067_v30 = vadd.f32 %v7066_v49, %v15071_v42 }
 0x980   : > { %v12135_v19 = vpop.eup %12134  ;;  %9303 = vst [vmem:[%s14597_s30 + $0x438] sm:$0xff] %v10326_v35  ;;  %9307 = vst [vmem:[%s14597_s30 + $0x454] sm:$0xff] %v10330_v44  ;;  %v7068_v58 = vpop.f32.mrf.mxu1 }
 0x981   : > { %9384 = vst.msk [vmem:[%s14597_s30 + $0x670] sm:$0xf] %vm9151_vm1, %v10407_v8  ;;  %9388 = vst.msk [vmem:[%s14597_s30 + $0x68c] sm:$0xf] %vm9151_vm1, %v10411_v22  ;;  %v10399_v52 = vcombine.low %v12135_v19, %v12135_v19  ;;  %v10403_v53 = vcombine.high %v12135_v19, %v12135_v19  ;;  %v7069_v6 = vadd.f32 %v7068_v58, %v15064_v29 }
 0x982   : > { %v7070_v54 = vpop.f32.mrf.mxu1 }
 0x983   : > { %v12137_v59 = vpop.eup %12136  ;;  %9376 = vst.msk [vmem:[%s14597_s30 + $0x638] sm:$0xf] %vm9151_vm1, %v10399_v52  ;;  %9380 = vst.msk [vmem:[%s14597_s30 + $0x654] sm:$0xf] %vm9151_vm1, %v10403_v53  ;;  %v7610_v2 = vpack.c.bf16 %v7069_v6, %v7065_v18  ;;  %v7071_v0 = vadd.f32 %v7070_v54, %v15071_v42 }
 0x984   : > { %v7074_v23 = vpop.f32.mrf.mxu1 }
 0x985   : > { %v12139_v24 = vpop.eup %12138  ;;  %v7611_v4 = vpack.c.bf16 %v7071_v0, %v7067_v30  ;;  %12148 = vtanh.bf16 %v7610_v2  ;;  %v7075_v13 = vadd.f32 %v7074_v23, %v15064_v29 }
 0x986   : > { %v12141_v63 = vpop.eup %12140  ;;  %v10334_v47 = vcombine.low %v12137_v59, %v12139_v24  ;;  %v10338_v34 = vcombine.high %v12137_v59, %v12139_v24  ;;  %v7076_v3 = vpop.f32.mrf.mxu1 }
 0x987   : > { %v10423_v43 = vcombine.low %v12141_v63, %v12141_v63  ;;  %v10427_v55 = vcombine.high %v12141_v63, %v12141_v63  ;;  %12150 = vtanh.bf16 %v7611_v4  ;;  %v7077_v60 = vadd.f32 %v7076_v3, %v15071_v42 }
 0x988   : > { %v12143_v46 = vpop.eup %12142  ;;  %9311 = vst [vmem:[%s14597_s30 + $0x470] sm:$0xff] %v10334_v47  ;;  %9315 = vst [vmem:[%s14597_s30 + $0x48c] sm:$0xff] %v10338_v34  ;;  %v7078_v62 = vpop.f32.mrf.mxu1 }
 0x989   : > { %9400 = vst.msk [vmem:[%s14597_s30 + $0x6e0] sm:$0xf] %vm9151_vm1, %v10423_v43  ;;  %9404 = vst.msk [vmem:[%s14597_s30 + $0x6fc] sm:$0xf] %vm9151_vm1, %v10427_v55  ;;  %v10415_v28 = vcombine.low %v12143_v46, %v12143_v46  ;;  %v10419_v21 = vcombine.high %v12143_v46, %v12143_v46  ;;  %v7079_v41 = vadd.f32 %v7078_v62, %v15064_v29 }
 0x98a   : > { %v7080_v20 = vpop.f32.mrf.mxu1 }
 0x98b   : > { %9392 = vst.msk [vmem:[%s14597_s30 + $0x6a8] sm:$0xf] %vm9151_vm1, %v10415_v28  ;;  %9396 = vst.msk [vmem:[%s14597_s30 + $0x6c4] sm:$0xf] %vm9151_vm1, %v10419_v21  ;;  %v7617_v51 = vpack.c.bf16 %v7079_v41, %v7075_v13  ;;  %v7081_v26 = vadd.f32 %v7080_v20, %v15071_v42  ;;  %v12145_v38 = vpop.eup %12144 }
 0x98c   : > { %v7084_v17 = vpop.f32.mrf.mxu1 }
 0x98d   : > { %v12147_v7 = vpop.eup %12146  ;;  %v7618_v1 = vpack.c.bf16 %v7081_v26, %v7077_v60  ;;  %12152 = vtanh.bf16 %v7617_v51  ;;  %v7085_v61 = vadd.f32 %v7084_v17, %v15064_v29 }
 0x98e   : > { %v10342_v37 = vcombine.low %v12145_v38, %v12147_v7  ;;  %v10346_v36 = vcombine.high %v12145_v38, %v12147_v7  ;;  %v7086_v15 = vpop.f32.mrf.mxu1 }
 0x98f   : > { %12154 = vtanh.bf16 %v7618_v1  ;;  %v7087_v56 = vadd.f32 %v7086_v15, %v15071_v42 }
 0x990   : > { %9319 = vst [vmem:[%s14597_s30 + $0x4a8] sm:$0xff] %v10342_v37  ;;  %9323 = vst [vmem:[%s14597_s30 + $0x4c4] sm:$0xff] %v10346_v36  ;;  %v7088_v12 = vpop.f32.mrf.mxu1 }
 0x991   : > { %v7089_v14 = vadd.f32 %v7088_v12, %v15064_v29 }
 0x992   : > { %v7090_v40 = vpop.f32.mrf.mxu1 }
 0x993   : > { %v7624_v16 = vpack.c.bf16 %v7089_v14, %v7085_v61  ;;  %v7091_v48 = vadd.f32 %v7090_v40, %v15071_v42  ;;  %v12149_v10 = vpop.eup %12148 }
 0x994   : > { %v7094_v50 = vpop.f32.mrf.mxu1 }
 0x995   : > { %v12151_v57 = vpop.eup %12150  ;;  %v7625_v45 = vpack.c.bf16 %v7091_v48, %v7087_v56  ;;  %12156 = vtanh.bf16 %v7624_v16  ;;  %v7095_v25 = vadd.f32 %v7094_v50, %v15064_v29 }
 0x996   : > { %v10350_v31 = vcombine.low %v12149_v10, %v12151_v57  ;;  %v10354_v32 = vcombine.high %v12149_v10, %v12151_v57  ;;  %v7096_v33 = vpop.f32.mrf.mxu1 }
 0x997   : > { %12158 = vtanh.bf16 %v7625_v45  ;;  %v7097_v27 = vadd.f32 %v7096_v33, %v15071_v42 }
 0x998   : > { %9327 = vst [vmem:[%s14597_s30 + $0x4e0] sm:$0xff] %v10350_v31  ;;  %9331 = vst [vmem:[%s14597_s30 + $0x4fc] sm:$0xff] %v10354_v32  ;;  %v7098_v39 = vpop.f32.mrf.mxu1 }
 0x999   : > { %v7099_v9 = vadd.f32 %v7098_v39, %v15064_v29 }
 0x99a   : > { %v7100_v5 = vpop.f32.mrf.mxu1 }
 0x99b   : > { %v7631_v11 = vpack.c.bf16 %v7099_v9, %v7095_v25  ;;  %v7101_v35 = vadd.f32 %v7100_v5, %v15071_v42  ;;  %v12153_v44 = vpop.eup %12152 }
 0x99c   : > { %v7104_v49 = vpop.f32.mrf.mxu1 }
 0x99d   : > { %v12155_v8 = vpop.eup %12154  ;;  %v7632_v22 = vpack.c.bf16 %v7101_v35, %v7097_v27  ;;  %12160 = vtanh.bf16 %v7631_v11  ;;  %v7105_v18 = vadd.f32 %v7104_v49, %v15064_v29 }
 0x99e   : > { %v10358_v19 = vcombine.low %v12153_v44, %v12155_v8  ;;  %v10362_v58 = vcombine.high %v12153_v44, %v12155_v8  ;;  %v7106_v52 = vpop.f32.mrf.mxu1 }
 0x99f   : > { %12162 = vtanh.bf16 %v7632_v22  ;;  %v7107_v59 = vadd.f32 %v7106_v52, %v15071_v42 }
 0x9a0   : > { %9335 = vst [vmem:[%s14597_s30 + $0x518] sm:$0xff] %v10358_v19  ;;  %9339 = vst [vmem:[%s14597_s30 + $0x534] sm:$0xff] %v10362_v58  ;;  %v7108_v53 = vpop.f32.mrf.mxu1 }
 0x9a1   : > { %v7109_v6 = vadd.f32 %v7108_v53, %v15064_v29 }
 0x9a2   : > { %v7110_v54 = vpop.f32.mrf.mxu1 }
 0x9a3   : > { %v7638_v30 = vpack.c.bf16 %v7109_v6, %v7105_v18  ;;  %v7111_v2 = vadd.f32 %v7110_v54, %v15071_v42  ;;  %v12157_v0 = vpop.eup %12156 }
 0x9a4   : > { %v7114_v23 = vpop.f32.mrf.mxu1 }
 0x9a5   : > { %v12159_v24 = vpop.eup %12158  ;;  %v7639_v4 = vpack.c.bf16 %v7111_v2, %v7107_v59  ;;  %12164 = vtanh.bf16 %v7638_v30  ;;  %v7115_v43 = vadd.f32 %v7114_v23, %v15064_v29 }
 0x9a6   : > { %v10366_v63 = vcombine.low %v12157_v0, %v12159_v24  ;;  %v10370_v47 = vcombine.high %v12157_v0, %v12159_v24  ;;  %v7116_v34 = vpop.f32.mrf.mxu1 }
 0x9a7   : > { %12166 = vtanh.bf16 %v7639_v4  ;;  %v7117_v62 = vadd.f32 %v7116_v34, %v15071_v42 }
 0x9a8   : > { %9343 = vst [vmem:[%s14597_s30 + $0x550] sm:$0xff] %v10366_v63  ;;  %9347 = vst [vmem:[%s14597_s30 + $0x56c] sm:$0xff] %v10370_v47  ;;  %v7118_v3 = vpop.f32.mrf.mxu1 }
 0x9a9   : > { %v7119_v55 = vadd.f32 %v7118_v3, %v15064_v29 }
 0x9aa   : > { %v7120_v46 = vpop.f32.mrf.mxu1 }
 0x9ab   : > { %v7645_v28 = vpack.c.bf16 %v7119_v55, %v7115_v43  ;;  %v7121_v21 = vadd.f32 %v7120_v46, %v15071_v42  ;;  %v12161_v13 = vpop.eup %12160 }
 0x9ac   : > { %v7124_v41 = vpop.f32.mrf.mxu1 }
 0x9ad   : > { %v12163_v20 = vpop.eup %12162  ;;  %v7646_v60 = vpack.c.bf16 %v7121_v21, %v7117_v62  ;;  %12168 = vtanh.bf16 %v7645_v28  ;;  %v7125_v7 = vadd.f32 %v7124_v41, %v15064_v29 }
 0x9ae   : > { %v10374_v51 = vcombine.low %v12161_v13, %v12163_v20  ;;  %v10378_v26 = vcombine.high %v12161_v13, %v12163_v20  ;;  %v7126_v38 = vpop.f32.mrf.mxu1 }
 0x9af   : > { %12170 = vtanh.bf16 %v7646_v60  ;;  %v7127_v36 = vadd.f32 %v7126_v38, %v15071_v42 }
 0x9b0   : > { %9351 = vst [vmem:[%s14597_s30 + $0x588] sm:$0xff] %v10374_v51  ;;  %9355 = vst [vmem:[%s14597_s30 + $0x5a4] sm:$0xff] %v10378_v26  ;;  %v7128_v17 = vpop.f32.mrf.mxu1 }
 0x9b1   : > { %v7129_v1 = vadd.f32 %v7128_v17, %v15064_v29 }
 0x9b2   : > { %v7130_v37 = vpop.f32.mrf.mxu1 }
 0x9b3   : > { %v7652_v15 = vpack.c.bf16 %v7129_v1, %v7125_v7  ;;  %v7131_v12 = vadd.f32 %v7130_v37, %v15071_v42  ;;  %v12165_v61 = vpop.eup %12164 }
 0x9b4   : > { %v7134_v14 = vpop.f32.mrf.mxu1 }
 0x9b5   : > { %v12167_v40 = vpop.eup %12166  ;;  %v7653_v56 = vpack.c.bf16 %v7131_v12, %v7127_v36  ;;  %12172 = vtanh.bf16 %v7652_v15  ;;  %v7135_v57 = vadd.f32 %v7134_v14, %v15064_v29 }
 0x9b6   : > { %v10382_v16 = vcombine.low %v12165_v61, %v12167_v40  ;;  %v10386_v48 = vcombine.high %v12165_v61, %v12167_v40  ;;  %v7136_v10 = vpop.f32.mrf.mxu1 }
 0x9b7   : > { %12174 = vtanh.bf16 %v7653_v56  ;;  %v7137_v32 = vadd.f32 %v7136_v10, %v15071_v42 }
 0x9b8   : > { %9359 = vst [vmem:[%s14597_s30 + $0x5c0] sm:$0xff] %v10382_v16  ;;  %9363 = vst [vmem:[%s14597_s30 + $0x5dc] sm:$0xff] %v10386_v48  ;;  %v7138_v50 = vpop.f32.mrf.mxu1 }
 0x9b9   : > { %v7139_v45 = vadd.f32 %v7138_v50, %v15064_v29 }
 0x9ba   : > { %v7140_v31 = vpop.f32.mrf.mxu1 }
 0x9bb   : > { %v7659_v33 = vpack.c.bf16 %v7139_v45, %v7135_v57  ;;  %v7141_v39 = vadd.f32 %v7140_v31, %v15071_v42  ;;  %v12169_v25 = vpop.eup %12168 }
 0x9bc   : > { %v7144_v9 = vpop.f32.mrf.mxu1 }
 0x9bd   : > { %v12171_v5 = vpop.eup %12170  ;;  %v7660_v27 = vpack.c.bf16 %v7141_v39, %v7137_v32  ;;  %12176 = vtanh.bf16 %v7659_v33  ;;  %v7145_v8 = vadd.f32 %v7144_v9, %v15064_v29 }
 0x9be   : > { %v10390_v11 = vcombine.low %v12169_v25, %v12171_v5  ;;  %v10394_v35 = vcombine.high %v12169_v25, %v12171_v5  ;;  %v7146_v44 = vpop.f32.mrf.mxu1 }
 0x9bf   : > { %12178 = vtanh.bf16 %v7660_v27  ;;  %v7147_v58 = vadd.f32 %v7146_v44, %v15071_v42 }
 0x9c0   : > { %9367 = vst [vmem:[%s14597_s30 + $0x5f8] sm:$0xff] %v10390_v11  ;;  %9371 = vst [vmem:[%s14597_s30 + $0x614] sm:$0xff] %v10394_v35  ;;  %v7148_v49 = vpop.f32.mrf.mxu1 }
 0x9c1   : > { %v7149_v22 = vadd.f32 %v7148_v49, %v15064_v29 }
 0x9c2   : > { %v7150_v19 = vpop.f32.mrf.mxu1 }
 0x9c3   : > { %v7666_v52 = vpack.c.bf16 %v7149_v22, %v7145_v8  ;;  %v7151_v53 = vadd.f32 %v7150_v19, %v15071_v42  ;;  %v12173_v18 = vpop.eup %12172 }
 0x9c4   : > { %v7154_v6 = vpop.f32.mrf.mxu1 }
 0x9c5   : > { %v12175_v54 = vpop.eup %12174  ;;  %v7667_v59 = vpack.c.bf16 %v7151_v53, %v7147_v58  ;;  %12180 = vtanh.bf16 %v7666_v52  ;;  %v7155_v24 = vadd.f32 %v7154_v6, %v15064_v29 }
 0x9c6   : > { %v10398_v30 = vcombine.low %v12173_v18, %v12175_v54  ;;  %v10402_v2 = vcombine.high %v12173_v18, %v12175_v54  ;;  %v7156_v0 = vpop.f32.mrf.mxu1 }
 0x9c7   : > { %12182 = vtanh.bf16 %v7667_v59  ;;  %v7157_v47 = vadd.f32 %v7156_v0, %v15071_v42 }
 0x9c8   : > { %9375 = vst [vmem:[%s14597_s30 + $0x630] sm:$0xff] %v10398_v30  ;;  %9379 = vst [vmem:[%s14597_s30 + $0x64c] sm:$0xff] %v10402_v2  ;;  %v7158_v23 = vpop.f32.mrf.mxu1 }
 0x9c9   : > { %v7159_v4 = vadd.f32 %v7158_v23, %v15064_v29 }
 0x9ca   : > { %v7160_v63 = vpop.f32.mrf.mxu1 }
 0x9cb   : > { %v7673_v34 = vpack.c.bf16 %v7159_v4, %v7155_v24  ;;  %v7161_v3 = vadd.f32 %v7160_v63, %v15071_v42  ;;  %v12177_v43 = vpop.eup %12176 }
 0x9cd   : > { %v12179_v55 = vpop.eup %12178  ;;  %v7674_v46 = vpack.c.bf16 %v7161_v3, %v7157_v47  ;;  %12184 = vtanh.bf16 %v7673_v34 }
 0x9ce   : > { %v10406_v62 = vcombine.low %v12177_v43, %v12179_v55  ;;  %v10410_v28 = vcombine.high %v12177_v43, %v12179_v55 }
 0x9cf   : > { %12186 = vtanh.bf16 %v7674_v46 }
 0x9d0   : > { %9383 = vst [vmem:[%s14597_s30 + $0x668] sm:$0xff] %v10406_v62  ;;  %9387 = vst [vmem:[%s14597_s30 + $0x684] sm:$0xff] %v10410_v28 }
 0x9d3   : > { %v12181_v29 = vpop.eup %12180 }
 0x9d5   : > { %v12183_v21 = vpop.eup %12182 }
 0x9d6   : > { %v10414_v13 = vcombine.low %v12181_v29, %v12183_v21  ;;  %v10418_v41 = vcombine.high %v12181_v29, %v12183_v21 }
 0x9d8   : > { %9391 = vst [vmem:[%s14597_s30 + $0x6a0] sm:$0xff] %v10414_v13  ;;  %9395 = vst [vmem:[%s14597_s30 + $0x6bc] sm:$0xff] %v10418_v41 }
 0x9db   : > { %v12185_v20 = vpop.eup %12184 }
 0x9dc   : > { %9416 = sbr.rel (!%p12522_p5) target bundleno = 2557 (0x9fd), region = 92 }
 0x9dd   : > { %v12187_v42 = vpop.eup %12186 }
 0x9de   : > { %v10422_v60 = vcombine.low %v12185_v20, %v12187_v42  ;;  %v10426_v51 = vcombine.high %v12185_v20, %v12187_v42 }
 0x9e0   : > { %9399 = vst [vmem:[%s14597_s30 + $0x6d8] sm:$0xff] %v10422_v60  ;;  %9403 = vst [vmem:[%s14597_s30 + $0x6f4] sm:$0xff] %v10426_v51 }
 0x9e1   : > { %s16093_s24 = smov (!%p9419_p11, %s9418_s24), 64 }
 0x9e2   : > { %s15520_s19 = sshll.u32 %s16093_s24, 7 }
 0x9e3   : > { %s9423_s29 = ssub.s32 8192, %s15520_s19 }
 0x9e4   : > { %9424 = vsyncadd %s16008_s3, %s9423_s29  ;;  %p10431_p12 = scmp.ne.s32.totalorder %s15520_s19, 0  ;;  %s10450_s20 = sshll.u32 %s12505_s0, 13 }
 0x9e5   : > { %s15530_s4 = scalar_lea.hbm %s15996_s17, %s10450_s20  ;;  %s9429_s5 = sshll.u32 %s13857_s21, 4  ;;  %s15533_s5 = int_to_ptr.vmem [resolvable:$true] %s9429_s5 }
 0x9e6   : > { %s12195_s24 = scalar_lea.vmem %s15533_s5, %s15520_s19  ;;  %s12386_s29 = smov [#allocation2]  }
 0x9e7   : > { %p12196_p13 = scmp.ne.s32.totalorder %s15533_s5, %s12195_s24  ;;  %s12199_s3 = sshll.u32 %s12386_s29, 4  ;;  %s12200_s3 = int_to_ptr.vmem [resolvable:$false] %s12199_s3 }
 0x9e8   : > { %s12201_s6 = scalar_lea.vmem %s12200_s3, 16384  ;;  %p12202_p2 = scmp.lt.s32.totalorder %s15533_s5, %s12200_s3 }
 0x9e9   : > { %p12197_p0 = pnand %p12196_p13, %p10431_p12  ;;  %p12203_p3 = scmp.lt.s32.totalorder %s12201_s6, %s12195_s24 }
 0x9eb   : > { %p12198_p1 = pneg %p12197_p0  ;;  %p12204_p4 = por %p12203_p3, %p12202_p2 }
 0x9ed   : > { %p12205_p7 = pnand %p12204_p4, %p12198_p1 }
 0x9ef   : > { %12208 = shalt.err (!%p12205_p7)
}
 0x9f0   : > { %s12209_s21 = scalar_lea.hbm %s15530_s4, %s15520_s19  ;;  %s12213_s1 = scalar_lea.hbm %s15996_s17, 9600 }
 0x9f1   : > { %p12210_p8 = scmp.ne.s32.totalorder %s15530_s4, %s12209_s21  ;;  %p12214_p11 = scmp.lt.s32.totalorder %s15530_s4, %s15996_s17 }
 0x9f2   : > { %p12215_p13 = scmp.lt.s32.totalorder %s12213_s1, %s12209_s21 }
 0x9f3   : > { %p12211_p9 = pnand %p12210_p8, %p10431_p12 }
 0x9f4   : > { %p12216_p0 = por %p12215_p13, %p12214_p11 }
 0x9f5   : > { %p12212_p10 = pneg %p12211_p9 }
 0x9f7   : > { %p12217_p1 = pnand %p12216_p0, %p12212_p10 }
 0x9f9   : > { %12220 = shalt.err (!%p12217_p1)
}
 0x9fa   : > { %s12387_s6 = smov 128   ;;  %s12388_s24 = smov 8  }
 0x9fb   : > { %s16076_s7 = scalar_lea.sflag [#allocation3], %s13848_s27 }
 0x9fc   : > { %9435 = dma.vmem_to_hbm [thread:$0]  (%p10431_p12), %s15533_s5, %s15520_s19, %s15530_s4, %s16076_s7, %s12387_s6, %s12387_s6, %s12388_s24  }
 0x9fd PF: > { %9438 = sbr.rel (!%p12522_p5) target bundleno = 2721 (0xaa1), region = 96  ;;  %s9440_s21 = ssub.s32 (%p12522_p5), 75, %s12568_s22 }
 0x9fe   : > { %s11392_s20 = smul.u32 (%p12522_p5), 1792, %s12505_s0  ;;  %p9441_p2 = scmp.lt.s32.totalorder (%p12522_p5), %s9440_s21, 64 }
 0xa00   : > { %s15567_s29 = scalar_lea.vmem (%p12522_p5), %s15997_s18, %s11392_s20  }
 0xa02   : > { %s16095_s21 = smov (!%p9441_p2, %s9440_s21), 64 }
 0xa03   : > { %s10437_s3 = smul.u32 448, %s16095_s21 }
 0xa05   : > { %p10441_p3 = scmp.eq.s32.totalorder %s10437_s3, 0 }
 0xa06   : > { %s9454_s4 = scalar_lea.vmem (!%p10441_p3), %s14597_s30, 24 [#allocation4]   ;;  %s9455_s5 = scalar_lea.vmem (!%p10441_p3), %s15567_s29, 24  }
 0xa07   : > { %9451 = sbr.rel (%p10441_p3) target bundleno = 2721 (0xaa1), region = 100 }
 0xa08   : > { %12191 = sdivrem.u32 (!%p10441_p3), %s16095_s21, 22 }
 0xa11   : > { %s15575_s7 = spop.drf %12191 }
 0xa12   : > { %p10442_p5 = scmp.le.s32.totalorder %s15575_s7, 0 }
 0xa13   : > { %s16077_s0 = smov (!%p10442_p5), %s15567_s29  ;;  %s16078_s2 = smov (!%p10442_p5), %s14597_s30 }
 0xa14   : > { %9892 = sbr.rel (%p10442_p5) target bundleno = 2619 (0xa3b), region = 179  ;;  %s15584_s22 = smov (!%p10442_p5), 0  }
 0xa15   : > { %s15586_s27 = smov (!%p10442_p5), 0  }
 0xa19 LB: >> { %v9467_v26 = vld [vmem:[%s12327_s2] sm:$0xff]  ;;  %v9471_v17 = vld [vmem:[%s12327_s2 + $0x38] sm:$0xff]  ;;  %s9599_s19 = sadd.s32 1, %s12331_s22  ;;  %v9475_v1 = vld [vmem:[%s12327_s2 + $0x70] sm:$0xff]  ;;  %s9461_s27 = sadd.s32 1, %s12335_s27   ;;  %s12335_s27 = sphi %s15586_s27, %s9461_s27   ;;  %s12331_s22 = sphi %s15584_s22, %s16081_s22   ;;  %s12327_s2 = sphi %s16078_s2, %s16080_s2   ;;  %s12323_s0 = sphi %s16077_s0, %s16079_s0  }
 0xa1a   : >> { %v9469_v38 = vld [vmem:[%s12327_s2 + $0x1c] sm:$0xff]  ;;  %9468 = vst [vmem:[%s12323_s0] sm:$0xff] %v9467_v26  ;;  %9472 = vst [vmem:[%s12323_s0 + $0x38] sm:$0xff] %v9471_v17  ;;  %v9473_v7 = vld [vmem:[%s12327_s2 + $0x54] sm:$0xff]  ;;  %p9600_p12 = scmp.ge.s32.totalorder %s9599_s19, %s15575_s7  ;;  %p9460_p4 = scmp.ge.s32.totalorder %s9461_s27, %s15575_s7 }
 0xa1b   : >> { %9470 = vst [vmem:[%s12323_s0 + $0x1c] sm:$0xff] %v9469_v38  ;;  %v9477_v37 = vld [vmem:[%s12327_s2 + $0x8c] sm:$0xff]  ;;  %9474 = vst [vmem:[%s12323_s0 + $0x54] sm:$0xff] %v9473_v7  ;;  %v9481_v15 = vld [vmem:[%s12327_s2 + $0xc4] sm:$0xff] }
 0xa1c   : >> { %9476 = vst [vmem:[%s12323_s0 + $0x70] sm:$0xff] %v9475_v1  ;;  %9478 = vst [vmem:[%s12323_s0 + $0x8c] sm:$0xff] %v9477_v37  ;;  %v9479_v36 = vld [vmem:[%s12327_s2 + $0xa8] sm:$0xff]  ;;  %v9483_v12 = vld [vmem:[%s12327_s2 + $0xe0] sm:$0xff]  ;;  %s16097_s19 = smov (%p9600_p12, %s9599_s19), 0 }
 0xa1d   : >> { %9480 = vst [vmem:[%s12323_s0 + $0xa8] sm:$0xff] %v9479_v36  ;;  %9482 = vst [vmem:[%s12323_s0 + $0xc4] sm:$0xff] %v9481_v15  ;;  %v9485_v61 = vld [vmem:[%s12327_s2 + $0xfc] sm:$0xff]  ;;  %v9489_v40 = vld [vmem:[%s12327_s2 + $0x134] sm:$0xff]  ;;  %s9602_s6 = smul.u32 616, %s16097_s19  ;;  %s16081_s22 = smov %s16097_s19 }
 0xa1e   : >> { %9484 = vst [vmem:[%s12323_s0 + $0xe0] sm:$0xff] %v9483_v12  ;;  %v9487_v14 = vld [vmem:[%s12327_s2 + $0x118] sm:$0xff]  ;;  %9486 = vst [vmem:[%s12323_s0 + $0xfc] sm:$0xff] %v9485_v61  ;;  %v9491_v56 = vld [vmem:[%s12327_s2 + $0x150] sm:$0xff] }
 0xa1f   : >> { %9488 = vst [vmem:[%s12323_s0 + $0x118] sm:$0xff] %v9487_v14  ;;  %9490 = vst [vmem:[%s12323_s0 + $0x134] sm:$0xff] %v9489_v40  ;;  %v9493_v16 = vld [vmem:[%s12327_s2 + $0x16c] sm:$0xff]  ;;  %v9497_v10 = vld [vmem:[%s12327_s2 + $0x1a4] sm:$0xff]  ;;  %s15648_s24 = scalar_lea.vmem %s14597_s30, %s9602_s6 [#allocation4]   ;;  %s15651_s20 = scalar_lea.vmem %s15567_s29, %s9602_s6  }
 0xa20   : >> { %v9495_v48 = vld [vmem:[%s12327_s2 + $0x188] sm:$0xff]  ;;  %9492 = vst [vmem:[%s12323_s0 + $0x150] sm:$0xff] %v9491_v56  ;;  %9494 = vst [vmem:[%s12323_s0 + $0x16c] sm:$0xff] %v9493_v16  ;;  %v9499_v50 = vld [vmem:[%s12327_s2 + $0x1c0] sm:$0xff] }
 0xa21   : >> { %9496 = vst [vmem:[%s12323_s0 + $0x188] sm:$0xff] %v9495_v48  ;;  %v9501_v57 = vld [vmem:[%s12327_s2 + $0x1dc] sm:$0xff]  ;;  %9498 = vst [vmem:[%s12323_s0 + $0x1a4] sm:$0xff] %v9497_v10  ;;  %v9505_v31 = vld [vmem:[%s12327_s2 + $0x214] sm:$0xff] }
 0xa22   : >> { %9500 = vst [vmem:[%s12323_s0 + $0x1c0] sm:$0xff] %v9499_v50  ;;  %9502 = vst [vmem:[%s12323_s0 + $0x1dc] sm:$0xff] %v9501_v57  ;;  %v9503_v45 = vld [vmem:[%s12327_s2 + $0x1f8] sm:$0xff]  ;;  %v9507_v32 = vld [vmem:[%s12327_s2 + $0x230] sm:$0xff] }
 0xa23   : >> { %9504 = vst [vmem:[%s12323_s0 + $0x1f8] sm:$0xff] %v9503_v45  ;;  %9506 = vst [vmem:[%s12323_s0 + $0x214] sm:$0xff] %v9505_v31  ;;  %v9509_v33 = vld [vmem:[%s12327_s2 + $0x24c] sm:$0xff]  ;;  %v9513_v25 = vld [vmem:[%s12327_s2 + $0x24] sm:$0xff] }
 0xa24   : >> { %9508 = vst [vmem:[%s12323_s0 + $0x230] sm:$0xff] %v9507_v32  ;;  %v9511_v39 = vld [vmem:[%s12327_s2 + $0x8] sm:$0xff]  ;;  %9510 = vst [vmem:[%s12323_s0 + $0x24c] sm:$0xff] %v9509_v33  ;;  %v9515_v9 = vld [vmem:[%s12327_s2 + $0x40] sm:$0xff] }
 0xa25   : >> { %9512 = vst [vmem:[%s12323_s0 + $0x8] sm:$0xff] %v9511_v39  ;;  %9514 = vst [vmem:[%s12323_s0 + $0x24] sm:$0xff] %v9513_v25  ;;  %v9517_v5 = vld [vmem:[%s12327_s2 + $0x5c] sm:$0xff]  ;;  %v9521_v11 = vld [vmem:[%s12327_s2 + $0x94] sm:$0xff] }
 0xa26   : >> { %v9519_v27 = vld [vmem:[%s12327_s2 + $0x78] sm:$0xff]  ;;  %9516 = vst [vmem:[%s12323_s0 + $0x40] sm:$0xff] %v9515_v9  ;;  %9518 = vst [vmem:[%s12323_s0 + $0x5c] sm:$0xff] %v9517_v5  ;;  %v9523_v35 = vld [vmem:[%s12327_s2 + $0xb0] sm:$0xff] }
 0xa27   : >> { %9520 = vst [vmem:[%s12323_s0 + $0x78] sm:$0xff] %v9519_v27  ;;  %v9525_v44 = vld [vmem:[%s12327_s2 + $0xcc] sm:$0xff]  ;;  %9522 = vst [vmem:[%s12323_s0 + $0x94] sm:$0xff] %v9521_v11  ;;  %v9529_v8 = vld [vmem:[%s12327_s2 + $0x104] sm:$0xff] }
 0xa28   : >> { %9524 = vst [vmem:[%s12323_s0 + $0xb0] sm:$0xff] %v9523_v35  ;;  %9526 = vst [vmem:[%s12323_s0 + $0xcc] sm:$0xff] %v9525_v44  ;;  %v9527_v49 = vld [vmem:[%s12327_s2 + $0xe8] sm:$0xff]  ;;  %v9531_v22 = vld [vmem:[%s12327_s2 + $0x120] sm:$0xff] }
 0xa29   : >> { %9528 = vst [vmem:[%s12323_s0 + $0xe8] sm:$0xff] %v9527_v49  ;;  %9530 = vst [vmem:[%s12323_s0 + $0x104] sm:$0xff] %v9529_v8  ;;  %v9533_v19 = vld [vmem:[%s12327_s2 + $0x13c] sm:$0xff]  ;;  %v9537_v52 = vld [vmem:[%s12327_s2 + $0x174] sm:$0xff] }
 0xa2a   : >> { %9532 = vst [vmem:[%s12323_s0 + $0x120] sm:$0xff] %v9531_v22  ;;  %v9535_v58 = vld [vmem:[%s12327_s2 + $0x158] sm:$0xff]  ;;  %9534 = vst [vmem:[%s12323_s0 + $0x13c] sm:$0xff] %v9533_v19  ;;  %v9539_v53 = vld [vmem:[%s12327_s2 + $0x190] sm:$0xff] }
 0xa2b   : >> { %9536 = vst [vmem:[%s12323_s0 + $0x158] sm:$0xff] %v9535_v58  ;;  %9538 = vst [vmem:[%s12323_s0 + $0x174] sm:$0xff] %v9537_v52  ;;  %v9541_v18 = vld [vmem:[%s12327_s2 + $0x1ac] sm:$0xff]  ;;  %v9545_v54 = vld [vmem:[%s12327_s2 + $0x1e4] sm:$0xff] }
 0xa2c   : >> { %v9543_v6 = vld [vmem:[%s12327_s2 + $0x1c8] sm:$0xff]  ;;  %9540 = vst [vmem:[%s12323_s0 + $0x190] sm:$0xff] %v9539_v53  ;;  %9542 = vst [vmem:[%s12323_s0 + $0x1ac] sm:$0xff] %v9541_v18  ;;  %v9547_v59 = vld [vmem:[%s12327_s2 + $0x200] sm:$0xff] }
 0xa2d   : >> { %9544 = vst [vmem:[%s12323_s0 + $0x1c8] sm:$0xff] %v9543_v6  ;;  %v9549_v30 = vld [vmem:[%s12327_s2 + $0x21c] sm:$0xff]  ;;  %9546 = vst [vmem:[%s12323_s0 + $0x1e4] sm:$0xff] %v9545_v54  ;;  %v9553_v0 = vld [vmem:[%s12327_s2 + $0x254] sm:$0xff] }
 0xa2e   : >> { %9548 = vst [vmem:[%s12323_s0 + $0x200] sm:$0xff] %v9547_v59  ;;  %9550 = vst [vmem:[%s12323_s0 + $0x21c] sm:$0xff] %v9549_v30  ;;  %v9551_v2 = vld [vmem:[%s12327_s2 + $0x238] sm:$0xff]  ;;  %v9555_v23 = vld [vmem:[%s12327_s2 + $0x10] sm:$0xff] }
 0xa2f   : >> { %9552 = vst [vmem:[%s12323_s0 + $0x238] sm:$0xff] %v9551_v2  ;;  %9554 = vst [vmem:[%s12323_s0 + $0x254] sm:$0xff] %v9553_v0  ;;  %v9557_v24 = vld [vmem:[%s12327_s2 + $0x2c] sm:$0xff]  ;;  %v9561_v63 = vld [vmem:[%s12327_s2 + $0x64] sm:$0xff] }
 0xa30   : >> { %9556 = vst [vmem:[%s12323_s0 + $0x10] sm:$0xff] %v9555_v23  ;;  %v9559_v4 = vld [vmem:[%s12327_s2 + $0x48] sm:$0xff]  ;;  %9558 = vst [vmem:[%s12323_s0 + $0x2c] sm:$0xff] %v9557_v24  ;;  %v9563_v47 = vld [vmem:[%s12327_s2 + $0x80] sm:$0xff] }
 0xa31   : >> { %9560 = vst [vmem:[%s12323_s0 + $0x48] sm:$0xff] %v9559_v4  ;;  %9562 = vst [vmem:[%s12323_s0 + $0x64] sm:$0xff] %v9561_v63  ;;  %v9565_v34 = vld [vmem:[%s12327_s2 + $0x9c] sm:$0xff]  ;;  %v9569_v43 = vld [vmem:[%s12327_s2 + $0xd4] sm:$0xff] }
 0xa32   : >> { %v9567_v3 = vld [vmem:[%s12327_s2 + $0xb8] sm:$0xff]  ;;  %9564 = vst [vmem:[%s12323_s0 + $0x80] sm:$0xff] %v9563_v47  ;;  %9566 = vst [vmem:[%s12323_s0 + $0x9c] sm:$0xff] %v9565_v34  ;;  %v9571_v55 = vld [vmem:[%s12327_s2 + $0xf0] sm:$0xff] }
 0xa33   : >> { %9568 = vst [vmem:[%s12323_s0 + $0xb8] sm:$0xff] %v9567_v3  ;;  %v9573_v46 = vld [vmem:[%s12327_s2 + $0x10c] sm:$0xff]  ;;  %9570 = vst [vmem:[%s12323_s0 + $0xd4] sm:$0xff] %v9569_v43  ;;  %v9577_v28 = vld [vmem:[%s12327_s2 + $0x144] sm:$0xff] }
 0xa34   : >> { %9572 = vst [vmem:[%s12323_s0 + $0xf0] sm:$0xff] %v9571_v55  ;;  %9574 = vst [vmem:[%s12323_s0 + $0x10c] sm:$0xff] %v9573_v46  ;;  %v9575_v62 = vld [vmem:[%s12327_s2 + $0x128] sm:$0xff]  ;;  %v9579_v29 = vld [vmem:[%s12327_s2 + $0x160] sm:$0xff] }
 0xa35   : >> { %9576 = vst [vmem:[%s12323_s0 + $0x128] sm:$0xff] %v9575_v62  ;;  %9578 = vst [vmem:[%s12323_s0 + $0x144] sm:$0xff] %v9577_v28  ;;  %v9581_v21 = vld [vmem:[%s12327_s2 + $0x17c] sm:$0xff]  ;;  %v9585_v41 = vld [vmem:[%s12327_s2 + $0x1b4] sm:$0xff] }
 0xa36   : >> { %9580 = vst [vmem:[%s12323_s0 + $0x160] sm:$0xff] %v9579_v29  ;;  %v9583_v13 = vld [vmem:[%s12327_s2 + $0x198] sm:$0xff]  ;;  %9582 = vst [vmem:[%s12323_s0 + $0x17c] sm:$0xff] %v9581_v21  ;;  %v9587_v20 = vld [vmem:[%s12327_s2 + $0x1d0] sm:$0xff]  ;;  %9463 = sbr.rel (!%p9460_p4) target bundleno = 2585 (0xa19), region = 185 }
 0xa37   : >> { %9584 = vst [vmem:[%s12323_s0 + $0x198] sm:$0xff] %v9583_v13  ;;  %9586 = vst [vmem:[%s12323_s0 + $0x1b4] sm:$0xff] %v9585_v41  ;;  %v9589_v42 = vld [vmem:[%s12327_s2 + $0x1ec] sm:$0xff]  ;;  %v9593_v51 = vld [vmem:[%s12327_s2 + $0x224] sm:$0xff] }
 0xa38   : >> { %v9591_v60 = vld [vmem:[%s12327_s2 + $0x208] sm:$0xff]  ;;  %9588 = vst [vmem:[%s12323_s0 + $0x1d0] sm:$0xff] %v9587_v20  ;;  %9590 = vst [vmem:[%s12323_s0 + $0x1ec] sm:$0xff] %v9589_v42  ;;  %v9595_v26 = vld [vmem:[%s12327_s2 + $0x240] sm:$0xff] }
 0xa39   : >> { %9592 = vst [vmem:[%s12323_s0 + $0x208] sm:$0xff] %v9591_v60  ;;  %v9597_v38 = vld [vmem:[%s12327_s2 + $0x25c] sm:$0xff]  ;;  %9594 = vst [vmem:[%s12323_s0 + $0x224] sm:$0xff] %v9593_v51  ;;  %s16080_s2 = smov %s15648_s24 }
 0xa3a   : >> { %9596 = vst [vmem:[%s12323_s0 + $0x240] sm:$0xff] %v9595_v26  ;;  %9598 = vst [vmem:[%s12323_s0 + $0x25c] sm:$0xff] %v9597_v38  ;;  %s16079_s0 = smov %s15651_s20 }
 0xa3b PF: > { %12193 = sdivrem.u32 %s16095_s21, 22 }
 0xa3c   : > { %s10443_s25 = smul.u32 616, %s15575_s7 }
 0xa3e   : > { %s15756_s1 = scalar_lea.vmem %s14597_s30, %s10443_s25 [#allocation4]   ;;  %s15759_s3 = scalar_lea.vmem %s15567_s29, %s10443_s25  }
 0xa44   : > { %s15761_s6 = spop.drf %12193 }
 0xa45   : > { %p10445_p7 = scmp.le.s32.totalorder %s15761_s6, 0 }
 0xa46   : > { %s16082_s27 = smov (!%p10445_p7), %s15759_s3  ;;  %s12341_s0 = smov (!%p10445_p7), %s15756_s1  }
 0xa47   : > { %9906 = sbr.rel (%p10445_p7) target bundleno = 2644 (0xa54), region = 190  ;;  %s12345_s2 = smov (!%p10445_p7), 0  }
 0xa48   : > { %s12349_s22 = smov (!%p10445_p7), 0  }
 0xa4c LB: >> { %v9622_v17 = vld [vmem:[%s12343_s0] sm:$0xff]  ;;  %v9624_v7 = vld [vmem:[%s12343_s0 + $0x8] sm:$0xff]  ;;  %v9626_v1 = vld [vmem:[%s12343_s0 + $0x10] sm:$0xff]  ;;  %s9628_s7 = sadd.s32 1, %s12347_s2  ;;  %s9616_s22 = sadd.s32 1, %s12351_s22   ;;  %s12351_s22 = sphi %s12349_s22, %s9616_s22   ;;  %s12347_s2 = sphi %s12345_s2, %s12346_s2   ;;  %s12343_s0 = sphi %s12341_s0, %s9633_s0   ;;  %s12339_s27 = sphi %s16082_s27, %s9634_s27  }
 0xa4d   : >> { %9623 = vst [vmem:[%s12339_s27] sm:$0xff] %v9622_v17  ;;  %9625 = vst [vmem:[%s12339_s27 + $0x8] sm:$0xff] %v9624_v7  ;;  %p9629_p8 = scmp.ge.s32.totalorder %s9628_s7, %s15761_s6  ;;  %p9615_p9 = scmp.ge.s32.totalorder %s9616_s22, %s15761_s6 }
 0xa4e   : >> { %9627 = vst [vmem:[%s12339_s27 + $0x10] sm:$0xff] %v9626_v1 }
 0xa4f   : >> { %s16099_s7 = smov (%p9629_p8, %s9628_s7), 0  ;;  %9618 = sbr.rel (!%p9615_p9) target bundleno = 2636 (0xa4c), region = 196 }
 0xa50   : >> { %s9631_s19 = smul.u32 28, %s16099_s7  ;;  %s12346_s2 = smov %s16099_s7  }
 0xa52   : >> { %s9633_s0 = scalar_lea.vmem %s15756_s1, %s9631_s19 [#allocation4]   ;;  %s9634_s27 = scalar_lea.vmem %s15759_s3, %s9631_s19  }
 0xa54 PF: > { %s15776_s24 = sshrl.u32 %s16095_s21, 6 }
 0xa55   : > { %p10446_p10 = scmp.le.s32.totalorder %s15776_s24, 0 }
 0xa56   : > { %s15787_s20 = smov (!%p10446_p10), 0   ;;  %s15789_s25 = smov (!%p10446_p10), 0  }
 0xa57   : > { %9920 = sbr.rel (%p10446_p10) target bundleno = 2704 (0xa90), region = 201 }
 0xa5c LB: >> { %v9647_v37 = vld [vmem:[%s12359_s4] sm:$0xf]  ;;  %v9649_v36 = vld [vmem:[%s12359_s4 + $0x1c] sm:$0xf]  ;;  %v9651_v15 = vld [vmem:[%s12359_s4 + $0x38] sm:$0xf]  ;;  %s12367_s25 = sphi %s15789_s25, %s9641_s25   ;;  %s12363_s20 = sphi %s15787_s20, %s16083_s20   ;;  %s12359_s4 = sphi %s9454_s4, %s9866_s4   ;;  %s12355_s5 = sphi %s9455_s5, %s9869_s5  }
 0xa5d   : >> { %9648 = vst [vmem:[%s12355_s5] sm:$0xf] %v9647_v37  ;;  %9650 = vst [vmem:[%s12355_s5 + $0x1c] sm:$0xf] %v9649_v36  ;;  %v9653_v12 = vld [vmem:[%s12359_s4 + $0x54] sm:$0xf]  ;;  %s9775_s1 = sadd.s32 1, %s12363_s20 }
 0xa5e   : >> { %9652 = vst [vmem:[%s12355_s5 + $0x38] sm:$0xf] %v9651_v15  ;;  %v9655_v61 = vld [vmem:[%s12359_s4 + $0x70] sm:$0xf]  ;;  %v9657_v14 = vld [vmem:[%s12359_s4 + $0x8c] sm:$0xf]  ;;  %p9776_p11 = scmp.ge.s32.totalorder %s9775_s1, %s15776_s24 }
 0xa5f   : >> { %9654 = vst [vmem:[%s12355_s5 + $0x54] sm:$0xf] %v9653_v12  ;;  %9656 = vst [vmem:[%s12355_s5 + $0x70] sm:$0xf] %v9655_v61  ;;  %v9659_v40 = vld [vmem:[%s12359_s4 + $0xa8] sm:$0xf] }
 0xa60   : >> { %9658 = vst [vmem:[%s12355_s5 + $0x8c] sm:$0xf] %v9657_v14  ;;  %v9661_v56 = vld [vmem:[%s12359_s4 + $0xc4] sm:$0xf]  ;;  %v9663_v16 = vld [vmem:[%s12359_s4 + $0xe0] sm:$0xf] }
 0xa61   : >> { %9660 = vst [vmem:[%s12355_s5 + $0xa8] sm:$0xf] %v9659_v40  ;;  %9662 = vst [vmem:[%s12355_s5 + $0xc4] sm:$0xf] %v9661_v56  ;;  %v9665_v48 = vld [vmem:[%s12359_s4 + $0xfc] sm:$0xf] }
 0xa62   : >> { %9664 = vst [vmem:[%s12355_s5 + $0xe0] sm:$0xf] %v9663_v16  ;;  %v9667_v10 = vld [vmem:[%s12359_s4 + $0x118] sm:$0xf]  ;;  %v9669_v50 = vld [vmem:[%s12359_s4 + $0x134] sm:$0xf] }
 0xa63   : >> { %9666 = vst [vmem:[%s12355_s5 + $0xfc] sm:$0xf] %v9665_v48  ;;  %9668 = vst [vmem:[%s12355_s5 + $0x118] sm:$0xf] %v9667_v10  ;;  %v9671_v57 = vld [vmem:[%s12359_s4 + $0x150] sm:$0xf] }
 0xa64   : >> { %9670 = vst [vmem:[%s12355_s5 + $0x134] sm:$0xf] %v9669_v50  ;;  %v9673_v45 = vld [vmem:[%s12359_s4 + $0x16c] sm:$0xf]  ;;  %v9675_v31 = vld [vmem:[%s12359_s4 + $0x188] sm:$0xf] }
 0xa65   : >> { %9672 = vst [vmem:[%s12355_s5 + $0x150] sm:$0xf] %v9671_v57  ;;  %9674 = vst [vmem:[%s12355_s5 + $0x16c] sm:$0xf] %v9673_v45  ;;  %v9677_v32 = vld [vmem:[%s12359_s4 + $0x1a4] sm:$0xf] }
 0xa66   : >> { %9676 = vst [vmem:[%s12355_s5 + $0x188] sm:$0xf] %v9675_v31  ;;  %v9679_v33 = vld [vmem:[%s12359_s4 + $0x1c0] sm:$0xf]  ;;  %v9681_v39 = vld [vmem:[%s12359_s4 + $0x1dc] sm:$0xf] }
 0xa67   : >> { %9678 = vst [vmem:[%s12355_s5 + $0x1a4] sm:$0xf] %v9677_v32  ;;  %9680 = vst [vmem:[%s12355_s5 + $0x1c0] sm:$0xf] %v9679_v33  ;;  %v9683_v25 = vld [vmem:[%s12359_s4 + $0x1f8] sm:$0xf] }
 0xa68   : >> { %9682 = vst [vmem:[%s12355_s5 + $0x1dc] sm:$0xf] %v9681_v39  ;;  %v9685_v9 = vld [vmem:[%s12359_s4 + $0x214] sm:$0xf]  ;;  %v9687_v5 = vld [vmem:[%s12359_s4 + $0x230] sm:$0xf] }
 0xa69   : >> { %9684 = vst [vmem:[%s12355_s5 + $0x1f8] sm:$0xf] %v9683_v25  ;;  %9686 = vst [vmem:[%s12355_s5 + $0x214] sm:$0xf] %v9685_v9  ;;  %v9689_v27 = vld [vmem:[%s12359_s4 + $0x24c] sm:$0xf] }
 0xa6a   : >> { %9688 = vst [vmem:[%s12355_s5 + $0x230] sm:$0xf] %v9687_v5  ;;  %v9691_v11 = vld [vmem:[%s12359_s4 + $0x268] sm:$0xf]  ;;  %v9693_v35 = vld [vmem:[%s12359_s4 + $0x284] sm:$0xf] }
 0xa6b   : >> { %9690 = vst [vmem:[%s12355_s5 + $0x24c] sm:$0xf] %v9689_v27  ;;  %9692 = vst [vmem:[%s12355_s5 + $0x268] sm:$0xf] %v9691_v11  ;;  %v9695_v44 = vld [vmem:[%s12359_s4 + $0x2a0] sm:$0xf] }
 0xa6c   : >> { %9694 = vst [vmem:[%s12355_s5 + $0x284] sm:$0xf] %v9693_v35  ;;  %v9697_v49 = vld [vmem:[%s12359_s4 + $0x2bc] sm:$0xf]  ;;  %v9699_v8 = vld [vmem:[%s12359_s4 + $0x2d8] sm:$0xf] }
 0xa6d   : >> { %9696 = vst [vmem:[%s12355_s5 + $0x2a0] sm:$0xf] %v9695_v44  ;;  %9698 = vst [vmem:[%s12355_s5 + $0x2bc] sm:$0xf] %v9697_v49  ;;  %v9701_v22 = vld [vmem:[%s12359_s4 + $0x2f4] sm:$0xf] }
 0xa6e   : >> { %9700 = vst [vmem:[%s12355_s5 + $0x2d8] sm:$0xf] %v9699_v8  ;;  %v9703_v19 = vld [vmem:[%s12359_s4 + $0x310] sm:$0xf]  ;;  %v9705_v58 = vld [vmem:[%s12359_s4 + $0x32c] sm:$0xf] }
 0xa6f   : >> { %9702 = vst [vmem:[%s12355_s5 + $0x2f4] sm:$0xf] %v9701_v22  ;;  %9704 = vst [vmem:[%s12355_s5 + $0x310] sm:$0xf] %v9703_v19  ;;  %v9707_v52 = vld [vmem:[%s12359_s4 + $0x348] sm:$0xf] }
 0xa70   : >> { %9706 = vst [vmem:[%s12355_s5 + $0x32c] sm:$0xf] %v9705_v58  ;;  %v9709_v53 = vld [vmem:[%s12359_s4 + $0x364] sm:$0xf]  ;;  %v9711_v18 = vld [vmem:[%s12359_s4 + $0x380] sm:$0xf] }
 0xa71   : >> { %9708 = vst [vmem:[%s12355_s5 + $0x348] sm:$0xf] %v9707_v52  ;;  %9710 = vst [vmem:[%s12355_s5 + $0x364] sm:$0xf] %v9709_v53  ;;  %v9713_v6 = vld [vmem:[%s12359_s4 + $0x39c] sm:$0xf] }
 0xa72   : >> { %9712 = vst [vmem:[%s12355_s5 + $0x380] sm:$0xf] %v9711_v18  ;;  %v9715_v54 = vld [vmem:[%s12359_s4 + $0x3b8] sm:$0xf]  ;;  %v9717_v59 = vld [vmem:[%s12359_s4 + $0x3d4] sm:$0xf] }
 0xa73   : >> { %9714 = vst [vmem:[%s12355_s5 + $0x39c] sm:$0xf] %v9713_v6  ;;  %9716 = vst [vmem:[%s12355_s5 + $0x3b8] sm:$0xf] %v9715_v54  ;;  %v9719_v30 = vld [vmem:[%s12359_s4 + $0x3f0] sm:$0xf] }
 0xa74   : >> { %9718 = vst [vmem:[%s12355_s5 + $0x3d4] sm:$0xf] %v9717_v59  ;;  %v9721_v2 = vld [vmem:[%s12359_s4 + $0x40c] sm:$0xf]  ;;  %v9723_v0 = vld [vmem:[%s12359_s4 + $0x428] sm:$0xf] }
 0xa75   : >> { %9720 = vst [vmem:[%s12355_s5 + $0x3f0] sm:$0xf] %v9719_v30  ;;  %9722 = vst [vmem:[%s12355_s5 + $0x40c] sm:$0xf] %v9721_v2  ;;  %v9725_v23 = vld [vmem:[%s12359_s4 + $0x444] sm:$0xf] }
 0xa76   : >> { %9724 = vst [vmem:[%s12355_s5 + $0x428] sm:$0xf] %v9723_v0  ;;  %v9727_v24 = vld [vmem:[%s12359_s4 + $0x460] sm:$0xf]  ;;  %v9729_v4 = vld [vmem:[%s12359_s4 + $0x47c] sm:$0xf] }
 0xa77   : >> { %9726 = vst [vmem:[%s12355_s5 + $0x444] sm:$0xf] %v9725_v23  ;;  %9728 = vst [vmem:[%s12355_s5 + $0x460] sm:$0xf] %v9727_v24  ;;  %v9731_v63 = vld [vmem:[%s12359_s4 + $0x498] sm:$0xf] }
 0xa78   : >> { %9730 = vst [vmem:[%s12355_s5 + $0x47c] sm:$0xf] %v9729_v4  ;;  %v9733_v47 = vld [vmem:[%s12359_s4 + $0x4b4] sm:$0xf]  ;;  %v9735_v34 = vld [vmem:[%s12359_s4 + $0x4d0] sm:$0xf] }
 0xa79   : >> { %9732 = vst [vmem:[%s12355_s5 + $0x498] sm:$0xf] %v9731_v63  ;;  %9734 = vst [vmem:[%s12355_s5 + $0x4b4] sm:$0xf] %v9733_v47  ;;  %v9737_v3 = vld [vmem:[%s12359_s4 + $0x4ec] sm:$0xf] }
 0xa7a   : >> { %9736 = vst [vmem:[%s12355_s5 + $0x4d0] sm:$0xf] %v9735_v34  ;;  %v9739_v43 = vld [vmem:[%s12359_s4 + $0x508] sm:$0xf]  ;;  %v9741_v55 = vld [vmem:[%s12359_s4 + $0x524] sm:$0xf] }
 0xa7b   : >> { %9738 = vst [vmem:[%s12355_s5 + $0x4ec] sm:$0xf] %v9737_v3  ;;  %9740 = vst [vmem:[%s12355_s5 + $0x508] sm:$0xf] %v9739_v43  ;;  %v9743_v46 = vld [vmem:[%s12359_s4 + $0x540] sm:$0xf] }
 0xa7c   : >> { %9742 = vst [vmem:[%s12355_s5 + $0x524] sm:$0xf] %v9741_v55  ;;  %v9745_v62 = vld [vmem:[%s12359_s4 + $0x55c] sm:$0xf]  ;;  %v9747_v28 = vld [vmem:[%s12359_s4 + $0x578] sm:$0xf] }
 0xa7d   : >> { %9744 = vst [vmem:[%s12355_s5 + $0x540] sm:$0xf] %v9743_v46  ;;  %9746 = vst [vmem:[%s12355_s5 + $0x55c] sm:$0xf] %v9745_v62  ;;  %v9749_v29 = vld [vmem:[%s12359_s4 + $0x594] sm:$0xf] }
 0xa7e   : >> { %9748 = vst [vmem:[%s12355_s5 + $0x578] sm:$0xf] %v9747_v28  ;;  %v9751_v21 = vld [vmem:[%s12359_s4 + $0x5b0] sm:$0xf]  ;;  %v9753_v13 = vld [vmem:[%s12359_s4 + $0x5cc] sm:$0xf] }
 0xa7f   : >> { %9750 = vst [vmem:[%s12355_s5 + $0x594] sm:$0xf] %v9749_v29  ;;  %9752 = vst [vmem:[%s12355_s5 + $0x5b0] sm:$0xf] %v9751_v21  ;;  %v9755_v41 = vld [vmem:[%s12359_s4 + $0x5e8] sm:$0xf] }
 0xa80   : >> { %9754 = vst [vmem:[%s12355_s5 + $0x5cc] sm:$0xf] %v9753_v13  ;;  %v9757_v20 = vld [vmem:[%s12359_s4 + $0x604] sm:$0xf]  ;;  %v9759_v42 = vld [vmem:[%s12359_s4 + $0x620] sm:$0xf] }
 0xa81   : >> { %9756 = vst [vmem:[%s12355_s5 + $0x5e8] sm:$0xf] %v9755_v41  ;;  %9758 = vst [vmem:[%s12355_s5 + $0x604] sm:$0xf] %v9757_v20  ;;  %v9761_v60 = vld [vmem:[%s12359_s4 + $0x63c] sm:$0xf] }
 0xa82   : >> { %9760 = vst [vmem:[%s12355_s5 + $0x620] sm:$0xf] %v9759_v42  ;;  %v9763_v51 = vld [vmem:[%s12359_s4 + $0x658] sm:$0xf]  ;;  %v9765_v26 = vld [vmem:[%s12359_s4 + $0x674] sm:$0xf] }
 0xa83   : >> { %9762 = vst [vmem:[%s12355_s5 + $0x63c] sm:$0xf] %v9761_v60  ;;  %9764 = vst [vmem:[%s12355_s5 + $0x658] sm:$0xf] %v9763_v51  ;;  %v9767_v38 = vld [vmem:[%s12359_s4 + $0x690] sm:$0xf] }
 0xa84   : >> { %9766 = vst [vmem:[%s12355_s5 + $0x674] sm:$0xf] %v9765_v26  ;;  %v9769_v17 = vld [vmem:[%s12359_s4 + $0x6ac] sm:$0xf]  ;;  %v9771_v7 = vld [vmem:[%s12359_s4 + $0x6c8] sm:$0xf] }
 0xa85   : >> { %9768 = vst [vmem:[%s12355_s5 + $0x690] sm:$0xf] %v9767_v38  ;;  %9770 = vst [vmem:[%s12355_s5 + $0x6ac] sm:$0xf] %v9769_v17  ;;  %v9773_v1 = vld [vmem:[%s12359_s4 + $0x6e4] sm:$0xf] }
 0xa86   : >> { %9772 = vst [vmem:[%s12355_s5 + $0x6c8] sm:$0xf] %v9771_v7  ;;  %9774 = vst [vmem:[%s12355_s5 + $0x6e4] sm:$0xf] %v9773_v1  ;;  %s16101_s1 = smov (%p9776_p11, %s9775_s1), 0  ;;  %s9641_s25 = sadd.s32 1, %s12367_s25  }
 0xa87   : >> { %s9864_s3 = smul.u32 1792, %s16101_s1  ;;  %p9640_p13 = scmp.ge.s32.totalorder %s9641_s25, %s15776_s24 }
 0xa88   : >> { %s16083_s20 = smov %s16101_s1 }
 0xa89   : >> { %s9865_s6 = scalar_lea.vmem %s14597_s30, %s9864_s3 [#allocation4]  ;;  %s9868_s27 = scalar_lea.vmem %s15567_s29, %s9864_s3 }
 0xa8a   : >> { %s9866_s4 = scalar_lea.vmem %s9865_s6, 24 [#allocation4]   ;;  %s9869_s5 = scalar_lea.vmem %s9868_s27, 24  }
 0xa8b   : > { %9643 = sbr.rel (!%p9640_p13) target bundleno = 2652 (0xa5c), region = 207 }
 0xa90 PF: > { %s15946_s0 = sand.u32 63, %s16095_s21   ;;  %s9870_s2 = smul.u32 1792, %s15776_s24 }
 0xa91   : > { %p10447_p0 = scmp.le.s32.totalorder %s15946_s0, 0 }
 0xa92   : > { %s15950_s22 = scalar_lea.vmem %s14597_s30, %s9870_s2 [#allocation4]  ;;  %s15953_s7 = scalar_lea.vmem %s15567_s29, %s9870_s2 }
 0xa93   : > { %s9872_s19 = scalar_lea.vmem %s15950_s22, 24 [#allocation4]   ;;  %s9875_s3 = scalar_lea.vmem %s15953_s7, 24  }
 0xa94   : > { %9934 = sbr.rel (%p10447_p0) target bundleno = 2721 (0xaa1), region = 212  ;;  %s12369_s25 = smov (!%p10447_p0), %s9875_s3  }
 0xa95   : > { %s12373_s4 = smov (!%p10447_p0), %s9872_s19   ;;  %s12377_s5 = smov (!%p10447_p0), 0  }
 0xa96   : > { %s12381_s20 = smov (!%p10447_p0), 0  }
 0xa99 LB: >> { %v9798_v37 = vld [vmem:[%s12375_s4] sm:$0xf]  ;;  %s9800_s30 = sadd.s32 1, %s12379_s5  ;;  %s9792_s20 = sadd.s32 1, %s12383_s20   ;;  %s12383_s20 = sphi %s12381_s20, %s9792_s20   ;;  %s12379_s5 = sphi %s12377_s5, %s12378_s5   ;;  %s12375_s4 = sphi %s12373_s4, %s9878_s4   ;;  %s12371_s25 = sphi %s12369_s25, %s9881_s25  }
 0xa9a   : >> { %9799 = vst [vmem:[%s12371_s25] sm:$0xf] %v9798_v37  ;;  %p9801_p1 = scmp.ge.s32.totalorder %s9800_s30, %s15946_s0  ;;  %p9791_p2 = scmp.ge.s32.totalorder %s9792_s20, %s15946_s0 }
 0xa9c   : >> { %s16103_s30 = smov (%p9801_p1, %s9800_s30), 0  ;;  %9794 = sbr.rel (!%p9791_p2) target bundleno = 2713 (0xa99), region = 218 }
 0xa9d   : >> { %s9876_s21 = smul.u32 28, %s16103_s30  ;;  %s12378_s5 = smov %s16103_s30  }
 0xa9f   : >> { %s9877_s29 = scalar_lea.vmem %s15950_s22, %s9876_s21 [#allocation4]  ;;  %s9880_s24 = scalar_lea.vmem %s15953_s7, %s9876_s21 }
 0xaa0   : >> { %s9878_s4 = scalar_lea.vmem %s9877_s29, 24 [#allocation4]   ;;  %s9881_s25 = scalar_lea.vmem %s9880_s24, 24  }
 0xaa1 PF: > { %s16084_s1 = sld [smem:[#allocation8_spill]] }
 0xaa2   : > { %s16085_s6 = sld [smem:[#allocation6_spill]] }
 0xaa7   : > { %p11398_p3 = scmp.ge.s32.totalorder %s16084_s1, 2 }
 0xaa8   : > { %s9816_s2 = sand.u32 1, %s16085_s6  }
 0xaa9   : > { %p11395_p5 = pnand %p11398_p3, %p12526_p6  ;;  %s9817_s19 = scalar_lea.sflag [#allocation3], %s9816_s2 }
 0xaab   : > { %p11396_p12 = pneg %p11395_p5 }
 0xaad   : > { %12302 = dma.done.wait (%p11396_p12), %s9817_s19, 8192  }
 0xaae   : > { %12304 = vsyncadd (%p11396_p12), %s9817_s19, 4294959104  ;;  %s16087_s30 = sld [smem:[#allocation9_spill]]  ;;  %s16090_s27 = smov %s12311_s28 }
 0xaaf   : > { %s16088_s3 = sld [smem:[#allocation7_spill]] }
 0xab0   : > { %s16089_s29 = sld [smem:[#allocation10_spill]] }
 0xab4   : > { %p29_p4 = scmp.ge.s32.totalorder %s16087_s30, 4  }
 0xab5   : > { %s16091_s28 = smov %s16088_s3 }
 0xab6   :  { %31 = sbr.rel (!%p29_p4) target bundleno = 12 (0xc), region = 229 }
 0xabb   :  { %9829 = vsyncpa [#allocation3], 1 }
 0xabc   :  { %9831 = vsyncpa [#allocation3 + $0x1], 1 }

</bundles_post_ra>
